<compile_context>
chip_gen: v7x
topology: tpu7x:2x2x1
jax: 0.10.0
libtpu: 0.0.40
codegen_flags: <defaults>
</compile_context>

<pallas_src>
import functools

import jax
import jax.numpy as jnp
from jax import lax
from jax.experimental import pallas as pl
from jax.experimental.pallas import tpu as pltpu

EPS = 1e-12            # torch.nn.functional.normalize default eps
EPS_SQ = EPS * EPS
NEG_SLOPE = 0.1        # leaky_relu slope used when scan=True
NEG_INF = float("-inf")


def _l2_normalize(x, axis):
    n = jnp.sqrt(jnp.sum(x * x, axis=axis, keepdims=True))
    return x / jnp.maximum(n, EPS)


def _topk_rows_axis0(vals, k):
    """Descending top-k along axis 0 of a (L, N) f32 array, as a list of k (1, N) rows.

    One XLU reduction per selection step: values are bit-packed into a monotonic
    int32 sort key whose low ceil(log2 L) bits carry the complemented row index,
    so a single jnp.max both selects the value and pinpoints exactly one
    occurrence to remove (torch.topk tie semantics).  Values are decoded from
    the key with the low index bits truncated (<= ~2^-(23-log2 L) rel. error)."""
    l = vals.shape[0]
    s = max((l - 1).bit_length(), 1)
    low_mask = (1 << s) - 1
    keep = jnp.int32(~low_mask)
    flip = jnp.int32(0x7FFFFFFF)
    removed = jnp.int32(-(2 ** 31))

    bits = pltpu.bitcast(vals, jnp.int32)
    key = jnp.where(bits < 0, bits ^ flip, bits)            # order-preserving int key
    iota = lax.broadcasted_iota(jnp.int32, vals.shape, 0)
    packed = (key & keep) | (low_mask - iota)               # unique per column

    rows = []
    for _ in range(k):
        pmax = jnp.max(packed, axis=0, keepdims=True)       # (1, N): one XLU reduce
        key_t = pmax & keep
        vbits = jnp.where(key_t < 0, key_t ^ flip, key_t)
        rows.append(pltpu.bitcast(vbits, jnp.float32))
        packed = jnp.where(packed == pmax, removed, packed)  # drop exactly one entry
    return rows


def adjacency_kernel(cap_len_ref,                       # SMEM (NC,) int32 (prefetch)
                     cap_ref,                           # VMEM (C_TILE*W_PAD, H) f32
                     img_ref,                           # VMEM (H, R*NI_TILE) matmul_dtype
                     w1_ref, b1_ref, w2_ref, b2_ref,    # SMEM MLP params (shared head)
                     out_ref,                           # VMEM (4, C_TILE, NI_TILE) f32
                     *, c_tile, w_len, n_img, n_reg, topk, matmul_dtype):
    c = pl.program_id(1)

    # MLP head params as SMEM scalars, read once per grid step (hoisted).
    w1_s = [[w1_ref[j, i] for i in range(topk)] for j in range(topk)]
    b1_s = [b1_ref[j] for j in range(topk)]
    w2_s = [w2_ref[j] for j in range(topk)]
    b2_s = b2_ref[0]

    def mlp_head(rows):
        # rows: K lane-dense (1, NI_TILE) rows (descending rank order).
        # Tiny KxK head on the VPU -- avoids an MXU matmul with M=K=4..20.
        y = None
        for j in range(topk):
            acc = None
            for i in range(topk):
                term = w1_s[j][i] * rows[i]
                acc = term if acc is None else acc + term
            hid = jnp.maximum(acc + b1_s[j], 0.0)
            t2 = w2_s[j] * hid
            y = t2 if y is None else y + t2
        return y + b2_s

    # Per-word L2 normalization of the caption tile (f32, EUP rsqrt).
    cap = cap_ref[...].astype(jnp.float32)
    csq = jnp.sum(cap * cap, axis=1, keepdims=True)
    cap_n = cap * lax.rsqrt(jnp.maximum(csq, EPS_SQ))

    # One lane-dense MXU GEMM for the whole caption tile x image tile:
    #   sim2d[m, r*NI_TILE + n] = <word m, region r of image n>
    sim2d = jnp.dot(cap_n.astype(matmul_dtype), img_ref[...],
                    preferred_element_type=jnp.float32)
    sim2d = jnp.maximum(sim2d, NEG_SLOPE * sim2d)           # leaky_relu (scan=True)

    widx3 = lax.broadcasted_iota(jnp.int32, (w_len, 1, 1), 0)   # word-index masks
    widx2 = lax.broadcasted_iota(jnp.int32, (w_len, 1), 0)

    for t in range(c_tile):                                 # static unroll over captions
        seq_word = cap_len_ref[c * c_tile + t]
        num_sel = jnp.maximum(seq_word, topk)               # num_selected_word
        seq_f = jnp.maximum(seq_word.astype(jnp.float32), 1.0)   # guard cap_len == 0

        # (W, R, NI_TILE); the W slice is sublane-aligned (W padded to 8).
        s3 = sim2d[t * w_len:(t + 1) * w_len, :].reshape(w_len, n_reg, n_img)
        # TODO(synk): the (W, R*NI)->(W, R, NI) retile is the next VMEM-copy
        # candidate at production sizes (replace with R lane-aligned slices).

        sel3 = widx3 < num_sel
        seq3 = widx3 < seq_word
        sel2 = widx2 < num_sel
        seq2 = widx2 < seq_word

        # ---- t2i: F.normalize over the WORD axis (selected words only) ----
        s_sel = jnp.where(sel3, s3, 0.0)
        wsq = jnp.sum(s_sel * s_sel, axis=0, keepdims=True)             # (1, R, NI)
        s_wn = s_sel * lax.rsqrt(jnp.maximum(wsq, EPS_SQ))
        row_sim = jnp.max(s_wn, axis=1)                                 # (W, NI)
        row_mean = jnp.sum(jnp.where(seq2, row_sim, 0.0), axis=0,
                           keepdims=True) / seq_f                       # (1, NI)
        t2i_rows = _topk_rows_axis0(jnp.where(sel2, row_sim, NEG_INF), topk)
        t2i_rel = mlp_head(t2i_rows) + row_mean                         # res=True

        # ---- i2t: F.normalize over the REGION axis (per word row) ----
        rsq = jnp.sum(s3 * s3, axis=1, keepdims=True)                   # (W, 1, NI)
        s_rn = s3 * lax.rsqrt(jnp.maximum(rsq, EPS_SQ))
        col_sim = jnp.max(jnp.where(seq3, s_rn, NEG_INF), axis=0)       # (R, NI)
        col_mean = jnp.mean(col_sim, axis=0, keepdims=True)             # (1, NI)
        i2t_rows = _topk_rows_axis0(col_sim, topk)
        i2t_rel = mlp_head(i2t_rows) + col_mean

        # Results are consumed immediately (no list carried to the end of the
        # loop); lane-dense row writes into the (4, C_TILE, NI_TILE) block,
        # which is DMA'd to HBM as one dense block per grid step.
        out_ref[0, pl.ds(t, 1), :] = t2i_rel
        out_ref[1, pl.ds(t, 1), :] = i2t_rel
        out_ref[2, pl.ds(t, 1), :] = row_mean
        out_ref[3, pl.ds(t, 1), :] = col_mean


def adjacency_learning_pallas(img_regions, cap_words, cap_len, w1, b1, w2, b2, *,
                              topk, c_tile=None, ni_tile=None,
                              matmul_dtype=jnp.float32,
                              vmem_limit_bytes=48 * 1024 * 1024):
    """Returns (batch_t2i_relation, batch_i2t_relation, batch_t2i_mean, batch_i2t_mean).

    matmul_dtype: pass jnp.bfloat16 at production sizes (halves the resident
      image block, ~2x MXU throughput); elementwise math stays f32.
    vmem_limit_bytes: raise to ~100 MiB on v5e/v6e at production tiles, keep
      <= ~48-56 MiB per core on v7x."""
    nc, w_len, h = cap_words.shape
    ni, r_len, _ = img_regions.shape
    assert nc == ni, "module asserts n_image == n_caption"
    assert r_len >= topk and w_len >= topk, "topk must not exceed R or W"

    img_regions = jnp.asarray(img_regions, jnp.float32)
    cap_words = jnp.asarray(cap_words, jnp.float32)

    # Zero-pad the word axis to a sublane multiple; padded rows are masked out
    # of every reduction inside the kernel.
    w_pad = ((w_len + 7) // 8) * 8
    if w_pad != w_len:
        cap_words = jnp.pad(cap_words, ((0, 0), (0, w_pad - w_len), (0, 0)))

    # Caption tile: keep the output block's sublane dim 8-aligned (or full);
    # c_tile*w_pad is the GEMM M dim (ideally a 256-multiple on v6e/v7x).
    if c_tile is None:
        if nc % 16 == 0:
            c_tile = 16
        elif nc % 8 == 0:
            c_tile = 8
        else:
            c_tile = nc
    assert nc % c_tile == 0 and (c_tile % 8 == 0 or c_tile == nc)

    # Image tile along NI (outer grid axis) bounds the resident (H, R*NI_TILE)
    # block + sim slab so production shapes fit v7x's 64 MiB VMEM per core.
    itemsize = jax.dtypes.canonicalize_dtype(matmul_dtype).itemsize
    if ni_tile is None:
        ni_tile = ni
        budget = 8 * 1024 * 1024                          # resident image block budget
        if ni % 128 == 0:
            while (ni_tile > 128 and ni_tile % 256 == 0
                   and h * r_len * ni_tile * itemsize > budget):
                ni_tile //= 2
    assert ni % ni_tile == 0 and (ni_tile == ni or ni_tile % 128 == 0)
    nb = ni // ni_tile

    # Hoisted, caption-independent image prep (XLA): L2 norm once, lay each NI
    # tile out as (H, R*NI_TILE) so the kernel runs one lane-dense GEMM.
    img_n = _l2_normalize(img_regions, -1)                                # (NI, R, H)
    img_blk = (img_n.reshape(nb, ni_tile, r_len, h)
                    .transpose(0, 3, 2, 1)
                    .reshape(nb, h, r_len * ni_tile)
                    .astype(matmul_dtype))                                # (NB, H, R*NT)

    cap2d = cap_words.reshape(nc * w_pad, h)                              # f32

    # Shared MLP head params -> SMEM scalars (mlp_i2t = deepcopy(mlp_t2i)).
    w1s = jnp.asarray(w1, jnp.float32).reshape(topk, topk)
    b1s = jnp.asarray(b1, jnp.float32).reshape(topk)
    w2s = jnp.asarray(w2, jnp.float32).reshape(topk)
    b2s = jnp.asarray(b2, jnp.float32).reshape(1)

    smem = pl.BlockSpec(memory_space=pltpu.MemorySpace.SMEM)
    kernel = functools.partial(
        adjacency_kernel, c_tile=c_tile, w_len=w_pad, n_img=ni_tile,
        n_reg=r_len, topk=topk, matmul_dtype=matmul_dtype)

    def call(img_buffer_count):
        img_kw = ({} if img_buffer_count is None
                  else dict(pipeline_mode=pl.Buffered(img_buffer_count)))
        grid_spec = pltpu.PrefetchScalarGridSpec(
            num_scalar_prefetch=1,
            grid=(nb, nc // c_tile),              # image tile outer, captions inner
            in_specs=[
                pl.BlockSpec((c_tile * w_pad, h), lambda n, c, clen: (c, 0)),
                pl.BlockSpec((None, h, r_len * ni_tile),
                             lambda n, c, clen: (n, 0, 0), **img_kw),
                smem, smem, smem, smem,
            ],
            out_specs=pl.BlockSpec((4, c_tile, ni_tile),
                                   lambda n, c, clen: (0, c, n)),
        )
        return pl.pallas_call(
            kernel,
            grid_spec=grid_spec,
            out_shape=jax.ShapeDtypeStruct((4, nc, ni), jnp.float32),
            compiler_params=pltpu.CompilerParams(
                dimension_semantics=("parallel", "parallel"),
                vmem_limit_bytes=vmem_limit_bytes),
        )(jnp.asarray(cap_len, jnp.int32), cap2d, img_blk, w1s, b1s, w2s, b2s)

    if nb == 1:
        # Image block is grid-constant -> single-buffer it (halves its VMEM).
        try:
            out = call(1)
        except Exception:
            out = call(None)      # fall back to default double buffering
    else:
        out = call(None)

    batch_t2i_relation = out[0]        # (NC, NI)
    batch_i2t_relation = out[1].T      # (NI, NC)
    batch_t2i_mean = out[2]            # (NC, NI)
    batch_i2t_mean = out[3].T          # (NI, NC)
    return batch_t2i_relation, batch_i2t_relation, batch_t2i_mean, batch_i2t_mean


def reference(img_regions, cap_words, cap_len, w1, b1, w2, b2, topk):
    """Plain-JAX port of the PyTorch forward (per-caption loop, dynamic slicing)."""
    img_n = _l2_normalize(img_regions, -1)
    t2i, t2i_mean, i2t, i2t_mean = [], [], [], []
    for i in range(cap_words.shape[0]):
        sw = int(cap_len[i])
        ns = max(sw, topk)
        cap_i = _l2_normalize(cap_words[i, :ns, :], -1)               # (ns, H)
        sim = jnp.einsum('wh,nrh->nwr', cap_i, img_n)                 # (NI, ns, R)
        sim = jnp.where(sim > 0, sim, NEG_SLOPE * sim)
        sim_wn = sim / jnp.maximum(
            jnp.sqrt(jnp.sum(sim * sim, axis=1, keepdims=True)), EPS)
        row_sim = sim_wn.max(axis=2)                                  # (NI, ns)
        row_mean = row_sim[:, :sw].mean(axis=1)                       # (NI,)
        row_topk = -jnp.sort(-row_sim, axis=1)[:, :topk]              # (NI, K)
        sim_rn = sim / jnp.maximum(
            jnp.sqrt(jnp.sum(sim * sim, axis=2, keepdims=True)), EPS)
        col_sim = sim_rn[:, :sw, :].max(axis=1)                       # (NI, R)
        col_mean = col_sim.mean(axis=1)
        col_topk = -jnp.sort(-col_sim, axis=1)[:, :topk]
        t2i.append(row_topk); t2i_mean.append(row_mean)
        i2t.append(col_topk); i2t_mean.append(col_mean)
    batch_t2i = jnp.stack(t2i, 0)                       # (NC, NI, K)
    batch_t2i_mean = jnp.stack(t2i_mean, 0)             # (NC, NI)
    batch_i2t = jnp.stack(i2t, 0).transpose(1, 0, 2)    # (NI, NC, K)
    batch_i2t_mean = jnp.stack(i2t_mean, 0).T           # (NI, NC)

    def mlp(x):
        hid = jnp.maximum(x @ w1.T + b1, 0.0)
        return (hid @ w2.T + b2)[..., 0]

    t2i_rel = mlp(batch_t2i) + batch_t2i_mean
    i2t_rel = mlp(batch_i2t) + batch_i2t_mean
    return t2i_rel, i2t_rel, batch_t2i_mean, batch_i2t_mean


if __name__ == "__main__":
    key = jax.random.PRNGKey(0)
    NC = NI = 2      # n_caption == n_image (asserted by the module)
    R = 16           # image regions per image (>= topk)
    W = 8            # max caption words
    H = 32           # hidden size
    K = 4            # topk

    k1, k2, k3, k4, k5, k6 = jax.random.split(key, 6)
    img_regions = jax.random.normal(k1, (NI, R, H), jnp.float32)
    cap_words = jax.random.normal(k2, (NC, W, H), jnp.float32)
    cap_len = jnp.array([3, 8], jnp.int32)   # first caption shorter than topk

    # nn.Linear(topk, topk) and nn.Linear(topk, 1); mlp_i2t = deepcopy(mlp_t2i).
    w1 = 0.2 * jax.random.normal(k3, (K, K), jnp.float32)
    b1 = 0.1 * jax.random.normal(k4, (K,), jnp.float32)
    w2 = 0.2 * jax.random.normal(k5, (1, K), jnp.float32)
    b2 = 0.1 * jax.random.normal(k6, (1,), jnp.float32)

    outs = adjacency_learning_pallas(img_regions, cap_words, cap_len,
                                     w1, b1, w2, b2, topk=K)
    outs = jax.block_until_ready(outs)

    refs = reference(img_regions, cap_words, [3, 8], w1, b1, w2, b2, K)
    names = ["batch_t2i_relation", "batch_i2t_relation",
             "batch_t2i_mean", "batch_i2t_mean"]
    for name, o, rf in zip(names, outs, refs):
        assert o.shape == rf.shape, (name, o.shape, rf.shape)
        assert jnp.allclose(o, rf, atol=1e-4, rtol=1e-4), (name, o, rf)

    # bf16 MXU-operand path (production config); loose tolerance for the cast.
    outs_bf16 = adjacency_learning_pallas(img_regions, cap_words, cap_len,
                                          w1, b1, w2, b2, topk=K,
                                          matmul_dtype=jnp.bfloat16)
    outs_bf16 = jax.block_until_ready(outs_bf16)
    for name, o, rf in zip(names, outs_bf16, refs):
        assert o.shape == rf.shape, ("bf16:" + name, o.shape, rf.shape)
        assert jnp.allclose(o, rf, atol=1e-1, rtol=1e-1), ("bf16:" + name)

    print("KERNEL_OK")
</pallas_src>

<mosaic_0001>
module attributes {stable_mosaic.version = 11 : i64} {
  func.func @adjacency_kernel(%arg0: i32, %arg1: i32, %arg2: memref<2xi32, #tpu.memory_space<smem>>, %arg3: memref<16x32xf32, #tpu.memory_space<vmem>>, %arg4: memref<1x32x32xf32, #tpu.memory_space<vmem>>, %arg5: memref<4x4xf32, #tpu.memory_space<smem>>, %arg6: memref<4xf32, #tpu.memory_space<smem>>, %arg7: memref<4xf32, #tpu.memory_space<smem>>, %arg8: memref<1xf32, #tpu.memory_space<smem>>, %arg9: memref<4x2x2xf32, #tpu.memory_space<vmem>>) attributes {dimension_semantics = [#tpu.dimension_semantics<parallel>, #tpu.dimension_semantics<parallel>], iteration_bounds = array<i64: 1, 1>, scalar_prefetch = 1 : i64, scratch_operands = 0 : i64, tpu.core_type = #tpu.core_type<tc>, window_params = [{transform_indices = @transform_0, window_bounds = array<i64: 16, 32>}, {pipeline_mode = #tpu.pipeline_mode<synchronous>, transform_indices = @transform_1, window_bounds = array<i64: 1, 32, 32>}, {transform_indices = @transform_2, window_bounds = array<i64: 4, 4>}, {transform_indices = @transform_3, window_bounds = array<i64: 4>}, {transform_indices = @transform_4, window_bounds = array<i64: 4>}, {transform_indices = @transform_5, window_bounds = array<i64: 1>}, {transform_indices = @transform_6, window_bounds = array<i64: 4, 2, 2>}]} {
    %c0 = arith.constant 0 : index
    %c0_0 = arith.constant 0 : index
    %0 = memref.load %arg5[%c0, %c0_0] : memref<4x4xf32, #tpu.memory_space<smem>>
    %c0_1 = arith.constant 0 : index
    %c1 = arith.constant 1 : index
    %1 = memref.load %arg5[%c0_1, %c1] : memref<4x4xf32, #tpu.memory_space<smem>>
    %c0_2 = arith.constant 0 : index
    %c2 = arith.constant 2 : index
    %2 = memref.load %arg5[%c0_2, %c2] : memref<4x4xf32, #tpu.memory_space<smem>>
    %c0_3 = arith.constant 0 : index
    %c3 = arith.constant 3 : index
    %3 = memref.load %arg5[%c0_3, %c3] : memref<4x4xf32, #tpu.memory_space<smem>>
    %c1_4 = arith.constant 1 : index
    %c0_5 = arith.constant 0 : index
    %4 = memref.load %arg5[%c1_4, %c0_5] : memref<4x4xf32, #tpu.memory_space<smem>>
    %c1_6 = arith.constant 1 : index
    %c1_7 = arith.constant 1 : index
    %5 = memref.load %arg5[%c1_6, %c1_7] : memref<4x4xf32, #tpu.memory_space<smem>>
    %c1_8 = arith.constant 1 : index
    %c2_9 = arith.constant 2 : index
    %6 = memref.load %arg5[%c1_8, %c2_9] : memref<4x4xf32, #tpu.memory_space<smem>>
    %c1_10 = arith.constant 1 : index
    %c3_11 = arith.constant 3 : index
    %7 = memref.load %arg5[%c1_10, %c3_11] : memref<4x4xf32, #tpu.memory_space<smem>>
    %c2_12 = arith.constant 2 : index
    %c0_13 = arith.constant 0 : index
    %8 = memref.load %arg5[%c2_12, %c0_13] : memref<4x4xf32, #tpu.memory_space<smem>>
    %c2_14 = arith.constant 2 : index
    %c1_15 = arith.constant 1 : index
    %9 = memref.load %arg5[%c2_14, %c1_15] : memref<4x4xf32, #tpu.memory_space<smem>>
    %c2_16 = arith.constant 2 : index
    %c2_17 = arith.constant 2 : index
    %10 = memref.load %arg5[%c2_16, %c2_17] : memref<4x4xf32, #tpu.memory_space<smem>>
    %c2_18 = arith.constant 2 : index
    %c3_19 = arith.constant 3 : index
    %11 = memref.load %arg5[%c2_18, %c3_19] : memref<4x4xf32, #tpu.memory_space<smem>>
    %c3_20 = arith.constant 3 : index
    %c0_21 = arith.constant 0 : index
    %12 = memref.load %arg5[%c3_20, %c0_21] : memref<4x4xf32, #tpu.memory_space<smem>>
    %c3_22 = arith.constant 3 : index
    %c1_23 = arith.constant 1 : index
    %13 = memref.load %arg5[%c3_22, %c1_23] : memref<4x4xf32, #tpu.memory_space<smem>>
    %c3_24 = arith.constant 3 : index
    %c2_25 = arith.constant 2 : index
    %14 = memref.load %arg5[%c3_24, %c2_25] : memref<4x4xf32, #tpu.memory_space<smem>>
    %c3_26 = arith.constant 3 : index
    %c3_27 = arith.constant 3 : index
    %15 = memref.load %arg5[%c3_26, %c3_27] : memref<4x4xf32, #tpu.memory_space<smem>>
    %c0_28 = arith.constant 0 : index
    %16 = memref.load %arg6[%c0_28] : memref<4xf32, #tpu.memory_space<smem>>
    %c1_29 = arith.constant 1 : index
    %17 = memref.load %arg6[%c1_29] : memref<4xf32, #tpu.memory_space<smem>>
    %c2_30 = arith.constant 2 : index
    %18 = memref.load %arg6[%c2_30] : memref<4xf32, #tpu.memory_space<smem>>
    %c3_31 = arith.constant 3 : index
    %19 = memref.load %arg6[%c3_31] : memref<4xf32, #tpu.memory_space<smem>>
    %c0_32 = arith.constant 0 : index
    %20 = memref.load %arg7[%c0_32] : memref<4xf32, #tpu.memory_space<smem>>
    %c1_33 = arith.constant 1 : index
    %21 = memref.load %arg7[%c1_33] : memref<4xf32, #tpu.memory_space<smem>>
    %c2_34 = arith.constant 2 : index
    %22 = memref.load %arg7[%c2_34] : memref<4xf32, #tpu.memory_space<smem>>
    %c3_35 = arith.constant 3 : index
    %23 = memref.load %arg7[%c3_35] : memref<4xf32, #tpu.memory_space<smem>>
    %c0_36 = arith.constant 0 : index
    %24 = memref.load %arg8[%c0_36] : memref<1xf32, #tpu.memory_space<smem>>
    %c0_37 = arith.constant 0 : index
    %c0_38 = arith.constant 0 : index
    %25 = vector.load %arg3[%c0_37, %c0_38] : memref<16x32xf32, #tpu.memory_space<vmem>>, vector<16x32xf32>
    %26 = arith.mulf %25, %25 : vector<16x32xf32>
    %cst = arith.constant dense<0.000000e+00> : vector<16xf32>
    %27 = vector.multi_reduction <add>, %26, %cst [1] : vector<16x32xf32> to vector<16xf32>
    %28 = vector.shape_cast %27 : vector<16xf32> to vector<16x1xf32>
    %cst_39 = arith.constant 1.000000e-24 : f32
    %29 = vector.broadcast %cst_39 : f32 to vector<16x1xf32>
    %30 = arith.maximumf %28, %29 : vector<16x1xf32>
    %31 = math.rsqrt %30 : vector<16x1xf32>
    %32 = vector.broadcast %31 : vector<16x1xf32> to vector<16x32xf32>
    %33 = arith.mulf %25, %32 : vector<16x32xf32>
    %c0_40 = arith.constant 0 : index
    %c0_41 = arith.constant 0 : index
    %c0_42 = arith.constant 0 : index
    %34 = vector.load %arg4[%c0_40, %c0_41, %c0_42] : memref<1x32x32xf32, #tpu.memory_space<vmem>>, vector<1x32x32xf32>
    %35 = vector.shape_cast %34 : vector<1x32x32xf32> to vector<32x32xf32>
    %cst_43 = arith.constant dense<0.000000e+00> : vector<16x32xf32>
    %36 = tpu.matmul %33, %35, %cst_43 {dimension_numbers = #tpu.dot_dimension_numbers<[1], [0], [0], [1], [0, 0, 1, 1], [], []>} : vector<16x32xf32>, vector<32x32xf32>, vector<16x32xf32> -> vector<16x32xf32>
    %cst_44 = arith.constant 1.000000e-01 : f32
    %37 = vector.broadcast %cst_44 : f32 to vector<16x32xf32>
    %38 = arith.mulf %37, %36 : vector<16x32xf32>
    %39 = arith.maximumf %36, %38 : vector<16x32xf32>
    %40 = tpu.iota {dimensions = array<i32: 0>} : vector<8x1x1xi32>
    %41 = tpu.iota {dimensions = array<i32: 0>} : vector<8x1xi32>
    %c2_i32 = arith.constant 2 : i32
    %42 = arith.muli %arg1, %c2_i32 : i32
    %c0_i32 = arith.constant 0 : i32
    %43 = arith.addi %42, %c0_i32 : i32
    %44 = arith.index_cast %43 : i32 to index
    %45 = memref.load %arg2[%44] : memref<2xi32, #tpu.memory_space<smem>>
    %c4_i32 = arith.constant 4 : i32
    %46 = arith.maxsi %45, %c4_i32 : i32
    %47 = arith.sitofp %45 : i32 to f32
    %cst_45 = arith.constant 1.000000e+00 : f32
    %48 = arith.maximumf %47, %cst_45 : f32
    %49 = vector.extract_strided_slice %39 {offsets = [0, 0], sizes = [8, 32], strides = [1, 1]} : vector<16x32xf32> to vector<8x32xf32>
    %50 = vector.shape_cast %49 : vector<8x32xf32> to vector<8x16x2xf32>
    %51 = vector.broadcast %46 : i32 to vector<8x1x1xi32>
    %52 = arith.cmpi slt, %40, %51 : vector<8x1x1xi32>
    %53 = vector.broadcast %45 : i32 to vector<8x1x1xi32>
    %54 = arith.cmpi slt, %40, %53 : vector<8x1x1xi32>
    %55 = vector.broadcast %46 : i32 to vector<8x1xi32>
    %56 = arith.cmpi slt, %41, %55 : vector<8x1xi32>
    %57 = vector.broadcast %45 : i32 to vector<8x1xi32>
    %58 = arith.cmpi slt, %41, %57 : vector<8x1xi32>
    %cst_46 = arith.constant 0.000000e+00 : f32
    %59 = vector.shape_cast %52 : vector<8x1x1xi1> to vector<8x1x1xi1>
    %60 = vector.broadcast %59 : vector<8x1x1xi1> to vector<8x16x2xi1>
    %61 = vector.broadcast %cst_46 : f32 to vector<8x16x2xf32>
    %62 = arith.select %60, %50, %61 : vector<8x16x2xi1>, vector<8x16x2xf32>
    %63 = arith.mulf %62, %62 : vector<8x16x2xf32>
    %cst_47 = arith.constant dense<0.000000e+00> : vector<16x2xf32>
    %64 = vector.multi_reduction <add>, %63, %cst_47 [0] : vector<8x16x2xf32> to vector<16x2xf32>
    %65 = vector.shape_cast %64 : vector<16x2xf32> to vector<1x16x2xf32>
    %cst_48 = arith.constant 1.000000e-24 : f32
    %66 = vector.broadcast %cst_48 : f32 to vector<1x16x2xf32>
    %67 = arith.maximumf %65, %66 : vector<1x16x2xf32>
    %68 = math.rsqrt %67 : vector<1x16x2xf32>
    %69 = vector.broadcast %68 : vector<1x16x2xf32> to vector<8x16x2xf32>
    %70 = arith.mulf %62, %69 : vector<8x16x2xf32>
    %cst_49 = arith.constant dense<0xFF800000> : vector<8x2xf32>
    %71 = vector.multi_reduction <maximumf>, %70, %cst_49 [1] : vector<8x16x2xf32> to vector<8x2xf32>
    %cst_50 = arith.constant 0.000000e+00 : f32
    %72 = vector.shape_cast %58 : vector<8x1xi1> to vector<8x1xi1>
    %73 = vector.broadcast %72 : vector<8x1xi1> to vector<8x2xi1>
    %74 = vector.broadcast %cst_50 : f32 to vector<8x2xf32>
    %75 = arith.select %73, %71, %74 : vector<8x2xi1>, vector<8x2xf32>
    %cst_51 = arith.constant dense<0.000000e+00> : vector<2xf32>
    %76 = vector.multi_reduction <add>, %75, %cst_51 [0] : vector<8x2xf32> to vector<2xf32>
    %77 = vector.shape_cast %76 : vector<2xf32> to vector<1x2xf32>
    %78 = vector.broadcast %48 : f32 to vector<1x2xf32>
    %79 = arith.divf %77, %78 : vector<1x2xf32>
    %cst_52 = arith.constant 0xFF800000 : f32
    %80 = vector.shape_cast %56 : vector<8x1xi1> to vector<8x1xi1>
    %81 = vector.broadcast %80 : vector<8x1xi1> to vector<8x2xi1>
    %82 = vector.broadcast %cst_52 : f32 to vector<8x2xf32>
    %83 = arith.select %81, %71, %82 : vector<8x2xi1>, vector<8x2xf32>
    %84 = tpu.bitcast %83 : vector<8x2xf32> -> vector<8x2xi32>
    %c0_i32_53 = arith.constant 0 : i32
    %85 = vector.broadcast %c0_i32_53 : i32 to vector<8x2xi32>
    %86 = arith.cmpi slt, %84, %85 : vector<8x2xi32>
    %c2147483647_i32 = arith.constant 2147483647 : i32
    %87 = vector.broadcast %c2147483647_i32 : i32 to vector<8x2xi32>
    %88 = arith.xori %84, %87 : vector<8x2xi32>
    %89 = arith.select %86, %88, %84 : vector<8x2xi1>, vector<8x2xi32>
    %90 = tpu.iota {dimensions = array<i32: 0>} : vector<8x2xi32>
    %c-8_i32 = arith.constant -8 : i32
    %91 = vector.broadcast %c-8_i32 : i32 to vector<8x2xi32>
    %92 = arith.andi %89, %91 : vector<8x2xi32>
    %c7_i32 = arith.constant 7 : i32
    %93 = vector.broadcast %c7_i32 : i32 to vector<8x2xi32>
    %94 = arith.subi %93, %90 : vector<8x2xi32>
    %95 = arith.ori %92, %94 : vector<8x2xi32>
    %cst_54 = arith.constant dense<-2147483648> : vector<2xi32>
    %96 = vector.multi_reduction <maxsi>, %95, %cst_54 [0] : vector<8x2xi32> to vector<2xi32>
    %97 = vector.shape_cast %96 : vector<2xi32> to vector<1x2xi32>
    %c-8_i32_55 = arith.constant -8 : i32
    %98 = vector.broadcast %c-8_i32_55 : i32 to vector<1x2xi32>
    %99 = arith.andi %97, %98 : vector<1x2xi32>
    %c0_i32_56 = arith.constant 0 : i32
    %100 = vector.broadcast %c0_i32_56 : i32 to vector<1x2xi32>
    %101 = arith.cmpi slt, %99, %100 : vector<1x2xi32>
    %c2147483647_i32_57 = arith.constant 2147483647 : i32
    %102 = vector.broadcast %c2147483647_i32_57 : i32 to vector<1x2xi32>
    %103 = arith.xori %99, %102 : vector<1x2xi32>
    %104 = arith.select %101, %103, %99 : vector<1x2xi1>, vector<1x2xi32>
    %105 = tpu.bitcast %104 : vector<1x2xi32> -> vector<1x2xf32>
    %106 = vector.broadcast %97 : vector<1x2xi32> to vector<8x2xi32>
    %107 = arith.cmpi eq, %95, %106 : vector<8x2xi32>
    %c-2147483648_i32 = arith.constant -2147483648 : i32
    %108 = vector.broadcast %c-2147483648_i32 : i32 to vector<8x2xi32>
    %109 = arith.select %107, %108, %95 : vector<8x2xi1>, vector<8x2xi32>
    %cst_58 = arith.constant dense<-2147483648> : vector<2xi32>
    %110 = vector.multi_reduction <maxsi>, %109, %cst_58 [0] : vector<8x2xi32> to vector<2xi32>
    %111 = vector.shape_cast %110 : vector<2xi32> to vector<1x2xi32>
    %c-8_i32_59 = arith.constant -8 : i32
    %112 = vector.broadcast %c-8_i32_59 : i32 to vector<1x2xi32>
    %113 = arith.andi %111, %112 : vector<1x2xi32>
    %c0_i32_60 = arith.constant 0 : i32
    %114 = vector.broadcast %c0_i32_60 : i32 to vector<1x2xi32>
    %115 = arith.cmpi slt, %113, %114 : vector<1x2xi32>
    %c2147483647_i32_61 = arith.constant 2147483647 : i32
    %116 = vector.broadcast %c2147483647_i32_61 : i32 to vector<1x2xi32>
    %117 = arith.xori %113, %116 : vector<1x2xi32>
    %118 = arith.select %115, %117, %113 : vector<1x2xi1>, vector<1x2xi32>
    %119 = tpu.bitcast %118 : vector<1x2xi32> -> vector<1x2xf32>
    %120 = vector.broadcast %111 : vector<1x2xi32> to vector<8x2xi32>
    %121 = arith.cmpi eq, %109, %120 : vector<8x2xi32>
    %c-2147483648_i32_62 = arith.constant -2147483648 : i32
    %122 = vector.broadcast %c-2147483648_i32_62 : i32 to vector<8x2xi32>
    %123 = arith.select %121, %122, %109 : vector<8x2xi1>, vector<8x2xi32>
    %cst_63 = arith.constant dense<-2147483648> : vector<2xi32>
    %124 = vector.multi_reduction <maxsi>, %123, %cst_63 [0] : vector<8x2xi32> to vector<2xi32>
    %125 = vector.shape_cast %124 : vector<2xi32> to vector<1x2xi32>
    %c-8_i32_64 = arith.constant -8 : i32
    %126 = vector.broadcast %c-8_i32_64 : i32 to vector<1x2xi32>
    %127 = arith.andi %125, %126 : vector<1x2xi32>
    %c0_i32_65 = arith.constant 0 : i32
    %128 = vector.broadcast %c0_i32_65 : i32 to vector<1x2xi32>
    %129 = arith.cmpi slt, %127, %128 : vector<1x2xi32>
    %c2147483647_i32_66 = arith.constant 2147483647 : i32
    %130 = vector.broadcast %c2147483647_i32_66 : i32 to vector<1x2xi32>
    %131 = arith.xori %127, %130 : vector<1x2xi32>
    %132 = arith.select %129, %131, %127 : vector<1x2xi1>, vector<1x2xi32>
    %133 = tpu.bitcast %132 : vector<1x2xi32> -> vector<1x2xf32>
    %134 = vector.broadcast %125 : vector<1x2xi32> to vector<8x2xi32>
    %135 = arith.cmpi eq, %123, %134 : vector<8x2xi32>
    %c-2147483648_i32_67 = arith.constant -2147483648 : i32
    %136 = vector.broadcast %c-2147483648_i32_67 : i32 to vector<8x2xi32>
    %137 = arith.select %135, %136, %123 : vector<8x2xi1>, vector<8x2xi32>
    %cst_68 = arith.constant dense<-2147483648> : vector<2xi32>
    %138 = vector.multi_reduction <maxsi>, %137, %cst_68 [0] : vector<8x2xi32> to vector<2xi32>
    %139 = vector.shape_cast %138 : vector<2xi32> to vector<1x2xi32>
    %c-8_i32_69 = arith.constant -8 : i32
    %140 = vector.broadcast %c-8_i32_69 : i32 to vector<1x2xi32>
    %141 = arith.andi %139, %140 : vector<1x2xi32>
    %c0_i32_70 = arith.constant 0 : i32
    %142 = vector.broadcast %c0_i32_70 : i32 to vector<1x2xi32>
    %143 = arith.cmpi slt, %141, %142 : vector<1x2xi32>
    %c2147483647_i32_71 = arith.constant 2147483647 : i32
    %144 = vector.broadcast %c2147483647_i32_71 : i32 to vector<1x2xi32>
    %145 = arith.xori %141, %144 : vector<1x2xi32>
    %146 = arith.select %143, %145, %141 : vector<1x2xi1>, vector<1x2xi32>
    %147 = tpu.bitcast %146 : vector<1x2xi32> -> vector<1x2xf32>
    %148 = vector.broadcast %0 : f32 to vector<1x2xf32>
    %149 = arith.mulf %148, %105 : vector<1x2xf32>
    %150 = vector.broadcast %1 : f32 to vector<1x2xf32>
    %151 = arith.mulf %150, %119 : vector<1x2xf32>
    %152 = arith.addf %149, %151 : vector<1x2xf32>
    %153 = vector.broadcast %2 : f32 to vector<1x2xf32>
    %154 = arith.mulf %153, %133 : vector<1x2xf32>
    %155 = arith.addf %152, %154 : vector<1x2xf32>
    %156 = vector.broadcast %3 : f32 to vector<1x2xf32>
    %157 = arith.mulf %156, %147 : vector<1x2xf32>
    %158 = arith.addf %155, %157 : vector<1x2xf32>
    %159 = vector.broadcast %16 : f32 to vector<1x2xf32>
    %160 = arith.addf %158, %159 : vector<1x2xf32>
    %cst_72 = arith.constant 0.000000e+00 : f32
    %161 = vector.broadcast %cst_72 : f32 to vector<1x2xf32>
    %162 = arith.maximumf %160, %161 : vector<1x2xf32>
    %163 = vector.broadcast %20 : f32 to vector<1x2xf32>
    %164 = arith.mulf %163, %162 : vector<1x2xf32>
    %165 = vector.broadcast %4 : f32 to vector<1x2xf32>
    %166 = arith.mulf %165, %105 : vector<1x2xf32>
    %167 = vector.broadcast %5 : f32 to vector<1x2xf32>
    %168 = arith.mulf %167, %119 : vector<1x2xf32>
    %169 = arith.addf %166, %168 : vector<1x2xf32>
    %170 = vector.broadcast %6 : f32 to vector<1x2xf32>
    %171 = arith.mulf %170, %133 : vector<1x2xf32>
    %172 = arith.addf %169, %171 : vector<1x2xf32>
    %173 = vector.broadcast %7 : f32 to vector<1x2xf32>
    %174 = arith.mulf %173, %147 : vector<1x2xf32>
    %175 = arith.addf %172, %174 : vector<1x2xf32>
    %176 = vector.broadcast %17 : f32 to vector<1x2xf32>
    %177 = arith.addf %175, %176 : vector<1x2xf32>
    %cst_73 = arith.constant 0.000000e+00 : f32
    %178 = vector.broadcast %cst_73 : f32 to vector<1x2xf32>
    %179 = arith.maximumf %177, %178 : vector<1x2xf32>
    %180 = vector.broadcast %21 : f32 to vector<1x2xf32>
    %181 = arith.mulf %180, %179 : vector<1x2xf32>
    %182 = arith.addf %164, %181 : vector<1x2xf32>
    %183 = vector.broadcast %8 : f32 to vector<1x2xf32>
    %184 = arith.mulf %183, %105 : vector<1x2xf32>
    %185 = vector.broadcast %9 : f32 to vector<1x2xf32>
    %186 = arith.mulf %185, %119 : vector<1x2xf32>
    %187 = arith.addf %184, %186 : vector<1x2xf32>
    %188 = vector.broadcast %10 : f32 to vector<1x2xf32>
    %189 = arith.mulf %188, %133 : vector<1x2xf32>
    %190 = arith.addf %187, %189 : vector<1x2xf32>
    %191 = vector.broadcast %11 : f32 to vector<1x2xf32>
    %192 = arith.mulf %191, %147 : vector<1x2xf32>
    %193 = arith.addf %190, %192 : vector<1x2xf32>
    %194 = vector.broadcast %18 : f32 to vector<1x2xf32>
    %195 = arith.addf %193, %194 : vector<1x2xf32>
    %cst_74 = arith.constant 0.000000e+00 : f32
    %196 = vector.broadcast %cst_74 : f32 to vector<1x2xf32>
    %197 = arith.maximumf %195, %196 : vector<1x2xf32>
    %198 = vector.broadcast %22 : f32 to vector<1x2xf32>
    %199 = arith.mulf %198, %197 : vector<1x2xf32>
    %200 = arith.addf %182, %199 : vector<1x2xf32>
    %201 = vector.broadcast %12 : f32 to vector<1x2xf32>
    %202 = arith.mulf %201, %105 : vector<1x2xf32>
    %203 = vector.broadcast %13 : f32 to vector<1x2xf32>
    %204 = arith.mulf %203, %119 : vector<1x2xf32>
    %205 = arith.addf %202, %204 : vector<1x2xf32>
    %206 = vector.broadcast %14 : f32 to vector<1x2xf32>
    %207 = arith.mulf %206, %133 : vector<1x2xf32>
    %208 = arith.addf %205, %207 : vector<1x2xf32>
    %209 = vector.broadcast %15 : f32 to vector<1x2xf32>
    %210 = arith.mulf %209, %147 : vector<1x2xf32>
    %211 = arith.addf %208, %210 : vector<1x2xf32>
    %212 = vector.broadcast %19 : f32 to vector<1x2xf32>
    %213 = arith.addf %211, %212 : vector<1x2xf32>
    %cst_75 = arith.constant 0.000000e+00 : f32
    %214 = vector.broadcast %cst_75 : f32 to vector<1x2xf32>
    %215 = arith.maximumf %213, %214 : vector<1x2xf32>
    %216 = vector.broadcast %23 : f32 to vector<1x2xf32>
    %217 = arith.mulf %216, %215 : vector<1x2xf32>
    %218 = arith.addf %200, %217 : vector<1x2xf32>
    %219 = vector.broadcast %24 : f32 to vector<1x2xf32>
    %220 = arith.addf %218, %219 : vector<1x2xf32>
    %221 = arith.addf %220, %79 : vector<1x2xf32>
    %222 = arith.mulf %50, %50 : vector<8x16x2xf32>
    %cst_76 = arith.constant dense<0.000000e+00> : vector<8x2xf32>
    %223 = vector.multi_reduction <add>, %222, %cst_76 [1] : vector<8x16x2xf32> to vector<8x2xf32>
    %224 = vector.shape_cast %223 : vector<8x2xf32> to vector<8x1x2xf32>
    %cst_77 = arith.constant 1.000000e-24 : f32
    %225 = vector.broadcast %cst_77 : f32 to vector<8x1x2xf32>
    %226 = arith.maximumf %224, %225 : vector<8x1x2xf32>
    %227 = math.rsqrt %226 : vector<8x1x2xf32>
    %228 = vector.broadcast %227 : vector<8x1x2xf32> to vector<8x16x2xf32>
    %229 = arith.mulf %50, %228 : vector<8x16x2xf32>
    %cst_78 = arith.constant 0xFF800000 : f32
    %230 = vector.shape_cast %54 : vector<8x1x1xi1> to vector<8x1x1xi1>
    %231 = vector.broadcast %230 : vector<8x1x1xi1> to vector<8x16x2xi1>
    %232 = vector.broadcast %cst_78 : f32 to vector<8x16x2xf32>
    %233 = arith.select %231, %229, %232 : vector<8x16x2xi1>, vector<8x16x2xf32>
    %cst_79 = arith.constant dense<0xFF800000> : vector<16x2xf32>
    %234 = vector.multi_reduction <maximumf>, %233, %cst_79 [0] : vector<8x16x2xf32> to vector<16x2xf32>
    %cst_80 = arith.constant dense<0.000000e+00> : vector<2xf32>
    %235 = vector.multi_reduction <add>, %234, %cst_80 [0] : vector<16x2xf32> to vector<2xf32>
    %236 = vector.shape_cast %235 : vector<2xf32> to vector<1x2xf32>
    %cst_81 = arith.constant 1.600000e+01 : f32
    %237 = vector.broadcast %cst_81 : f32 to vector<1x2xf32>
    %238 = arith.divf %236, %237 : vector<1x2xf32>
    %239 = tpu.bitcast %234 : vector<16x2xf32> -> vector<16x2xi32>
    %c0_i32_82 = arith.constant 0 : i32
    %240 = vector.broadcast %c0_i32_82 : i32 to vector<16x2xi32>
    %241 = arith.cmpi slt, %239, %240 : vector<16x2xi32>
    %c2147483647_i32_83 = arith.constant 2147483647 : i32
    %242 = vector.broadcast %c2147483647_i32_83 : i32 to vector<16x2xi32>
    %243 = arith.xori %239, %242 : vector<16x2xi32>
    %244 = arith.select %241, %243, %239 : vector<16x2xi1>, vector<16x2xi32>
    %245 = tpu.iota {dimensions = array<i32: 0>} : vector<16x2xi32>
    %c-16_i32 = arith.constant -16 : i32
    %246 = vector.broadcast %c-16_i32 : i32 to vector<16x2xi32>
    %247 = arith.andi %244, %246 : vector<16x2xi32>
    %c15_i32 = arith.constant 15 : i32
    %248 = vector.broadcast %c15_i32 : i32 to vector<16x2xi32>
    %249 = arith.subi %248, %245 : vector<16x2xi32>
    %250 = arith.ori %247, %249 : vector<16x2xi32>
    %cst_84 = arith.constant dense<-2147483648> : vector<2xi32>
    %251 = vector.multi_reduction <maxsi>, %250, %cst_84 [0] : vector<16x2xi32> to vector<2xi32>
    %252 = vector.shape_cast %251 : vector<2xi32> to vector<1x2xi32>
    %c-16_i32_85 = arith.constant -16 : i32
    %253 = vector.broadcast %c-16_i32_85 : i32 to vector<1x2xi32>
    %254 = arith.andi %252, %253 : vector<1x2xi32>
    %c0_i32_86 = arith.constant 0 : i32
    %255 = vector.broadcast %c0_i32_86 : i32 to vector<1x2xi32>
    %256 = arith.cmpi slt, %254, %255 : vector<1x2xi32>
    %c2147483647_i32_87 = arith.constant 2147483647 : i32
    %257 = vector.broadcast %c2147483647_i32_87 : i32 to vector<1x2xi32>
    %258 = arith.xori %254, %257 : vector<1x2xi32>
    %259 = arith.select %256, %258, %254 : vector<1x2xi1>, vector<1x2xi32>
    %260 = tpu.bitcast %259 : vector<1x2xi32> -> vector<1x2xf32>
    %261 = vector.broadcast %252 : vector<1x2xi32> to vector<16x2xi32>
    %262 = arith.cmpi eq, %250, %261 : vector<16x2xi32>
    %c-2147483648_i32_88 = arith.constant -2147483648 : i32
    %263 = vector.broadcast %c-2147483648_i32_88 : i32 to vector<16x2xi32>
    %264 = arith.select %262, %263, %250 : vector<16x2xi1>, vector<16x2xi32>
    %cst_89 = arith.constant dense<-2147483648> : vector<2xi32>
    %265 = vector.multi_reduction <maxsi>, %264, %cst_89 [0] : vector<16x2xi32> to vector<2xi32>
    %266 = vector.shape_cast %265 : vector<2xi32> to vector<1x2xi32>
    %c-16_i32_90 = arith.constant -16 : i32
    %267 = vector.broadcast %c-16_i32_90 : i32 to vector<1x2xi32>
    %268 = arith.andi %266, %267 : vector<1x2xi32>
    %c0_i32_91 = arith.constant 0 : i32
    %269 = vector.broadcast %c0_i32_91 : i32 to vector<1x2xi32>
    %270 = arith.cmpi slt, %268, %269 : vector<1x2xi32>
    %c2147483647_i32_92 = arith.constant 2147483647 : i32
    %271 = vector.broadcast %c2147483647_i32_92 : i32 to vector<1x2xi32>
    %272 = arith.xori %268, %271 : vector<1x2xi32>
    %273 = arith.select %270, %272, %268 : vector<1x2xi1>, vector<1x2xi32>
    %274 = tpu.bitcast %273 : vector<1x2xi32> -> vector<1x2xf32>
    %275 = vector.broadcast %266 : vector<1x2xi32> to vector<16x2xi32>
    %276 = arith.cmpi eq, %264, %275 : vector<16x2xi32>
    %c-2147483648_i32_93 = arith.constant -2147483648 : i32
    %277 = vector.broadcast %c-2147483648_i32_93 : i32 to vector<16x2xi32>
    %278 = arith.select %276, %277, %264 : vector<16x2xi1>, vector<16x2xi32>
    %cst_94 = arith.constant dense<-2147483648> : vector<2xi32>
    %279 = vector.multi_reduction <maxsi>, %278, %cst_94 [0] : vector<16x2xi32> to vector<2xi32>
    %280 = vector.shape_cast %279 : vector<2xi32> to vector<1x2xi32>
    %c-16_i32_95 = arith.constant -16 : i32
    %281 = vector.broadcast %c-16_i32_95 : i32 to vector<1x2xi32>
    %282 = arith.andi %280, %281 : vector<1x2xi32>
    %c0_i32_96 = arith.constant 0 : i32
    %283 = vector.broadcast %c0_i32_96 : i32 to vector<1x2xi32>
    %284 = arith.cmpi slt, %282, %283 : vector<1x2xi32>
    %c2147483647_i32_97 = arith.constant 2147483647 : i32
    %285 = vector.broadcast %c2147483647_i32_97 : i32 to vector<1x2xi32>
    %286 = arith.xori %282, %285 : vector<1x2xi32>
    %287 = arith.select %284, %286, %282 : vector<1x2xi1>, vector<1x2xi32>
    %288 = tpu.bitcast %287 : vector<1x2xi32> -> vector<1x2xf32>
    %289 = vector.broadcast %280 : vector<1x2xi32> to vector<16x2xi32>
    %290 = arith.cmpi eq, %278, %289 : vector<16x2xi32>
    %c-2147483648_i32_98 = arith.constant -2147483648 : i32
    %291 = vector.broadcast %c-2147483648_i32_98 : i32 to vector<16x2xi32>
    %292 = arith.select %290, %291, %278 : vector<16x2xi1>, vector<16x2xi32>
    %cst_99 = arith.constant dense<-2147483648> : vector<2xi32>
    %293 = vector.multi_reduction <maxsi>, %292, %cst_99 [0] : vector<16x2xi32> to vector<2xi32>
    %294 = vector.shape_cast %293 : vector<2xi32> to vector<1x2xi32>
    %c-16_i32_100 = arith.constant -16 : i32
    %295 = vector.broadcast %c-16_i32_100 : i32 to vector<1x2xi32>
    %296 = arith.andi %294, %295 : vector<1x2xi32>
    %c0_i32_101 = arith.constant 0 : i32
    %297 = vector.broadcast %c0_i32_101 : i32 to vector<1x2xi32>
    %298 = arith.cmpi slt, %296, %297 : vector<1x2xi32>
    %c2147483647_i32_102 = arith.constant 2147483647 : i32
    %299 = vector.broadcast %c2147483647_i32_102 : i32 to vector<1x2xi32>
    %300 = arith.xori %296, %299 : vector<1x2xi32>
    %301 = arith.select %298, %300, %296 : vector<1x2xi1>, vector<1x2xi32>
    %302 = tpu.bitcast %301 : vector<1x2xi32> -> vector<1x2xf32>
    %303 = vector.broadcast %0 : f32 to vector<1x2xf32>
    %304 = arith.mulf %303, %260 : vector<1x2xf32>
    %305 = vector.broadcast %1 : f32 to vector<1x2xf32>
    %306 = arith.mulf %305, %274 : vector<1x2xf32>
    %307 = arith.addf %304, %306 : vector<1x2xf32>
    %308 = vector.broadcast %2 : f32 to vector<1x2xf32>
    %309 = arith.mulf %308, %288 : vector<1x2xf32>
    %310 = arith.addf %307, %309 : vector<1x2xf32>
    %311 = vector.broadcast %3 : f32 to vector<1x2xf32>
    %312 = arith.mulf %311, %302 : vector<1x2xf32>
    %313 = arith.addf %310, %312 : vector<1x2xf32>
    %314 = vector.broadcast %16 : f32 to vector<1x2xf32>
    %315 = arith.addf %313, %314 : vector<1x2xf32>
    %cst_103 = arith.constant 0.000000e+00 : f32
    %316 = vector.broadcast %cst_103 : f32 to vector<1x2xf32>
    %317 = arith.maximumf %315, %316 : vector<1x2xf32>
    %318 = vector.broadcast %20 : f32 to vector<1x2xf32>
    %319 = arith.mulf %318, %317 : vector<1x2xf32>
    %320 = vector.broadcast %4 : f32 to vector<1x2xf32>
    %321 = arith.mulf %320, %260 : vector<1x2xf32>
    %322 = vector.broadcast %5 : f32 to vector<1x2xf32>
    %323 = arith.mulf %322, %274 : vector<1x2xf32>
    %324 = arith.addf %321, %323 : vector<1x2xf32>
    %325 = vector.broadcast %6 : f32 to vector<1x2xf32>
    %326 = arith.mulf %325, %288 : vector<1x2xf32>
    %327 = arith.addf %324, %326 : vector<1x2xf32>
    %328 = vector.broadcast %7 : f32 to vector<1x2xf32>
    %329 = arith.mulf %328, %302 : vector<1x2xf32>
    %330 = arith.addf %327, %329 : vector<1x2xf32>
    %331 = vector.broadcast %17 : f32 to vector<1x2xf32>
    %332 = arith.addf %330, %331 : vector<1x2xf32>
    %cst_104 = arith.constant 0.000000e+00 : f32
    %333 = vector.broadcast %cst_104 : f32 to vector<1x2xf32>
    %334 = arith.maximumf %332, %333 : vector<1x2xf32>
    %335 = vector.broadcast %21 : f32 to vector<1x2xf32>
    %336 = arith.mulf %335, %334 : vector<1x2xf32>
    %337 = arith.addf %319, %336 : vector<1x2xf32>
    %338 = vector.broadcast %8 : f32 to vector<1x2xf32>
    %339 = arith.mulf %338, %260 : vector<1x2xf32>
    %340 = vector.broadcast %9 : f32 to vector<1x2xf32>
    %341 = arith.mulf %340, %274 : vector<1x2xf32>
    %342 = arith.addf %339, %341 : vector<1x2xf32>
    %343 = vector.broadcast %10 : f32 to vector<1x2xf32>
    %344 = arith.mulf %343, %288 : vector<1x2xf32>
    %345 = arith.addf %342, %344 : vector<1x2xf32>
    %346 = vector.broadcast %11 : f32 to vector<1x2xf32>
    %347 = arith.mulf %346, %302 : vector<1x2xf32>
    %348 = arith.addf %345, %347 : vector<1x2xf32>
    %349 = vector.broadcast %18 : f32 to vector<1x2xf32>
    %350 = arith.addf %348, %349 : vector<1x2xf32>
    %cst_105 = arith.constant 0.000000e+00 : f32
    %351 = vector.broadcast %cst_105 : f32 to vector<1x2xf32>
    %352 = arith.maximumf %350, %351 : vector<1x2xf32>
    %353 = vector.broadcast %22 : f32 to vector<1x2xf32>
    %354 = arith.mulf %353, %352 : vector<1x2xf32>
    %355 = arith.addf %337, %354 : vector<1x2xf32>
    %356 = vector.broadcast %12 : f32 to vector<1x2xf32>
    %357 = arith.mulf %356, %260 : vector<1x2xf32>
    %358 = vector.broadcast %13 : f32 to vector<1x2xf32>
    %359 = arith.mulf %358, %274 : vector<1x2xf32>
    %360 = arith.addf %357, %359 : vector<1x2xf32>
    %361 = vector.broadcast %14 : f32 to vector<1x2xf32>
    %362 = arith.mulf %361, %288 : vector<1x2xf32>
    %363 = arith.addf %360, %362 : vector<1x2xf32>
    %364 = vector.broadcast %15 : f32 to vector<1x2xf32>
    %365 = arith.mulf %364, %302 : vector<1x2xf32>
    %366 = arith.addf %363, %365 : vector<1x2xf32>
    %367 = vector.broadcast %19 : f32 to vector<1x2xf32>
    %368 = arith.addf %366, %367 : vector<1x2xf32>
    %cst_106 = arith.constant 0.000000e+00 : f32
    %369 = vector.broadcast %cst_106 : f32 to vector<1x2xf32>
    %370 = arith.maximumf %368, %369 : vector<1x2xf32>
    %371 = vector.broadcast %23 : f32 to vector<1x2xf32>
    %372 = arith.mulf %371, %370 : vector<1x2xf32>
    %373 = arith.addf %355, %372 : vector<1x2xf32>
    %374 = vector.broadcast %24 : f32 to vector<1x2xf32>
    %375 = arith.addf %373, %374 : vector<1x2xf32>
    %376 = arith.addf %375, %238 : vector<1x2xf32>
    %c0_107 = arith.constant 0 : index
    %c0_108 = arith.constant 0 : index
    %c0_109 = arith.constant 0 : index
    %377 = vector.load %arg9[%c0_107, %c0_108, %c0_109] : memref<4x2x2xf32, #tpu.memory_space<vmem>>, vector<1x1x2xf32>
    %378 = vector.shape_cast %377 : vector<1x1x2xf32> to vector<1x2xf32>
    %379 = vector.shape_cast %221 : vector<1x2xf32> to vector<1x1x2xf32>
    tpu.vector_store %arg9[%c0_107, %c0_108, %c0_109], %379 {strides = array<i32>} : memref<4x2x2xf32, #tpu.memory_space<vmem>>, vector<1x1x2xf32>,
    %c1_110 = arith.constant 1 : index
    %c0_111 = arith.constant 0 : index
    %c0_112 = arith.constant 0 : index
    %380 = vector.load %arg9[%c1_110, %c0_111, %c0_112] : memref<4x2x2xf32, #tpu.memory_space<vmem>>, vector<1x1x2xf32>
    %381 = vector.shape_cast %380 : vector<1x1x2xf32> to vector<1x2xf32>
    %382 = vector.shape_cast %376 : vector<1x2xf32> to vector<1x1x2xf32>
    tpu.vector_store %arg9[%c1_110, %c0_111, %c0_112], %382 {strides = array<i32>} : memref<4x2x2xf32, #tpu.memory_space<vmem>>, vector<1x1x2xf32>,
    %c2_113 = arith.constant 2 : index
    %c0_114 = arith.constant 0 : index
    %c0_115 = arith.constant 0 : index
    %383 = vector.load %arg9[%c2_113, %c0_114, %c0_115] : memref<4x2x2xf32, #tpu.memory_space<vmem>>, vector<1x1x2xf32>
    %384 = vector.shape_cast %383 : vector<1x1x2xf32> to vector<1x2xf32>
    %385 = vector.shape_cast %79 : vector<1x2xf32> to vector<1x1x2xf32>
    tpu.vector_store %arg9[%c2_113, %c0_114, %c0_115], %385 {strides = array<i32>} : memref<4x2x2xf32, #tpu.memory_space<vmem>>, vector<1x1x2xf32>,
    %c3_116 = arith.constant 3 : index
    %c0_117 = arith.constant 0 : index
    %c0_118 = arith.constant 0 : index
    %386 = vector.load %arg9[%c3_116, %c0_117, %c0_118] : memref<4x2x2xf32, #tpu.memory_space<vmem>>, vector<1x1x2xf32>
    %387 = vector.shape_cast %386 : vector<1x1x2xf32> to vector<1x2xf32>
    %388 = vector.shape_cast %238 : vector<1x2xf32> to vector<1x1x2xf32>
    tpu.vector_store %arg9[%c3_116, %c0_117, %c0_118], %388 {strides = array<i32>} : memref<4x2x2xf32, #tpu.memory_space<vmem>>, vector<1x1x2xf32>,
    %c2_i32_119 = arith.constant 2 : i32
    %389 = arith.muli %arg1, %c2_i32_119 : i32
    %c1_i32 = arith.constant 1 : i32
    %390 = arith.addi %389, %c1_i32 : i32
    %391 = arith.index_cast %390 : i32 to index
    %392 = memref.load %arg2[%391] : memref<2xi32, #tpu.memory_space<smem>>
    %c4_i32_120 = arith.constant 4 : i32
    %393 = arith.maxsi %392, %c4_i32_120 : i32
    %394 = arith.sitofp %392 : i32 to f32
    %cst_121 = arith.constant 1.000000e+00 : f32
    %395 = arith.maximumf %394, %cst_121 : f32
    %396 = vector.extract_strided_slice %39 {offsets = [8, 0], sizes = [8, 32], strides = [1, 1]} : vector<16x32xf32> to vector<8x32xf32>
    %397 = vector.shape_cast %396 : vector<8x32xf32> to vector<8x16x2xf32>
    %398 = vector.broadcast %393 : i32 to vector<8x1x1xi32>
    %399 = arith.cmpi slt, %40, %398 : vector<8x1x1xi32>
    %400 = vector.broadcast %392 : i32 to vector<8x1x1xi32>
    %401 = arith.cmpi slt, %40, %400 : vector<8x1x1xi32>
    %402 = vector.broadcast %393 : i32 to vector<8x1xi32>
    %403 = arith.cmpi slt, %41, %402 : vector<8x1xi32>
    %404 = vector.broadcast %392 : i32 to vector<8x1xi32>
    %405 = arith.cmpi slt, %41, %404 : vector<8x1xi32>
    %cst_122 = arith.constant 0.000000e+00 : f32
    %406 = vector.shape_cast %399 : vector<8x1x1xi1> to vector<8x1x1xi1>
    %407 = vector.broadcast %406 : vector<8x1x1xi1> to vector<8x16x2xi1>
    %408 = vector.broadcast %cst_122 : f32 to vector<8x16x2xf32>
    %409 = arith.select %407, %397, %408 : vector<8x16x2xi1>, vector<8x16x2xf32>
    %410 = arith.mulf %409, %409 : vector<8x16x2xf32>
    %cst_123 = arith.constant dense<0.000000e+00> : vector<16x2xf32>
    %411 = vector.multi_reduction <add>, %410, %cst_123 [0] : vector<8x16x2xf32> to vector<16x2xf32>
    %412 = vector.shape_cast %411 : vector<16x2xf32> to vector<1x16x2xf32>
    %cst_124 = arith.constant 1.000000e-24 : f32
    %413 = vector.broadcast %cst_124 : f32 to vector<1x16x2xf32>
    %414 = arith.maximumf %412, %413 : vector<1x16x2xf32>
    %415 = math.rsqrt %414 : vector<1x16x2xf32>
    %416 = vector.broadcast %415 : vector<1x16x2xf32> to vector<8x16x2xf32>
    %417 = arith.mulf %409, %416 : vector<8x16x2xf32>
    %cst_125 = arith.constant dense<0xFF800000> : vector<8x2xf32>
    %418 = vector.multi_reduction <maximumf>, %417, %cst_125 [1] : vector<8x16x2xf32> to vector<8x2xf32>
    %cst_126 = arith.constant 0.000000e+00 : f32
    %419 = vector.shape_cast %405 : vector<8x1xi1> to vector<8x1xi1>
    %420 = vector.broadcast %419 : vector<8x1xi1> to vector<8x2xi1>
    %421 = vector.broadcast %cst_126 : f32 to vector<8x2xf32>
    %422 = arith.select %420, %418, %421 : vector<8x2xi1>, vector<8x2xf32>
    %cst_127 = arith.constant dense<0.000000e+00> : vector<2xf32>
    %423 = vector.multi_reduction <add>, %422, %cst_127 [0] : vector<8x2xf32> to vector<2xf32>
    %424 = vector.shape_cast %423 : vector<2xf32> to vector<1x2xf32>
    %425 = vector.broadcast %395 : f32 to vector<1x2xf32>
    %426 = arith.divf %424, %425 : vector<1x2xf32>
    %cst_128 = arith.constant 0xFF800000 : f32
    %427 = vector.shape_cast %403 : vector<8x1xi1> to vector<8x1xi1>
    %428 = vector.broadcast %427 : vector<8x1xi1> to vector<8x2xi1>
    %429 = vector.broadcast %cst_128 : f32 to vector<8x2xf32>
    %430 = arith.select %428, %418, %429 : vector<8x2xi1>, vector<8x2xf32>
    %431 = tpu.bitcast %430 : vector<8x2xf32> -> vector<8x2xi32>
    %c0_i32_129 = arith.constant 0 : i32
    %432 = vector.broadcast %c0_i32_129 : i32 to vector<8x2xi32>
    %433 = arith.cmpi slt, %431, %432 : vector<8x2xi32>
    %c2147483647_i32_130 = arith.constant 2147483647 : i32
    %434 = vector.broadcast %c2147483647_i32_130 : i32 to vector<8x2xi32>
    %435 = arith.xori %431, %434 : vector<8x2xi32>
    %436 = arith.select %433, %435, %431 : vector<8x2xi1>, vector<8x2xi32>
    %437 = tpu.iota {dimensions = array<i32: 0>} : vector<8x2xi32>
    %c-8_i32_131 = arith.constant -8 : i32
    %438 = vector.broadcast %c-8_i32_131 : i32 to vector<8x2xi32>
    %439 = arith.andi %436, %438 : vector<8x2xi32>
    %c7_i32_132 = arith.constant 7 : i32
    %440 = vector.broadcast %c7_i32_132 : i32 to vector<8x2xi32>
    %441 = arith.subi %440, %437 : vector<8x2xi32>
    %442 = arith.ori %439, %441 : vector<8x2xi32>
    %cst_133 = arith.constant dense<-2147483648> : vector<2xi32>
    %443 = vector.multi_reduction <maxsi>, %442, %cst_133 [0] : vector<8x2xi32> to vector<2xi32>
    %444 = vector.shape_cast %443 : vector<2xi32> to vector<1x2xi32>
    %c-8_i32_134 = arith.constant -8 : i32
    %445 = vector.broadcast %c-8_i32_134 : i32 to vector<1x2xi32>
    %446 = arith.andi %444, %445 : vector<1x2xi32>
    %c0_i32_135 = arith.constant 0 : i32
    %447 = vector.broadcast %c0_i32_135 : i32 to vector<1x2xi32>
    %448 = arith.cmpi slt, %446, %447 : vector<1x2xi32>
    %c2147483647_i32_136 = arith.constant 2147483647 : i32
    %449 = vector.broadcast %c2147483647_i32_136 : i32 to vector<1x2xi32>
    %450 = arith.xori %446, %449 : vector<1x2xi32>
    %451 = arith.select %448, %450, %446 : vector<1x2xi1>, vector<1x2xi32>
    %452 = tpu.bitcast %451 : vector<1x2xi32> -> vector<1x2xf32>
    %453 = vector.broadcast %444 : vector<1x2xi32> to vector<8x2xi32>
    %454 = arith.cmpi eq, %442, %453 : vector<8x2xi32>
    %c-2147483648_i32_137 = arith.constant -2147483648 : i32
    %455 = vector.broadcast %c-2147483648_i32_137 : i32 to vector<8x2xi32>
    %456 = arith.select %454, %455, %442 : vector<8x2xi1>, vector<8x2xi32>
    %cst_138 = arith.constant dense<-2147483648> : vector<2xi32>
    %457 = vector.multi_reduction <maxsi>, %456, %cst_138 [0] : vector<8x2xi32> to vector<2xi32>
    %458 = vector.shape_cast %457 : vector<2xi32> to vector<1x2xi32>
    %c-8_i32_139 = arith.constant -8 : i32
    %459 = vector.broadcast %c-8_i32_139 : i32 to vector<1x2xi32>
    %460 = arith.andi %458, %459 : vector<1x2xi32>
    %c0_i32_140 = arith.constant 0 : i32
    %461 = vector.broadcast %c0_i32_140 : i32 to vector<1x2xi32>
    %462 = arith.cmpi slt, %460, %461 : vector<1x2xi32>
    %c2147483647_i32_141 = arith.constant 2147483647 : i32
    %463 = vector.broadcast %c2147483647_i32_141 : i32 to vector<1x2xi32>
    %464 = arith.xori %460, %463 : vector<1x2xi32>
    %465 = arith.select %462, %464, %460 : vector<1x2xi1>, vector<1x2xi32>
    %466 = tpu.bitcast %465 : vector<1x2xi32> -> vector<1x2xf32>
    %467 = vector.broadcast %458 : vector<1x2xi32> to vector<8x2xi32>
    %468 = arith.cmpi eq, %456, %467 : vector<8x2xi32>
    %c-2147483648_i32_142 = arith.constant -2147483648 : i32
    %469 = vector.broadcast %c-2147483648_i32_142 : i32 to vector<8x2xi32>
    %470 = arith.select %468, %469, %456 : vector<8x2xi1>, vector<8x2xi32>
    %cst_143 = arith.constant dense<-2147483648> : vector<2xi32>
    %471 = vector.multi_reduction <maxsi>, %470, %cst_143 [0] : vector<8x2xi32> to vector<2xi32>
    %472 = vector.shape_cast %471 : vector<2xi32> to vector<1x2xi32>
    %c-8_i32_144 = arith.constant -8 : i32
    %473 = vector.broadcast %c-8_i32_144 : i32 to vector<1x2xi32>
    %474 = arith.andi %472, %473 : vector<1x2xi32>
    %c0_i32_145 = arith.constant 0 : i32
    %475 = vector.broadcast %c0_i32_145 : i32 to vector<1x2xi32>
    %476 = arith.cmpi slt, %474, %475 : vector<1x2xi32>
    %c2147483647_i32_146 = arith.constant 2147483647 : i32
    %477 = vector.broadcast %c2147483647_i32_146 : i32 to vector<1x2xi32>
    %478 = arith.xori %474, %477 : vector<1x2xi32>
    %479 = arith.select %476, %478, %474 : vector<1x2xi1>, vector<1x2xi32>
    %480 = tpu.bitcast %479 : vector<1x2xi32> -> vector<1x2xf32>
    %481 = vector.broadcast %472 : vector<1x2xi32> to vector<8x2xi32>
    %482 = arith.cmpi eq, %470, %481 : vector<8x2xi32>
    %c-2147483648_i32_147 = arith.constant -2147483648 : i32
    %483 = vector.broadcast %c-2147483648_i32_147 : i32 to vector<8x2xi32>
    %484 = arith.select %482, %483, %470 : vector<8x2xi1>, vector<8x2xi32>
    %cst_148 = arith.constant dense<-2147483648> : vector<2xi32>
    %485 = vector.multi_reduction <maxsi>, %484, %cst_148 [0] : vector<8x2xi32> to vector<2xi32>
    %486 = vector.shape_cast %485 : vector<2xi32> to vector<1x2xi32>
    %c-8_i32_149 = arith.constant -8 : i32
    %487 = vector.broadcast %c-8_i32_149 : i32 to vector<1x2xi32>
    %488 = arith.andi %486, %487 : vector<1x2xi32>
    %c0_i32_150 = arith.constant 0 : i32
    %489 = vector.broadcast %c0_i32_150 : i32 to vector<1x2xi32>
    %490 = arith.cmpi slt, %488, %489 : vector<1x2xi32>
    %c2147483647_i32_151 = arith.constant 2147483647 : i32
    %491 = vector.broadcast %c2147483647_i32_151 : i32 to vector<1x2xi32>
    %492 = arith.xori %488, %491 : vector<1x2xi32>
    %493 = arith.select %490, %492, %488 : vector<1x2xi1>, vector<1x2xi32>
    %494 = tpu.bitcast %493 : vector<1x2xi32> -> vector<1x2xf32>
    %495 = vector.broadcast %0 : f32 to vector<1x2xf32>
    %496 = arith.mulf %495, %452 : vector<1x2xf32>
    %497 = vector.broadcast %1 : f32 to vector<1x2xf32>
    %498 = arith.mulf %497, %466 : vector<1x2xf32>
    %499 = arith.addf %496, %498 : vector<1x2xf32>
    %500 = vector.broadcast %2 : f32 to vector<1x2xf32>
    %501 = arith.mulf %500, %480 : vector<1x2xf32>
    %502 = arith.addf %499, %501 : vector<1x2xf32>
    %503 = vector.broadcast %3 : f32 to vector<1x2xf32>
    %504 = arith.mulf %503, %494 : vector<1x2xf32>
    %505 = arith.addf %502, %504 : vector<1x2xf32>
    %506 = vector.broadcast %16 : f32 to vector<1x2xf32>
    %507 = arith.addf %505, %506 : vector<1x2xf32>
    %cst_152 = arith.constant 0.000000e+00 : f32
    %508 = vector.broadcast %cst_152 : f32 to vector<1x2xf32>
    %509 = arith.maximumf %507, %508 : vector<1x2xf32>
    %510 = vector.broadcast %20 : f32 to vector<1x2xf32>
    %511 = arith.mulf %510, %509 : vector<1x2xf32>
    %512 = vector.broadcast %4 : f32 to vector<1x2xf32>
    %513 = arith.mulf %512, %452 : vector<1x2xf32>
    %514 = vector.broadcast %5 : f32 to vector<1x2xf32>
    %515 = arith.mulf %514, %466 : vector<1x2xf32>
    %516 = arith.addf %513, %515 : vector<1x2xf32>
    %517 = vector.broadcast %6 : f32 to vector<1x2xf32>
    %518 = arith.mulf %517, %480 : vector<1x2xf32>
    %519 = arith.addf %516, %518 : vector<1x2xf32>
    %520 = vector.broadcast %7 : f32 to vector<1x2xf32>
    %521 = arith.mulf %520, %494 : vector<1x2xf32>
    %522 = arith.addf %519, %521 : vector<1x2xf32>
    %523 = vector.broadcast %17 : f32 to vector<1x2xf32>
    %524 = arith.addf %522, %523 : vector<1x2xf32>
    %cst_153 = arith.constant 0.000000e+00 : f32
    %525 = vector.broadcast %cst_153 : f32 to vector<1x2xf32>
    %526 = arith.maximumf %524, %525 : vector<1x2xf32>
    %527 = vector.broadcast %21 : f32 to vector<1x2xf32>
    %528 = arith.mulf %527, %526 : vector<1x2xf32>
    %529 = arith.addf %511, %528 : vector<1x2xf32>
    %530 = vector.broadcast %8 : f32 to vector<1x2xf32>
    %531 = arith.mulf %530, %452 : vector<1x2xf32>
    %532 = vector.broadcast %9 : f32 to vector<1x2xf32>
    %533 = arith.mulf %532, %466 : vector<1x2xf32>
    %534 = arith.addf %531, %533 : vector<1x2xf32>
    %535 = vector.broadcast %10 : f32 to vector<1x2xf32>
    %536 = arith.mulf %535, %480 : vector<1x2xf32>
    %537 = arith.addf %534, %536 : vector<1x2xf32>
    %538 = vector.broadcast %11 : f32 to vector<1x2xf32>
    %539 = arith.mulf %538, %494 : vector<1x2xf32>
    %540 = arith.addf %537, %539 : vector<1x2xf32>
    %541 = vector.broadcast %18 : f32 to vector<1x2xf32>
    %542 = arith.addf %540, %541 : vector<1x2xf32>
    %cst_154 = arith.constant 0.000000e+00 : f32
    %543 = vector.broadcast %cst_154 : f32 to vector<1x2xf32>
    %544 = arith.maximumf %542, %543 : vector<1x2xf32>
    %545 = vector.broadcast %22 : f32 to vector<1x2xf32>
    %546 = arith.mulf %545, %544 : vector<1x2xf32>
    %547 = arith.addf %529, %546 : vector<1x2xf32>
    %548 = vector.broadcast %12 : f32 to vector<1x2xf32>
    %549 = arith.mulf %548, %452 : vector<1x2xf32>
    %550 = vector.broadcast %13 : f32 to vector<1x2xf32>
    %551 = arith.mulf %550, %466 : vector<1x2xf32>
    %552 = arith.addf %549, %551 : vector<1x2xf32>
    %553 = vector.broadcast %14 : f32 to vector<1x2xf32>
    %554 = arith.mulf %553, %480 : vector<1x2xf32>
    %555 = arith.addf %552, %554 : vector<1x2xf32>
    %556 = vector.broadcast %15 : f32 to vector<1x2xf32>
    %557 = arith.mulf %556, %494 : vector<1x2xf32>
    %558 = arith.addf %555, %557 : vector<1x2xf32>
    %559 = vector.broadcast %19 : f32 to vector<1x2xf32>
    %560 = arith.addf %558, %559 : vector<1x2xf32>
    %cst_155 = arith.constant 0.000000e+00 : f32
    %561 = vector.broadcast %cst_155 : f32 to vector<1x2xf32>
    %562 = arith.maximumf %560, %561 : vector<1x2xf32>
    %563 = vector.broadcast %23 : f32 to vector<1x2xf32>
    %564 = arith.mulf %563, %562 : vector<1x2xf32>
    %565 = arith.addf %547, %564 : vector<1x2xf32>
    %566 = vector.broadcast %24 : f32 to vector<1x2xf32>
    %567 = arith.addf %565, %566 : vector<1x2xf32>
    %568 = arith.addf %567, %426 : vector<1x2xf32>
    %569 = arith.mulf %397, %397 : vector<8x16x2xf32>
    %cst_156 = arith.constant dense<0.000000e+00> : vector<8x2xf32>
    %570 = vector.multi_reduction <add>, %569, %cst_156 [1] : vector<8x16x2xf32> to vector<8x2xf32>
    %571 = vector.shape_cast %570 : vector<8x2xf32> to vector<8x1x2xf32>
    %cst_157 = arith.constant 1.000000e-24 : f32
    %572 = vector.broadcast %cst_157 : f32 to vector<8x1x2xf32>
    %573 = arith.maximumf %571, %572 : vector<8x1x2xf32>
    %574 = math.rsqrt %573 : vector<8x1x2xf32>
    %575 = vector.broadcast %574 : vector<8x1x2xf32> to vector<8x16x2xf32>
    %576 = arith.mulf %397, %575 : vector<8x16x2xf32>
    %cst_158 = arith.constant 0xFF800000 : f32
    %577 = vector.shape_cast %401 : vector<8x1x1xi1> to vector<8x1x1xi1>
    %578 = vector.broadcast %577 : vector<8x1x1xi1> to vector<8x16x2xi1>
    %579 = vector.broadcast %cst_158 : f32 to vector<8x16x2xf32>
    %580 = arith.select %578, %576, %579 : vector<8x16x2xi1>, vector<8x16x2xf32>
    %cst_159 = arith.constant dense<0xFF800000> : vector<16x2xf32>
    %581 = vector.multi_reduction <maximumf>, %580, %cst_159 [0] : vector<8x16x2xf32> to vector<16x2xf32>
    %cst_160 = arith.constant dense<0.000000e+00> : vector<2xf32>
    %582 = vector.multi_reduction <add>, %581, %cst_160 [0] : vector<16x2xf32> to vector<2xf32>
    %583 = vector.shape_cast %582 : vector<2xf32> to vector<1x2xf32>
    %cst_161 = arith.constant 1.600000e+01 : f32
    %584 = vector.broadcast %cst_161 : f32 to vector<1x2xf32>
    %585 = arith.divf %583, %584 : vector<1x2xf32>
    %586 = tpu.bitcast %581 : vector<16x2xf32> -> vector<16x2xi32>
    %c0_i32_162 = arith.constant 0 : i32
    %587 = vector.broadcast %c0_i32_162 : i32 to vector<16x2xi32>
    %588 = arith.cmpi slt, %586, %587 : vector<16x2xi32>
    %c2147483647_i32_163 = arith.constant 2147483647 : i32
    %589 = vector.broadcast %c2147483647_i32_163 : i32 to vector<16x2xi32>
    %590 = arith.xori %586, %589 : vector<16x2xi32>
    %591 = arith.select %588, %590, %586 : vector<16x2xi1>, vector<16x2xi32>
    %592 = tpu.iota {dimensions = array<i32: 0>} : vector<16x2xi32>
    %c-16_i32_164 = arith.constant -16 : i32
    %593 = vector.broadcast %c-16_i32_164 : i32 to vector<16x2xi32>
    %594 = arith.andi %591, %593 : vector<16x2xi32>
    %c15_i32_165 = arith.constant 15 : i32
    %595 = vector.broadcast %c15_i32_165 : i32 to vector<16x2xi32>
    %596 = arith.subi %595, %592 : vector<16x2xi32>
    %597 = arith.ori %594, %596 : vector<16x2xi32>
    %cst_166 = arith.constant dense<-2147483648> : vector<2xi32>
    %598 = vector.multi_reduction <maxsi>, %597, %cst_166 [0] : vector<16x2xi32> to vector<2xi32>
    %599 = vector.shape_cast %598 : vector<2xi32> to vector<1x2xi32>
    %c-16_i32_167 = arith.constant -16 : i32
    %600 = vector.broadcast %c-16_i32_167 : i32 to vector<1x2xi32>
    %601 = arith.andi %599, %600 : vector<1x2xi32>
    %c0_i32_168 = arith.constant 0 : i32
    %602 = vector.broadcast %c0_i32_168 : i32 to vector<1x2xi32>
    %603 = arith.cmpi slt, %601, %602 : vector<1x2xi32>
    %c2147483647_i32_169 = arith.constant 2147483647 : i32
    %604 = vector.broadcast %c2147483647_i32_169 : i32 to vector<1x2xi32>
    %605 = arith.xori %601, %604 : vector<1x2xi32>
    %606 = arith.select %603, %605, %601 : vector<1x2xi1>, vector<1x2xi32>
    %607 = tpu.bitcast %606 : vector<1x2xi32> -> vector<1x2xf32>
    %608 = vector.broadcast %599 : vector<1x2xi32> to vector<16x2xi32>
    %609 = arith.cmpi eq, %597, %608 : vector<16x2xi32>
    %c-2147483648_i32_170 = arith.constant -2147483648 : i32
    %610 = vector.broadcast %c-2147483648_i32_170 : i32 to vector<16x2xi32>
    %611 = arith.select %609, %610, %597 : vector<16x2xi1>, vector<16x2xi32>
    %cst_171 = arith.constant dense<-2147483648> : vector<2xi32>
    %612 = vector.multi_reduction <maxsi>, %611, %cst_171 [0] : vector<16x2xi32> to vector<2xi32>
    %613 = vector.shape_cast %612 : vector<2xi32> to vector<1x2xi32>
    %c-16_i32_172 = arith.constant -16 : i32
    %614 = vector.broadcast %c-16_i32_172 : i32 to vector<1x2xi32>
    %615 = arith.andi %613, %614 : vector<1x2xi32>
    %c0_i32_173 = arith.constant 0 : i32
    %616 = vector.broadcast %c0_i32_173 : i32 to vector<1x2xi32>
    %617 = arith.cmpi slt, %615, %616 : vector<1x2xi32>
    %c2147483647_i32_174 = arith.constant 2147483647 : i32
    %618 = vector.broadcast %c2147483647_i32_174 : i32 to vector<1x2xi32>
    %619 = arith.xori %615, %618 : vector<1x2xi32>
    %620 = arith.select %617, %619, %615 : vector<1x2xi1>, vector<1x2xi32>
    %621 = tpu.bitcast %620 : vector<1x2xi32> -> vector<1x2xf32>
    %622 = vector.broadcast %613 : vector<1x2xi32> to vector<16x2xi32>
    %623 = arith.cmpi eq, %611, %622 : vector<16x2xi32>
    %c-2147483648_i32_175 = arith.constant -2147483648 : i32
    %624 = vector.broadcast %c-2147483648_i32_175 : i32 to vector<16x2xi32>
    %625 = arith.select %623, %624, %611 : vector<16x2xi1>, vector<16x2xi32>
    %cst_176 = arith.constant dense<-2147483648> : vector<2xi32>
    %626 = vector.multi_reduction <maxsi>, %625, %cst_176 [0] : vector<16x2xi32> to vector<2xi32>
    %627 = vector.shape_cast %626 : vector<2xi32> to vector<1x2xi32>
    %c-16_i32_177 = arith.constant -16 : i32
    %628 = vector.broadcast %c-16_i32_177 : i32 to vector<1x2xi32>
    %629 = arith.andi %627, %628 : vector<1x2xi32>
    %c0_i32_178 = arith.constant 0 : i32
    %630 = vector.broadcast %c0_i32_178 : i32 to vector<1x2xi32>
    %631 = arith.cmpi slt, %629, %630 : vector<1x2xi32>
    %c2147483647_i32_179 = arith.constant 2147483647 : i32
    %632 = vector.broadcast %c2147483647_i32_179 : i32 to vector<1x2xi32>
    %633 = arith.xori %629, %632 : vector<1x2xi32>
    %634 = arith.select %631, %633, %629 : vector<1x2xi1>, vector<1x2xi32>
    %635 = tpu.bitcast %634 : vector<1x2xi32> -> vector<1x2xf32>
    %636 = vector.broadcast %627 : vector<1x2xi32> to vector<16x2xi32>
    %637 = arith.cmpi eq, %625, %636 : vector<16x2xi32>
    %c-2147483648_i32_180 = arith.constant -2147483648 : i32
    %638 = vector.broadcast %c-2147483648_i32_180 : i32 to vector<16x2xi32>
    %639 = arith.select %637, %638, %625 : vector<16x2xi1>, vector<16x2xi32>
    %cst_181 = arith.constant dense<-2147483648> : vector<2xi32>
    %640 = vector.multi_reduction <maxsi>, %639, %cst_181 [0] : vector<16x2xi32> to vector<2xi32>
    %641 = vector.shape_cast %640 : vector<2xi32> to vector<1x2xi32>
    %c-16_i32_182 = arith.constant -16 : i32
    %642 = vector.broadcast %c-16_i32_182 : i32 to vector<1x2xi32>
    %643 = arith.andi %641, %642 : vector<1x2xi32>
    %c0_i32_183 = arith.constant 0 : i32
    %644 = vector.broadcast %c0_i32_183 : i32 to vector<1x2xi32>
    %645 = arith.cmpi slt, %643, %644 : vector<1x2xi32>
    %c2147483647_i32_184 = arith.constant 2147483647 : i32
    %646 = vector.broadcast %c2147483647_i32_184 : i32 to vector<1x2xi32>
    %647 = arith.xori %643, %646 : vector<1x2xi32>
    %648 = arith.select %645, %647, %643 : vector<1x2xi1>, vector<1x2xi32>
    %649 = tpu.bitcast %648 : vector<1x2xi32> -> vector<1x2xf32>
    %650 = vector.broadcast %0 : f32 to vector<1x2xf32>
    %651 = arith.mulf %650, %607 : vector<1x2xf32>
    %652 = vector.broadcast %1 : f32 to vector<1x2xf32>
    %653 = arith.mulf %652, %621 : vector<1x2xf32>
    %654 = arith.addf %651, %653 : vector<1x2xf32>
    %655 = vector.broadcast %2 : f32 to vector<1x2xf32>
    %656 = arith.mulf %655, %635 : vector<1x2xf32>
    %657 = arith.addf %654, %656 : vector<1x2xf32>
    %658 = vector.broadcast %3 : f32 to vector<1x2xf32>
    %659 = arith.mulf %658, %649 : vector<1x2xf32>
    %660 = arith.addf %657, %659 : vector<1x2xf32>
    %661 = vector.broadcast %16 : f32 to vector<1x2xf32>
    %662 = arith.addf %660, %661 : vector<1x2xf32>
    %cst_185 = arith.constant 0.000000e+00 : f32
    %663 = vector.broadcast %cst_185 : f32 to vector<1x2xf32>
    %664 = arith.maximumf %662, %663 : vector<1x2xf32>
    %665 = vector.broadcast %20 : f32 to vector<1x2xf32>
    %666 = arith.mulf %665, %664 : vector<1x2xf32>
    %667 = vector.broadcast %4 : f32 to vector<1x2xf32>
    %668 = arith.mulf %667, %607 : vector<1x2xf32>
    %669 = vector.broadcast %5 : f32 to vector<1x2xf32>
    %670 = arith.mulf %669, %621 : vector<1x2xf32>
    %671 = arith.addf %668, %670 : vector<1x2xf32>
    %672 = vector.broadcast %6 : f32 to vector<1x2xf32>
    %673 = arith.mulf %672, %635 : vector<1x2xf32>
    %674 = arith.addf %671, %673 : vector<1x2xf32>
    %675 = vector.broadcast %7 : f32 to vector<1x2xf32>
    %676 = arith.mulf %675, %649 : vector<1x2xf32>
    %677 = arith.addf %674, %676 : vector<1x2xf32>
    %678 = vector.broadcast %17 : f32 to vector<1x2xf32>
    %679 = arith.addf %677, %678 : vector<1x2xf32>
    %cst_186 = arith.constant 0.000000e+00 : f32
    %680 = vector.broadcast %cst_186 : f32 to vector<1x2xf32>
    %681 = arith.maximumf %679, %680 : vector<1x2xf32>
    %682 = vector.broadcast %21 : f32 to vector<1x2xf32>
    %683 = arith.mulf %682, %681 : vector<1x2xf32>
    %684 = arith.addf %666, %683 : vector<1x2xf32>
    %685 = vector.broadcast %8 : f32 to vector<1x2xf32>
    %686 = arith.mulf %685, %607 : vector<1x2xf32>
    %687 = vector.broadcast %9 : f32 to vector<1x2xf32>
    %688 = arith.mulf %687, %621 : vector<1x2xf32>
    %689 = arith.addf %686, %688 : vector<1x2xf32>
    %690 = vector.broadcast %10 : f32 to vector<1x2xf32>
    %691 = arith.mulf %690, %635 : vector<1x2xf32>
    %692 = arith.addf %689, %691 : vector<1x2xf32>
    %693 = vector.broadcast %11 : f32 to vector<1x2xf32>
    %694 = arith.mulf %693, %649 : vector<1x2xf32>
    %695 = arith.addf %692, %694 : vector<1x2xf32>
    %696 = vector.broadcast %18 : f32 to vector<1x2xf32>
    %697 = arith.addf %695, %696 : vector<1x2xf32>
    %cst_187 = arith.constant 0.000000e+00 : f32
    %698 = vector.broadcast %cst_187 : f32 to vector<1x2xf32>
    %699 = arith.maximumf %697, %698 : vector<1x2xf32>
    %700 = vector.broadcast %22 : f32 to vector<1x2xf32>
    %701 = arith.mulf %700, %699 : vector<1x2xf32>
    %702 = arith.addf %684, %701 : vector<1x2xf32>
    %703 = vector.broadcast %12 : f32 to vector<1x2xf32>
    %704 = arith.mulf %703, %607 : vector<1x2xf32>
    %705 = vector.broadcast %13 : f32 to vector<1x2xf32>
    %706 = arith.mulf %705, %621 : vector<1x2xf32>
    %707 = arith.addf %704, %706 : vector<1x2xf32>
    %708 = vector.broadcast %14 : f32 to vector<1x2xf32>
    %709 = arith.mulf %708, %635 : vector<1x2xf32>
    %710 = arith.addf %707, %709 : vector<1x2xf32>
    %711 = vector.broadcast %15 : f32 to vector<1x2xf32>
    %712 = arith.mulf %711, %649 : vector<1x2xf32>
    %713 = arith.addf %710, %712 : vector<1x2xf32>
    %714 = vector.broadcast %19 : f32 to vector<1x2xf32>
    %715 = arith.addf %713, %714 : vector<1x2xf32>
    %cst_188 = arith.constant 0.000000e+00 : f32
    %716 = vector.broadcast %cst_188 : f32 to vector<1x2xf32>
    %717 = arith.maximumf %715, %716 : vector<1x2xf32>
    %718 = vector.broadcast %23 : f32 to vector<1x2xf32>
    %719 = arith.mulf %718, %717 : vector<1x2xf32>
    %720 = arith.addf %702, %719 : vector<1x2xf32>
    %721 = vector.broadcast %24 : f32 to vector<1x2xf32>
    %722 = arith.addf %720, %721 : vector<1x2xf32>
    %723 = arith.addf %722, %585 : vector<1x2xf32>
    %c0_189 = arith.constant 0 : index
    %c1_190 = arith.constant 1 : index
    %c0_191 = arith.constant 0 : index
    %724 = vector.load %arg9[%c0_189, %c1_190, %c0_191] : memref<4x2x2xf32, #tpu.memory_space<vmem>>, vector<1x1x2xf32>
    %725 = vector.shape_cast %724 : vector<1x1x2xf32> to vector<1x2xf32>
    %726 = vector.shape_cast %568 : vector<1x2xf32> to vector<1x1x2xf32>
    tpu.vector_store %arg9[%c0_189, %c1_190, %c0_191], %726 {strides = array<i32>} : memref<4x2x2xf32, #tpu.memory_space<vmem>>, vector<1x1x2xf32>,
    %c1_192 = arith.constant 1 : index
    %c1_193 = arith.constant 1 : index
    %c0_194 = arith.constant 0 : index
    %727 = vector.load %arg9[%c1_192, %c1_193, %c0_194] : memref<4x2x2xf32, #tpu.memory_space<vmem>>, vector<1x1x2xf32>
    %728 = vector.shape_cast %727 : vector<1x1x2xf32> to vector<1x2xf32>
    %729 = vector.shape_cast %723 : vector<1x2xf32> to vector<1x1x2xf32>
    tpu.vector_store %arg9[%c1_192, %c1_193, %c0_194], %729 {strides = array<i32>} : memref<4x2x2xf32, #tpu.memory_space<vmem>>, vector<1x1x2xf32>,
    %c2_195 = arith.constant 2 : index
    %c1_196 = arith.constant 1 : index
    %c0_197 = arith.constant 0 : index
    %730 = vector.load %arg9[%c2_195, %c1_196, %c0_197] : memref<4x2x2xf32, #tpu.memory_space<vmem>>, vector<1x1x2xf32>
    %731 = vector.shape_cast %730 : vector<1x1x2xf32> to vector<1x2xf32>
    %732 = vector.shape_cast %426 : vector<1x2xf32> to vector<1x1x2xf32>
    tpu.vector_store %arg9[%c2_195, %c1_196, %c0_197], %732 {strides = array<i32>} : memref<4x2x2xf32, #tpu.memory_space<vmem>>, vector<1x1x2xf32>,
    %c3_198 = arith.constant 3 : index
    %c1_199 = arith.constant 1 : index
    %c0_200 = arith.constant 0 : index
    %733 = vector.load %arg9[%c3_198, %c1_199, %c0_200] : memref<4x2x2xf32, #tpu.memory_space<vmem>>, vector<1x1x2xf32>
    %734 = vector.shape_cast %733 : vector<1x1x2xf32> to vector<1x2xf32>
    %735 = vector.shape_cast %585 : vector<1x2xf32> to vector<1x1x2xf32>
    tpu.vector_store %arg9[%c3_198, %c1_199, %c0_200], %735 {strides = array<i32>} : memref<4x2x2xf32, #tpu.memory_space<vmem>>, vector<1x1x2xf32>,
    return
  }
  func.func @transform_0(%arg0: i32, %arg1: i32, %arg2: memref<2xi32, #tpu.memory_space<smem>>) -> (i32, i32) {
    %c0_i32 = arith.constant 0 : i32
    %c0_i32_0 = arith.constant 0 : i32
    return %arg1, %c0_i32 : i32, i32
  }
  func.func @transform_1(%arg0: i32, %arg1: i32, %arg2: memref<2xi32, #tpu.memory_space<smem>>) -> (i32, i32, i32) {
    %c0_i32 = arith.constant 0 : i32
    %c0_i32_0 = arith.constant 0 : i32
    %c0_i32_1 = arith.constant 0 : i32
    return %arg0, %c0_i32, %c0_i32_0 : i32, i32, i32
  }
  func.func @transform_2(%arg0: i32, %arg1: i32, %arg2: memref<2xi32, #tpu.memory_space<smem>>) -> (i32, i32) {
    %c0_i32 = arith.constant 0 : i32
    %c0_i32_0 = arith.constant 0 : i32
    %c0_i32_1 = arith.constant 0 : i32
    return %c0_i32, %c0_i32_0 : i32, i32
  }
  func.func @transform_3(%arg0: i32, %arg1: i32, %arg2: memref<2xi32, #tpu.memory_space<smem>>) -> i32 {
    %c0_i32 = arith.constant 0 : i32
    %c0_i32_0 = arith.constant 0 : i32
    return %c0_i32 : i32
  }
  func.func @transform_4(%arg0: i32, %arg1: i32, %arg2: memref<2xi32, #tpu.memory_space<smem>>) -> i32 {
    %c0_i32 = arith.constant 0 : i32
    %c0_i32_0 = arith.constant 0 : i32
    return %c0_i32 : i32
  }
  func.func @transform_5(%arg0: i32, %arg1: i32, %arg2: memref<2xi32, #tpu.memory_space<smem>>) -> i32 {
    %c0_i32 = arith.constant 0 : i32
    %c0_i32_0 = arith.constant 0 : i32
    return %c0_i32 : i32
  }
  func.func @transform_6(%arg0: i32, %arg1: i32, %arg2: memref<2xi32, #tpu.memory_space<smem>>) -> (i32, i32, i32) {
    %c0_i32 = arith.constant 0 : i32
    %c0_i32_0 = arith.constant 0 : i32
    return %c0_i32, %arg1, %arg0 : i32, i32, i32
  }
}

module attributes {stable_mosaic.version = 11 : i64} {
  func.func @adjacency_kernel(%arg0: i32, %arg1: i32, %arg2: memref<2xi32, #tpu.memory_space<smem>>, %arg3: memref<16x32xf32, #tpu.memory_space<vmem>>, %arg4: memref<1x32x32xf32, #tpu.memory_space<vmem>>, %arg5: memref<4x4xf32, #tpu.memory_space<smem>>, %arg6: memref<4xf32, #tpu.memory_space<smem>>, %arg7: memref<4xf32, #tpu.memory_space<smem>>, %arg8: memref<1xf32, #tpu.memory_space<smem>>, %arg9: memref<4x2x2xf32, #tpu.memory_space<vmem>>) attributes {dimension_semantics = [#tpu.dimension_semantics<parallel>, #tpu.dimension_semantics<parallel>], iteration_bounds = array<i64: 1, 1>, scalar_prefetch = 1 : i64, scratch_operands = 0 : i64, tpu.core_type = #tpu.core_type<tc>, window_params = [{transform_indices = @transform_0, window_bounds = array<i64: 16, 32>}, {transform_indices = @transform_1, window_bounds = array<i64: 1, 32, 32>}, {transform_indices = @transform_2, window_bounds = array<i64: 4, 4>}, {transform_indices = @transform_3, window_bounds = array<i64: 4>}, {transform_indices = @transform_4, window_bounds = array<i64: 4>}, {transform_indices = @transform_5, window_bounds = array<i64: 1>}, {transform_indices = @transform_6, window_bounds = array<i64: 4, 2, 2>}]} {
    %c0 = arith.constant 0 : index
    %c0_0 = arith.constant 0 : index
    %0 = memref.load %arg5[%c0, %c0_0] : memref<4x4xf32, #tpu.memory_space<smem>>
    %c0_1 = arith.constant 0 : index
    %c1 = arith.constant 1 : index
    %1 = memref.load %arg5[%c0_1, %c1] : memref<4x4xf32, #tpu.memory_space<smem>>
    %c0_2 = arith.constant 0 : index
    %c2 = arith.constant 2 : index
    %2 = memref.load %arg5[%c0_2, %c2] : memref<4x4xf32, #tpu.memory_space<smem>>
    %c0_3 = arith.constant 0 : index
    %c3 = arith.constant 3 : index
    %3 = memref.load %arg5[%c0_3, %c3] : memref<4x4xf32, #tpu.memory_space<smem>>
    %c1_4 = arith.constant 1 : index
    %c0_5 = arith.constant 0 : index
    %4 = memref.load %arg5[%c1_4, %c0_5] : memref<4x4xf32, #tpu.memory_space<smem>>
    %c1_6 = arith.constant 1 : index
    %c1_7 = arith.constant 1 : index
    %5 = memref.load %arg5[%c1_6, %c1_7] : memref<4x4xf32, #tpu.memory_space<smem>>
    %c1_8 = arith.constant 1 : index
    %c2_9 = arith.constant 2 : index
    %6 = memref.load %arg5[%c1_8, %c2_9] : memref<4x4xf32, #tpu.memory_space<smem>>
    %c1_10 = arith.constant 1 : index
    %c3_11 = arith.constant 3 : index
    %7 = memref.load %arg5[%c1_10, %c3_11] : memref<4x4xf32, #tpu.memory_space<smem>>
    %c2_12 = arith.constant 2 : index
    %c0_13 = arith.constant 0 : index
    %8 = memref.load %arg5[%c2_12, %c0_13] : memref<4x4xf32, #tpu.memory_space<smem>>
    %c2_14 = arith.constant 2 : index
    %c1_15 = arith.constant 1 : index
    %9 = memref.load %arg5[%c2_14, %c1_15] : memref<4x4xf32, #tpu.memory_space<smem>>
    %c2_16 = arith.constant 2 : index
    %c2_17 = arith.constant 2 : index
    %10 = memref.load %arg5[%c2_16, %c2_17] : memref<4x4xf32, #tpu.memory_space<smem>>
    %c2_18 = arith.constant 2 : index
    %c3_19 = arith.constant 3 : index
    %11 = memref.load %arg5[%c2_18, %c3_19] : memref<4x4xf32, #tpu.memory_space<smem>>
    %c3_20 = arith.constant 3 : index
    %c0_21 = arith.constant 0 : index
    %12 = memref.load %arg5[%c3_20, %c0_21] : memref<4x4xf32, #tpu.memory_space<smem>>
    %c3_22 = arith.constant 3 : index
    %c1_23 = arith.constant 1 : index
    %13 = memref.load %arg5[%c3_22, %c1_23] : memref<4x4xf32, #tpu.memory_space<smem>>
    %c3_24 = arith.constant 3 : index
    %c2_25 = arith.constant 2 : index
    %14 = memref.load %arg5[%c3_24, %c2_25] : memref<4x4xf32, #tpu.memory_space<smem>>
    %c3_26 = arith.constant 3 : index
    %c3_27 = arith.constant 3 : index
    %15 = memref.load %arg5[%c3_26, %c3_27] : memref<4x4xf32, #tpu.memory_space<smem>>
    %c0_28 = arith.constant 0 : index
    %16 = memref.load %arg6[%c0_28] : memref<4xf32, #tpu.memory_space<smem>>
    %c1_29 = arith.constant 1 : index
    %17 = memref.load %arg6[%c1_29] : memref<4xf32, #tpu.memory_space<smem>>
    %c2_30 = arith.constant 2 : index
    %18 = memref.load %arg6[%c2_30] : memref<4xf32, #tpu.memory_space<smem>>
    %c3_31 = arith.constant 3 : index
    %19 = memref.load %arg6[%c3_31] : memref<4xf32, #tpu.memory_space<smem>>
    %c0_32 = arith.constant 0 : index
    %20 = memref.load %arg7[%c0_32] : memref<4xf32, #tpu.memory_space<smem>>
    %c1_33 = arith.constant 1 : index
    %21 = memref.load %arg7[%c1_33] : memref<4xf32, #tpu.memory_space<smem>>
    %c2_34 = arith.constant 2 : index
    %22 = memref.load %arg7[%c2_34] : memref<4xf32, #tpu.memory_space<smem>>
    %c3_35 = arith.constant 3 : index
    %23 = memref.load %arg7[%c3_35] : memref<4xf32, #tpu.memory_space<smem>>
    %c0_36 = arith.constant 0 : index
    %24 = memref.load %arg8[%c0_36] : memref<1xf32, #tpu.memory_space<smem>>
    %c0_37 = arith.constant 0 : index
    %c0_38 = arith.constant 0 : index
    %25 = vector.load %arg3[%c0_37, %c0_38] : memref<16x32xf32, #tpu.memory_space<vmem>>, vector<16x32xf32>
    %26 = arith.mulf %25, %25 : vector<16x32xf32>
    %cst = arith.constant dense<0.000000e+00> : vector<16xf32>
    %27 = vector.multi_reduction <add>, %26, %cst [1] : vector<16x32xf32> to vector<16xf32>
    %28 = vector.shape_cast %27 : vector<16xf32> to vector<16x1xf32>
    %cst_39 = arith.constant 1.000000e-24 : f32
    %29 = vector.broadcast %cst_39 : f32 to vector<16x1xf32>
    %30 = arith.maximumf %28, %29 : vector<16x1xf32>
    %31 = math.rsqrt %30 : vector<16x1xf32>
    %32 = vector.broadcast %31 : vector<16x1xf32> to vector<16x32xf32>
    %33 = arith.mulf %25, %32 : vector<16x32xf32>
    %c0_40 = arith.constant 0 : index
    %c0_41 = arith.constant 0 : index
    %c0_42 = arith.constant 0 : index
    %34 = vector.load %arg4[%c0_40, %c0_41, %c0_42] : memref<1x32x32xf32, #tpu.memory_space<vmem>>, vector<1x32x32xf32>
    %35 = vector.shape_cast %34 : vector<1x32x32xf32> to vector<32x32xf32>
    %cst_43 = arith.constant dense<0.000000e+00> : vector<16x32xf32>
    %36 = tpu.matmul %33, %35, %cst_43 {dimension_numbers = #tpu.dot_dimension_numbers<[1], [0], [0], [1], [0, 0, 1, 1], [], []>} : vector<16x32xf32>, vector<32x32xf32>, vector<16x32xf32> -> vector<16x32xf32>
    %cst_44 = arith.constant 1.000000e-01 : f32
    %37 = vector.broadcast %cst_44 : f32 to vector<16x32xf32>
    %38 = arith.mulf %37, %36 : vector<16x32xf32>
    %39 = arith.maximumf %36, %38 : vector<16x32xf32>
    %40 = tpu.iota {dimensions = array<i32: 0>} : vector<8x1x1xi32>
    %41 = tpu.iota {dimensions = array<i32: 0>} : vector<8x1xi32>
    %c2_i32 = arith.constant 2 : i32
    %42 = arith.muli %arg1, %c2_i32 : i32
    %c0_i32 = arith.constant 0 : i32
    %43 = arith.addi %42, %c0_i32 : i32
    %44 = arith.index_cast %43 : i32 to index
    %45 = memref.load %arg2[%44] : memref<2xi32, #tpu.memory_space<smem>>
    %c4_i32 = arith.constant 4 : i32
    %46 = arith.maxsi %45, %c4_i32 : i32
    %47 = arith.sitofp %45 : i32 to f32
    %cst_45 = arith.constant 1.000000e+00 : f32
    %48 = arith.maximumf %47, %cst_45 : f32
    %49 = vector.extract_strided_slice %39 {offsets = [0, 0], sizes = [8, 32], strides = [1, 1]} : vector<16x32xf32> to vector<8x32xf32>
    %50 = vector.shape_cast %49 : vector<8x32xf32> to vector<8x16x2xf32>
    %51 = vector.broadcast %46 : i32 to vector<8x1x1xi32>
    %52 = arith.cmpi slt, %40, %51 : vector<8x1x1xi32>
    %53 = vector.broadcast %45 : i32 to vector<8x1x1xi32>
    %54 = arith.cmpi slt, %40, %53 : vector<8x1x1xi32>
    %55 = vector.broadcast %46 : i32 to vector<8x1xi32>
    %56 = arith.cmpi slt, %41, %55 : vector<8x1xi32>
    %57 = vector.broadcast %45 : i32 to vector<8x1xi32>
    %58 = arith.cmpi slt, %41, %57 : vector<8x1xi32>
    %cst_46 = arith.constant 0.000000e+00 : f32
    %59 = vector.shape_cast %52 : vector<8x1x1xi1> to vector<8x1x1xi1>
    %60 = vector.broadcast %59 : vector<8x1x1xi1> to vector<8x16x2xi1>
    %61 = vector.broadcast %cst_46 : f32 to vector<8x16x2xf32>
    %62 = arith.select %60, %50, %61 : vector<8x16x2xi1>, vector<8x16x2xf32>
    %63 = arith.mulf %62, %62 : vector<8x16x2xf32>
    %cst_47 = arith.constant dense<0.000000e+00> : vector<16x2xf32>
    %64 = vector.multi_reduction <add>, %63, %cst_47 [0] : vector<8x16x2xf32> to vector<16x2xf32>
    %65 = vector.shape_cast %64 : vector<16x2xf32> to vector<1x16x2xf32>
    %cst_48 = arith.constant 1.000000e-24 : f32
    %66 = vector.broadcast %cst_48 : f32 to vector<1x16x2xf32>
    %67 = arith.maximumf %65, %66 : vector<1x16x2xf32>
    %68 = math.rsqrt %67 : vector<1x16x2xf32>
    %69 = vector.broadcast %68 : vector<1x16x2xf32> to vector<8x16x2xf32>
    %70 = arith.mulf %62, %69 : vector<8x16x2xf32>
    %cst_49 = arith.constant dense<0xFF800000> : vector<8x2xf32>
    %71 = vector.multi_reduction <maximumf>, %70, %cst_49 [1] : vector<8x16x2xf32> to vector<8x2xf32>
    %cst_50 = arith.constant 0.000000e+00 : f32
    %72 = vector.shape_cast %58 : vector<8x1xi1> to vector<8x1xi1>
    %73 = vector.broadcast %72 : vector<8x1xi1> to vector<8x2xi1>
    %74 = vector.broadcast %cst_50 : f32 to vector<8x2xf32>
    %75 = arith.select %73, %71, %74 : vector<8x2xi1>, vector<8x2xf32>
    %cst_51 = arith.constant dense<0.000000e+00> : vector<2xf32>
    %76 = vector.multi_reduction <add>, %75, %cst_51 [0] : vector<8x2xf32> to vector<2xf32>
    %77 = vector.shape_cast %76 : vector<2xf32> to vector<1x2xf32>
    %78 = vector.broadcast %48 : f32 to vector<1x2xf32>
    %79 = arith.divf %77, %78 : vector<1x2xf32>
    %cst_52 = arith.constant 0xFF800000 : f32
    %80 = vector.shape_cast %56 : vector<8x1xi1> to vector<8x1xi1>
    %81 = vector.broadcast %80 : vector<8x1xi1> to vector<8x2xi1>
    %82 = vector.broadcast %cst_52 : f32 to vector<8x2xf32>
    %83 = arith.select %81, %71, %82 : vector<8x2xi1>, vector<8x2xf32>
    %84 = tpu.bitcast %83 : vector<8x2xf32> -> vector<8x2xi32>
    %c0_i32_53 = arith.constant 0 : i32
    %85 = vector.broadcast %c0_i32_53 : i32 to vector<8x2xi32>
    %86 = arith.cmpi slt, %84, %85 : vector<8x2xi32>
    %c2147483647_i32 = arith.constant 2147483647 : i32
    %87 = vector.broadcast %c2147483647_i32 : i32 to vector<8x2xi32>
    %88 = arith.xori %84, %87 : vector<8x2xi32>
    %89 = arith.select %86, %88, %84 : vector<8x2xi1>, vector<8x2xi32>
    %90 = tpu.iota {dimensions = array<i32: 0>} : vector<8x2xi32>
    %c-8_i32 = arith.constant -8 : i32
    %91 = vector.broadcast %c-8_i32 : i32 to vector<8x2xi32>
    %92 = arith.andi %89, %91 : vector<8x2xi32>
    %c7_i32 = arith.constant 7 : i32
    %93 = vector.broadcast %c7_i32 : i32 to vector<8x2xi32>
    %94 = arith.subi %93, %90 : vector<8x2xi32>
    %95 = arith.ori %92, %94 : vector<8x2xi32>
    %cst_54 = arith.constant dense<-2147483648> : vector<2xi32>
    %96 = vector.multi_reduction <maxsi>, %95, %cst_54 [0] : vector<8x2xi32> to vector<2xi32>
    %97 = vector.shape_cast %96 : vector<2xi32> to vector<1x2xi32>
    %c-8_i32_55 = arith.constant -8 : i32
    %98 = vector.broadcast %c-8_i32_55 : i32 to vector<1x2xi32>
    %99 = arith.andi %97, %98 : vector<1x2xi32>
    %c0_i32_56 = arith.constant 0 : i32
    %100 = vector.broadcast %c0_i32_56 : i32 to vector<1x2xi32>
    %101 = arith.cmpi slt, %99, %100 : vector<1x2xi32>
    %c2147483647_i32_57 = arith.constant 2147483647 : i32
    %102 = vector.broadcast %c2147483647_i32_57 : i32 to vector<1x2xi32>
    %103 = arith.xori %99, %102 : vector<1x2xi32>
    %104 = arith.select %101, %103, %99 : vector<1x2xi1>, vector<1x2xi32>
    %105 = tpu.bitcast %104 : vector<1x2xi32> -> vector<1x2xf32>
    %106 = vector.broadcast %97 : vector<1x2xi32> to vector<8x2xi32>
    %107 = arith.cmpi eq, %95, %106 : vector<8x2xi32>
    %c-2147483648_i32 = arith.constant -2147483648 : i32
    %108 = vector.broadcast %c-2147483648_i32 : i32 to vector<8x2xi32>
    %109 = arith.select %107, %108, %95 : vector<8x2xi1>, vector<8x2xi32>
    %cst_58 = arith.constant dense<-2147483648> : vector<2xi32>
    %110 = vector.multi_reduction <maxsi>, %109, %cst_58 [0] : vector<8x2xi32> to vector<2xi32>
    %111 = vector.shape_cast %110 : vector<2xi32> to vector<1x2xi32>
    %c-8_i32_59 = arith.constant -8 : i32
    %112 = vector.broadcast %c-8_i32_59 : i32 to vector<1x2xi32>
    %113 = arith.andi %111, %112 : vector<1x2xi32>
    %c0_i32_60 = arith.constant 0 : i32
    %114 = vector.broadcast %c0_i32_60 : i32 to vector<1x2xi32>
    %115 = arith.cmpi slt, %113, %114 : vector<1x2xi32>
    %c2147483647_i32_61 = arith.constant 2147483647 : i32
    %116 = vector.broadcast %c2147483647_i32_61 : i32 to vector<1x2xi32>
    %117 = arith.xori %113, %116 : vector<1x2xi32>
    %118 = arith.select %115, %117, %113 : vector<1x2xi1>, vector<1x2xi32>
    %119 = tpu.bitcast %118 : vector<1x2xi32> -> vector<1x2xf32>
    %120 = vector.broadcast %111 : vector<1x2xi32> to vector<8x2xi32>
    %121 = arith.cmpi eq, %109, %120 : vector<8x2xi32>
    %c-2147483648_i32_62 = arith.constant -2147483648 : i32
    %122 = vector.broadcast %c-2147483648_i32_62 : i32 to vector<8x2xi32>
    %123 = arith.select %121, %122, %109 : vector<8x2xi1>, vector<8x2xi32>
    %cst_63 = arith.constant dense<-2147483648> : vector<2xi32>
    %124 = vector.multi_reduction <maxsi>, %123, %cst_63 [0] : vector<8x2xi32> to vector<2xi32>
    %125 = vector.shape_cast %124 : vector<2xi32> to vector<1x2xi32>
    %c-8_i32_64 = arith.constant -8 : i32
    %126 = vector.broadcast %c-8_i32_64 : i32 to vector<1x2xi32>
    %127 = arith.andi %125, %126 : vector<1x2xi32>
    %c0_i32_65 = arith.constant 0 : i32
    %128 = vector.broadcast %c0_i32_65 : i32 to vector<1x2xi32>
    %129 = arith.cmpi slt, %127, %128 : vector<1x2xi32>
    %c2147483647_i32_66 = arith.constant 2147483647 : i32
    %130 = vector.broadcast %c2147483647_i32_66 : i32 to vector<1x2xi32>
    %131 = arith.xori %127, %130 : vector<1x2xi32>
    %132 = arith.select %129, %131, %127 : vector<1x2xi1>, vector<1x2xi32>
    %133 = tpu.bitcast %132 : vector<1x2xi32> -> vector<1x2xf32>
    %134 = vector.broadcast %125 : vector<1x2xi32> to vector<8x2xi32>
    %135 = arith.cmpi eq, %123, %134 : vector<8x2xi32>
    %c-2147483648_i32_67 = arith.constant -2147483648 : i32
    %136 = vector.broadcast %c-2147483648_i32_67 : i32 to vector<8x2xi32>
    %137 = arith.select %135, %136, %123 : vector<8x2xi1>, vector<8x2xi32>
    %cst_68 = arith.constant dense<-2147483648> : vector<2xi32>
    %138 = vector.multi_reduction <maxsi>, %137, %cst_68 [0] : vector<8x2xi32> to vector<2xi32>
    %139 = vector.shape_cast %138 : vector<2xi32> to vector<1x2xi32>
    %c-8_i32_69 = arith.constant -8 : i32
    %140 = vector.broadcast %c-8_i32_69 : i32 to vector<1x2xi32>
    %141 = arith.andi %139, %140 : vector<1x2xi32>
    %c0_i32_70 = arith.constant 0 : i32
    %142 = vector.broadcast %c0_i32_70 : i32 to vector<1x2xi32>
    %143 = arith.cmpi slt, %141, %142 : vector<1x2xi32>
    %c2147483647_i32_71 = arith.constant 2147483647 : i32
    %144 = vector.broadcast %c2147483647_i32_71 : i32 to vector<1x2xi32>
    %145 = arith.xori %141, %144 : vector<1x2xi32>
    %146 = arith.select %143, %145, %141 : vector<1x2xi1>, vector<1x2xi32>
    %147 = tpu.bitcast %146 : vector<1x2xi32> -> vector<1x2xf32>
    %148 = vector.broadcast %0 : f32 to vector<1x2xf32>
    %149 = arith.mulf %148, %105 : vector<1x2xf32>
    %150 = vector.broadcast %1 : f32 to vector<1x2xf32>
    %151 = arith.mulf %150, %119 : vector<1x2xf32>
    %152 = arith.addf %149, %151 : vector<1x2xf32>
    %153 = vector.broadcast %2 : f32 to vector<1x2xf32>
    %154 = arith.mulf %153, %133 : vector<1x2xf32>
    %155 = arith.addf %152, %154 : vector<1x2xf32>
    %156 = vector.broadcast %3 : f32 to vector<1x2xf32>
    %157 = arith.mulf %156, %147 : vector<1x2xf32>
    %158 = arith.addf %155, %157 : vector<1x2xf32>
    %159 = vector.broadcast %16 : f32 to vector<1x2xf32>
    %160 = arith.addf %158, %159 : vector<1x2xf32>
    %cst_72 = arith.constant 0.000000e+00 : f32
    %161 = vector.broadcast %cst_72 : f32 to vector<1x2xf32>
    %162 = arith.maximumf %160, %161 : vector<1x2xf32>
    %163 = vector.broadcast %20 : f32 to vector<1x2xf32>
    %164 = arith.mulf %163, %162 : vector<1x2xf32>
    %165 = vector.broadcast %4 : f32 to vector<1x2xf32>
    %166 = arith.mulf %165, %105 : vector<1x2xf32>
    %167 = vector.broadcast %5 : f32 to vector<1x2xf32>
    %168 = arith.mulf %167, %119 : vector<1x2xf32>
    %169 = arith.addf %166, %168 : vector<1x2xf32>
    %170 = vector.broadcast %6 : f32 to vector<1x2xf32>
    %171 = arith.mulf %170, %133 : vector<1x2xf32>
    %172 = arith.addf %169, %171 : vector<1x2xf32>
    %173 = vector.broadcast %7 : f32 to vector<1x2xf32>
    %174 = arith.mulf %173, %147 : vector<1x2xf32>
    %175 = arith.addf %172, %174 : vector<1x2xf32>
    %176 = vector.broadcast %17 : f32 to vector<1x2xf32>
    %177 = arith.addf %175, %176 : vector<1x2xf32>
    %cst_73 = arith.constant 0.000000e+00 : f32
    %178 = vector.broadcast %cst_73 : f32 to vector<1x2xf32>
    %179 = arith.maximumf %177, %178 : vector<1x2xf32>
    %180 = vector.broadcast %21 : f32 to vector<1x2xf32>
    %181 = arith.mulf %180, %179 : vector<1x2xf32>
    %182 = arith.addf %164, %181 : vector<1x2xf32>
    %183 = vector.broadcast %8 : f32 to vector<1x2xf32>
    %184 = arith.mulf %183, %105 : vector<1x2xf32>
    %185 = vector.broadcast %9 : f32 to vector<1x2xf32>
    %186 = arith.mulf %185, %119 : vector<1x2xf32>
    %187 = arith.addf %184, %186 : vector<1x2xf32>
    %188 = vector.broadcast %10 : f32 to vector<1x2xf32>
    %189 = arith.mulf %188, %133 : vector<1x2xf32>
    %190 = arith.addf %187, %189 : vector<1x2xf32>
    %191 = vector.broadcast %11 : f32 to vector<1x2xf32>
    %192 = arith.mulf %191, %147 : vector<1x2xf32>
    %193 = arith.addf %190, %192 : vector<1x2xf32>
    %194 = vector.broadcast %18 : f32 to vector<1x2xf32>
    %195 = arith.addf %193, %194 : vector<1x2xf32>
    %cst_74 = arith.constant 0.000000e+00 : f32
    %196 = vector.broadcast %cst_74 : f32 to vector<1x2xf32>
    %197 = arith.maximumf %195, %196 : vector<1x2xf32>
    %198 = vector.broadcast %22 : f32 to vector<1x2xf32>
    %199 = arith.mulf %198, %197 : vector<1x2xf32>
    %200 = arith.addf %182, %199 : vector<1x2xf32>
    %201 = vector.broadcast %12 : f32 to vector<1x2xf32>
    %202 = arith.mulf %201, %105 : vector<1x2xf32>
    %203 = vector.broadcast %13 : f32 to vector<1x2xf32>
    %204 = arith.mulf %203, %119 : vector<1x2xf32>
    %205 = arith.addf %202, %204 : vector<1x2xf32>
    %206 = vector.broadcast %14 : f32 to vector<1x2xf32>
    %207 = arith.mulf %206, %133 : vector<1x2xf32>
    %208 = arith.addf %205, %207 : vector<1x2xf32>
    %209 = vector.broadcast %15 : f32 to vector<1x2xf32>
    %210 = arith.mulf %209, %147 : vector<1x2xf32>
    %211 = arith.addf %208, %210 : vector<1x2xf32>
    %212 = vector.broadcast %19 : f32 to vector<1x2xf32>
    %213 = arith.addf %211, %212 : vector<1x2xf32>
    %cst_75 = arith.constant 0.000000e+00 : f32
    %214 = vector.broadcast %cst_75 : f32 to vector<1x2xf32>
    %215 = arith.maximumf %213, %214 : vector<1x2xf32>
    %216 = vector.broadcast %23 : f32 to vector<1x2xf32>
    %217 = arith.mulf %216, %215 : vector<1x2xf32>
    %218 = arith.addf %200, %217 : vector<1x2xf32>
    %219 = vector.broadcast %24 : f32 to vector<1x2xf32>
    %220 = arith.addf %218, %219 : vector<1x2xf32>
    %221 = arith.addf %220, %79 : vector<1x2xf32>
    %222 = arith.mulf %50, %50 : vector<8x16x2xf32>
    %cst_76 = arith.constant dense<0.000000e+00> : vector<8x2xf32>
    %223 = vector.multi_reduction <add>, %222, %cst_76 [1] : vector<8x16x2xf32> to vector<8x2xf32>
    %224 = vector.shape_cast %223 : vector<8x2xf32> to vector<8x1x2xf32>
    %cst_77 = arith.constant 1.000000e-24 : f32
    %225 = vector.broadcast %cst_77 : f32 to vector<8x1x2xf32>
    %226 = arith.maximumf %224, %225 : vector<8x1x2xf32>
    %227 = math.rsqrt %226 : vector<8x1x2xf32>
    %228 = vector.broadcast %227 : vector<8x1x2xf32> to vector<8x16x2xf32>
    %229 = arith.mulf %50, %228 : vector<8x16x2xf32>
    %cst_78 = arith.constant 0xFF800000 : f32
    %230 = vector.shape_cast %54 : vector<8x1x1xi1> to vector<8x1x1xi1>
    %231 = vector.broadcast %230 : vector<8x1x1xi1> to vector<8x16x2xi1>
    %232 = vector.broadcast %cst_78 : f32 to vector<8x16x2xf32>
    %233 = arith.select %231, %229, %232 : vector<8x16x2xi1>, vector<8x16x2xf32>
    %cst_79 = arith.constant dense<0xFF800000> : vector<16x2xf32>
    %234 = vector.multi_reduction <maximumf>, %233, %cst_79 [0] : vector<8x16x2xf32> to vector<16x2xf32>
    %cst_80 = arith.constant dense<0.000000e+00> : vector<2xf32>
    %235 = vector.multi_reduction <add>, %234, %cst_80 [0] : vector<16x2xf32> to vector<2xf32>
    %236 = vector.shape_cast %235 : vector<2xf32> to vector<1x2xf32>
    %cst_81 = arith.constant 1.600000e+01 : f32
    %237 = vector.broadcast %cst_81 : f32 to vector<1x2xf32>
    %238 = arith.divf %236, %237 : vector<1x2xf32>
    %239 = tpu.bitcast %234 : vector<16x2xf32> -> vector<16x2xi32>
    %c0_i32_82 = arith.constant 0 : i32
    %240 = vector.broadcast %c0_i32_82 : i32 to vector<16x2xi32>
    %241 = arith.cmpi slt, %239, %240 : vector<16x2xi32>
    %c2147483647_i32_83 = arith.constant 2147483647 : i32
    %242 = vector.broadcast %c2147483647_i32_83 : i32 to vector<16x2xi32>
    %243 = arith.xori %239, %242 : vector<16x2xi32>
    %244 = arith.select %241, %243, %239 : vector<16x2xi1>, vector<16x2xi32>
    %245 = tpu.iota {dimensions = array<i32: 0>} : vector<16x2xi32>
    %c-16_i32 = arith.constant -16 : i32
    %246 = vector.broadcast %c-16_i32 : i32 to vector<16x2xi32>
    %247 = arith.andi %244, %246 : vector<16x2xi32>
    %c15_i32 = arith.constant 15 : i32
    %248 = vector.broadcast %c15_i32 : i32 to vector<16x2xi32>
    %249 = arith.subi %248, %245 : vector<16x2xi32>
    %250 = arith.ori %247, %249 : vector<16x2xi32>
    %cst_84 = arith.constant dense<-2147483648> : vector<2xi32>
    %251 = vector.multi_reduction <maxsi>, %250, %cst_84 [0] : vector<16x2xi32> to vector<2xi32>
    %252 = vector.shape_cast %251 : vector<2xi32> to vector<1x2xi32>
    %c-16_i32_85 = arith.constant -16 : i32
    %253 = vector.broadcast %c-16_i32_85 : i32 to vector<1x2xi32>
    %254 = arith.andi %252, %253 : vector<1x2xi32>
    %c0_i32_86 = arith.constant 0 : i32
    %255 = vector.broadcast %c0_i32_86 : i32 to vector<1x2xi32>
    %256 = arith.cmpi slt, %254, %255 : vector<1x2xi32>
    %c2147483647_i32_87 = arith.constant 2147483647 : i32
    %257 = vector.broadcast %c2147483647_i32_87 : i32 to vector<1x2xi32>
    %258 = arith.xori %254, %257 : vector<1x2xi32>
    %259 = arith.select %256, %258, %254 : vector<1x2xi1>, vector<1x2xi32>
    %260 = tpu.bitcast %259 : vector<1x2xi32> -> vector<1x2xf32>
    %261 = vector.broadcast %252 : vector<1x2xi32> to vector<16x2xi32>
    %262 = arith.cmpi eq, %250, %261 : vector<16x2xi32>
    %c-2147483648_i32_88 = arith.constant -2147483648 : i32
    %263 = vector.broadcast %c-2147483648_i32_88 : i32 to vector<16x2xi32>
    %264 = arith.select %262, %263, %250 : vector<16x2xi1>, vector<16x2xi32>
    %cst_89 = arith.constant dense<-2147483648> : vector<2xi32>
    %265 = vector.multi_reduction <maxsi>, %264, %cst_89 [0] : vector<16x2xi32> to vector<2xi32>
    %266 = vector.shape_cast %265 : vector<2xi32> to vector<1x2xi32>
    %c-16_i32_90 = arith.constant -16 : i32
    %267 = vector.broadcast %c-16_i32_90 : i32 to vector<1x2xi32>
    %268 = arith.andi %266, %267 : vector<1x2xi32>
    %c0_i32_91 = arith.constant 0 : i32
    %269 = vector.broadcast %c0_i32_91 : i32 to vector<1x2xi32>
    %270 = arith.cmpi slt, %268, %269 : vector<1x2xi32>
    %c2147483647_i32_92 = arith.constant 2147483647 : i32
    %271 = vector.broadcast %c2147483647_i32_92 : i32 to vector<1x2xi32>
    %272 = arith.xori %268, %271 : vector<1x2xi32>
    %273 = arith.select %270, %272, %268 : vector<1x2xi1>, vector<1x2xi32>
    %274 = tpu.bitcast %273 : vector<1x2xi32> -> vector<1x2xf32>
    %275 = vector.broadcast %266 : vector<1x2xi32> to vector<16x2xi32>
    %276 = arith.cmpi eq, %264, %275 : vector<16x2xi32>
    %c-2147483648_i32_93 = arith.constant -2147483648 : i32
    %277 = vector.broadcast %c-2147483648_i32_93 : i32 to vector<16x2xi32>
    %278 = arith.select %276, %277, %264 : vector<16x2xi1>, vector<16x2xi32>
    %cst_94 = arith.constant dense<-2147483648> : vector<2xi32>
    %279 = vector.multi_reduction <maxsi>, %278, %cst_94 [0] : vector<16x2xi32> to vector<2xi32>
    %280 = vector.shape_cast %279 : vector<2xi32> to vector<1x2xi32>
    %c-16_i32_95 = arith.constant -16 : i32
    %281 = vector.broadcast %c-16_i32_95 : i32 to vector<1x2xi32>
    %282 = arith.andi %280, %281 : vector<1x2xi32>
    %c0_i32_96 = arith.constant 0 : i32
    %283 = vector.broadcast %c0_i32_96 : i32 to vector<1x2xi32>
    %284 = arith.cmpi slt, %282, %283 : vector<1x2xi32>
    %c2147483647_i32_97 = arith.constant 2147483647 : i32
    %285 = vector.broadcast %c2147483647_i32_97 : i32 to vector<1x2xi32>
    %286 = arith.xori %282, %285 : vector<1x2xi32>
    %287 = arith.select %284, %286, %282 : vector<1x2xi1>, vector<1x2xi32>
    %288 = tpu.bitcast %287 : vector<1x2xi32> -> vector<1x2xf32>
    %289 = vector.broadcast %280 : vector<1x2xi32> to vector<16x2xi32>
    %290 = arith.cmpi eq, %278, %289 : vector<16x2xi32>
    %c-2147483648_i32_98 = arith.constant -2147483648 : i32
    %291 = vector.broadcast %c-2147483648_i32_98 : i32 to vector<16x2xi32>
    %292 = arith.select %290, %291, %278 : vector<16x2xi1>, vector<16x2xi32>
    %cst_99 = arith.constant dense<-2147483648> : vector<2xi32>
    %293 = vector.multi_reduction <maxsi>, %292, %cst_99 [0] : vector<16x2xi32> to vector<2xi32>
    %294 = vector.shape_cast %293 : vector<2xi32> to vector<1x2xi32>
    %c-16_i32_100 = arith.constant -16 : i32
    %295 = vector.broadcast %c-16_i32_100 : i32 to vector<1x2xi32>
    %296 = arith.andi %294, %295 : vector<1x2xi32>
    %c0_i32_101 = arith.constant 0 : i32
    %297 = vector.broadcast %c0_i32_101 : i32 to vector<1x2xi32>
    %298 = arith.cmpi slt, %296, %297 : vector<1x2xi32>
    %c2147483647_i32_102 = arith.constant 2147483647 : i32
    %299 = vector.broadcast %c2147483647_i32_102 : i32 to vector<1x2xi32>
    %300 = arith.xori %296, %299 : vector<1x2xi32>
    %301 = arith.select %298, %300, %296 : vector<1x2xi1>, vector<1x2xi32>
    %302 = tpu.bitcast %301 : vector<1x2xi32> -> vector<1x2xf32>
    %303 = vector.broadcast %0 : f32 to vector<1x2xf32>
    %304 = arith.mulf %303, %260 : vector<1x2xf32>
    %305 = vector.broadcast %1 : f32 to vector<1x2xf32>
    %306 = arith.mulf %305, %274 : vector<1x2xf32>
    %307 = arith.addf %304, %306 : vector<1x2xf32>
    %308 = vector.broadcast %2 : f32 to vector<1x2xf32>
    %309 = arith.mulf %308, %288 : vector<1x2xf32>
    %310 = arith.addf %307, %309 : vector<1x2xf32>
    %311 = vector.broadcast %3 : f32 to vector<1x2xf32>
    %312 = arith.mulf %311, %302 : vector<1x2xf32>
    %313 = arith.addf %310, %312 : vector<1x2xf32>
    %314 = vector.broadcast %16 : f32 to vector<1x2xf32>
    %315 = arith.addf %313, %314 : vector<1x2xf32>
    %cst_103 = arith.constant 0.000000e+00 : f32
    %316 = vector.broadcast %cst_103 : f32 to vector<1x2xf32>
    %317 = arith.maximumf %315, %316 : vector<1x2xf32>
    %318 = vector.broadcast %20 : f32 to vector<1x2xf32>
    %319 = arith.mulf %318, %317 : vector<1x2xf32>
    %320 = vector.broadcast %4 : f32 to vector<1x2xf32>
    %321 = arith.mulf %320, %260 : vector<1x2xf32>
    %322 = vector.broadcast %5 : f32 to vector<1x2xf32>
    %323 = arith.mulf %322, %274 : vector<1x2xf32>
    %324 = arith.addf %321, %323 : vector<1x2xf32>
    %325 = vector.broadcast %6 : f32 to vector<1x2xf32>
    %326 = arith.mulf %325, %288 : vector<1x2xf32>
    %327 = arith.addf %324, %326 : vector<1x2xf32>
    %328 = vector.broadcast %7 : f32 to vector<1x2xf32>
    %329 = arith.mulf %328, %302 : vector<1x2xf32>
    %330 = arith.addf %327, %329 : vector<1x2xf32>
    %331 = vector.broadcast %17 : f32 to vector<1x2xf32>
    %332 = arith.addf %330, %331 : vector<1x2xf32>
    %cst_104 = arith.constant 0.000000e+00 : f32
    %333 = vector.broadcast %cst_104 : f32 to vector<1x2xf32>
    %334 = arith.maximumf %332, %333 : vector<1x2xf32>
    %335 = vector.broadcast %21 : f32 to vector<1x2xf32>
    %336 = arith.mulf %335, %334 : vector<1x2xf32>
    %337 = arith.addf %319, %336 : vector<1x2xf32>
    %338 = vector.broadcast %8 : f32 to vector<1x2xf32>
    %339 = arith.mulf %338, %260 : vector<1x2xf32>
    %340 = vector.broadcast %9 : f32 to vector<1x2xf32>
    %341 = arith.mulf %340, %274 : vector<1x2xf32>
    %342 = arith.addf %339, %341 : vector<1x2xf32>
    %343 = vector.broadcast %10 : f32 to vector<1x2xf32>
    %344 = arith.mulf %343, %288 : vector<1x2xf32>
    %345 = arith.addf %342, %344 : vector<1x2xf32>
    %346 = vector.broadcast %11 : f32 to vector<1x2xf32>
    %347 = arith.mulf %346, %302 : vector<1x2xf32>
    %348 = arith.addf %345, %347 : vector<1x2xf32>
    %349 = vector.broadcast %18 : f32 to vector<1x2xf32>
    %350 = arith.addf %348, %349 : vector<1x2xf32>
    %cst_105 = arith.constant 0.000000e+00 : f32
    %351 = vector.broadcast %cst_105 : f32 to vector<1x2xf32>
    %352 = arith.maximumf %350, %351 : vector<1x2xf32>
    %353 = vector.broadcast %22 : f32 to vector<1x2xf32>
    %354 = arith.mulf %353, %352 : vector<1x2xf32>
    %355 = arith.addf %337, %354 : vector<1x2xf32>
    %356 = vector.broadcast %12 : f32 to vector<1x2xf32>
    %357 = arith.mulf %356, %260 : vector<1x2xf32>
    %358 = vector.broadcast %13 : f32 to vector<1x2xf32>
    %359 = arith.mulf %358, %274 : vector<1x2xf32>
    %360 = arith.addf %357, %359 : vector<1x2xf32>
    %361 = vector.broadcast %14 : f32 to vector<1x2xf32>
    %362 = arith.mulf %361, %288 : vector<1x2xf32>
    %363 = arith.addf %360, %362 : vector<1x2xf32>
    %364 = vector.broadcast %15 : f32 to vector<1x2xf32>
    %365 = arith.mulf %364, %302 : vector<1x2xf32>
    %366 = arith.addf %363, %365 : vector<1x2xf32>
    %367 = vector.broadcast %19 : f32 to vector<1x2xf32>
    %368 = arith.addf %366, %367 : vector<1x2xf32>
    %cst_106 = arith.constant 0.000000e+00 : f32
    %369 = vector.broadcast %cst_106 : f32 to vector<1x2xf32>
    %370 = arith.maximumf %368, %369 : vector<1x2xf32>
    %371 = vector.broadcast %23 : f32 to vector<1x2xf32>
    %372 = arith.mulf %371, %370 : vector<1x2xf32>
    %373 = arith.addf %355, %372 : vector<1x2xf32>
    %374 = vector.broadcast %24 : f32 to vector<1x2xf32>
    %375 = arith.addf %373, %374 : vector<1x2xf32>
    %376 = arith.addf %375, %238 : vector<1x2xf32>
    %c0_107 = arith.constant 0 : index
    %c0_108 = arith.constant 0 : index
    %c0_109 = arith.constant 0 : index
    %377 = vector.load %arg9[%c0_107, %c0_108, %c0_109] : memref<4x2x2xf32, #tpu.memory_space<vmem>>, vector<1x1x2xf32>
    %378 = vector.shape_cast %377 : vector<1x1x2xf32> to vector<1x2xf32>
    %379 = vector.shape_cast %221 : vector<1x2xf32> to vector<1x1x2xf32>
    tpu.vector_store %arg9[%c0_107, %c0_108, %c0_109], %379 {strides = array<i32>} : memref<4x2x2xf32, #tpu.memory_space<vmem>>, vector<1x1x2xf32>,
    %c1_110 = arith.constant 1 : index
    %c0_111 = arith.constant 0 : index
    %c0_112 = arith.constant 0 : index
    %380 = vector.load %arg9[%c1_110, %c0_111, %c0_112] : memref<4x2x2xf32, #tpu.memory_space<vmem>>, vector<1x1x2xf32>
    %381 = vector.shape_cast %380 : vector<1x1x2xf32> to vector<1x2xf32>
    %382 = vector.shape_cast %376 : vector<1x2xf32> to vector<1x1x2xf32>
    tpu.vector_store %arg9[%c1_110, %c0_111, %c0_112], %382 {strides = array<i32>} : memref<4x2x2xf32, #tpu.memory_space<vmem>>, vector<1x1x2xf32>,
    %c2_113 = arith.constant 2 : index
    %c0_114 = arith.constant 0 : index
    %c0_115 = arith.constant 0 : index
    %383 = vector.load %arg9[%c2_113, %c0_114, %c0_115] : memref<4x2x2xf32, #tpu.memory_space<vmem>>, vector<1x1x2xf32>
    %384 = vector.shape_cast %383 : vector<1x1x2xf32> to vector<1x2xf32>
    %385 = vector.shape_cast %79 : vector<1x2xf32> to vector<1x1x2xf32>
    tpu.vector_store %arg9[%c2_113, %c0_114, %c0_115], %385 {strides = array<i32>} : memref<4x2x2xf32, #tpu.memory_space<vmem>>, vector<1x1x2xf32>,
    %c3_116 = arith.constant 3 : index
    %c0_117 = arith.constant 0 : index
    %c0_118 = arith.constant 0 : index
    %386 = vector.load %arg9[%c3_116, %c0_117, %c0_118] : memref<4x2x2xf32, #tpu.memory_space<vmem>>, vector<1x1x2xf32>
    %387 = vector.shape_cast %386 : vector<1x1x2xf32> to vector<1x2xf32>
    %388 = vector.shape_cast %238 : vector<1x2xf32> to vector<1x1x2xf32>
    tpu.vector_store %arg9[%c3_116, %c0_117, %c0_118], %388 {strides = array<i32>} : memref<4x2x2xf32, #tpu.memory_space<vmem>>, vector<1x1x2xf32>,
    %c2_i32_119 = arith.constant 2 : i32
    %389 = arith.muli %arg1, %c2_i32_119 : i32
    %c1_i32 = arith.constant 1 : i32
    %390 = arith.addi %389, %c1_i32 : i32
    %391 = arith.index_cast %390 : i32 to index
    %392 = memref.load %arg2[%391] : memref<2xi32, #tpu.memory_space<smem>>
    %c4_i32_120 = arith.constant 4 : i32
    %393 = arith.maxsi %392, %c4_i32_120 : i32
    %394 = arith.sitofp %392 : i32 to f32
    %cst_121 = arith.constant 1.000000e+00 : f32
    %395 = arith.maximumf %394, %cst_121 : f32
    %396 = vector.extract_strided_slice %39 {offsets = [8, 0], sizes = [8, 32], strides = [1, 1]} : vector<16x32xf32> to vector<8x32xf32>
    %397 = vector.shape_cast %396 : vector<8x32xf32> to vector<8x16x2xf32>
    %398 = vector.broadcast %393 : i32 to vector<8x1x1xi32>
    %399 = arith.cmpi slt, %40, %398 : vector<8x1x1xi32>
    %400 = vector.broadcast %392 : i32 to vector<8x1x1xi32>
    %401 = arith.cmpi slt, %40, %400 : vector<8x1x1xi32>
    %402 = vector.broadcast %393 : i32 to vector<8x1xi32>
    %403 = arith.cmpi slt, %41, %402 : vector<8x1xi32>
    %404 = vector.broadcast %392 : i32 to vector<8x1xi32>
    %405 = arith.cmpi slt, %41, %404 : vector<8x1xi32>
    %cst_122 = arith.constant 0.000000e+00 : f32
    %406 = vector.shape_cast %399 : vector<8x1x1xi1> to vector<8x1x1xi1>
    %407 = vector.broadcast %406 : vector<8x1x1xi1> to vector<8x16x2xi1>
    %408 = vector.broadcast %cst_122 : f32 to vector<8x16x2xf32>
    %409 = arith.select %407, %397, %408 : vector<8x16x2xi1>, vector<8x16x2xf32>
    %410 = arith.mulf %409, %409 : vector<8x16x2xf32>
    %cst_123 = arith.constant dense<0.000000e+00> : vector<16x2xf32>
    %411 = vector.multi_reduction <add>, %410, %cst_123 [0] : vector<8x16x2xf32> to vector<16x2xf32>
    %412 = vector.shape_cast %411 : vector<16x2xf32> to vector<1x16x2xf32>
    %cst_124 = arith.constant 1.000000e-24 : f32
    %413 = vector.broadcast %cst_124 : f32 to vector<1x16x2xf32>
    %414 = arith.maximumf %412, %413 : vector<1x16x2xf32>
    %415 = math.rsqrt %414 : vector<1x16x2xf32>
    %416 = vector.broadcast %415 : vector<1x16x2xf32> to vector<8x16x2xf32>
    %417 = arith.mulf %409, %416 : vector<8x16x2xf32>
    %cst_125 = arith.constant dense<0xFF800000> : vector<8x2xf32>
    %418 = vector.multi_reduction <maximumf>, %417, %cst_125 [1] : vector<8x16x2xf32> to vector<8x2xf32>
    %cst_126 = arith.constant 0.000000e+00 : f32
    %419 = vector.shape_cast %405 : vector<8x1xi1> to vector<8x1xi1>
    %420 = vector.broadcast %419 : vector<8x1xi1> to vector<8x2xi1>
    %421 = vector.broadcast %cst_126 : f32 to vector<8x2xf32>
    %422 = arith.select %420, %418, %421 : vector<8x2xi1>, vector<8x2xf32>
    %cst_127 = arith.constant dense<0.000000e+00> : vector<2xf32>
    %423 = vector.multi_reduction <add>, %422, %cst_127 [0] : vector<8x2xf32> to vector<2xf32>
    %424 = vector.shape_cast %423 : vector<2xf32> to vector<1x2xf32>
    %425 = vector.broadcast %395 : f32 to vector<1x2xf32>
    %426 = arith.divf %424, %425 : vector<1x2xf32>
    %cst_128 = arith.constant 0xFF800000 : f32
    %427 = vector.shape_cast %403 : vector<8x1xi1> to vector<8x1xi1>
    %428 = vector.broadcast %427 : vector<8x1xi1> to vector<8x2xi1>
    %429 = vector.broadcast %cst_128 : f32 to vector<8x2xf32>
    %430 = arith.select %428, %418, %429 : vector<8x2xi1>, vector<8x2xf32>
    %431 = tpu.bitcast %430 : vector<8x2xf32> -> vector<8x2xi32>
    %c0_i32_129 = arith.constant 0 : i32
    %432 = vector.broadcast %c0_i32_129 : i32 to vector<8x2xi32>
    %433 = arith.cmpi slt, %431, %432 : vector<8x2xi32>
    %c2147483647_i32_130 = arith.constant 2147483647 : i32
    %434 = vector.broadcast %c2147483647_i32_130 : i32 to vector<8x2xi32>
    %435 = arith.xori %431, %434 : vector<8x2xi32>
    %436 = arith.select %433, %435, %431 : vector<8x2xi1>, vector<8x2xi32>
    %437 = tpu.iota {dimensions = array<i32: 0>} : vector<8x2xi32>
    %c-8_i32_131 = arith.constant -8 : i32
    %438 = vector.broadcast %c-8_i32_131 : i32 to vector<8x2xi32>
    %439 = arith.andi %436, %438 : vector<8x2xi32>
    %c7_i32_132 = arith.constant 7 : i32
    %440 = vector.broadcast %c7_i32_132 : i32 to vector<8x2xi32>
    %441 = arith.subi %440, %437 : vector<8x2xi32>
    %442 = arith.ori %439, %441 : vector<8x2xi32>
    %cst_133 = arith.constant dense<-2147483648> : vector<2xi32>
    %443 = vector.multi_reduction <maxsi>, %442, %cst_133 [0] : vector<8x2xi32> to vector<2xi32>
    %444 = vector.shape_cast %443 : vector<2xi32> to vector<1x2xi32>
    %c-8_i32_134 = arith.constant -8 : i32
    %445 = vector.broadcast %c-8_i32_134 : i32 to vector<1x2xi32>
    %446 = arith.andi %444, %445 : vector<1x2xi32>
    %c0_i32_135 = arith.constant 0 : i32
    %447 = vector.broadcast %c0_i32_135 : i32 to vector<1x2xi32>
    %448 = arith.cmpi slt, %446, %447 : vector<1x2xi32>
    %c2147483647_i32_136 = arith.constant 2147483647 : i32
    %449 = vector.broadcast %c2147483647_i32_136 : i32 to vector<1x2xi32>
    %450 = arith.xori %446, %449 : vector<1x2xi32>
    %451 = arith.select %448, %450, %446 : vector<1x2xi1>, vector<1x2xi32>
    %452 = tpu.bitcast %451 : vector<1x2xi32> -> vector<1x2xf32>
    %453 = vector.broadcast %444 : vector<1x2xi32> to vector<8x2xi32>
    %454 = arith.cmpi eq, %442, %453 : vector<8x2xi32>
    %c-2147483648_i32_137 = arith.constant -2147483648 : i32
    %455 = vector.broadcast %c-2147483648_i32_137 : i32 to vector<8x2xi32>
    %456 = arith.select %454, %455, %442 : vector<8x2xi1>, vector<8x2xi32>
    %cst_138 = arith.constant dense<-2147483648> : vector<2xi32>
    %457 = vector.multi_reduction <maxsi>, %456, %cst_138 [0] : vector<8x2xi32> to vector<2xi32>
    %458 = vector.shape_cast %457 : vector<2xi32> to vector<1x2xi32>
    %c-8_i32_139 = arith.constant -8 : i32
    %459 = vector.broadcast %c-8_i32_139 : i32 to vector<1x2xi32>
    %460 = arith.andi %458, %459 : vector<1x2xi32>
    %c0_i32_140 = arith.constant 0 : i32
    %461 = vector.broadcast %c0_i32_140 : i32 to vector<1x2xi32>
    %462 = arith.cmpi slt, %460, %461 : vector<1x2xi32>
    %c2147483647_i32_141 = arith.constant 2147483647 : i32
    %463 = vector.broadcast %c2147483647_i32_141 : i32 to vector<1x2xi32>
    %464 = arith.xori %460, %463 : vector<1x2xi32>
    %465 = arith.select %462, %464, %460 : vector<1x2xi1>, vector<1x2xi32>
    %466 = tpu.bitcast %465 : vector<1x2xi32> -> vector<1x2xf32>
    %467 = vector.broadcast %458 : vector<1x2xi32> to vector<8x2xi32>
    %468 = arith.cmpi eq, %456, %467 : vector<8x2xi32>
    %c-2147483648_i32_142 = arith.constant -2147483648 : i32
    %469 = vector.broadcast %c-2147483648_i32_142 : i32 to vector<8x2xi32>
    %470 = arith.select %468, %469, %456 : vector<8x2xi1>, vector<8x2xi32>
    %cst_143 = arith.constant dense<-2147483648> : vector<2xi32>
    %471 = vector.multi_reduction <maxsi>, %470, %cst_143 [0] : vector<8x2xi32> to vector<2xi32>
    %472 = vector.shape_cast %471 : vector<2xi32> to vector<1x2xi32>
    %c-8_i32_144 = arith.constant -8 : i32
    %473 = vector.broadcast %c-8_i32_144 : i32 to vector<1x2xi32>
    %474 = arith.andi %472, %473 : vector<1x2xi32>
    %c0_i32_145 = arith.constant 0 : i32
    %475 = vector.broadcast %c0_i32_145 : i32 to vector<1x2xi32>
    %476 = arith.cmpi slt, %474, %475 : vector<1x2xi32>
    %c2147483647_i32_146 = arith.constant 2147483647 : i32
    %477 = vector.broadcast %c2147483647_i32_146 : i32 to vector<1x2xi32>
    %478 = arith.xori %474, %477 : vector<1x2xi32>
    %479 = arith.select %476, %478, %474 : vector<1x2xi1>, vector<1x2xi32>
    %480 = tpu.bitcast %479 : vector<1x2xi32> -> vector<1x2xf32>
    %481 = vector.broadcast %472 : vector<1x2xi32> to vector<8x2xi32>
    %482 = arith.cmpi eq, %470, %481 : vector<8x2xi32>
    %c-2147483648_i32_147 = arith.constant -2147483648 : i32
    %483 = vector.broadcast %c-2147483648_i32_147 : i32 to vector<8x2xi32>
    %484 = arith.select %482, %483, %470 : vector<8x2xi1>, vector<8x2xi32>
    %cst_148 = arith.constant dense<-2147483648> : vector<2xi32>
    %485 = vector.multi_reduction <maxsi>, %484, %cst_148 [0] : vector<8x2xi32> to vector<2xi32>
    %486 = vector.shape_cast %485 : vector<2xi32> to vector<1x2xi32>
    %c-8_i32_149 = arith.constant -8 : i32
    %487 = vector.broadcast %c-8_i32_149 : i32 to vector<1x2xi32>
    %488 = arith.andi %486, %487 : vector<1x2xi32>
    %c0_i32_150 = arith.constant 0 : i32
    %489 = vector.broadcast %c0_i32_150 : i32 to vector<1x2xi32>
    %490 = arith.cmpi slt, %488, %489 : vector<1x2xi32>
    %c2147483647_i32_151 = arith.constant 2147483647 : i32
    %491 = vector.broadcast %c2147483647_i32_151 : i32 to vector<1x2xi32>
    %492 = arith.xori %488, %491 : vector<1x2xi32>
    %493 = arith.select %490, %492, %488 : vector<1x2xi1>, vector<1x2xi32>
    %494 = tpu.bitcast %493 : vector<1x2xi32> -> vector<1x2xf32>
    %495 = vector.broadcast %0 : f32 to vector<1x2xf32>
    %496 = arith.mulf %495, %452 : vector<1x2xf32>
    %497 = vector.broadcast %1 : f32 to vector<1x2xf32>
    %498 = arith.mulf %497, %466 : vector<1x2xf32>
    %499 = arith.addf %496, %498 : vector<1x2xf32>
    %500 = vector.broadcast %2 : f32 to vector<1x2xf32>
    %501 = arith.mulf %500, %480 : vector<1x2xf32>
    %502 = arith.addf %499, %501 : vector<1x2xf32>
    %503 = vector.broadcast %3 : f32 to vector<1x2xf32>
    %504 = arith.mulf %503, %494 : vector<1x2xf32>
    %505 = arith.addf %502, %504 : vector<1x2xf32>
    %506 = vector.broadcast %16 : f32 to vector<1x2xf32>
    %507 = arith.addf %505, %506 : vector<1x2xf32>
    %cst_152 = arith.constant 0.000000e+00 : f32
    %508 = vector.broadcast %cst_152 : f32 to vector<1x2xf32>
    %509 = arith.maximumf %507, %508 : vector<1x2xf32>
    %510 = vector.broadcast %20 : f32 to vector<1x2xf32>
    %511 = arith.mulf %510, %509 : vector<1x2xf32>
    %512 = vector.broadcast %4 : f32 to vector<1x2xf32>
    %513 = arith.mulf %512, %452 : vector<1x2xf32>
    %514 = vector.broadcast %5 : f32 to vector<1x2xf32>
    %515 = arith.mulf %514, %466 : vector<1x2xf32>
    %516 = arith.addf %513, %515 : vector<1x2xf32>
    %517 = vector.broadcast %6 : f32 to vector<1x2xf32>
    %518 = arith.mulf %517, %480 : vector<1x2xf32>
    %519 = arith.addf %516, %518 : vector<1x2xf32>
    %520 = vector.broadcast %7 : f32 to vector<1x2xf32>
    %521 = arith.mulf %520, %494 : vector<1x2xf32>
    %522 = arith.addf %519, %521 : vector<1x2xf32>
    %523 = vector.broadcast %17 : f32 to vector<1x2xf32>
    %524 = arith.addf %522, %523 : vector<1x2xf32>
    %cst_153 = arith.constant 0.000000e+00 : f32
    %525 = vector.broadcast %cst_153 : f32 to vector<1x2xf32>
    %526 = arith.maximumf %524, %525 : vector<1x2xf32>
    %527 = vector.broadcast %21 : f32 to vector<1x2xf32>
    %528 = arith.mulf %527, %526 : vector<1x2xf32>
    %529 = arith.addf %511, %528 : vector<1x2xf32>
    %530 = vector.broadcast %8 : f32 to vector<1x2xf32>
    %531 = arith.mulf %530, %452 : vector<1x2xf32>
    %532 = vector.broadcast %9 : f32 to vector<1x2xf32>
    %533 = arith.mulf %532, %466 : vector<1x2xf32>
    %534 = arith.addf %531, %533 : vector<1x2xf32>
    %535 = vector.broadcast %10 : f32 to vector<1x2xf32>
    %536 = arith.mulf %535, %480 : vector<1x2xf32>
    %537 = arith.addf %534, %536 : vector<1x2xf32>
    %538 = vector.broadcast %11 : f32 to vector<1x2xf32>
    %539 = arith.mulf %538, %494 : vector<1x2xf32>
    %540 = arith.addf %537, %539 : vector<1x2xf32>
    %541 = vector.broadcast %18 : f32 to vector<1x2xf32>
    %542 = arith.addf %540, %541 : vector<1x2xf32>
    %cst_154 = arith.constant 0.000000e+00 : f32
    %543 = vector.broadcast %cst_154 : f32 to vector<1x2xf32>
    %544 = arith.maximumf %542, %543 : vector<1x2xf32>
    %545 = vector.broadcast %22 : f32 to vector<1x2xf32>
    %546 = arith.mulf %545, %544 : vector<1x2xf32>
    %547 = arith.addf %529, %546 : vector<1x2xf32>
    %548 = vector.broadcast %12 : f32 to vector<1x2xf32>
    %549 = arith.mulf %548, %452 : vector<1x2xf32>
    %550 = vector.broadcast %13 : f32 to vector<1x2xf32>
    %551 = arith.mulf %550, %466 : vector<1x2xf32>
    %552 = arith.addf %549, %551 : vector<1x2xf32>
    %553 = vector.broadcast %14 : f32 to vector<1x2xf32>
    %554 = arith.mulf %553, %480 : vector<1x2xf32>
    %555 = arith.addf %552, %554 : vector<1x2xf32>
    %556 = vector.broadcast %15 : f32 to vector<1x2xf32>
    %557 = arith.mulf %556, %494 : vector<1x2xf32>
    %558 = arith.addf %555, %557 : vector<1x2xf32>
    %559 = vector.broadcast %19 : f32 to vector<1x2xf32>
    %560 = arith.addf %558, %559 : vector<1x2xf32>
    %cst_155 = arith.constant 0.000000e+00 : f32
    %561 = vector.broadcast %cst_155 : f32 to vector<1x2xf32>
    %562 = arith.maximumf %560, %561 : vector<1x2xf32>
    %563 = vector.broadcast %23 : f32 to vector<1x2xf32>
    %564 = arith.mulf %563, %562 : vector<1x2xf32>
    %565 = arith.addf %547, %564 : vector<1x2xf32>
    %566 = vector.broadcast %24 : f32 to vector<1x2xf32>
    %567 = arith.addf %565, %566 : vector<1x2xf32>
    %568 = arith.addf %567, %426 : vector<1x2xf32>
    %569 = arith.mulf %397, %397 : vector<8x16x2xf32>
    %cst_156 = arith.constant dense<0.000000e+00> : vector<8x2xf32>
    %570 = vector.multi_reduction <add>, %569, %cst_156 [1] : vector<8x16x2xf32> to vector<8x2xf32>
    %571 = vector.shape_cast %570 : vector<8x2xf32> to vector<8x1x2xf32>
    %cst_157 = arith.constant 1.000000e-24 : f32
    %572 = vector.broadcast %cst_157 : f32 to vector<8x1x2xf32>
    %573 = arith.maximumf %571, %572 : vector<8x1x2xf32>
    %574 = math.rsqrt %573 : vector<8x1x2xf32>
    %575 = vector.broadcast %574 : vector<8x1x2xf32> to vector<8x16x2xf32>
    %576 = arith.mulf %397, %575 : vector<8x16x2xf32>
    %cst_158 = arith.constant 0xFF800000 : f32
    %577 = vector.shape_cast %401 : vector<8x1x1xi1> to vector<8x1x1xi1>
    %578 = vector.broadcast %577 : vector<8x1x1xi1> to vector<8x16x2xi1>
    %579 = vector.broadcast %cst_158 : f32 to vector<8x16x2xf32>
    %580 = arith.select %578, %576, %579 : vector<8x16x2xi1>, vector<8x16x2xf32>
    %cst_159 = arith.constant dense<0xFF800000> : vector<16x2xf32>
    %581 = vector.multi_reduction <maximumf>, %580, %cst_159 [0] : vector<8x16x2xf32> to vector<16x2xf32>
    %cst_160 = arith.constant dense<0.000000e+00> : vector<2xf32>
    %582 = vector.multi_reduction <add>, %581, %cst_160 [0] : vector<16x2xf32> to vector<2xf32>
    %583 = vector.shape_cast %582 : vector<2xf32> to vector<1x2xf32>
    %cst_161 = arith.constant 1.600000e+01 : f32
    %584 = vector.broadcast %cst_161 : f32 to vector<1x2xf32>
    %585 = arith.divf %583, %584 : vector<1x2xf32>
    %586 = tpu.bitcast %581 : vector<16x2xf32> -> vector<16x2xi32>
    %c0_i32_162 = arith.constant 0 : i32
    %587 = vector.broadcast %c0_i32_162 : i32 to vector<16x2xi32>
    %588 = arith.cmpi slt, %586, %587 : vector<16x2xi32>
    %c2147483647_i32_163 = arith.constant 2147483647 : i32
    %589 = vector.broadcast %c2147483647_i32_163 : i32 to vector<16x2xi32>
    %590 = arith.xori %586, %589 : vector<16x2xi32>
    %591 = arith.select %588, %590, %586 : vector<16x2xi1>, vector<16x2xi32>
    %592 = tpu.iota {dimensions = array<i32: 0>} : vector<16x2xi32>
    %c-16_i32_164 = arith.constant -16 : i32
    %593 = vector.broadcast %c-16_i32_164 : i32 to vector<16x2xi32>
    %594 = arith.andi %591, %593 : vector<16x2xi32>
    %c15_i32_165 = arith.constant 15 : i32
    %595 = vector.broadcast %c15_i32_165 : i32 to vector<16x2xi32>
    %596 = arith.subi %595, %592 : vector<16x2xi32>
    %597 = arith.ori %594, %596 : vector<16x2xi32>
    %cst_166 = arith.constant dense<-2147483648> : vector<2xi32>
    %598 = vector.multi_reduction <maxsi>, %597, %cst_166 [0] : vector<16x2xi32> to vector<2xi32>
    %599 = vector.shape_cast %598 : vector<2xi32> to vector<1x2xi32>
    %c-16_i32_167 = arith.constant -16 : i32
    %600 = vector.broadcast %c-16_i32_167 : i32 to vector<1x2xi32>
    %601 = arith.andi %599, %600 : vector<1x2xi32>
    %c0_i32_168 = arith.constant 0 : i32
    %602 = vector.broadcast %c0_i32_168 : i32 to vector<1x2xi32>
    %603 = arith.cmpi slt, %601, %602 : vector<1x2xi32>
    %c2147483647_i32_169 = arith.constant 2147483647 : i32
    %604 = vector.broadcast %c2147483647_i32_169 : i32 to vector<1x2xi32>
    %605 = arith.xori %601, %604 : vector<1x2xi32>
    %606 = arith.select %603, %605, %601 : vector<1x2xi1>, vector<1x2xi32>
    %607 = tpu.bitcast %606 : vector<1x2xi32> -> vector<1x2xf32>
    %608 = vector.broadcast %599 : vector<1x2xi32> to vector<16x2xi32>
    %609 = arith.cmpi eq, %597, %608 : vector<16x2xi32>
    %c-2147483648_i32_170 = arith.constant -2147483648 : i32
    %610 = vector.broadcast %c-2147483648_i32_170 : i32 to vector<16x2xi32>
    %611 = arith.select %609, %610, %597 : vector<16x2xi1>, vector<16x2xi32>
    %cst_171 = arith.constant dense<-2147483648> : vector<2xi32>
    %612 = vector.multi_reduction <maxsi>, %611, %cst_171 [0] : vector<16x2xi32> to vector<2xi32>
    %613 = vector.shape_cast %612 : vector<2xi32> to vector<1x2xi32>
    %c-16_i32_172 = arith.constant -16 : i32
    %614 = vector.broadcast %c-16_i32_172 : i32 to vector<1x2xi32>
    %615 = arith.andi %613, %614 : vector<1x2xi32>
    %c0_i32_173 = arith.constant 0 : i32
    %616 = vector.broadcast %c0_i32_173 : i32 to vector<1x2xi32>
    %617 = arith.cmpi slt, %615, %616 : vector<1x2xi32>
    %c2147483647_i32_174 = arith.constant 2147483647 : i32
    %618 = vector.broadcast %c2147483647_i32_174 : i32 to vector<1x2xi32>
    %619 = arith.xori %615, %618 : vector<1x2xi32>
    %620 = arith.select %617, %619, %615 : vector<1x2xi1>, vector<1x2xi32>
    %621 = tpu.bitcast %620 : vector<1x2xi32> -> vector<1x2xf32>
    %622 = vector.broadcast %613 : vector<1x2xi32> to vector<16x2xi32>
    %623 = arith.cmpi eq, %611, %622 : vector<16x2xi32>
    %c-2147483648_i32_175 = arith.constant -2147483648 : i32
    %624 = vector.broadcast %c-2147483648_i32_175 : i32 to vector<16x2xi32>
    %625 = arith.select %623, %624, %611 : vector<16x2xi1>, vector<16x2xi32>
    %cst_176 = arith.constant dense<-2147483648> : vector<2xi32>
    %626 = vector.multi_reduction <maxsi>, %625, %cst_176 [0] : vector<16x2xi32> to vector<2xi32>
    %627 = vector.shape_cast %626 : vector<2xi32> to vector<1x2xi32>
    %c-16_i32_177 = arith.constant -16 : i32
    %628 = vector.broadcast %c-16_i32_177 : i32 to vector<1x2xi32>
    %629 = arith.andi %627, %628 : vector<1x2xi32>
    %c0_i32_178 = arith.constant 0 : i32
    %630 = vector.broadcast %c0_i32_178 : i32 to vector<1x2xi32>
    %631 = arith.cmpi slt, %629, %630 : vector<1x2xi32>
    %c2147483647_i32_179 = arith.constant 2147483647 : i32
    %632 = vector.broadcast %c2147483647_i32_179 : i32 to vector<1x2xi32>
    %633 = arith.xori %629, %632 : vector<1x2xi32>
    %634 = arith.select %631, %633, %629 : vector<1x2xi1>, vector<1x2xi32>
    %635 = tpu.bitcast %634 : vector<1x2xi32> -> vector<1x2xf32>
    %636 = vector.broadcast %627 : vector<1x2xi32> to vector<16x2xi32>
    %637 = arith.cmpi eq, %625, %636 : vector<16x2xi32>
    %c-2147483648_i32_180 = arith.constant -2147483648 : i32
    %638 = vector.broadcast %c-2147483648_i32_180 : i32 to vector<16x2xi32>
    %639 = arith.select %637, %638, %625 : vector<16x2xi1>, vector<16x2xi32>
    %cst_181 = arith.constant dense<-2147483648> : vector<2xi32>
    %640 = vector.multi_reduction <maxsi>, %639, %cst_181 [0] : vector<16x2xi32> to vector<2xi32>
    %641 = vector.shape_cast %640 : vector<2xi32> to vector<1x2xi32>
    %c-16_i32_182 = arith.constant -16 : i32
    %642 = vector.broadcast %c-16_i32_182 : i32 to vector<1x2xi32>
    %643 = arith.andi %641, %642 : vector<1x2xi32>
    %c0_i32_183 = arith.constant 0 : i32
    %644 = vector.broadcast %c0_i32_183 : i32 to vector<1x2xi32>
    %645 = arith.cmpi slt, %643, %644 : vector<1x2xi32>
    %c2147483647_i32_184 = arith.constant 2147483647 : i32
    %646 = vector.broadcast %c2147483647_i32_184 : i32 to vector<1x2xi32>
    %647 = arith.xori %643, %646 : vector<1x2xi32>
    %648 = arith.select %645, %647, %643 : vector<1x2xi1>, vector<1x2xi32>
    %649 = tpu.bitcast %648 : vector<1x2xi32> -> vector<1x2xf32>
    %650 = vector.broadcast %0 : f32 to vector<1x2xf32>
    %651 = arith.mulf %650, %607 : vector<1x2xf32>
    %652 = vector.broadcast %1 : f32 to vector<1x2xf32>
    %653 = arith.mulf %652, %621 : vector<1x2xf32>
    %654 = arith.addf %651, %653 : vector<1x2xf32>
    %655 = vector.broadcast %2 : f32 to vector<1x2xf32>
    %656 = arith.mulf %655, %635 : vector<1x2xf32>
    %657 = arith.addf %654, %656 : vector<1x2xf32>
    %658 = vector.broadcast %3 : f32 to vector<1x2xf32>
    %659 = arith.mulf %658, %649 : vector<1x2xf32>
    %660 = arith.addf %657, %659 : vector<1x2xf32>
    %661 = vector.broadcast %16 : f32 to vector<1x2xf32>
    %662 = arith.addf %660, %661 : vector<1x2xf32>
    %cst_185 = arith.constant 0.000000e+00 : f32
    %663 = vector.broadcast %cst_185 : f32 to vector<1x2xf32>
    %664 = arith.maximumf %662, %663 : vector<1x2xf32>
    %665 = vector.broadcast %20 : f32 to vector<1x2xf32>
    %666 = arith.mulf %665, %664 : vector<1x2xf32>
    %667 = vector.broadcast %4 : f32 to vector<1x2xf32>
    %668 = arith.mulf %667, %607 : vector<1x2xf32>
    %669 = vector.broadcast %5 : f32 to vector<1x2xf32>
    %670 = arith.mulf %669, %621 : vector<1x2xf32>
    %671 = arith.addf %668, %670 : vector<1x2xf32>
    %672 = vector.broadcast %6 : f32 to vector<1x2xf32>
    %673 = arith.mulf %672, %635 : vector<1x2xf32>
    %674 = arith.addf %671, %673 : vector<1x2xf32>
    %675 = vector.broadcast %7 : f32 to vector<1x2xf32>
    %676 = arith.mulf %675, %649 : vector<1x2xf32>
    %677 = arith.addf %674, %676 : vector<1x2xf32>
    %678 = vector.broadcast %17 : f32 to vector<1x2xf32>
    %679 = arith.addf %677, %678 : vector<1x2xf32>
    %cst_186 = arith.constant 0.000000e+00 : f32
    %680 = vector.broadcast %cst_186 : f32 to vector<1x2xf32>
    %681 = arith.maximumf %679, %680 : vector<1x2xf32>
    %682 = vector.broadcast %21 : f32 to vector<1x2xf32>
    %683 = arith.mulf %682, %681 : vector<1x2xf32>
    %684 = arith.addf %666, %683 : vector<1x2xf32>
    %685 = vector.broadcast %8 : f32 to vector<1x2xf32>
    %686 = arith.mulf %685, %607 : vector<1x2xf32>
    %687 = vector.broadcast %9 : f32 to vector<1x2xf32>
    %688 = arith.mulf %687, %621 : vector<1x2xf32>
    %689 = arith.addf %686, %688 : vector<1x2xf32>
    %690 = vector.broadcast %10 : f32 to vector<1x2xf32>
    %691 = arith.mulf %690, %635 : vector<1x2xf32>
    %692 = arith.addf %689, %691 : vector<1x2xf32>
    %693 = vector.broadcast %11 : f32 to vector<1x2xf32>
    %694 = arith.mulf %693, %649 : vector<1x2xf32>
    %695 = arith.addf %692, %694 : vector<1x2xf32>
    %696 = vector.broadcast %18 : f32 to vector<1x2xf32>
    %697 = arith.addf %695, %696 : vector<1x2xf32>
    %cst_187 = arith.constant 0.000000e+00 : f32
    %698 = vector.broadcast %cst_187 : f32 to vector<1x2xf32>
    %699 = arith.maximumf %697, %698 : vector<1x2xf32>
    %700 = vector.broadcast %22 : f32 to vector<1x2xf32>
    %701 = arith.mulf %700, %699 : vector<1x2xf32>
    %702 = arith.addf %684, %701 : vector<1x2xf32>
    %703 = vector.broadcast %12 : f32 to vector<1x2xf32>
    %704 = arith.mulf %703, %607 : vector<1x2xf32>
    %705 = vector.broadcast %13 : f32 to vector<1x2xf32>
    %706 = arith.mulf %705, %621 : vector<1x2xf32>
    %707 = arith.addf %704, %706 : vector<1x2xf32>
    %708 = vector.broadcast %14 : f32 to vector<1x2xf32>
    %709 = arith.mulf %708, %635 : vector<1x2xf32>
    %710 = arith.addf %707, %709 : vector<1x2xf32>
    %711 = vector.broadcast %15 : f32 to vector<1x2xf32>
    %712 = arith.mulf %711, %649 : vector<1x2xf32>
    %713 = arith.addf %710, %712 : vector<1x2xf32>
    %714 = vector.broadcast %19 : f32 to vector<1x2xf32>
    %715 = arith.addf %713, %714 : vector<1x2xf32>
    %cst_188 = arith.constant 0.000000e+00 : f32
    %716 = vector.broadcast %cst_188 : f32 to vector<1x2xf32>
    %717 = arith.maximumf %715, %716 : vector<1x2xf32>
    %718 = vector.broadcast %23 : f32 to vector<1x2xf32>
    %719 = arith.mulf %718, %717 : vector<1x2xf32>
    %720 = arith.addf %702, %719 : vector<1x2xf32>
    %721 = vector.broadcast %24 : f32 to vector<1x2xf32>
    %722 = arith.addf %720, %721 : vector<1x2xf32>
    %723 = arith.addf %722, %585 : vector<1x2xf32>
    %c0_189 = arith.constant 0 : index
    %c1_190 = arith.constant 1 : index
    %c0_191 = arith.constant 0 : index
    %724 = vector.load %arg9[%c0_189, %c1_190, %c0_191] : memref<4x2x2xf32, #tpu.memory_space<vmem>>, vector<1x1x2xf32>
    %725 = vector.shape_cast %724 : vector<1x1x2xf32> to vector<1x2xf32>
    %726 = vector.shape_cast %568 : vector<1x2xf32> to vector<1x1x2xf32>
    tpu.vector_store %arg9[%c0_189, %c1_190, %c0_191], %726 {strides = array<i32>} : memref<4x2x2xf32, #tpu.memory_space<vmem>>, vector<1x1x2xf32>,
    %c1_192 = arith.constant 1 : index
    %c1_193 = arith.constant 1 : index
    %c0_194 = arith.constant 0 : index
    %727 = vector.load %arg9[%c1_192, %c1_193, %c0_194] : memref<4x2x2xf32, #tpu.memory_space<vmem>>, vector<1x1x2xf32>
    %728 = vector.shape_cast %727 : vector<1x1x2xf32> to vector<1x2xf32>
    %729 = vector.shape_cast %723 : vector<1x2xf32> to vector<1x1x2xf32>
    tpu.vector_store %arg9[%c1_192, %c1_193, %c0_194], %729 {strides = array<i32>} : memref<4x2x2xf32, #tpu.memory_space<vmem>>, vector<1x1x2xf32>,
    %c2_195 = arith.constant 2 : index
    %c1_196 = arith.constant 1 : index
    %c0_197 = arith.constant 0 : index
    %730 = vector.load %arg9[%c2_195, %c1_196, %c0_197] : memref<4x2x2xf32, #tpu.memory_space<vmem>>, vector<1x1x2xf32>
    %731 = vector.shape_cast %730 : vector<1x1x2xf32> to vector<1x2xf32>
    %732 = vector.shape_cast %426 : vector<1x2xf32> to vector<1x1x2xf32>
    tpu.vector_store %arg9[%c2_195, %c1_196, %c0_197], %732 {strides = array<i32>} : memref<4x2x2xf32, #tpu.memory_space<vmem>>, vector<1x1x2xf32>,
    %c3_198 = arith.constant 3 : index
    %c1_199 = arith.constant 1 : index
    %c0_200 = arith.constant 0 : index
    %733 = vector.load %arg9[%c3_198, %c1_199, %c0_200] : memref<4x2x2xf32, #tpu.memory_space<vmem>>, vector<1x1x2xf32>
    %734 = vector.shape_cast %733 : vector<1x1x2xf32> to vector<1x2xf32>
    %735 = vector.shape_cast %585 : vector<1x2xf32> to vector<1x1x2xf32>
    tpu.vector_store %arg9[%c3_198, %c1_199, %c0_200], %735 {strides = array<i32>} : memref<4x2x2xf32, #tpu.memory_space<vmem>>, vector<1x1x2xf32>,
    return
  }
  func.func @transform_0(%arg0: i32, %arg1: i32, %arg2: memref<2xi32, #tpu.memory_space<smem>>) -> (i32, i32) {
    %c0_i32 = arith.constant 0 : i32
    %c0_i32_0 = arith.constant 0 : i32
    return %arg1, %c0_i32 : i32, i32
  }
  func.func @transform_1(%arg0: i32, %arg1: i32, %arg2: memref<2xi32, #tpu.memory_space<smem>>) -> (i32, i32, i32) {
    %c0_i32 = arith.constant 0 : i32
    %c0_i32_0 = arith.constant 0 : i32
    %c0_i32_1 = arith.constant 0 : i32
    return %arg0, %c0_i32, %c0_i32_0 : i32, i32, i32
  }
  func.func @transform_2(%arg0: i32, %arg1: i32, %arg2: memref<2xi32, #tpu.memory_space<smem>>) -> (i32, i32) {
    %c0_i32 = arith.constant 0 : i32
    %c0_i32_0 = arith.constant 0 : i32
    %c0_i32_1 = arith.constant 0 : i32
    return %c0_i32, %c0_i32_0 : i32, i32
  }
  func.func @transform_3(%arg0: i32, %arg1: i32, %arg2: memref<2xi32, #tpu.memory_space<smem>>) -> i32 {
    %c0_i32 = arith.constant 0 : i32
    %c0_i32_0 = arith.constant 0 : i32
    return %c0_i32 : i32
  }
  func.func @transform_4(%arg0: i32, %arg1: i32, %arg2: memref<2xi32, #tpu.memory_space<smem>>) -> i32 {
    %c0_i32 = arith.constant 0 : i32
    %c0_i32_0 = arith.constant 0 : i32
    return %c0_i32 : i32
  }
  func.func @transform_5(%arg0: i32, %arg1: i32, %arg2: memref<2xi32, #tpu.memory_space<smem>>) -> i32 {
    %c0_i32 = arith.constant 0 : i32
    %c0_i32_0 = arith.constant 0 : i32
    return %c0_i32 : i32
  }
  func.func @transform_6(%arg0: i32, %arg1: i32, %arg2: memref<2xi32, #tpu.memory_space<smem>>) -> (i32, i32, i32) {
    %c0_i32 = arith.constant 0 : i32
    %c0_i32_0 = arith.constant 0 : i32
    return %c0_i32, %arg1, %arg0 : i32, i32, i32
  }
}

</mosaic_0001>

<bundles_post_ra>
// kernel: tpu_custom_call.1
= control target key start
LH: loop header
LB: loop body
LE: loop exit
PB: predicated region body
PF: predicated region fallthrough
CT: control target
= control target key end

     0   :  { %s4168_s0 = inlined_call_operand.vmem [shape: s32[2], index: 0, kind: input, shape index: {}]   ;;  %s4169_s1 = inlined_call_operand.hbm [shape: f32[16,32], index: 1, kind: input, shape index: {}]   ;;  %s4170_s2 = inlined_call_operand.hbm [shape: f32[1,32,32], index: 2, kind: input, shape index: {}]   ;;  %s4171_s3 = inlined_call_operand.vmem [shape: f32[4,4], index: 3, kind: input, shape index: {}]   ;;  %s4172_s4 = inlined_call_operand.vmem [shape: f32[4], index: 4, kind: input, shape index: {}]   ;;  %s4173_s5 = inlined_call_operand.vmem [shape: f32[4], index: 5, kind: input, shape index: {}]   ;;  %s4174_s6 = inlined_call_operand.<no memory space> [shape: f32[1], index: 6, kind: input, shape index: {}]   ;;  %s4175_s7 = inlined_call_operand.vmem [shape: f32[4,2,2], index: 7, kind: output, shape index: {}]  }
   0x1   :  { %s12_s26 = sshll.u32 %s4168_s0, 4  ;;  %s13_s26 = int_to_ptr.vmem [resolvable:$true] %s12_s26 }
   0x2   :  { %s2407_s27 = scalar_lea.vmem %s13_s26, 16  ;;  %p2412_p1 = scmp.lt.s32.totalorder %s13_s26, %s13_s26 }
   0x3   :  { %p2408_p0 = scmp.ne.s32.totalorder %s13_s26, %s2407_s27  ;;  %p2413_p2 = scmp.lt.s32.totalorder %s2407_s27, %s2407_s27 }
   0x5   :  { %p2414_p3 = por %p2413_p2, %p2412_p1 }
   0x7   :  { %p2415_p4 = pnand %p2414_p3, %p2408_p0 }
   0x9   :  { %2418 = shalt.err (!%p2415_p4)  }
   0xa   :  { %s2509_s28 = smov [#allocation3]  }
   0xb   :  { %15 = dma.vmem_to_smem %s13_s26, 16, %s2509_s28, [#allocation2] }
   0xc   :  { %2499 = dma.done.wait [#allocation2], 16 }
   0xd   :  { %2500 = vsyncadd [#allocation2], 4294967280 }
   0xe   :  { %18 = sfence }
   0xf   :  { %19 = vsyncpa [#allocation6], 0 }
  0x10   :  { %20 = vsyncpa [#allocation9], 0 }
  0x11   :  { %21 = vsyncpa [#allocation7], 0 }
  0x12   :  { %22 = vsyncpa [#allocation12], 0  ;;  %s63_s0 = sshll.u32 %s4172_s4, 4  ;;  %s64_s0 = int_to_ptr.vmem [resolvable:$true] %s63_s0 }
  0x13   :  { %s2419_s8 = scalar_lea.vmem %s64_s0, 16  ;;  %p2424_p6 = scmp.lt.s32.totalorder %s64_s0, %s64_s0 }
  0x14   :  { %p2420_p5 = scmp.ne.s32.totalorder %s64_s0, %s2419_s8  ;;  %p2425_p7 = scmp.lt.s32.totalorder %s2419_s8, %s2419_s8 }
  0x16   :  { %p2426_p8 = por %p2425_p7, %p2424_p6 }
  0x18   :  { %p2427_p9 = pnand %p2426_p8, %p2420_p5 }
  0x1a   :  { %2430 = shalt.err (!%p2427_p9)
}
  0x1b   :  { %s2510_s9 = smov [#allocation11]   ;;  %s2511_s10 = smov [#allocation5]  }
  0x1c   :  { %66 = dma.vmem_to_smem %s64_s0, 16, %s2510_s9, [#allocation12]  }
  0x1d   :  { %s28_s11 = sshll.u32 %s2511_s10, 4  ;;  %s2431_s14 = scalar_lea.hbm %s4169_s1, 256  ;;  %s29_s11 = int_to_ptr.vmem [resolvable:$true] %s28_s11 }
  0x1e   :  { %p2432_p10 = scmp.ne.s32.totalorder %s4169_s1, %s2431_s14  ;;  %p2435_p11 = scmp.lt.u32.totalorder %s2431_s14, %s4169_s1 }
  0x20   :  { %p2437_p12 = pnand %p2435_p11, %p2432_p10 }
  0x22   :  { %2440 = shalt.err (!%p2437_p12)
}
  0x23   :  { %s2441_s18 = scalar_lea.vmem %s29_s11, 256  ;;  %p2446_p0 = scmp.lt.s32.totalorder %s29_s11, %s29_s11 }
  0x24   :  { %p2442_p13 = scmp.ne.s32.totalorder %s29_s11, %s2441_s18  ;;  %p2447_p1 = scmp.lt.s32.totalorder %s2441_s18, %s2441_s18 }
  0x26   :  { %p2448_p2 = por %p2447_p1, %p2446_p0 }
  0x28   :  { %p2449_p3 = pnand %p2448_p2, %p2442_p13 }
  0x2a   :  { %2452 = shalt.err (!%p2449_p3)
}
  0x2b   :  { %s2512_s19 = smov 128   ;;  %s2513_s20 = smov 8  }
  0x2c   :  { %34 = dma.hbm_to_vmem [thread:$0]  %s4169_s1, 256, %s29_s11, [#allocation6], %s2512_s19, %s2512_s19, %s2513_s20  }
  0x2d   :  { %s53_s25 = sshll.u32 %s4171_s3, 4  ;;  %s2514_s26 = smov [#allocation8]   ;;  %s54_s25 = int_to_ptr.vmem [resolvable:$true] %s53_s25 }
  0x2e   :  { %s40_s27 = sshll.u32 %s2514_s26, 4  ;;  %s2453_s30 = scalar_lea.hbm %s4170_s2, 512  ;;  %s41_s27 = int_to_ptr.vmem [resolvable:$true] %s40_s27 }
  0x2f   :  { %p2454_p4 = scmp.ne.s32.totalorder %s4170_s2, %s2453_s30  ;;  %p2457_p5 = scmp.lt.u32.totalorder %s2453_s30, %s4170_s2 }
  0x31   :  { %p2459_p6 = pnand %p2457_p5, %p2454_p4 }
  0x33   :  { %2462 = shalt.err (!%p2459_p6)
}
  0x34   :  { %s2463_s1 = scalar_lea.vmem %s41_s27, 512  ;;  %p2468_p8 = scmp.lt.s32.totalorder %s41_s27, %s41_s27 }
  0x35   :  { %p2464_p7 = scmp.ne.s32.totalorder %s41_s27, %s2463_s1  ;;  %p2469_p9 = scmp.lt.s32.totalorder %s2463_s1, %s2463_s1 }
  0x37   :  { %p2470_p10 = por %p2469_p9, %p2468_p8 }
  0x39   :  { %p2471_p11 = pnand %p2470_p10, %p2464_p7 }
  0x3b   :  { %2474 = shalt.err (!%p2471_p11)
}
  0x3c   :  { %46 = dma.hbm_to_vmem [thread:$0]  %s4170_s2, 512, %s41_s27, [#allocation9], %s2512_s19, %s2512_s19, %s2513_s20  }
  0x3d   :  { %s2475_s12 = scalar_lea.vmem %s54_s25, 64  ;;  %p2480_p13 = scmp.lt.s32.totalorder %s54_s25, %s54_s25 }
  0x3e   :  { %p2476_p12 = scmp.ne.s32.totalorder %s54_s25, %s2475_s12  ;;  %p2481_p0 = scmp.lt.s32.totalorder %s2475_s12, %s2475_s12 }
  0x40   :  { %p2482_p1 = por %p2481_p0, %p2480_p13 }
  0x42   :  { %p2483_p2 = pnand %p2482_p1, %p2476_p12 }
  0x44   :  { %2486 = shalt.err (!%p2483_p2)
}
  0x45   :  { %s2515_s13 = smov [#allocation10]   ;;  %s73_s16 = sshll.u32 %s4173_s5, 4  ;;  %s74_s16 = int_to_ptr.vmem [resolvable:$true] %s73_s16 }
  0x46   :  { %56 = dma.vmem_to_smem %s54_s25, 64, %s2515_s13, [#allocation7]  }
  0x47   :  { %s2487_s4 = scalar_lea.vmem %s74_s16, 16  ;;  %p2492_p4 = scmp.lt.s32.totalorder %s74_s16, %s74_s16 }
  0x48   :  { %p2488_p3 = scmp.ne.s32.totalorder %s74_s16, %s2487_s4  ;;  %p2493_p5 = scmp.lt.s32.totalorder %s2487_s4, %s2487_s4 }
  0x4a   :  { %p2494_p6 = por %p2493_p5, %p2492_p4 }
  0x4c   :  { %p2495_p7 = pnand %p2494_p6, %p2488_p3 }
  0x4e   :  { %2498 = shalt.err (!%p2495_p7)
}
  0x4f   :  { %s2516_s2 = smov [#allocation13]  }
  0x50   :  { %76 = dma.vmem_to_smem %s74_s16, 16, %s2516_s2, [#allocation12]  }
  0x51   :  { %2501 = dma.done.wait [#allocation6], 256  }
  0x52   :  { %2502 = vsyncadd [#allocation6], 4294967040 }
  0x53   :  { %2503 = dma.done.wait [#allocation9], 512  }
  0x54   :  { %2504 = vsyncadd [#allocation9], 4294966784 }
  0x55   :  { %2505 = dma.done.wait [#allocation7], 64  }
  0x56   :  { %2506 = vsyncadd [#allocation7], 4294967232 }
  0x57   :  { %2507 = dma.done.wait [#allocation12], 32  }
  0x58   :  { %2508 = vsyncadd [#allocation12], 4294967264 }
  0x59   :  { %94 = sfence }
  0x5a   :  { %v120_v0 = vld [vmem:[#allocation5] sm:$0xff]  ;;  %vm124_vm0 = vcmask 261120   ;;  %v121_v1 = vld [vmem:[#allocation5 + $0x8] sm:$0xff]  ;;  %v137_v6 = vld [vmem:[#allocation8] sm:$0xff]  ;;  %s2517_s5 = smov 124   ;;  %s2518_s17 = smov 126   ;;  %v226_v26 = vlaneseq }
  0x5b   :  { %v122_v2 = vmul.f32 %v120_v0, %v120_v0  ;;  %v123_v3 = vmul.f32 %v121_v1, %v121_v1  ;;  %v138_v7 = vld [vmem:[#allocation8 + $0x8] sm:$0xff]  ;;  %v139_v8 = vld [vmem:[#allocation8 + $0x10] sm:$0xff]  ;;  %v140_v10 = vld [vmem:[#allocation8 + $0x18] sm:$0xff]  ;;  %s2519_s18 = smov 120   ;;  %s2520_s19 = smov 122   ;;  %vm620_vm1 = vcmask 15360  }
  0x5c   :  { %v2325_v9 = vpack.c.bf16 %v138_v7, %v137_v6  ;;  %v2329_v11 = vpack.c.bf16 %v140_v10, %v139_v8  ;;  %s2521_s20 = smov 116   ;;  %s2522_s21 = smov 118   ;;  %v2532_v27 = vmov 1983009808   ;;  %v2651_v29 = vshrl.u32 %v226_v26, 7 }
  0x5d   :  { %v125_v4 = vsel %vm124_vm0, %v122_v2, 0.0  ;;  %v128_v5 = vsel %vm124_vm0, %v123_v3, 0.0  ;;  %s2523_s22 = smov 112   ;;  %s2524_s23 = smov 114   ;;  %v283_v28 = vunpack.c.l.s4 %v2532_v27  ;;  %v2533_v40 = vmov 1934713408  }
  0x5e   :  { %126 = vadd.xlane.f32.xlu0 %v125_v4  ;;  %2326 = vmatprep.subr.bf16.mxu0 %v2325_v9  ;;  %s2525_s24 = smov 108   ;;  %s2526_s25 = smov 110   ;;  %4262 = vst [vmem:[#allocation19_spill] sm:$0xff] %v2651_v29  ;;  %v347_v41 = vunpack.c.l.s4 %v2533_v40 }
  0x5f   :  { %2328 = vmatpush3.bf16.msra.mxu0 %v2325_v9  ;;  %s2527_s26 = smov 104   ;;  %s2528_s27 = smov 106   ;;  %v284_v30 = vunpack.c.0.s8 %v283_v28 }
  0x60   :  { %2330 = vmatprep.subr.bf16.mxu0 %v2329_v11  ;;  %s2529_s28 = smov 102   ;;  %s2530_s29 = smov 100   ;;  %v348_v52 = vunpack.c.0.s8 %v347_v41 }
  0x61   :  { %s2531_s30 = smov 98   ;;  %s2653_s0 = sld [smem:[#allocation3 + $0x1]]  ;;  %v2656_v33 = vsub.s32 %v284_v30, %v2651_v29 }
  0x62   :  { %129 = vadd.xlane.f32.xlu0 %v128_v5  ;;  %s2664_s8 = sld [smem:[#allocation3]]  ;;  %v2670_v59 = vsub.s32 %v348_v52, %v2651_v29  ;;  %s2534_s1 = smov 1.0  }
  0x63   :  { %2332 = vmatpush3.bf16.msra.mxu0 %v2329_v11  ;;  %s2744_s14 = sld [smem:[#allocation10]]  ;;  %s2850_s4 = sld [smem:[#allocation10 + $0x1]] }
  0x64   :  { %4263 = vst [vmem:[#allocation20_spill] sm:$0xff] %v2670_v59  ;;  %s2755_s15 = sld [smem:[#allocation10 + $0x100]]  ;;  %s2861_s2 = sld [smem:[#allocation10 + $0x81]] }
  0x65   :  { %s2767_s16 = sld [smem:[#allocation10 + $0x180]] }
  0x67   :  { %p1272_p8 = scmp.gt.s32.totalorder %s2653_s0, 4 }
  0x68   :  { %s232_s10 = scvt.s32.f32 %s2664_s8  ;;  %p230_p9 = scmp.gt.s32.totalorder %s2664_s8, 4 }
  0x69   :  { %s1273_s9 = scalar_select %p1272_p8, %s2653_s0, 4 }
  0x6a   :  { %s2682_s3 = smax.f32 %s2534_s1, %s232_s10  ;;  %s3406_s10 = sld [smem:[#allocation13 + $0x3]] }
  0x6b   :  { %v2679_v2 = vstv %s1273_s9  ;;  %s231_s11 = scalar_select %p230_p9, %s2664_s8, 4 }
  0x6c   :  { %4264 = vst [vmem:[#allocation21_spill] sm:$0xff] %v2679_v2  ;;  %vm1595_vm2 = vcmp.gt.s32.totalorder %v2679_v2, 0  ;;  %vm1596_vm3 = vcmp.gt.s32.totalorder %v2679_v2, 1  ;;  %vm1597_vm4 = vcmp.gt.s32.totalorder %v2679_v2, 2  ;;  %vm4243_vm5 = vcmp.gt.s32.totalorder %v2679_v2, 3  ;;  %s3201_s9 = sld [smem:[#allocation13 + $0x2]] }
  0x6d   :  { %vm4242_vm6 = vcmp.gt.s32.totalorder %v2679_v2, 4  ;;  %vm4241_vm7 = vcmp.gt.s32.totalorder %v2679_v2, 5  ;;  %vm4240_vm8 = vcmp.gt.s32.totalorder %v2679_v2, 6  ;;  %vm4182_vm9 = vcmp.gt.s32.totalorder %v2679_v2, 7 }
  0xeb   :  { %v127_v12 = vpop.xlane.xlu0 %126 }
  0xec   :  { %v131_v13 = vmax.f32 %v127_v12, 1e-24 }
  0xee   :  { %2359 = vrsqrt.f32 %v131_v13 }
  0xef   :  { %v130_v14 = vpop.xlane.xlu0 %129 }
  0xf0   :  { %v132_v15 = vmax.f32 %v130_v14, 1e-24 }
  0xf2   :  { %2361 = vrsqrt.f32 %v132_v15 }
  0xf8   :  { %v2360_v16 = vpop.eup %2359 }
  0xf9   :  { %v135_v17 = vmul.f32 %v2360_v16, %v120_v0 }
  0xfb   :  { %2322 = vmatprep.mubr.msk.f32.mxu0 %vm124_vm0, %v135_v17 }
  0xfc   :  { %v2362_v18 = vpop.eup %2361 }
  0xfd   :  { %v136_v19 = vmul.f32 %v2362_v18, %v121_v1 }
  0xff   :  { %2323 = vmatmul.mubr.msk.f32.vlgmr.msra.gmra.mrb[0].mxu0 %vm124_vm0, %v136_v19  ;;  %v776_v19 = vstv %s2682_s3  ;;  %s1274_s3 = scvt.s32.f32 %s2653_s0 }
 0x100   :  { %2363 = vrcp.f32 %v776_v19  ;;  %v2825_v19 = vstv %s2744_s14 }
 0x101   :  { %4286 = vst [vmem:[#allocation43_spill] sm:$0xff] %v2825_v19 }
 0x1d2   :  { %v2324_v20 = vpop.f32.mrb[0].mxu0 }
 0x1d3   :  { %v223_v21 = vmul.f32 0.1, %v2324_v20  ;;  %v213_v22 = vpop.f32.mrb[1].mxu0 }
 0x1d4   :  { %v222_v24 = vmul.f32 0.1, %v213_v22 }
 0x1d5   :  { %v2615_v23 = vmax.f32 %v2324_v20, %v223_v21  ;;  %v2699_v20 = vadd.s32 8, %v2651_v29 }
 0x1d6   :  { %v2630_v25 = vmax.f32 %v213_v22, %v222_v24 }
 0x1d7   :  { %1280 = vrot.lane.b32.xlu1 %v2615_v23, %s2517_s5  ;;  %1277 = vrot.lane.b32.xlu0 %v2615_v23, %s2518_s17  ;;  %4265 = vst [vmem:[#allocation22_spill] sm:$0xff] %v2699_v20 }
 0x1db   :  { %1286 = vrot.lane.b32.xlu1 %v2615_v23, %s2519_s18  ;;  %1283 = vrot.lane.b32.xlu0 %v2615_v23, %s2520_s19 }
 0x1df   :  { %1292 = vrot.lane.b32.xlu1 %v2615_v23, %s2521_s20  ;;  %1289 = vrot.lane.b32.xlu0 %v2615_v23, %s2522_s21 }
 0x1e3   :  { %1298 = vrot.lane.b32.xlu1 %v2615_v23, %s2523_s22  ;;  %1295 = vrot.lane.b32.xlu0 %v2615_v23, %s2524_s23 }
 0x1e7   :  { %1304 = vrot.lane.b32.xlu1 %v2615_v23, %s2525_s24  ;;  %1301 = vrot.lane.b32.xlu0 %v2615_v23, %s2526_s25 }
 0x1eb   :  { %1310 = vrot.lane.b32.xlu1 %v2615_v23, %s2527_s26  ;;  %1307 = vrot.lane.b32.xlu0 %v2615_v23, %s2528_s27 }
 0x1ef   :  { %1313 = vrot.lane.b32.xlu0 %v2615_v23, %s2529_s28  ;;  %235 = vrot.lane.b32.xlu1 %v2630_v25, %s2518_s17  ;;  %s2889_s17 = sld [smem:[#allocation10 + $0x181]] }
 0x1f3   :  { %241 = vrot.lane.b32.xlu0 %v2630_v25, %s2520_s19  ;;  %238 = vrot.lane.b32.xlu1 %v2630_v25, %s2517_s5  ;;  %s2863_s5 = sld [smem:[#allocation10 + $0x101]]  ;;  %s3083_s19 = sld [smem:[#allocation10 + $0x82]] }
 0x1f7   :  { %262 = vrot.lane.b32.xlu0 %v2630_v25, %s2525_s24  ;;  %244 = vrot.lane.b32.xlu1 %v2630_v25, %s2519_s18  ;;  %s3070_s18 = sld [smem:[#allocation10 + $0x2]]  ;;  %s3148_s24 = sld [smem:[#allocation10 + $0x103]] }
 0x1fb   :  { %268 = vrot.lane.b32.xlu0 %v2630_v25, %s2527_s26  ;;  %247 = vrot.lane.b32.xlu1 %v2630_v25, %s2522_s21  ;;  %s3138_s21 = sld [smem:[#allocation10 + $0x3]]  ;;  %s3156_s26 = sld [smem:[#allocation11]] }
 0x1ff   :  { %274 = vrot.lane.b32.xlu0 %v2630_v25, %s2530_s29  ;;  %250 = vrot.lane.b32.xlu1 %v2630_v25, %s2521_s20  ;;  %s3085_s20 = sld [smem:[#allocation10 + $0x102]] }
 0x203   :  { %1319 = vrot.lane.b32.xlu0 %v2615_v23, %s2531_s30  ;;  %253 = vrot.lane.b32.xlu1 %v2630_v25, %s2524_s23  ;;  %s3146_s23 = sld [smem:[#allocation10 + $0x83]] }
 0x207   :  { %256 = vrot.lane.b32.xlu1 %v2630_v25, %s2523_s22  ;;  %s3140_s22 = sld [smem:[#allocation10 + $0x182]] }
 0x20b   :  { %259 = vrot.lane.b32.xlu1 %v2630_v25, %s2526_s25  ;;  %s3154_s25 = sld [smem:[#allocation10 + $0x183]] }
 0x20f   :  { %265 = vrot.lane.b32.xlu1 %v2630_v25, %s2528_s27  ;;  %s3165_s27 = sld [smem:[#allocation11 + $0x1]] }
 0x213   :  { %271 = vrot.lane.b32.xlu1 %v2630_v25, %s2529_s28  ;;  %s3167_s28 = sld [smem:[#allocation13]] }
 0x217   :  { %277 = vrot.lane.b32.xlu1 %v2630_v25, %s2531_s30  ;;  %s3183_s30 = sld [smem:[#allocation13 + $0x1]] }
 0x21b   :  { %1316 = vrot.lane.b32.xlu1 %v2615_v23, %s2530_s29  ;;  %s3181_s29 = sld [smem:[#allocation11 + $0x2]] }
 0x249   :  { %v1281_v31 = vpop.permute.xlu1 %1280  ;;  %v1278_v32 = vpop.permute.xlu0 %1277 }
 0x24a   :  { %v1322_v34 = vcombine.low %v2615_v23, %v1281_v31  ;;  %v1323_v35 = vcombine.high %v2615_v23, %v1281_v31 }
 0x24c   :  { %v1330_v42 = vrot.slane %v1322_v34, %v2656_v33  ;;  %v1337_v43 = vrot.slane %v1323_v35, %v2656_v33  ;;  %v2719_v34 = vstv %s231_s11  ;;  %v2722_v35 = vstv %s2664_s8  ;;  %s3199_s8 = sld [smem:[#allocation11 + $0x3]] }
 0x24d   :  { %v1287_v36 = vpop.permute.xlu1 %1286  ;;  %v1284_v37 = vpop.permute.xlu0 %1283  ;;  %vm553_vm10 = vcmp.gt.s32.totalorder %v2719_v34, 0  ;;  %vm554_vm11 = vcmp.gt.s32.totalorder %v2719_v34, 1  ;;  %vm555_vm12 = vcmp.gt.s32.totalorder %v2719_v34, 2  ;;  %vm556_vm13 = vcmp.gt.s32.totalorder %v2719_v34, 3 }
 0x24e   :  { %v1338_v38 = vcombine.low %v1278_v32, %v1284_v37  ;;  %v1339_v39 = vcombine.high %v1278_v32, %v1284_v37  ;;  %v2730_v37 = vstv %s4174_s6  ;;  %s2753_s6 = sld [smem:[#allocation10 + $0x80]]  ;;  %vm557_vm14 = vcmp.gt.s32.totalorder %v2719_v34, 4 }
 0x24f   :  { %4274 = vst [vmem:[#allocation31_spill] sm:$0xff] %v2730_v37  ;;  %vm558_vm15 = vcmp.gt.s32.totalorder %v2719_v34, 5  ;;  %vm559_vm0 = vcmp.gt.s32.totalorder %v2719_v34, 6 }
 0x250   :  { %v1346_v44 = vrot.slane %v1338_v38, %v2656_v33  ;;  %v1353_v45 = vrot.slane %v1339_v39, %v2656_v33 }
 0x251   :  { %v1293_v46 = vpop.permute.xlu1 %1292  ;;  %v1290_v47 = vpop.permute.xlu0 %1289 }
 0x252   :  { %v1386_v48 = vcombine.low %v1330_v42, %v1346_v44  ;;  %v1387_v49 = vcombine.high %v1330_v42, %v1346_v44  ;;  %v1402_v50 = vcombine.low %v1337_v43, %v1353_v45  ;;  %v1403_v51 = vcombine.high %v1337_v43, %v1353_v45 }
 0x253   :  { %v1354_v53 = vcombine.low %v1287_v36, %v1293_v46  ;;  %v1355_v54 = vcombine.high %v1287_v36, %v1293_v46 }
 0x254   :  { %v1394_v7 = vrot.slane %v1386_v48, %v2670_v59  ;;  %v1401_v8 = vrot.slane %v1387_v49, %v2670_v59  ;;  %v1410_v15 = vrot.slane %v1402_v50, %v2670_v59  ;;  %v1417_v16 = vrot.slane %v1403_v51, %v2670_v59 }
 0x255   :  { %v1299_v55 = vpop.permute.xlu1 %1298  ;;  %v1296_v56 = vpop.permute.xlu0 %1295  ;;  %v1362_v60 = vrot.slane %v1354_v53, %v2656_v33  ;;  %v1369_v61 = vrot.slane %v1355_v54, %v2656_v33 }
 0x256   :  { %v1370_v57 = vcombine.low %v1290_v47, %v1296_v56  ;;  %v1371_v58 = vcombine.high %v1290_v47, %v1296_v56 }
 0x258   :  { %v1378_v62 = vrot.slane %v1370_v57, %v2656_v33  ;;  %v1385_v63 = vrot.slane %v1371_v58, %v2656_v33 }
 0x259   :  { %v1305_v0 = vpop.permute.xlu1 %1304  ;;  %v2676_v1 = vpop.permute.xlu0 %1301 }
 0x25a   :  { %v1418_v3 = vcombine.low %v1362_v60, %v1378_v62  ;;  %v1419_v4 = vcombine.high %v1362_v60, %v1378_v62  ;;  %v1434_v5 = vcombine.low %v1369_v61, %v1385_v63  ;;  %v1435_v6 = vcombine.high %v1369_v61, %v1385_v63 }
 0x25b   :  { %v1458_v9 = vcombine.low %v1299_v55, %v1305_v0  ;;  %v1459_v10 = vcombine.high %v1299_v55, %v1305_v0 }
 0x25c   :  { %v1426_v11 = vrot.slane %v1418_v3, %v2670_v59  ;;  %v1433_v12 = vrot.slane %v1419_v4, %v2670_v59  ;;  %v1442_v13 = vrot.slane %v1434_v5, %v2670_v59  ;;  %v1449_v14 = vrot.slane %v1435_v6, %v2670_v59 }
 0x25d   :  { %v2692_v17 = vpop.permute.xlu1 %1310  ;;  %v1308_v18 = vpop.permute.xlu0 %1307  ;;  %v2738_v40 = vrot.slane %v1458_v9, %v2656_v33  ;;  %v2741_v41 = vrot.slane %v1459_v10, %v2656_v33 }
 0x25e   :  { %v2701_v21 = vcombine.low %v1394_v7, %v1426_v11  ;;  %v2703_v22 = vcombine.high %v1394_v7, %v1426_v11  ;;  %v2705_v23 = vcombine.low %v1401_v8, %v1433_v12  ;;  %v2707_v24 = vcombine.high %v1401_v8, %v1433_v12 }
 0x25f   :  { %v2709_v26 = vcombine.low %v1410_v15, %v1442_v13  ;;  %v2711_v27 = vcombine.high %v1410_v15, %v1442_v13  ;;  %v2713_v28 = vcombine.low %v1417_v16, %v1449_v14  ;;  %v2715_v30 = vcombine.high %v1417_v16, %v1449_v14  ;;  %v2819_v16 = vpop.eup %2363 }
 0x260   :  { %4266 = vst [vmem:[#allocation23_spill] sm:$0xff] %v2701_v21  ;;  %4267 = vst [vmem:[#allocation24_spill] sm:$0xff] %v2703_v22  ;;  %v1933_v39 = vmul.f32 %v2701_v21, %v2701_v21  ;;  %v1935_v43 = vmul.f32 %v2703_v22, %v2703_v22  ;;  %v1937_v44 = vmul.f32 %v2705_v23, %v2705_v23  ;;  %v2812_v14 = vsel %vm1595_vm2, %v2701_v21, 0.0 }
 0x261   :  { %4268 = vst [vmem:[#allocation25_spill] sm:$0xff] %v2705_v23  ;;  %4269 = vst [vmem:[#allocation26_spill] sm:$0xff] %v2707_v24  ;;  %v2717_v31 = vpop.permute.xlu0 %1313  ;;  %v236_v32 = vpop.permute.xlu1 %235  ;;  %v1474_v45 = vcombine.low %v2676_v1, %v1308_v18  ;;  %v1475_v46 = vcombine.high %v2676_v1, %v1308_v18  ;;  %v1939_v47 = vmul.f32 %v2707_v24, %v2707_v24  ;;  %v2817_v15 = vsel %vm1596_vm3, %v2703_v22, 0.0 }
 0x262   :  { %4270 = vst [vmem:[#allocation27_spill] sm:$0xff] %v2709_v26  ;;  %4271 = vst [vmem:[#allocation28_spill] sm:$0xff] %v2711_v27  ;;  %v1941_v48 = vmul.f32 %v2709_v26, %v2709_v26  ;;  %v1943_v49 = vmul.f32 %v2711_v27, %v2711_v27  ;;  %v1945_v50 = vmul.f32 %v2713_v28, %v2713_v28  ;;  %v2775_v57 = vsel %vm620_vm1, %v1933_v39, 0.0 }
 0x263   :  { %4272 = vst [vmem:[#allocation29_spill] sm:$0xff] %v2713_v28  ;;  %4273 = vst [vmem:[#allocation30_spill] sm:$0xff] %v2715_v30  ;;  %v1947_v53 = vmul.f32 %v2715_v30, %v2715_v30  ;;  %v1482_v54 = vrot.slane %v1474_v45, %v2656_v33  ;;  %v1489_v55 = vrot.slane %v1475_v46, %v2656_v33  ;;  %v2784_v3 = vsel %vm620_vm1, %v1935_v43, 0.0 }
 0x264   :  { %4275 = vst [vmem:[#allocation32_spill] sm:$0xff] %v2775_v57  ;;  %4276 = vst [vmem:[#allocation33_spill] sm:$0xff] %v2784_v3  ;;  %v2787_v4 = vsel %vm620_vm1, %v1937_v44, 0.0  ;;  %v2796_v8 = vsel %vm620_vm1, %v1939_v47, 0.0  ;;  %v2799_v9 = vsel %vm620_vm1, %v1941_v48, 0.0  ;;  %v2802_v10 = vsel %vm620_vm1, %v1943_v49, 0.0 }
 0x265   :  { %v242_v51 = vpop.permute.xlu0 %241  ;;  %v239_v52 = vpop.permute.xlu1 %238  ;;  %v1522_v62 = vcombine.low %v2738_v40, %v1482_v54  ;;  %v1523_v63 = vcombine.high %v2738_v40, %v1482_v54  ;;  %v1538_v0 = vcombine.low %v2741_v41, %v1489_v55  ;;  %v1539_v1 = vcombine.high %v2741_v41, %v1489_v55  ;;  %4277 = vst [vmem:[#allocation34_spill] sm:$0xff] %v2787_v4 }
 0x266   :  { %v296_v56 = vcombine.low %v236_v32, %v242_v51  ;;  %v297_v58 = vcombine.high %v236_v32, %v242_v51  ;;  %v280_v60 = vcombine.low %v2630_v25, %v239_v52  ;;  %v281_v61 = vcombine.high %v2630_v25, %v239_v52  ;;  %4278 = vst [vmem:[#allocation35_spill] sm:$0xff] %v2796_v8 }
 0x267   :  { %4279 = vst [vmem:[#allocation36_spill] sm:$0xff] %v2799_v9  ;;  %4280 = vst [vmem:[#allocation37_spill] sm:$0xff] %v2802_v10  ;;  %v2805_v11 = vsel %vm620_vm1, %v1945_v50, 0.0  ;;  %v2822_v18 = vsel %vm620_vm1, %v1947_v53, 0.0  ;;  %v2828_v32 = vstv %s2753_s6  ;;  %v2831_v39 = vstv %s2755_s15 }
 0x268   :  { %v304_v5 = vrot.slane %v296_v56, %v2656_v33  ;;  %v288_v25 = vrot.slane %v280_v60, %v2656_v33  ;;  %4281 = vst [vmem:[#allocation38_spill] sm:$0xff] %v2805_v11  ;;  %v311_v12 = vrot.slane %v297_v58, %v2656_v33  ;;  %v295_v13 = vrot.slane %v281_v61, %v2656_v33 }
 0x269   :  { %v2791_v6 = vpop.permute.xlu0 %262  ;;  %v2793_v7 = vpop.permute.xlu1 %244  ;;  %4282 = vst [vmem:[#allocation39_spill] sm:$0xff] %v2812_v14  ;;  %4283 = vst [vmem:[#allocation40_spill] sm:$0xff] %v2817_v15  ;;  %v2838_v44 = vstv %s2767_s16  ;;  %v2843_v45 = vsel %vm1597_vm4, %v2705_v23, 0.0  ;;  %v2848_v46 = vsel %vm4243_vm5, %v2707_v24, 0.0  ;;  %v2855_v48 = vsel %vm4242_vm6, %v2709_v26, 0.0 }
 0x26a   :  { %4284 = vst [vmem:[#allocation41_spill] sm:$0xff] %v2819_v16  ;;  %4285 = vst [vmem:[#allocation42_spill] sm:$0xff] %v2822_v18  ;;  %v344_v40 = vcombine.low %v288_v25, %v304_v5  ;;  %v345_v47 = vcombine.high %v288_v25, %v304_v5  ;;  %v1646_v49 = vmul.f32 %v2812_v14, %v2812_v14  ;;  %v2868_v53 = vsel %vm4241_vm7, %v2711_v27, 0.0 }
 0x26b   :  { %4287 = vst [vmem:[#allocation44_spill] sm:$0xff] %v2828_v32  ;;  %4288 = vst [vmem:[#allocation45_spill] sm:$0xff] %v2831_v39  ;;  %v1648_v50 = vmul.f32 %v2817_v15, %v2817_v15  ;;  %v360_v51 = vcombine.low %v295_v13, %v311_v12  ;;  %v361_v52 = vcombine.high %v295_v13, %v311_v12  ;;  %v2873_v54 = vsel %vm4240_vm8, %v2713_v28, 0.0 }
 0x26c   :  { %4289 = vst [vmem:[#allocation46_spill] sm:$0xff] %v2838_v44  ;;  %4290 = vst [vmem:[#allocation47_spill] sm:$0xff] %v2843_v45  ;;  %v2876_v55 = vrot.slane %v1522_v62, %v2670_v59  ;;  %v2879_v56 = vrot.slane %v1523_v63, %v2670_v59  ;;  %v2882_v58 = vrot.slane %v1538_v0, %v2670_v59  ;;  %v2894_v62 = vsel %vm4182_vm9, %v2715_v30, 0.0 }
 0x26d   :  { %v2833_v41 = vpop.permute.xlu0 %268  ;;  %v2835_v43 = vpop.permute.xlu1 %247  ;;  %4291 = vst [vmem:[#allocation48_spill] sm:$0xff] %v2848_v46  ;;  %4292 = vst [vmem:[#allocation49_spill] sm:$0xff] %v2855_v48  ;;  %v1650_v60 = vmul.f32 %v2843_v45, %v2843_v45  ;;  %v2887_v61 = vrot.slane %v1539_v1, %v2670_v59  ;;  %v1652_v63 = vmul.f32 %v2848_v46, %v2848_v46  ;;  %v1662_v13 = vsel %vm620_vm1, %v1646_v49, 0.0 }
 0x26e   :  { %4293 = vst [vmem:[#allocation50_spill] sm:$0xff] %v2868_v53  ;;  %4294 = vst [vmem:[#allocation51_spill] sm:$0xff] %v2873_v54  ;;  %v1654_v0 = vmul.f32 %v2855_v48, %v2855_v48  ;;  %v1656_v12 = vmul.f32 %v2868_v53, %v2868_v53  ;;  %v1658_v1 = vmul.f32 %v2873_v54, %v2873_v54  ;;  %v1663_v42 = vsel %vm620_vm1, %v1648_v50, 0.0 }
 0x26f   :  { %4295 = vst [vmem:[#allocation52_spill] sm:$0xff] %v2876_v55  ;;  %4296 = vst [vmem:[#allocation53_spill] sm:$0xff] %v2879_v56  ;;  %v352_v38 = vrot.slane %v344_v40, %v2670_v59  ;;  %v359_v36 = vrot.slane %v345_v47, %v2670_v59  ;;  %v368_v30 = vrot.slane %v360_v51, %v2670_v59  ;;  %v1665_v23 = vsel %vm620_vm1, %v1650_v60, 0.0 }
 0x270   :  { %4297 = vst [vmem:[#allocation54_spill] sm:$0xff] %v2882_v58  ;;  %4298 = vst [vmem:[#allocation55_spill] sm:$0xff] %v2887_v61  ;;  %v375_v28 = vrot.slane %v361_v52, %v2670_v59  ;;  %v1660_v24 = vmul.f32 %v2894_v62, %v2894_v62  ;;  %v1667_v47 = vsel %vm620_vm1, %v1652_v63, 0.0  ;;  %v2922_v50 = vsel %vm620_vm1, %v1654_v0, 0.0 }
 0x271   :  { %v275_v5 = vpop.permute.xlu0 %274  ;;  %v251_v25 = vpop.permute.xlu1 %250  ;;  %4299 = vst [vmem:[#allocation56_spill] sm:$0xff] %v2894_v62  ;;  %vm560_vm9 = vcmp.gt.s32.totalorder %v2719_v34, 7  ;;  %v2938_v0 = vstv %s2850_s4  ;;  %v2944_v22 = vstv %s2863_s5  ;;  %vm765_vm8 = vcmask 1047559  }
 0x272   :  { %v312_v27 = vcombine.low %v2793_v7, %v251_v25  ;;  %v313_v26 = vcombine.high %v2793_v7, %v251_v25  ;;  %v448_v49 = vcombine.low %v2833_v41, %v275_v5  ;;  %v1664_v7 = vadd.f32 %v1663_v42, %v1662_v13  ;;  %4300 = vst [vmem:[#allocation57_spill] sm:$0xff] %v2938_v0 }
 0x273   :  { %v2931_v42 = vsel %vm620_vm1, %v1656_v12, 0.0  ;;  %v2934_v25 = vsel %vm620_vm1, %v1658_v1, 0.0  ;;  %v449_v63 = vcombine.high %v2833_v41, %v275_v5  ;;  %v2941_v13 = vstv %s2861_s2  ;;  %4302 = vst [vmem:[#allocation59_spill] sm:$0xff] %v2944_v22 }
 0x274   :  { %4301 = vst [vmem:[#allocation58_spill] sm:$0xff] %v2941_v13  ;;  %v320_v21 = vrot.slane %v312_v27, %v2656_v33  ;;  %v327_v18 = vrot.slane %v313_v26, %v2656_v33  ;;  %v2951_v1 = vrot.slane %v448_v49, %v2656_v33  ;;  %v1666_v11 = vadd.f32 %v1665_v23, %v1664_v7 }
 0x275   :  { %v254_v40 = vpop.permute.xlu1 %253  ;;  %v1320_v51 = vpop.permute.xlu0 %1319  ;;  %v2958_v27 = vrot.slane %v449_v63, %v2656_v33  ;;  %v2965_v49 = vsel %vm620_vm1, %v1660_v24, 0.0  ;;  %vm570_vm7 = vcmp.lt.s32.totalorder %v2651_v29, %v2719_v34  ;;  %vm571_vm6 = vcmp.lt.s32.totalorder %v2651_v29, %v2722_v35 }
 0x276   :  { %v328_v52 = vcombine.low %v2835_v43, %v254_v40  ;;  %v329_v60 = vcombine.high %v2835_v43, %v254_v40  ;;  %v1506_v41 = vcombine.low %v2717_v31, %v1320_v51  ;;  %v2955_v40 = vstv %s2889_s17 }
 0x277   :  { %4303 = vst [vmem:[#allocation60_spill] sm:$0xff] %v2955_v40  ;;  %v1507_v26 = vcombine.high %v2717_v31, %v1320_v51  ;;  %v1668_v63 = vadd.f32 %v1667_v47, %v1666_v11  ;;  %vm564_vm5 = vcmp.gt.s32.totalorder %v2722_v35, 2 }
 0x278   :  { %v336_v43 = vrot.slane %v328_v52, %v2656_v33  ;;  %v343_v12 = vrot.slane %v329_v60, %v2656_v33  ;;  %v2962_v52 = vstv %s2653_s0  ;;  %s3466_s0 = smax.f32 %s2534_s1, %s1274_s3 }
 0x279   :  { %v257_v5 = vpop.permute.xlu1 %256  ;;  %4304 = vst [vmem:[#allocation61_spill] sm:$0xff] %v2962_v52  ;;  %v3043_v3 = vrot.slane %v1507_v26, %v2656_v33  ;;  %v3061_v54 = vadd.f32 %v2922_v50, %v1668_v63 }
 0x27a   :  { %v376_v10 = vcombine.low %v320_v21, %v336_v43  ;;  %v377_v9 = vcombine.high %v320_v21, %v336_v43  ;;  %v392_v8 = vcombine.low %v327_v18, %v343_v12  ;;  %v393_v37 = vcombine.high %v327_v18, %v343_v12 }
 0x27b   :  { %v2972_v18 = vrot.slane %v1506_v41, %v2656_v33  ;;  %v416_v7 = vcombine.low %v257_v5, %v2791_v6  ;;  %v417_v31 = vcombine.high %v257_v5, %v2791_v6  ;;  %4311 = vst [vmem:[#allocation68_spill] sm:$0xff] %v3043_v3  ;;  %v3242_v3 = vstv %s3140_s22 }
 0x27c   :  { %v384_v60 = vrot.slane %v376_v10, %v2670_v59  ;;  %v391_v4 = vrot.slane %v377_v9, %v2670_v59  ;;  %v400_v23 = vrot.slane %v392_v8, %v2670_v59  ;;  %v407_v21 = vrot.slane %v393_v37, %v2670_v59  ;;  %4320 = vst [vmem:[#allocation77_spill] sm:$0xff] %v3242_v3 }
 0x27d   :  { %4305 = vst [vmem:[#allocation62_spill] sm:$0xff] %v2972_v18  ;;  %v2976_v51 = vpop.permute.xlu1 %259  ;;  %v424_v61 = vrot.slane %v416_v7, %v2656_v33  ;;  %v3055_v13 = vrot.slane %v417_v31, %v2656_v33  ;;  %v3246_v19 = vadd.f32 %v2931_v42, %v3061_v54  ;;  %v3258_v42 = vstv %s3156_s26 }
 0x27e   :  { %v2978_v24 = vcombine.low %v352_v38, %v384_v60  ;;  %v2980_v43 = vcombine.high %v352_v38, %v384_v60  ;;  %v2982_v10 = vcombine.low %v359_v36, %v391_v4  ;;  %v2984_v9 = vcombine.high %v359_v36, %v391_v4  ;;  %4322 = vst [vmem:[#allocation79_spill] sm:$0xff] %v3258_v42 }
 0x27f   :  { %v2986_v8 = vcombine.low %v368_v30, %v400_v23  ;;  %v2988_v37 = vcombine.high %v368_v30, %v400_v23  ;;  %v2990_v12 = vcombine.low %v375_v28, %v407_v21  ;;  %v2992_v41 = vcombine.high %v375_v28, %v407_v21 }
 0x280   :  { %4306 = vst [vmem:[#allocation63_spill] sm:$0xff] %v2984_v9  ;;  %v2997_v6 = vsel %vm553_vm10, %v2978_v24, 0.0  ;;  %v3002_v38 = vsel %vm554_vm11, %v2980_v43, 0.0  ;;  %v3007_v36 = vsel %vm555_vm12, %v2982_v10, 0.0  ;;  %v3012_v28 = vsel %vm556_vm13, %v2984_v9, 0.0 }
 0x281   :  { %4307 = vst [vmem:[#allocation64_spill] sm:$0xff] %v2986_v8  ;;  %4308 = vst [vmem:[#allocation65_spill] sm:$0xff] %v2988_v37  ;;  %v3017_v30 = vsel %vm557_vm14, %v2986_v8, 0.0  ;;  %v3022_v4 = vsel %vm558_vm15, %v2988_v37, 0.0  ;;  %v3027_v11 = vsel %vm559_vm0, %v2990_v12, 0.0  ;;  %v3032_v47 = vsel %vm560_vm9, %v2992_v41, 0.0  ;;  %v266_v5 = vpop.permute.xlu1 %265 }
 0x282   :  { %4309 = vst [vmem:[#allocation66_spill] sm:$0xff] %v2990_v12  ;;  %4310 = vst [vmem:[#allocation67_spill] sm:$0xff] %v2992_v41  ;;  %v604_v60 = vmul.f32 %v2997_v6, %v2997_v6  ;;  %v606_v23 = vmul.f32 %v3002_v38, %v3002_v38  ;;  %v608_v21 = vmul.f32 %v3007_v36, %v3007_v36 }
 0x283   :  { %v610_v52 = vmul.f32 %v3012_v28, %v3012_v28  ;;  %v612_v57 = vmul.f32 %v3017_v30, %v3017_v30  ;;  %v614_v2 = vmul.f32 %v3022_v4, %v3022_v4  ;;  %v616_v58 = vmul.f32 %v3027_v11, %v3027_v11 }
 0x284   :  { %v621_v40 = vsel %vm620_vm1, %v604_v60, 0.0  ;;  %v622_v22 = vsel %vm620_vm1, %v606_v23, 0.0  ;;  %v618_v26 = vmul.f32 %v3032_v47, %v3032_v47  ;;  %v624_v56 = vsel %vm620_vm1, %v608_v21, 0.0 }
 0x285   :  { %v623_v0 = vadd.f32 %v622_v22, %v621_v40  ;;  %v272_v62 = vpop.permute.xlu1 %271  ;;  %v626_v7 = vsel %vm620_vm1, %v610_v52, 0.0  ;;  %v925_v60 = vmul.f32 %v2978_v24, %v2978_v24  ;;  %v927_v23 = vmul.f32 %v2980_v43, %v2980_v43 }
 0x286   :  { %v929_v31 = vmul.f32 %v2982_v10, %v2982_v10  ;;  %v628_v40 = vsel %vm620_vm1, %v612_v57, 0.0  ;;  %v630_v21 = vsel %vm620_vm1, %v614_v2, 0.0  ;;  %v931_v50 = vmul.f32 %v2984_v9, %v2984_v9 }
 0x287   :  { %v625_v22 = vadd.f32 %v624_v56, %v623_v0  ;;  %v632_v52 = vsel %vm620_vm1, %v616_v58, 0.0  ;;  %v933_v63 = vmul.f32 %v2986_v8, %v2986_v8  ;;  %v935_v53 = vmul.f32 %v2988_v37, %v2988_v37 }
 0x288   :  { %v937_v48 = vmul.f32 %v2990_v12, %v2990_v12  ;;  %v634_v2 = vsel %vm620_vm1, %v618_v26, 0.0  ;;  %v939_v56 = vmul.f32 %v2992_v41, %v2992_v41  ;;  %v3091_v58 = vsel %vm620_vm1, %v925_v60, 0.0 }
 0x289   :  { %v627_v57 = vadd.f32 %v626_v7, %v625_v22  ;;  %v278_v0 = vpop.permute.xlu1 %277  ;;  %v3094_v46 = vsel %vm620_vm1, %v927_v23, 0.0  ;;  %v3097_v45 = vsel %vm620_vm1, %v929_v31, 0.0  ;;  %v3100_v20 = vsel %vm620_vm1, %v931_v50, 0.0 }
 0x28a   :  { %v432_v7 = vcombine.low %v2976_v51, %v266_v5  ;;  %v433_v22 = vcombine.high %v2976_v51, %v266_v5  ;;  %v464_v15 = vcombine.low %v272_v62, %v278_v0  ;;  %v465_v14 = vcombine.high %v272_v62, %v278_v0 }
 0x28b   :  { %v629_v26 = vadd.f32 %v628_v40, %v627_v57  ;;  %v3105_v60 = vsel %vm620_vm1, %v933_v63, 0.0  ;;  %v3108_v23 = vsel %vm620_vm1, %v935_v53, 0.0  ;;  %v3111_v31 = vsel %vm620_vm1, %v937_v48, 0.0 }
 0x28c   :  { %v440_v50 = vrot.slane %v432_v7, %v2656_v33  ;;  %v447_v40 = vrot.slane %v433_v22, %v2656_v33  ;;  %v472_v51 = vrot.slane %v464_v15, %v2656_v33  ;;  %v479_v62 = vrot.slane %v465_v14, %v2656_v33 }
 0x28d   :  { %v631_v55 = vadd.f32 %v630_v21, %v629_v26  ;;  %v3118_v5 = vsel %vm620_vm1, %v939_v56, 0.0  ;;  %v3121_v57 = vstv %s3070_s18  ;;  %v3129_v22 = vstv %s3083_s19 }
 0x28e   :  { %v480_v63 = vcombine.low %v424_v61, %v440_v50  ;;  %v481_v53 = vcombine.high %v424_v61, %v440_v50  ;;  %4312 = vst [vmem:[#allocation69_spill] sm:$0xff] %v3121_v57  ;;  %v496_v0 = vcombine.low %v3055_v13, %v447_v40  ;;  %v497_v7 = vcombine.high %v3055_v13, %v447_v40 }
 0x28f   :  { %v633_v48 = vadd.f32 %v632_v52, %v631_v55  ;;  %v512_v21 = vcombine.low %v2951_v1, %v472_v51  ;;  %v513_v26 = vcombine.high %v2951_v1, %v472_v51  ;;  %v528_v15 = vcombine.low %v2958_v27, %v479_v62  ;;  %4313 = vst [vmem:[#allocation70_spill] sm:$0xff] %v3129_v22 }
 0x290   :  { %v3132_v14 = vstv %s3085_s20  ;;  %v488_v61 = vrot.slane %v480_v63, %v2670_v59  ;;  %v495_v50 = vrot.slane %v481_v53, %v2670_v59  ;;  %v504_v52 = vrot.slane %v496_v0, %v2670_v59 }
 0x291   :  { %4314 = vst [vmem:[#allocation71_spill] sm:$0xff] %v3132_v14  ;;  %v635_v56 = vadd.f32 %v634_v2, %v633_v48  ;;  %v520_v55 = vrot.slane %v512_v21, %v2670_v59  ;;  %v527_v13 = vrot.slane %v513_v26, %v2670_v59  ;;  %v529_v1 = vcombine.high %v2958_v27, %v479_v62 }
 0x292   :  { %v536_v40 = vrot.slane %v528_v15, %v2670_v59  ;;  %v511_v2 = vrot.slane %v497_v7, %v2670_v59  ;;  %v3255_v12 = vstv %s3138_s21 }
 0x293   :  { %v651_v51 = vmax.f32 %v635_v56, 1e-24  ;;  %v3150_v63 = vcombine.low %v488_v61, %v520_v55  ;;  %v3152_v53 = vcombine.high %v488_v61, %v520_v55  ;;  %v543_v48 = vrot.slane %v529_v1, %v2670_v59  ;;  %4321 = vst [vmem:[#allocation78_spill] sm:$0xff] %v3255_v12 }
 0x294   :  { %v3159_v27 = vcombine.low %v495_v50, %v527_v13  ;;  %v3161_v62 = vcombine.high %v495_v50, %v527_v13  ;;  %v3163_v0 = vcombine.low %v504_v52, %v536_v40  ;;  %v3169_v7 = vcombine.high %v504_v52, %v536_v40 }
 0x295   :  { %2365 = vrsqrt.f32 %v651_v51  ;;  %v3174_v21 = vsel %vm553_vm10, %v3150_v63, 0.0  ;;  %v3179_v26 = vsel %vm554_vm11, %v3152_v53, 0.0  ;;  %v3185_v15 = vcombine.low %v511_v2, %v543_v48 }
 0x296   :  { %4315 = vst [vmem:[#allocation72_spill] sm:$0xff] %v3161_v62  ;;  %4316 = vst [vmem:[#allocation73_spill] sm:$0xff] %v3163_v0  ;;  %v3187_v56 = vcombine.high %v511_v2, %v543_v48  ;;  %v3192_v61 = vsel %vm555_vm12, %v3159_v27, 0.0  ;;  %v3197_v50 = vsel %vm556_vm13, %v3161_v62, 0.0  ;;  %v3206_v55 = vsel %vm557_vm14, %v3163_v0, 0.0 }
 0x297   :  { %4317 = vst [vmem:[#allocation74_spill] sm:$0xff] %v3169_v7  ;;  %4318 = vst [vmem:[#allocation75_spill] sm:$0xff] %v3185_v15  ;;  %v3211_v52 = vsel %vm558_vm15, %v3169_v7, 0.0  ;;  %v605_v13 = vmul.f32 %v3174_v21, %v3174_v21  ;;  %v607_v1 = vmul.f32 %v3179_v26, %v3179_v26  ;;  %v3220_v40 = vsel %vm559_vm0, %v3185_v15, 0.0 }
 0x298   :  { %4319 = vst [vmem:[#allocation76_spill] sm:$0xff] %v3187_v56  ;;  %v3225_v51 = vsel %vm560_vm9, %v3187_v56, 0.0  ;;  %v609_v2 = vmul.f32 %v3192_v61, %v3192_v61  ;;  %v611_v48 = vmul.f32 %v3197_v50, %v3197_v50  ;;  %v613_v14 = vmul.f32 %v3206_v55, %v3206_v55 }
 0x299   :  { %v615_v22 = vmul.f32 %v3211_v52, %v3211_v52  ;;  %v617_v57 = vmul.f32 %v3220_v40, %v3220_v40  ;;  %v619_v44 = vmul.f32 %v3225_v51, %v3225_v51  ;;  %v636_v39 = vsel %vm620_vm1, %v605_v13, 0.0 }
 0x29a   :  { %v637_v32 = vsel %vm620_vm1, %v607_v1, 0.0  ;;  %v639_v18 = vsel %vm620_vm1, %v609_v2, 0.0  ;;  %v641_v16 = vsel %vm620_vm1, %v611_v48, 0.0  ;;  %v643_v13 = vsel %vm620_vm1, %v613_v14, 0.0 }
 0x29b   :  { %v638_v59 = vadd.f32 %v637_v32, %v636_v39  ;;  %v645_v1 = vsel %vm620_vm1, %v615_v22, 0.0  ;;  %v647_v3 = vsel %vm620_vm1, %v617_v57, 0.0  ;;  %v649_v41 = vsel %vm620_vm1, %v619_v44, 0.0 }
 0x29c   :  { %v3261_v32 = vstv %s3167_s28  ;;  %v3264_v39 = vstv %s3146_s23  ;;  %v3267_v2 = vstv %s3165_s27  ;;  %v3270_v14 = vstv %s3183_s30 }
 0x29d   :  { %v640_v54 = vadd.f32 %v639_v18, %v638_v59  ;;  %4323 = vst [vmem:[#allocation80_spill] sm:$0xff] %v3261_v32  ;;  %4324 = vst [vmem:[#allocation81_spill] sm:$0xff] %v3264_v39  ;;  %v3273_v48 = vstv %s3148_s24  ;;  %v3276_v22 = vstv %s3181_s29  ;;  %v3279_v44 = vstv %s3201_s9 }
 0x29e   :  { %4325 = vst [vmem:[#allocation82_spill] sm:$0xff] %v3267_v2  ;;  %4326 = vst [vmem:[#allocation83_spill] sm:$0xff] %v3270_v14  ;;  %v3282_v12 = vstv %s3154_s25  ;;  %v3285_v59 = vstv %s3199_s8  ;;  %vm753_vm9 = vcmask 1041409   ;;  %vm4244_vm10 = vcmask 1042434  }
 0x29f   :  { %4327 = vst [vmem:[#allocation84_spill] sm:$0xff] %v3273_v48  ;;  %4328 = vst [vmem:[#allocation85_spill] sm:$0xff] %v3276_v22  ;;  %v2366_v57 = vpop.eup %2365  ;;  %v642_v37 = vadd.f32 %v641_v16, %v640_v54  ;;  %v926_v54 = vmul.f32 %v3150_v63, %v3150_v63  ;;  %vm4246_vm11 = vcmask 1043459   ;;  %vm4245_vm12 = vcmask 1044484  }
 0x2a0   :  { %4329 = vst [vmem:[#allocation86_spill] sm:$0xff] %v3279_v44  ;;  %4330 = vst [vmem:[#allocation87_spill] sm:$0xff] %v3282_v12  ;;  %v655_v18 = vmul.f32 %v2366_v57, %v2997_v6  ;;  %v657_v32 = vmul.f32 %v2366_v57, %v3002_v38  ;;  %v659_v2 = vmul.f32 %v2366_v57, %v3007_v36  ;;  %vm562_vm13 = vcmp.gt.s32.totalorder %v2722_v35, 0 }
 0x2a1   :  { %4331 = vst [vmem:[#allocation88_spill] sm:$0xff] %v3285_v59  ;;  %v661_v14 = vmul.f32 %v2366_v57, %v3012_v28  ;;  %v663_v42 = vmul.f32 %v2366_v57, %v3017_v30  ;;  %v665_v22 = vmul.f32 %v2366_v57, %v3022_v4  ;;  %v667_v16 = vmul.f32 %v2366_v57, %v3027_v11 }
 0x2a2   :  { %v3297_v44 = vmul.f32 %v2366_v57, %v3032_v47  ;;  %v3300_v6 = vsel %vm620_vm1, %v655_v18, -inf  ;;  %v3303_v38 = vsel %vm620_vm1, %v657_v32, -inf  ;;  %v3306_v36 = vsel %vm620_vm1, %v659_v2, -inf }
 0x2a3   :  { %v3309_v28 = vsel %vm620_vm1, %v661_v14, -inf  ;;  %v3312_v30 = vsel %vm620_vm1, %v663_v42, -inf  ;;  %v3315_v4 = vsel %vm620_vm1, %v665_v22, -inf  ;;  %v3318_v11 = vsel %vm620_vm1, %v667_v16, -inf }
 0x2a4   :  { %v644_v47 = vadd.f32 %v643_v13, %v642_v37  ;;  %v928_v32 = vmul.f32 %v3152_v53, %v3152_v53  ;;  %v930_v2 = vmul.f32 %v3159_v27, %v3159_v27  ;;  %v932_v14 = vmul.f32 %v3161_v62, %v3161_v62 }
 0x2a5   :  { %v934_v42 = vmul.f32 %v3163_v0, %v3163_v0  ;;  %v936_v22 = vmul.f32 %v3169_v7, %v3169_v7  ;;  %v938_v57 = vmul.f32 %v3185_v15, %v3185_v15  ;;  %v940_v37 = vmul.f32 %v3187_v56, %v3187_v56 }
 0x2a6   :  { %v646_v13 = vadd.f32 %v645_v1, %v644_v47  ;;  %v942_v18 = vsel %vm620_vm1, %v926_v54, 0.0  ;;  %v951_v16 = vsel %vm620_vm1, %v928_v32, 0.0  ;;  %v960_v59 = vsel %vm620_vm1, %v930_v2, 0.0 }
 0x2a7   :  { %v943_v12 = vadd.f32 %v942_v18, %v3091_v58  ;;  %v952_v48 = vadd.f32 %v951_v16, %v3094_v46  ;;  %v961_v39 = vadd.f32 %v960_v59, %v3097_v45  ;;  %v969_v7 = vsel %vm620_vm1, %v932_v14, 0.0 }
 0x2a8   :  { %v648_v0 = vadd.f32 %v647_v3, %v646_v13  ;;  %v970_v15 = vadd.f32 %v969_v7, %v3100_v20  ;;  %v978_v56 = vsel %vm620_vm1, %v934_v42, 0.0  ;;  %v987_v1 = vsel %vm620_vm1, %v936_v22, 0.0 }
 0x2a9   :  { %v944_v54 = vrot.slane %v943_v12, 4  ;;  %v953_v47 = vrot.slane %v952_v48, 4  ;;  %v962_v32 = vrot.slane %v961_v39, 4  ;;  %v979_v2 = vadd.f32 %v978_v56, %v3105_v60 }
 0x2aa   :  { %v650_v8 = vadd.f32 %v649_v41, %v648_v0  ;;  %v971_v58 = vrot.slane %v970_v15, 4  ;;  %v988_v46 = vadd.f32 %v987_v1, %v3108_v23  ;;  %v996_v45 = vsel %vm620_vm1, %v938_v57, 0.0 }
 0x2ab   :  { %v945_v59 = vadd.f32 %v944_v54, %v943_v12  ;;  %v954_v14 = vadd.f32 %v953_v47, %v952_v48  ;;  %v963_v3 = vadd.f32 %v962_v32, %v961_v39  ;;  %v980_v13 = vrot.slane %v979_v2, 4 }
 0x2ac   :  { %v652_v20 = vmax.f32 %v650_v8, 1e-24  ;;  %v972_v7 = vadd.f32 %v971_v58, %v970_v15  ;;  %v989_v42 = vrot.slane %v988_v46, 4  ;;  %v997_v22 = vadd.f32 %v996_v45, %v3111_v31 }
 0x2ad   :  { %v946_v18 = vrot.slane %v945_v59, 2  ;;  %v955_v16 = vrot.slane %v954_v14, 2  ;;  %v964_v62 = vrot.slane %v963_v3, 2  ;;  %v981_v9 = vadd.f32 %v980_v13, %v979_v2 }
 0x2ae   :  { %2367 = vrsqrt.f32 %v652_v20  ;;  %v973_v41 = vrot.slane %v972_v7, 2  ;;  %v990_v60 = vadd.f32 %v989_v42, %v988_v46  ;;  %v998_v0 = vrot.slane %v997_v22, 4 }
 0x2af   :  { %v947_v23 = vadd.f32 %v946_v18, %v945_v59  ;;  %v956_v56 = vadd.f32 %v955_v16, %v954_v14  ;;  %v965_v57 = vadd.f32 %v964_v62, %v963_v3  ;;  %v982_v12 = vrot.slane %v981_v9, 2 }
 0x2b0   :  { %v974_v48 = vadd.f32 %v973_v41, %v972_v7  ;;  %v991_v39 = vrot.slane %v990_v60, 2  ;;  %v999_v1 = vadd.f32 %v998_v0, %v997_v22  ;;  %v1005_v8 = vsel %vm620_vm1, %v940_v37, 0.0 }
 0x2b1   :  { %v948_v15 = vrot.slane %v947_v23, 1  ;;  %v957_v54 = vrot.slane %v956_v56, 1  ;;  %v966_v31 = vrot.slane %v965_v57, 1  ;;  %v983_v47 = vadd.f32 %v982_v12, %v981_v9 }
 0x2b2   :  { %v975_v32 = vrot.slane %v974_v48, 1  ;;  %v992_v58 = vadd.f32 %v991_v39, %v990_v60  ;;  %v1000_v2 = vrot.slane %v999_v1, 2  ;;  %v1006_v45 = vadd.f32 %v1005_v8, %v3118_v5 }
 0x2b3   :  { %v949_v46 = vadd.f32 %v948_v15, %v947_v23  ;;  %v958_v13 = vadd.f32 %v957_v54, %v956_v56  ;;  %v3350_v59 = vadd.f32 %v966_v31, %v965_v57  ;;  %v984_v62 = vrot.slane %v983_v47, 1 }
 0x2b4   :  { %v3352_v14 = vadd.f32 %v975_v32, %v974_v48  ;;  %v993_v3 = vrot.slane %v992_v58, 1  ;;  %v1001_v20 = vadd.f32 %v1000_v2, %v999_v1  ;;  %v1007_v7 = vrot.slane %v1006_v45, 4 }
 0x2b5   :  { %v734_v37 = vsel %vm620_vm1, %v3297_v44, -inf  ;;  %v3356_v42 = vadd.f32 %v984_v62, %v983_v47  ;;  %v1013_v9 = vmax.f32 %v949_v46, 1e-24  ;;  %v1014_v22 = vmax.f32 %v958_v13, 1e-24 }
 0x2b6   :  { %v3358_v18 = vadd.f32 %v993_v3, %v992_v58  ;;  %v1002_v5 = vrot.slane %v1001_v20, 1  ;;  %v3360_v16 = vadd.f32 %v1007_v7, %v1006_v45  ;;  %v1015_v41 = vmax.f32 %v3350_v59, 1e-24 }
 0x2b7   :  { %v1016_v60 = vmax.f32 %v3352_v14, 1e-24  ;;  %v1017_v0 = vmax.f32 %v3356_v42, 1e-24  ;;  %2369 = vrsqrt.f32 %v1013_v9  ;;  %v3367_v23 = vadd.f32 %v2934_v25, %v3246_v19  ;;  %v1317_v42 = vpop.permute.xlu1 %1316 }
 0x2b8   :  { %v2368_v44 = vpop.eup %2367  ;;  %v3369_v56 = vadd.f32 %v1002_v5, %v1001_v20  ;;  %v1009_v57 = vrot.slane %v3360_v16, 2  ;;  %v1018_v12 = vmax.f32 %v3358_v18, 1e-24  ;;  %2371 = vrsqrt.f32 %v1014_v22 }
 0x2b9   :  { %v656_v48 = vmul.f32 %v2368_v44, %v3174_v21  ;;  %v658_v39 = vmul.f32 %v2368_v44, %v3179_v26  ;;  %v660_v1 = vmul.f32 %v2368_v44, %v3192_v61  ;;  %v662_v8 = vmul.f32 %v2368_v44, %v3197_v50 }
 0x2ba   :  { %v664_v15 = vmul.f32 %v2368_v44, %v3206_v55  ;;  %v666_v19 = vmul.f32 %v2368_v44, %v3211_v52  ;;  %v668_v25 = vmul.f32 %v2368_v44, %v3220_v40  ;;  %v670_v54 = vmul.f32 %v2368_v44, %v3225_v51 }
 0x2bb   :  { %v672_v31 = vsel %vm620_vm1, %v656_v48, -inf  ;;  %v681_v47 = vsel %vm620_vm1, %v658_v39, -inf  ;;  %v690_v21 = vsel %vm620_vm1, %v660_v1, -inf  ;;  %v699_v26 = vsel %vm620_vm1, %v662_v8, -inf }
 0x2bc   :  { %v673_v61 = vmax.f32 %v3300_v6, %v672_v31  ;;  %v682_v50 = vmax.f32 %v3303_v38, %v681_v47  ;;  %v691_v55 = vmax.f32 %v3306_v36, %v690_v21  ;;  %v700_v52 = vmax.f32 %v3309_v28, %v699_v26 }
 0x2bd   :  { %v708_v40 = vsel %vm620_vm1, %v664_v15, -inf  ;;  %v717_v51 = vsel %vm620_vm1, %v666_v19, -inf  ;;  %v726_v32 = vsel %vm620_vm1, %v668_v25, -inf  ;;  %v735_v58 = vsel %vm620_vm1, %v670_v54, -inf }
 0x2be   :  { %v674_v2 = vrot.slane %v673_v61, 4  ;;  %v683_v45 = vrot.slane %v682_v50, 4  ;;  %v692_v46 = vrot.slane %v691_v55, 4  ;;  %v701_v13 = vrot.slane %v700_v52, 4 }
 0x2bf   :  { %v709_v6 = vmax.f32 %v3312_v30, %v708_v40  ;;  %v718_v38 = vmax.f32 %v3315_v4, %v717_v51  ;;  %v727_v36 = vmax.f32 %v3318_v11, %v726_v32  ;;  %v736_v28 = vmax.f32 %v734_v37, %v735_v58 }
 0x2c0   :  { %v675_v62 = vmax.f32 %v673_v61, %v674_v2  ;;  %v684_v3 = vmax.f32 %v682_v50, %v683_v45  ;;  %v693_v20 = vmax.f32 %v691_v55, %v692_v46  ;;  %v702_v7 = vmax.f32 %v700_v52, %v701_v13 }
 0x2c1   :  { %v3396_v9 = vpop.eup %2369  ;;  %v710_v22 = vrot.slane %v709_v6, 4  ;;  %v719_v5 = vrot.slane %v718_v38, 4  ;;  %v728_v44 = vrot.slane %v727_v36, 4  ;;  %v737_v48 = vrot.slane %v736_v28, 4 }
 0x2c2   :  { %v3398_v39 = vpop.eup %2371  ;;  %v676_v30 = vrot.slane %v675_v62, 2  ;;  %v685_v1 = vrot.slane %v684_v3, 2  ;;  %v694_v4 = vrot.slane %v693_v20, 2  ;;  %v703_v8 = vrot.slane %v702_v7, 2 }
 0x2c3   :  { %v711_v11 = vmax.f32 %v709_v6, %v710_v22  ;;  %v720_v37 = vmax.f32 %v718_v38, %v719_v5  ;;  %v729_v15 = vmax.f32 %v727_v36, %v728_v44  ;;  %v738_v19 = vmax.f32 %v736_v28, %v737_v48 }
 0x2c4   :  { %vm4247_vm14 = vcmask 1045509   ;;  %v677_v25 = vmax.f32 %v675_v62, %v676_v30  ;;  %v686_v54 = vmax.f32 %v684_v3, %v685_v1  ;;  %v695_v31 = vmax.f32 %v693_v20, %v694_v4 }
 0x2c5   :  { %v704_v47 = vmax.f32 %v702_v7, %v703_v8  ;;  %vm563_vm15 = vcmp.gt.s32.totalorder %v2722_v35, 1  ;;  %vm763_vm0 = vcmask 1046534   ;;  %v712_v21 = vrot.slane %v711_v11, 2 }
 0x2c6   :  { %v721_v26 = vrot.slane %v720_v37, 2  ;;  %v730_v61 = vrot.slane %v729_v15, 2  ;;  %v739_v50 = vrot.slane %v738_v19, 2  ;;  %v678_v55 = vrot.slane %v677_v25, 1 }
 0x2c7   :  { %v687_v52 = vrot.slane %v686_v54, 1  ;;  %v696_v40 = vrot.slane %v695_v31, 1  ;;  %v705_v51 = vrot.slane %v704_v47, 1  ;;  %v713_v32 = vmax.f32 %v711_v11, %v712_v21 }
 0x2c8   :  { %v722_v58 = vmax.f32 %v720_v37, %v721_v26  ;;  %v731_v2 = vmax.f32 %v729_v15, %v730_v61  ;;  %v740_v45 = vmax.f32 %v738_v19, %v739_v50  ;;  %v679_v46 = vmax.f32 %v677_v25, %v678_v55 }
 0x2c9   :  { %v688_v13 = vmax.f32 %v686_v54, %v687_v52  ;;  %v697_v6 = vmax.f32 %v695_v31, %v696_v40  ;;  %v706_v38 = vmax.f32 %v704_v47, %v705_v51  ;;  %v714_v36 = vrot.slane %v713_v32, 1 }
 0x2ca   :  { %v723_v28 = vrot.slane %v722_v58, 1  ;;  %v732_v62 = vrot.slane %v731_v2, 1  ;;  %v741_v3 = vrot.slane %v740_v45, 1  ;;  %v1010_v7 = vadd.f32 %v1009_v57, %v3360_v16 }
 0x2cb   :  { %v754_v20 = vsel %vm753_vm9, %v688_v13, %v679_v46  ;;  %v1019_v22 = vmax.f32 %v3369_v56, 1e-24  ;;  %2373 = vrsqrt.f32 %v1015_v41  ;;  %v715_v5 = vmax.f32 %v713_v32, %v714_v36  ;;  %v4333_v13 = vld [vmem:[#allocation72_spill] sm:$0xff] }
 0x2cc   :  { %v724_v44 = vmax.f32 %v722_v58, %v723_v28  ;;  %v733_v48 = vmax.f32 %v731_v2, %v732_v62  ;;  %v742_v30 = vmax.f32 %v740_v45, %v741_v3  ;;  %v756_v1 = vsel %vm4244_vm10, %v697_v6, %v754_v20  ;;  %v4332_v45 = vld [vmem:[#allocation63_spill] sm:$0xff]  ;;  %v4335_v62 = vld [vmem:[#allocation64_spill] sm:$0xff] }
 0x2cd   :  { %v1011_v4 = vrot.slane %v1010_v7, 1  ;;  %2375 = vrsqrt.f32 %v1016_v60  ;;  %v1029_v16 = vmul.f32 %v3396_v9, %v2978_v24  ;;  %v758_v56 = vsel %vm4246_vm11, %v706_v38, %v756_v1 }
 0x2ce   :  { %2377 = vrsqrt.f32 %v1017_v0  ;;  %v1030_v59 = vmul.f32 %v3396_v9, %v3150_v63  ;;  %v1031_v41 = vmul.f32 %v3398_v39, %v2980_v43  ;;  %vm565_vm10 = vcmp.gt.s32.totalorder %v2722_v35, 3 }
 0x2cf   :  { %v760_v57 = vsel %vm4245_vm12, %v715_v5, %v758_v56  ;;  %v1012_v14 = vadd.f32 %v1011_v4, %v1010_v7  ;;  %2379 = vrsqrt.f32 %v1018_v12  ;;  %v1032_v24 = vmul.f32 %v3398_v39, %v3152_v53  ;;  %v4339_v56 = vld [vmem:[#allocation66_spill] sm:$0xff] }
 0x2d0   :  { %v762_v60 = vsel %vm4247_vm14, %v724_v44, %v760_v57  ;;  %2381 = vrsqrt.f32 %v1019_v22  ;;  %v1061_v43 = vsel %vm562_vm13, %v1029_v16, -inf  ;;  %v1062_v63 = vsel %vm562_vm13, %v1030_v59, -inf  ;;  %v4336_v22 = vld [vmem:[#allocation73_spill] sm:$0xff] }
 0x2d1   :  { %vm566_vm12 = vcmp.gt.s32.totalorder %v2722_v35, 4  ;;  %vm567_vm11 = vcmp.gt.s32.totalorder %v2722_v35, 5  ;;  %v764_v18 = vsel %vm763_vm0, %v733_v48, %v762_v60  ;;  %v1020_v0 = vmax.f32 %v1012_v14, 1e-24  ;;  %v4337_v44 = vld [vmem:[#allocation65_spill] sm:$0xff] }
 0x2d2   :  { %v1063_v53 = vsel %vm563_vm15, %v1031_v41, -inf  ;;  %v1064_v12 = vsel %vm563_vm15, %v1032_v24, -inf  ;;  %vm568_vm14 = vcmp.gt.s32.totalorder %v2722_v35, 6  ;;  %v766_v9 = vsel %vm765_vm8, %v742_v30, %v764_v18  ;;  %v4338_v30 = vld [vmem:[#allocation74_spill] sm:$0xff]  ;;  %v4340_v41 = vld [vmem:[#allocation75_spill] sm:$0xff] }
 0x2d3   :  { %v3450_v39 = vstv %s3406_s10  ;;  %v3453_v8 = vsel %vm620_vm1, %v1061_v43, -inf  ;;  %v1490_v11 = vcombine.low %v2692_v17, %v1317_v42  ;;  %v768_v37 = vsel %vm571_vm6, %v766_v9, 0.0 }
 0x2d4   :  { %v781_v15 = vsel %vm570_vm7, %v766_v9, -inf  ;;  %2383 = vrsqrt.f32 %v1020_v0  ;;  %v3463_v19 = vsel %vm620_vm1, %v1063_v53, -inf  ;;  %v769_v25 = vsel %vm620_vm1, %v768_v37, 0.0 }
 0x2d5   :  { %vm783_vm13 = vcmp.lt.s32.totalorder %v781_v15, 0  ;;  %v784_v54 = vxor.u32 2147483647, %v781_v15  ;;  %v3471_v31 = vadd.f32 %v2965_v49, %v3367_v23  ;;  %v2374_v47 = vpop.eup %2373  ;;  %vm569_vm6 = vcmp.gt.s32.totalorder %v2722_v35, 7 }
 0x2d6   :  { %v770_v34 = vrot.slane %v769_v25, 4  ;;  %v3475_v21 = vsel %vm620_vm1, %v1062_v63, -inf  ;;  %v3478_v26 = vsel %vm620_vm1, %v1064_v12, -inf  ;;  %v1491_v61 = vcombine.high %v2692_v17, %v1317_v42  ;;  %v4341_v12 = vld [vmem:[#allocation67_spill] sm:$0xff] }
 0x2d7   :  { %v785_v50 = vsel %vm783_vm13, %v784_v54, %v781_v15  ;;  %v1033_v55 = vmul.f32 %v2374_v47, %v2982_v10  ;;  %v1034_v52 = vmul.f32 %v2374_v47, %v3159_v27  ;;  %v1810_v40 = vstv %s3466_s0  ;;  %v2376_v49 = vpop.eup %2375 }
 0x2d8   :  { %v771_v23 = vadd.f32 %v770_v34, %v769_v25  ;;  %v786_v51 = vand.u32 4294967288, %v785_v50  ;;  %v1692_v32 = vmax.f32 %v3471_v31, 1e-24  ;;  %v3486_v58 = vrot.slane %v1490_v11, %v2656_v33  ;;  %v2378_v2 = vpop.eup %2377  ;;  %v4342_v11 = vld [vmem:[#allocation76_spill] sm:$0xff] }
 0x2d9   :  { %v1035_v46 = vmul.f32 %v2376_v49, %v4332_v45  ;;  %v1036_v6 = vmul.f32 %v2376_v49, %v4333_v13  ;;  %v1066_v17 = vsel %vm564_vm5, %v1034_v52, -inf  ;;  %v3493_v10 = vrot.slane %v1491_v61, %v2656_v33  ;;  %v2380_v27 = vpop.eup %2379  ;;  %v4343_v49 = vld [vmem:[#allocation41_spill] sm:$0xff] }
 0x2da   :  { %v772_v38 = vrot.slane %v771_v23, 2  ;;  %v4334_v36 = vsub.s32 7, %v2651_v29  ;;  %v1037_v3 = vmul.f32 %v2378_v2, %v4335_v62  ;;  %v1065_v20 = vsel %vm564_vm5, %v1033_v55, -inf  ;;  %v2382_v7 = vpop.eup %2381 }
 0x2db   :  { %vm1262_vm7 = vcmask 8192   ;;  %v1038_v5 = vmul.f32 %v2378_v2, %v4336_v22  ;;  %v1039_v48 = vmul.f32 %v2380_v27, %v4337_v44  ;;  %v1040_v33 = vmul.f32 %v2380_v27, %v4338_v30 }
 0x2dc   :  { %v3497_v28 = vor.u32 %v4334_v36, %v786_v51  ;;  %v1067_v1 = vsel %vm565_vm10, %v1035_v46, -inf  ;;  %v773_v4 = vadd.f32 %v772_v38, %v771_v23  ;;  %v1041_v59 = vmul.f32 %v2382_v7, %v4339_v56 }
 0x2dd   :  { %v1042_v57 = vmul.f32 %v2382_v7, %v4340_v41  ;;  %v1068_v24 = vsel %vm565_vm10, %v1036_v6, -inf  ;;  %v1069_v42 = vsel %vm566_vm12, %v1037_v3, -inf  ;;  %v1071_v60 = vsel %vm567_vm11, %v1039_v48, -inf }
 0x2de   :  { %v789_v16 = vsel %vm620_vm1, %v3497_v28, 2147483648  ;;  %v2384_v43 = vpop.eup %2383  ;;  %v774_v63 = vrot.slane %v773_v4, 1  ;;  %v1072_v18 = vsel %vm567_vm11, %v1040_v33, -inf  ;;  %v1073_v0 = vsel %vm568_vm14, %v1041_v59, -inf }
 0x2df   :  { %v790_v14 = vrot.slane %v789_v16, 4  ;;  %v1074_v53 = vsel %vm568_vm14, %v1042_v57, -inf  ;;  %v1043_v9 = vmul.f32 %v2384_v43, %v4341_v12  ;;  %v1044_v37 = vmul.f32 %v2384_v43, %v4342_v11  ;;  %v4348_v11 = vld [vmem:[#allocation44_spill] sm:$0xff] }
 0x2e0   :  { %v1079_v15 = vsel %vm620_vm1, %v1065_v20, -inf  ;;  %v775_v25 = vadd.f32 %v774_v63, %v773_v4  ;;  %v1081_v34 = vsel %vm620_vm1, %v1067_v1, -inf  ;;  %v1070_v50 = vsel %vm566_vm12, %v1038_v5, -inf  ;;  %v4345_v63 = vld [vmem:[#allocation20_spill] sm:$0xff] }
 0x2e1   :  { %vm791_vm5 = vcmp.gt.s32.totalorder %v789_v16, %v790_v14  ;;  %v1080_v47 = vmax.f32 %v3453_v8, %v1079_v15  ;;  %v1075_v55 = vsel %vm569_vm6, %v1043_v9, -inf  ;;  %v1082_v52 = vmax.f32 %v3463_v19, %v1081_v34 }
 0x2e2   :  { %v792_v54 = vsel %vm791_vm5, %v789_v16, %v790_v14  ;;  %v3534_v23 = vmul.f32 %v4343_v49, %v775_v25  ;;  %v1076_v51 = vsel %vm569_vm6, %v1044_v37, -inf  ;;  %v1083_v2 = vsel %vm620_vm1, %v1069_v42, -inf  ;;  %v4351_v49 = vld [vmem:[#allocation46_spill] sm:$0xff] }
 0x2e3   :  { %v793_v61 = vrot.slane %v792_v54, 2  ;;  %v1085_v8 = vsel %vm620_vm1, %v1071_v60, -inf  ;;  %v1084_v45 = vmax.f32 %v1080_v47, %v1083_v2  ;;  %v1087_v13 = vsel %vm620_vm1, %v1073_v0, -inf }
 0x2e4   :  { %v1086_v46 = vmax.f32 %v1082_v52, %v1085_v8  ;;  %v1089_v27 = vsel %vm620_vm1, %v1075_v55, -inf  ;;  %v1094_v19 = vsel %vm620_vm1, %v1066_v17, -inf  ;;  %v1096_v38 = vsel %vm620_vm1, %v1068_v24, -inf  ;;  %2302 = vst.msk [vmem:[%s4175_s7 + $0x4] sm:$0x1] %vm1262_vm7, %v3534_v23  ;;  %v4350_v55 = vld [vmem:[#allocation45_spill] sm:$0xff] }
 0x2e5   :  { %vm794_vm10 = vcmp.gt.s32.totalorder %v792_v54, %v793_v61  ;;  %v1088_v36 = vmax.f32 %v1084_v45, %v1087_v13  ;;  %v1095_v3 = vmax.f32 %v3475_v21, %v1094_v19  ;;  %v1097_v20 = vmax.f32 %v3478_v26, %v1096_v38  ;;  %v4344_v21 = vld [vmem:[#allocation62_spill] sm:$0xff]  ;;  %v4355_v19 = vld [vmem:[#allocation39_spill] sm:$0xff] }
 0x2e6   :  { %v795_v6 = vsel %vm794_vm10, %v792_v54, %v793_v61  ;;  %v1090_v62 = vmax.f32 %v1086_v46, %v1089_v27  ;;  %v1098_v7 = vsel %vm620_vm1, %v1070_v50, -inf  ;;  %v1100_v22 = vsel %vm620_vm1, %v1072_v18, -inf  ;;  %v4346_v18 = vld [vmem:[#allocation43_spill] sm:$0xff] }
 0x2e7   :  { %v796_v35 = vrot.slane %v795_v6, 1  ;;  %v1102_v17 = vsel %vm620_vm1, %v1074_v53, -inf  ;;  %v1099_v44 = vmax.f32 %v1095_v3, %v1098_v7  ;;  %2385 = vrsqrt.f32 %v1692_v32  ;;  %v4347_v53 = vld [vmem:[#allocation68_spill] sm:$0xff] }
 0x2e8   :  { %v1091_v5 = vmax.f32 %v1088_v36, %v1090_v62  ;;  %v1101_v30 = vmax.f32 %v1097_v20, %v1100_v22  ;;  %v1104_v33 = vsel %vm620_vm1, %v1076_v51, -inf  ;;  %v1554_v26 = vcombine.low %v3486_v58, %v4344_v21  ;;  %v4352_v51 = vld [vmem:[#allocation52_spill] sm:$0xff] }
 0x2e9   :  { %vm797_vm11 = vcmp.gt.s32.totalorder %v795_v6, %v796_v35  ;;  %v1103_v4 = vmax.f32 %v1099_v44, %v1102_v17  ;;  %v1555_v16 = vcombine.high %v3486_v58, %v4344_v21  ;;  %2387 = vrcp.f32 %v1810_v40  ;;  %v4356_v20 = vld [vmem:[#allocation40_spill] sm:$0xff]  ;;  %v4358_v17 = vld [vmem:[#allocation22_spill] sm:$0xff] }
 0x2ea   :  { %v798_v48 = vsel %vm797_vm11, %v795_v6, %v796_v35  ;;  %v1105_v59 = vmax.f32 %v1101_v30, %v1104_v33  ;;  %vm1120_vm14 = vcmp.lt.s32.totalorder %v1091_v5, 0  ;;  %v1122_v31 = vxor.u32 2147483647, %v1091_v5  ;;  %v4361_v33 = vld [vmem:[#allocation48_spill] sm:$0xff] }
 0x2eb   :  { %v799_v1 = vand.u32 4294967288, %v798_v48  ;;  %vm804_vm12 = vcmp.eq.s32.totalorder %v3497_v28, %v798_v48  ;;  %v1107_v24 = vsel %vm620_vm1, %v1091_v5, 0.0  ;;  %v1562_v58 = vrot.slane %v1554_v26, %v4345_v63  ;;  %v4360_v48 = vld [vmem:[#allocation47_spill] sm:$0xff]  ;;  %v4362_v26 = vld [vmem:[#allocation49_spill] sm:$0xff] }
 0x2ec   :  { %v805_v56 = vsel %vm804_vm12, 2147483648, %v3497_v28  ;;  %v1106_v14 = vmax.f32 %v1103_v4, %v1105_v59  ;;  %v1124_v42 = vsel %vm1120_vm14, %v1122_v31, %v1091_v5  ;;  %v3569_v28 = vrot.slane %v1555_v16, %v4345_v63  ;;  %v4363_v16 = vld [vmem:[#allocation50_spill] sm:$0xff]  ;;  %v4364_v31 = vld [vmem:[#allocation51_spill] sm:$0xff] }
 0x2ed   :  { %vm800_vm15 = vcmp.lt.s32.totalorder %v799_v1, 0  ;;  %v801_v32 = vxor.u32 2147483647, %v799_v1  ;;  %v806_v41 = vsel %vm620_vm1, %v805_v56, 2147483648  ;;  %v1127_v43 = vand.u32 4294967280, %v1124_v42 }
 0x2ee   :  { %v807_v57 = vrot.slane %v806_v41, 4  ;;  %v1570_v12 = vcombine.low %v3493_v10, %v4347_v53  ;;  %v1571_v40 = vcombine.high %v3493_v10, %v4347_v53  ;;  %v1108_v15 = vsel %vm620_vm1, %v1106_v14, 0.0 }
 0x2ef   :  { %v802_v60 = vsel %vm800_vm15, %v801_v32, %v799_v1  ;;  %vm1121_vm6 = vcmp.lt.s32.totalorder %v1106_v14, 0  ;;  %v1109_v54 = vadd.f32 %v1108_v15, %v1107_v24  ;;  %v1123_v47 = vxor.u32 2147483647, %v1106_v14 }
 0x2f0   :  { %vm808_vm13 = vcmp.gt.s32.totalorder %v806_v41, %v807_v57  ;;  %v3572_v0 = vmul.f32 %v4346_v18, %v802_v60  ;;  %v3579_v37 = vmul.f32 %v4348_v11, %v802_v60  ;;  %v4349_v34 = vsub.s32 15, %v2651_v29  ;;  %v4393_v29 = vld [vmem:[#allocation77_spill] sm:$0xff] }
 0x2f1   :  { %v809_v9 = vsel %vm808_vm13, %v806_v41, %v807_v57  ;;  %v2386_v50 = vpop.eup %2385  ;;  %v3587_v52 = vmul.f32 %v4350_v55, %v802_v60  ;;  %v3590_v10 = vmul.f32 %v4351_v49, %v802_v60  ;;  %v3593_v2 = vcombine.low %v4352_v51, %v1562_v58 }
 0x2f2   :  { %v810_v25 = vrot.slane %v809_v9, 2  ;;  %v3584_v61 = vor.u32 %v4349_v34, %v1127_v43  ;;  %v3596_v8 = vcombine.high %v4352_v51, %v1562_v58  ;;  %v1110_v45 = vrot.slane %v1109_v54, 4 }
 0x2f3   :  { %4353 = vst [vmem:[#allocation63_spill] sm:$0xff] %v3593_v2  ;;  %v1125_v46 = vsel %vm1121_vm6, %v1123_v47, %v1106_v14  ;;  %v1578_v13 = vrot.slane %v1570_v12, %v4345_v63  ;;  %v1696_v38 = vmul.f32 %v2386_v50, %v4355_v19  ;;  %v1585_v35 = vrot.slane %v1571_v40, %v4345_v63  ;;  %v3604_v22 = vpop.eup %2387  ;;  %v4365_v14 = vld [vmem:[#allocation56_spill] sm:$0xff]  ;;  %v4373_v19 = vld [vmem:[#allocation58_spill] sm:$0xff] }
 0x2f4   :  { %4354 = vst [vmem:[#allocation72_spill] sm:$0xff] %v3596_v8  ;;  %vm811_vm5 = vcmp.gt.s32.totalorder %v809_v9, %v810_v25  ;;  %v1128_v27 = vand.u32 4294967280, %v1125_v46  ;;  %v1111_v62 = vadd.f32 %v1110_v45, %v1109_v54  ;;  %v1133_v3 = vsel %vm620_vm1, %v3584_v61, 2147483648  ;;  %4357 = vst [vmem:[#allocation64_spill] sm:$0xff] %v3604_v22  ;;  %v4370_v45 = vld [vmem:[#allocation53_spill] sm:$0xff] }
 0x2f5   :  { %v812_v6 = vsel %vm811_vm5, %v809_v9, %v810_v25  ;;  %v1698_v7 = vmul.f32 %v2386_v50, %v4356_v20  ;;  %v4359_v5 = vsub.s32 15, %v4358_v17  ;;  %v1700_v30 = vmul.f32 %v2386_v50, %v4360_v48  ;;  %v4375_v20 = vld [vmem:[#allocation60_spill] sm:$0xff]  ;;  %v4392_v17 = vld [vmem:[#allocation71_spill] sm:$0xff] }
 0x2f6   :  { %v813_v36 = vrot.slane %v812_v6, 1  ;;  %v1702_v21 = vmul.f32 %v2386_v50, %v4361_v33  ;;  %v1704_v1 = vmul.f32 %v2386_v50, %v4362_v26  ;;  %v1112_v4 = vrot.slane %v1111_v62, 2 }
 0x2f7   :  { %v3608_v44 = vor.u32 %v4359_v5, %v1128_v27  ;;  %v1706_v59 = vmul.f32 %v2386_v50, %v4363_v16  ;;  %v1708_v32 = vmul.f32 %v2386_v50, %v4364_v31  ;;  %v1710_v24 = vmul.f32 %v2386_v50, %v4365_v14 }
 0x2f8   :  { %vm814_vm10 = vcmp.gt.s32.totalorder %v812_v6, %v813_v36  ;;  %v3619_v42 = vsel %vm620_vm1, %v1696_v38, -inf  ;;  %v1113_v43 = vadd.f32 %v1112_v4, %v1111_v62  ;;  %v3622_v53 = vsel %vm620_vm1, %v1698_v7, -inf }
 0x2f9   :  { %v815_v41 = vsel %vm814_vm10, %v812_v6, %v813_v36  ;;  %v1134_v57 = vsel %vm620_vm1, %v3608_v44, 2147483648  ;;  %v3625_v12 = vsel %vm620_vm1, %v1700_v30, -inf  ;;  %v3629_v47 = vsel %vm620_vm1, %v1702_v21, -inf  ;;  %v4372_v6 = vld [vmem:[#allocation57_spill] sm:$0xff]  ;;  %v4374_v36 = vld [vmem:[#allocation59_spill] sm:$0xff] }
 0x2fa   :  { %v816_v60 = vand.u32 4294967288, %v815_v41  ;;  %vm821_vm11 = vcmp.eq.s32.totalorder %v805_v56, %v815_v41  ;;  %vm1135_vm12 = vcmp.gt.s32.totalorder %v1133_v3, %v1134_v57  ;;  %4366 = vst [vmem:[#allocation73_spill] sm:$0xff] %v3625_v12  ;;  %v1114_v15 = vrot.slane %v1113_v43, 1  ;;  %4367 = vst [vmem:[#allocation65_spill] sm:$0xff] %v3629_v47 }
 0x2fb   :  { %v822_v63 = vsel %vm821_vm11, 2147483648, %v805_v56  ;;  %v1136_v58 = vsel %vm1135_vm12, %v1133_v3, %v1134_v57  ;;  %v3632_v34 = vsel %vm620_vm1, %v1704_v1, -inf  ;;  %v3635_v51 = vsel %vm620_vm1, %v1706_v59, -inf }
 0x2fc   :  { %vm817_vm14 = vcmp.lt.s32.totalorder %v816_v60, 0  ;;  %v818_v40 = vxor.u32 2147483647, %v816_v60  ;;  %v823_v9 = vsel %vm620_vm1, %v822_v63, 2147483648  ;;  %v1137_v54 = vrot.slane %v1136_v58, 4  ;;  %4368 = vst [vmem:[#allocation74_spill] sm:$0xff] %v3632_v34 }
 0x2fd   :  { %v824_v25 = vrot.slane %v823_v9, 4  ;;  %v1115_v50 = vadd.f32 %v1114_v15, %v1113_v43  ;;  %4369 = vst [vmem:[#allocation66_spill] sm:$0xff] %v3635_v51  ;;  %v3639_v46 = vcombine.low %v4370_v45, %v3569_v28  ;;  %v3649_v33 = vsel %vm620_vm1, %v1708_v32, -inf }
 0x2fe   :  { %v819_v56 = vsel %vm817_vm14, %v818_v40, %v816_v60  ;;  %vm1138_vm13 = vcmp.gt.s32.totalorder %v1136_v58, %v1137_v54  ;;  %4377 = vst [vmem:[#allocation76_spill] sm:$0xff] %v3649_v33  ;;  %v3652_v21 = vsel %vm620_vm1, %v1710_v24, -inf  ;;  %v3662_v4 = vcombine.high %v4370_v45, %v3569_v28  ;;  %v4384_v60 = vld [vmem:[#allocation21_spill] sm:$0xff] }
 0x2ff   :  { %4371 = vst [vmem:[#allocation75_spill] sm:$0xff] %v3639_v46  ;;  %vm825_vm15 = vcmp.gt.s32.totalorder %v823_v9, %v824_v25  ;;  %v858_v27 = vmul.f32 %v4372_v6, %v819_v56  ;;  %v874_v38 = vmul.f32 %v4373_v19, %v819_v56  ;;  %v891_v62 = vmul.f32 %v4374_v36, %v819_v56 }
 0x300   :  { %v826_v3 = vsel %vm825_vm15, %v823_v9, %v824_v25  ;;  %v908_v7 = vmul.f32 %v4375_v20, %v819_v56  ;;  %v3645_v5 = vmul.f32 0.0625, %v1115_v50  ;;  %4378 = vst [vmem:[#allocation41_spill] sm:$0xff] %v3652_v21  ;;  %v1139_v1 = vsel %vm1138_vm13, %v1136_v58, %v1137_v54  ;;  %4379 = vst [vmem:[#allocation62_spill] sm:$0xff] %v3662_v4 }
 0x301   :  { %v827_v48 = vrot.slane %v826_v3, 2  ;;  %v859_v30 = vadd.f32 %v858_v27, %v3572_v0  ;;  %v875_v26 = vadd.f32 %v874_v38, %v3579_v37  ;;  %v4380_v0 = vld [vmem:[#allocation54_spill] sm:$0xff]  ;;  %v1140_v59 = vrot.slane %v1139_v1, 2  ;;  %v4383_v37 = vld [vmem:[#allocation55_spill] sm:$0xff] }
 0x302   :  { %4376 = vst [vmem:[#allocation67_spill] sm:$0xff] %v3645_v5  ;;  %2303 = vst.msk [vmem:[%s4175_s7 + $0x6] sm:$0x1] %vm1262_vm7, %v3645_v5  ;;  %v3665_v16 = vcombine.low %v4380_v0, %v1578_v13  ;;  %v3668_v31 = vcombine.high %v4380_v0, %v1578_v13  ;;  %v3671_v32 = vcombine.low %v4383_v37, %v1585_v35  ;;  %v3681_v43 = vsel %vm1595_vm2, %v3593_v2, 0.0 }
 0x303   :  { %vm828_vm6 = vcmp.gt.s32.totalorder %v826_v3, %v827_v48  ;;  %v892_v57 = vadd.f32 %v891_v62, %v3587_v52  ;;  %v909_v14 = vadd.f32 %v908_v7, %v3590_v10  ;;  %v3676_v24 = vcombine.high %v4383_v37, %v1585_v35 }
 0x304   :  { %4381 = vst [vmem:[#allocation20_spill] sm:$0xff] %v3665_v16  ;;  %4382 = vst [vmem:[#allocation68_spill] sm:$0xff] %v3668_v31  ;;  %v829_v41 = vsel %vm828_vm6, %v826_v3, %v827_v48  ;;  %vm1141_vm5 = vcmp.gt.s32.totalorder %v1139_v1, %v1140_v59  ;;  %v3686_v13 = vsel %vm1596_vm3, %v3596_v8, 0.0  ;;  %v3691_v52 = vsel %vm1597_vm4, %v3639_v46, 0.0 }
 0x305   :  { %v830_v28 = vrot.slane %v829_v41, 1  ;;  %v1142_v58 = vsel %vm1141_vm5, %v1139_v1, %v1140_v59  ;;  %vm4385_vm10 = vcmp.gt.s32.totalorder %v4384_v60, 3  ;;  %vm4386_vm2 = vcmp.gt.s32.totalorder %v4384_v60, 4 }
 0x306   :  { %v3696_v10 = vsel %vm4385_vm10, %v3662_v4, 0.0  ;;  %v3701_v35 = vsel %vm4386_vm2, %v3665_v16, 0.0  ;;  %v1143_v40 = vrot.slane %v1142_v58, 1  ;;  %vm4387_vm3 = vcmp.gt.s32.totalorder %v4384_v60, 5 }
 0x307   :  { %vm831_vm11 = vcmp.gt.s32.totalorder %v829_v41, %v830_v28  ;;  %v3706_v9 = vsel %vm4387_vm3, %v3668_v31, 0.0  ;;  %vm4388_vm4 = vcmp.gt.s32.totalorder %v4384_v60, 6  ;;  %vm4389_vm12 = vcmp.gt.s32.totalorder %v4384_v60, 7 }
 0x308   :  { %v3711_v15 = vsel %vm4388_vm4, %v3671_v32, 0.0  ;;  %v832_v25 = vsel %vm831_vm11, %v829_v41, %v830_v28  ;;  %v3716_v54 = vsel %vm4389_vm12, %v3676_v24, 0.0  ;;  %v1647_v56 = vmul.f32 %v3681_v43, %v3681_v43 }
 0x309   :  { %v1649_v50 = vmul.f32 %v3686_v13, %v3686_v13  ;;  %v833_v45 = vand.u32 4294967288, %v832_v25  ;;  %vm838_vm14 = vcmp.eq.s32.totalorder %v822_v63, %v832_v25  ;;  %vm1144_vm15 = vcmp.gt.s32.totalorder %v1142_v58, %v1143_v40  ;;  %v4391_v25 = vld [vmem:[#allocation70_spill] sm:$0xff] }
 0x30a   :  { %v1651_v27 = vmul.f32 %v3691_v52, %v3691_v52  ;;  %v839_v38 = vsel %vm838_vm14, 2147483648, %v822_v63  ;;  %v1145_v62 = vsel %vm1144_vm15, %v1142_v58, %v1143_v40  ;;  %v1653_v3 = vmul.f32 %v3696_v10, %v3696_v10  ;;  %v4390_v58 = vld [vmem:[#allocation69_spill] sm:$0xff] }
 0x30b   :  { %v1655_v7 = vmul.f32 %v3701_v35, %v3701_v35  ;;  %vm834_vm13 = vcmp.lt.s32.totalorder %v833_v45, 0  ;;  %v835_v48 = vxor.u32 2147483647, %v833_v45  ;;  %v840_v1 = vsel %vm620_vm1, %v839_v38, 2147483648 }
 0x30c   :  { %v1146_v0 = vand.u32 4294967280, %v1145_v62  ;;  %v841_v59 = vrot.slane %v840_v1, 4  ;;  %vm1151_vm6 = vcmp.eq.s32.totalorder %v3584_v61, %v1145_v62  ;;  %vm1152_vm5 = vcmp.eq.s32.totalorder %v3608_v44, %v1145_v62 }
 0x30d   :  { %v1657_v63 = vmul.f32 %v3706_v9, %v3706_v9  ;;  %v836_v37 = vsel %vm834_vm13, %v835_v48, %v833_v45  ;;  %v3734_v28 = vsel %vm1151_vm6, 2147483648, %v3584_v61  ;;  %v3741_v21 = vsel %vm1152_vm5, 2147483648, %v3608_v44 }
 0x30e   :  { %vm1147_vm10 = vcmp.lt.s32.totalorder %v1146_v0, 0  ;;  %v1148_v41 = vxor.u32 2147483647, %v1146_v0  ;;  %vm842_vm2 = vcmp.gt.s32.totalorder %v840_v1, %v841_v59  ;;  %v861_v40 = vmul.f32 %v4390_v58, %v836_v37 }
 0x30f   :  { %v877_v38 = vmul.f32 %v4391_v25, %v836_v37  ;;  %v894_v22 = vmul.f32 %v4392_v17, %v836_v37  ;;  %v843_v5 = vsel %vm842_vm2, %v840_v1, %v841_v59  ;;  %v911_v60 = vmul.f32 %v4393_v29, %v836_v37 }
 0x310   :  { %v1149_v62 = vsel %vm1147_vm10, %v1148_v41, %v1146_v0  ;;  %v844_v45 = vrot.slane %v843_v5, 2  ;;  %v862_v48 = vadd.f32 %v861_v40, %v859_v30  ;;  %v1659_v61 = vmul.f32 %v3711_v15, %v3711_v15 }
 0x311   :  { %v1661_v33 = vmul.f32 %v3716_v54, %v3716_v54  ;;  %v878_v51 = vadd.f32 %v877_v38, %v875_v26  ;;  %v895_v34 = vadd.f32 %v894_v22, %v892_v57  ;;  %v1155_v47 = vsel %vm620_vm1, %v3734_v28, 2147483648 }
 0x312   :  { %v1156_v1 = vsel %vm620_vm1, %v3741_v21, 2147483648  ;;  %vm845_vm11 = vcmp.gt.s32.totalorder %v843_v5, %v844_v45  ;;  %v912_v0 = vadd.f32 %v911_v60, %v909_v14  ;;  %v3752_v44 = vmul.f32 %v1149_v62, %v4346_v18 }
 0x313   :  { %vm1157_vm3 = vcmp.gt.s32.totalorder %v1155_v47, %v1156_v1  ;;  %v846_v30 = vsel %vm845_vm11, %v843_v5, %v844_v45  ;;  %v3755_v37 = vmul.f32 %v1149_v62, %v4348_v11  ;;  %v1677_v26 = vsel %vm620_vm1, %v1647_v56, 0.0 }
 0x314   :  { %v1158_v59 = vsel %vm1157_vm3, %v1155_v47, %v1156_v1  ;;  %v847_v22 = vrot.slane %v846_v30, 1  ;;  %v3759_v41 = vmul.f32 %v1149_v62, %v4350_v55  ;;  %v1678_v40 = vsel %vm620_vm1, %v1649_v50, 0.0 }
 0x315   :  { %v1159_v57 = vrot.slane %v1158_v59, 4  ;;  %v3763_v14 = vmul.f32 %v1149_v62, %v4351_v49  ;;  %v1679_v60 = vadd.f32 %v1678_v40, %v1677_v26  ;;  %v1680_v38 = vsel %vm620_vm1, %v1651_v27, 0.0  ;;  %v4395_v49 = vld [vmem:[#allocation78_spill] sm:$0xff] }
 0x316   :  { %v1682_v47 = vsel %vm620_vm1, %v1653_v3, 0.0  ;;  %vm848_vm4 = vcmp.gt.s32.totalorder %v846_v30, %v847_v22  ;;  %v1684_v5 = vsel %vm620_vm1, %v1655_v7, 0.0  ;;  %v1686_v56 = vsel %vm620_vm1, %v1657_v63, 0.0 }
 0x317   :  { %vm1160_vm12 = vcmp.gt.s32.totalorder %v1158_v59, %v1159_v57  ;;  %v849_v45 = vsel %vm848_vm4, %v846_v30, %v847_v22  ;;  %v1681_v55 = vadd.f32 %v1680_v38, %v1679_v60  ;;  %v1934_v50 = vmul.f32 %v3593_v2, %v3593_v2  ;;  %v4394_v38 = vld [vmem:[#allocation32_spill] sm:$0xff] }
 0x318   :  { %v1161_v1 = vsel %vm1160_vm12, %v1158_v59, %v1159_v57  ;;  %v850_v11 = vand.u32 4294967288, %v849_v45  ;;  %v1688_v26 = vsel %vm620_vm1, %v1659_v61, 0.0  ;;  %v1936_v27 = vmul.f32 %v3596_v8, %v3596_v8 }
 0x319   :  { %v1162_v62 = vrot.slane %v1161_v1, 2  ;;  %v1683_v3 = vadd.f32 %v1682_v47, %v1681_v55  ;;  %v1690_v40 = vsel %vm620_vm1, %v1661_v33, 0.0  ;;  %v3777_v7 = vmul.f32 %v3639_v46, %v3639_v46 }
 0x31a   :  { %v3781_v63 = vmul.f32 %v3662_v4, %v3662_v4  ;;  %vm851_vm14 = vcmp.lt.s32.totalorder %v850_v11, 0  ;;  %v852_v30 = vxor.u32 2147483647, %v850_v11  ;;  %v3785_v61 = vmul.f32 %v3665_v16, %v3665_v16  ;;  %v4396_v4 = vld [vmem:[#allocation81_spill] sm:$0xff]  ;;  %v4397_v16 = vld [vmem:[#allocation84_spill] sm:$0xff] }
 0x31b   :  { %vm1163_vm15 = vcmp.gt.s32.totalorder %v1161_v1, %v1162_v62  ;;  %v1685_v22 = vadd.f32 %v1684_v5, %v1683_v3  ;;  %v3789_v55 = vmul.f32 %v3668_v31, %v3668_v31  ;;  %v1950_v33 = vsel %vm620_vm1, %v1934_v50, 0.0  ;;  %v4399_v31 = vld [vmem:[#allocation33_spill] sm:$0xff] }
 0x31c   :  { %v1164_v59 = vsel %vm1163_vm15, %v1161_v1, %v1162_v62  ;;  %v853_v57 = vsel %vm851_vm14, %v852_v30, %v850_v11  ;;  %v1951_v47 = vadd.f32 %v1950_v33, %v4394_v38  ;;  %v1959_v45 = vsel %vm620_vm1, %v1936_v27, 0.0  ;;  %v4398_v1 = vld [vmem:[#allocation87_spill] sm:$0xff] }
 0x31d   :  { %v1165_v60 = vrot.slane %v1164_v59, 1  ;;  %v864_v18 = vmul.f32 %v4395_v49, %v853_v57  ;;  %v880_v46 = vmul.f32 %v4396_v4, %v853_v57  ;;  %v897_v8 = vmul.f32 %v4397_v16, %v853_v57  ;;  %v4400_v49 = vld [vmem:[#allocation79_spill] sm:$0xff]  ;;  %v4401_v4 = vld [vmem:[#allocation82_spill] sm:$0xff]  ;;  %v4402_v16 = vld [vmem:[#allocation85_spill] sm:$0xff] }
 0x31e   :  { %v914_v5 = vmul.f32 %v4398_v1, %v853_v57  ;;  %v1687_v62 = vadd.f32 %v1686_v56, %v1685_v22  ;;  %v1952_v3 = vrot.slane %v1951_v47, 4  ;;  %v1960_v2 = vadd.f32 %v1959_v45, %v4399_v31  ;;  %v4403_v57 = vld [vmem:[#allocation88_spill] sm:$0xff] }
 0x31f   :  { %vm1166_vm13 = vcmp.gt.s32.totalorder %v1164_v59, %v1165_v60  ;;  %v865_v50 = vadd.f32 %v864_v18, %v862_v48  ;;  %v881_v11 = vadd.f32 %v880_v46, %v878_v51  ;;  %v898_v30 = vadd.f32 %v897_v8, %v895_v34 }
 0x320   :  { %v915_v29 = vadd.f32 %v914_v5, %v912_v0  ;;  %v1167_v33 = vsel %vm1166_vm13, %v1164_v59, %v1165_v60  ;;  %v1689_v38 = vadd.f32 %v1688_v26, %v1687_v62  ;;  %v1953_v27 = vadd.f32 %v1952_v3, %v1951_v47  ;;  %v4404_v26 = vld [vmem:[#allocation80_spill] sm:$0xff]  ;;  %v4405_v59 = vld [vmem:[#allocation83_spill] sm:$0xff]  ;;  %v4406_v60 = vld [vmem:[#allocation86_spill] sm:$0xff] }
 0x321   :  { %v1961_v17 = vrot.slane %v1960_v2, 4  ;;  %v867_v25 = vadd.f32 %v4400_v49, %v865_v50  ;;  %v883_v58 = vadd.f32 %v4401_v4, %v881_v11  ;;  %v900_v12 = vadd.f32 %v4402_v16, %v898_v30 }
 0x322   :  { %v917_v1 = vadd.f32 %v4403_v57, %v915_v29  ;;  %v1168_v56 = vand.u32 4294967280, %v1167_v33  ;;  %vm1173_vm6 = vcmp.eq.s32.totalorder %v3734_v28, %v1167_v33  ;;  %vm1174_vm5 = vcmp.eq.s32.totalorder %v3741_v21, %v1167_v33 }
 0x323   :  { %v1691_v18 = vadd.f32 %v1690_v40, %v1689_v38  ;;  %v868_v8 = vmax.f32 %v867_v25, 0.0  ;;  %v884_v34 = vmax.f32 %v883_v58, 0.0  ;;  %v901_v51 = vmax.f32 %v900_v12, 0.0 }
 0x324   :  { %v918_v46 = vmax.f32 %v917_v1, 0.0  ;;  %vm1169_vm10 = vcmp.lt.s32.totalorder %v1168_v56, 0  ;;  %v1170_v31 = vxor.u32 2147483647, %v1168_v56  ;;  %v3806_v48 = vsel %vm1173_vm6, 2147483648, %v3734_v28 }
 0x325   :  { %v3809_v0 = vsel %vm1174_vm5, 2147483648, %v3741_v21  ;;  %v870_v29 = vmul.f32 %v4404_v26, %v868_v8  ;;  %v886_v22 = vmul.f32 %v4405_v59, %v884_v34  ;;  %v903_v47 = vmul.f32 %v4406_v60, %v901_v51 }
 0x326   :  { %v920_v40 = vmul.f32 %v3450_v39, %v918_v46  ;;  %v1171_v25 = vsel %vm1169_vm10, %v1170_v31, %v1168_v56  ;;  %v1177_v12 = vsel %vm620_vm1, %v3806_v48, 2147483648  ;;  %v1178_v58 = vsel %vm620_vm1, %v3809_v0, 2147483648 }
 0x327   :  { %v1693_v28 = vmax.f32 %v1691_v18, 1e-24  ;;  %v887_v45 = vadd.f32 %v886_v22, %v870_v29  ;;  %vm1179_vm2 = vcmp.gt.s32.totalorder %v1177_v12, %v1178_v58  ;;  %v1218_v21 = vmul.f32 %v1171_v25, %v4372_v6  ;;  %v4407_v29 = vld [vmem:[#allocation34_spill] sm:$0xff] }
 0x328   :  { %v1228_v1 = vmul.f32 %v1171_v25, %v4373_v19  ;;  %v1180_v5 = vsel %vm1179_vm2, %v1177_v12, %v1178_v58  ;;  %v1239_v62 = vmul.f32 %v1171_v25, %v4374_v36  ;;  %v1250_v3 = vmul.f32 %v1171_v25, %v4375_v20 }
 0x329   :  { %2389 = vrsqrt.f32 %v1693_v28  ;;  %v904_v50 = vadd.f32 %v903_v47, %v887_v45  ;;  %v1181_v11 = vrot.slane %v1180_v5, 4  ;;  %v3824_v30 = vadd.f32 %v1218_v21, %v3752_v44 }
 0x32a   :  { %v3827_v33 = vadd.f32 %v1228_v1, %v3755_v37  ;;  %v3830_v38 = vadd.f32 %v1239_v62, %v3759_v41  ;;  %v3833_v56 = vadd.f32 %v1250_v3, %v3763_v14  ;;  %v1954_v18 = vrot.slane %v1953_v27, 2  ;;  %v4408_v41 = vld [vmem:[#allocation31_spill] sm:$0xff] }
 0x32b   :  { %v1962_v8 = vadd.f32 %v1961_v17, %v1960_v2  ;;  %v921_v34 = vadd.f32 %v920_v40, %v904_v50  ;;  %vm1182_vm11 = vcmp.gt.s32.totalorder %v1180_v5, %v1181_v11  ;;  %v1968_v51 = vsel %vm620_vm1, %v3777_v7, 0.0  ;;  %v4409_v14 = vld [vmem:[#allocation35_spill] sm:$0xff]  ;;  %v4410_v7 = vld [vmem:[#allocation36_spill] sm:$0xff] }
 0x32c   :  { %v1977_v44 = vsel %vm620_vm1, %v3781_v63, 0.0  ;;  %v1183_v46 = vsel %vm1182_vm11, %v1180_v5, %v1181_v11  ;;  %v1955_v31 = vadd.f32 %v1954_v18, %v1953_v27  ;;  %v1969_v22 = vadd.f32 %v1968_v51, %v4407_v29 }
 0x32d   :  { %v1963_v37 = vrot.slane %v1962_v8, 2  ;;  %v923_v47 = vadd.f32 %v4408_v41, %v921_v34  ;;  %v1184_v25 = vrot.slane %v1183_v46, 2  ;;  %v1978_v12 = vadd.f32 %v1977_v44, %v4409_v14  ;;  %v4411_v34 = vld [vmem:[#allocation37_spill] sm:$0xff] }
 0x32e   :  { %v1986_v2 = vsel %vm620_vm1, %v3785_v61, 0.0  ;;  %v1956_v17 = vrot.slane %v1955_v31, 1  ;;  %v1970_v58 = vrot.slane %v1969_v22, 4  ;;  %v1995_v45 = vsel %vm620_vm1, %v3789_v55, 0.0 }
 0x32f   :  { %v1964_v40 = vadd.f32 %v1963_v37, %v1962_v8  ;;  %v3845_v28 = vadd.f32 %v1986_v2, %v4410_v7  ;;  %v924_v63 = vadd.f32 %v923_v47, %v3534_v23  ;;  %vm1185_vm3 = vcmp.gt.s32.totalorder %v1183_v46, %v1184_v25 }
 0x330   :  { %v1979_v27 = vrot.slane %v1978_v12, 4  ;;  %v1186_v21 = vsel %vm1185_vm3, %v1183_v46, %v1184_v25  ;;  %v3852_v1 = vmul.f32 %v3671_v32, %v3671_v32  ;;  %v3854_v61 = vadd.f32 %v1970_v58, %v1969_v22 }
 0x331   :  { %v1965_v5 = vrot.slane %v1964_v40, 1  ;;  %v1187_v62 = vrot.slane %v1186_v21, 1  ;;  %1263 = vst.msk [vmem:[%s4175_s7] sm:$0x1] %vm1262_vm7, %v924_v63  ;;  %v3862_v23 = vmul.f32 %v3676_v24, %v3676_v24  ;;  %v3864_v3 = vadd.f32 %v1956_v17, %v1955_v31  ;;  %v4413_v63 = vld [vmem:[#allocation69_spill] sm:$0xff] }
 0x332   :  { %v3866_v55 = vadd.f32 %v1979_v27, %v1978_v12  ;;  %v1972_v18 = vrot.slane %v3854_v61, 2  ;;  %v3873_v51 = vadd.f32 %v1995_v45, %v4411_v34  ;;  %v4414_v45 = vld [vmem:[#allocation70_spill] sm:$0xff]  ;;  %vm4422_vm11 = vcmask 1042434  }
 0x333   :  { %v2390_v50 = vpop.eup %2389  ;;  %v3868_v11 = vadd.f32 %v1965_v5, %v1964_v40  ;;  %vm1188_vm4 = vcmp.gt.s32.totalorder %v1186_v21, %v1187_v62  ;;  %v4412_v40 = vld [vmem:[#allocation73_spill] sm:$0xff]  ;;  %v4415_v5 = vld [vmem:[#allocation71_spill] sm:$0xff] }
 0x334   :  { %v1697_v44 = vmul.f32 %v2390_v50, %v3681_v43  ;;  %v1699_v46 = vmul.f32 %v2390_v50, %v3686_v13  ;;  %v1701_v31 = vmul.f32 %v2390_v50, %v3691_v52  ;;  %v1189_v37 = vsel %vm1188_vm4, %v1186_v21, %v1187_v62 }
 0x335   :  { %v1703_v29 = vmul.f32 %v2390_v50, %v3696_v10  ;;  %v1705_v22 = vmul.f32 %v2390_v50, %v3701_v35  ;;  %v1707_v47 = vmul.f32 %v2390_v50, %v3706_v9  ;;  %v1190_v25 = vand.u32 4294967280, %v1189_v37 }
 0x336   :  { %vm1195_vm12 = vcmp.eq.s32.totalorder %v3806_v48, %v1189_v37  ;;  %vm1196_vm14 = vcmp.eq.s32.totalorder %v3809_v0, %v1189_v37  ;;  %v1709_v14 = vmul.f32 %v2390_v50, %v3711_v15  ;;  %v3887_v52 = vmul.f32 %v2390_v50, %v3716_v54  ;;  %v4416_v50 = vld [vmem:[#allocation77_spill] sm:$0xff] }
 0x337   :  { %v1197_v43 = vsel %vm1195_vm12, 2147483648, %v3806_v48  ;;  %v1198_v13 = vsel %vm1196_vm14, 2147483648, %v3809_v0  ;;  %v1713_v10 = vsel %vm620_vm1, %v1697_v44, -inf  ;;  %vm1191_vm15 = vcmp.lt.s32.totalorder %v1190_v25, 0 }
 0x338   :  { %v1192_v35 = vxor.u32 2147483647, %v1190_v25  ;;  %v1199_v9 = vsel %vm620_vm1, %v1197_v43, 2147483648  ;;  %v1200_v12 = vsel %vm620_vm1, %v1198_v13, 2147483648  ;;  %v1714_v2 = vmax.f32 %v3619_v42, %v1713_v10 }
 0x339   :  { %vm1201_vm13 = vcmp.gt.s32.totalorder %v1199_v9, %v1200_v12  ;;  %v1722_v15 = vsel %vm620_vm1, %v1699_v46, -inf  ;;  %v1731_v48 = vsel %vm620_vm1, %v1701_v31, -inf  ;;  %vm4431_vm12 = vcmask 1044484  }
 0x33a   :  { %v1193_v17 = vsel %vm1191_vm15, %v1192_v35, %v1190_v25  ;;  %v1202_v0 = vsel %vm1201_vm13, %v1199_v9, %v1200_v12  ;;  %v1723_v54 = vmax.f32 %v3622_v53, %v1722_v15  ;;  %v1732_v58 = vmax.f32 %v4412_v40, %v1731_v48  ;;  %v4418_v40 = vld [vmem:[#allocation74_spill] sm:$0xff] }
 0x33b   :  { %v1203_v7 = vrot.slane %v1202_v0, 4  ;;  %v1220_v27 = vmul.f32 %v1193_v17, %v4413_v63  ;;  %v1230_v21 = vmul.f32 %v1193_v17, %v4414_v45  ;;  %v1241_v62 = vmul.f32 %v1193_v17, %v4415_v5 }
 0x33c   :  { %v1252_v34 = vmul.f32 %v1193_v17, %v4416_v50  ;;  %v1715_v42 = vrot.slane %v1714_v2, 4  ;;  %v1724_v44 = vrot.slane %v1723_v54, 4  ;;  %v1733_v46 = vrot.slane %v1732_v58, 4  ;;  %v4417_v17 = vld [vmem:[#allocation65_spill] sm:$0xff] }
 0x33d   :  { %vm1204_vm6 = vcmp.gt.s32.totalorder %v1202_v0, %v1203_v7  ;;  %v3902_v31 = vadd.f32 %v1220_v27, %v3824_v30  ;;  %v3905_v53 = vadd.f32 %v1230_v21, %v3827_v33  ;;  %v3908_v37 = vadd.f32 %v1241_v62, %v3830_v38 }
 0x33e   :  { %v1205_v25 = vsel %vm1204_vm6, %v1202_v0, %v1203_v7  ;;  %v3911_v43 = vadd.f32 %v1252_v34, %v3833_v56  ;;  %v1716_v13 = vmax.f32 %v1714_v2, %v1715_v42  ;;  %v1725_v10 = vmax.f32 %v1723_v54, %v1724_v44 }
 0x33f   :  { %v1206_v35 = vrot.slane %v1205_v25, 2  ;;  %v1734_v9 = vmax.f32 %v1732_v58, %v1733_v46  ;;  %v1740_v12 = vsel %vm620_vm1, %v1703_v29, -inf  ;;  %v1749_v15 = vsel %vm620_vm1, %v1705_v22, -inf  ;;  %v4419_v22 = vld [vmem:[#allocation66_spill] sm:$0xff] }
 0x340   :  { %v1717_v30 = vrot.slane %v1716_v13, 2  ;;  %v1726_v48 = vrot.slane %v1725_v10, 2  ;;  %v1741_v33 = vmax.f32 %v4417_v17, %v1740_v12  ;;  %v1750_v27 = vmax.f32 %v4418_v40, %v1749_v15  ;;  %v4420_v12 = vld [vmem:[#allocation76_spill] sm:$0xff] }
 0x341   :  { %vm1207_vm5 = vcmp.gt.s32.totalorder %v1205_v25, %v1206_v35  ;;  %v1735_v38 = vrot.slane %v1734_v9, 2  ;;  %v1758_v0 = vsel %vm620_vm1, %v1707_v47, -inf  ;;  %v1767_v56 = vsel %vm620_vm1, %v1709_v14, -inf }
 0x342   :  { %v1208_v2 = vsel %vm1207_vm5, %v1205_v25, %v1206_v35  ;;  %v1718_v54 = vmax.f32 %v1716_v13, %v1717_v30  ;;  %v1727_v7 = vmax.f32 %v1725_v10, %v1726_v48  ;;  %v1742_v58 = vrot.slane %v1741_v33, 4 }
 0x343   :  { %v1209_v21 = vrot.slane %v1208_v2, 1  ;;  %v1736_v29 = vmax.f32 %v1734_v9, %v1735_v38  ;;  %v1751_v62 = vrot.slane %v1750_v27, 4  ;;  %v1759_v34 = vmax.f32 %v4419_v22, %v1758_v0 }
 0x344   :  { %v1719_v42 = vrot.slane %v1718_v54, 1  ;;  %v1728_v44 = vrot.slane %v1727_v7, 1  ;;  %v1743_v46 = vmax.f32 %v1741_v33, %v1742_v58  ;;  %v1768_v15 = vmax.f32 %v4420_v12, %v1767_v56  ;;  %v4425_v12 = vld [vmem:[#allocation84_spill] sm:$0xff] }
 0x345   :  { %vm1210_vm10 = vcmp.gt.s32.totalorder %v1208_v2, %v1209_v21  ;;  %v1737_v17 = vrot.slane %v1736_v29, 1  ;;  %v1752_v40 = vmax.f32 %v1750_v27, %v1751_v62  ;;  %v1760_v47 = vrot.slane %v1759_v34, 4 }
 0x346   :  { %v1211_v8 = vsel %vm1210_vm10, %v1208_v2, %v1209_v21  ;;  %v1720_v14 = vmax.f32 %v1718_v54, %v1719_v42  ;;  %v1729_v25 = vmax.f32 %v1727_v7, %v1728_v44  ;;  %v1744_v13 = vrot.slane %v1743_v46, 2  ;;  %v4421_v54 = vld [vmem:[#allocation41_spill] sm:$0xff]  ;;  %v4423_v42 = vld [vmem:[#allocation78_spill] sm:$0xff] }
 0x347   :  { %v1212_v10 = vand.u32 4294967280, %v1211_v8  ;;  %v1738_v35 = vmax.f32 %v1736_v29, %v1737_v17  ;;  %v1753_v30 = vrot.slane %v1752_v40, 2  ;;  %v1761_v9 = vmax.f32 %v1759_v34, %v1760_v47  ;;  %v4424_v44 = vld [vmem:[#allocation81_spill] sm:$0xff] }
 0x348   :  { %v1745_v48 = vmax.f32 %v1743_v46, %v1744_v13  ;;  %v1769_v38 = vrot.slane %v1768_v15, 4  ;;  %v1776_v0 = vsel %vm620_vm1, %v3887_v52, -inf  ;;  %v1794_v33 = vsel %vm753_vm9, %v1729_v25, %v1720_v14 }
 0x349   :  { %vm1213_vm2 = vcmp.lt.s32.totalorder %v1212_v10, 0  ;;  %v1214_v56 = vxor.u32 2147483647, %v1212_v10  ;;  %v1754_v58 = vmax.f32 %v1752_v40, %v1753_v30  ;;  %v1762_v27 = vrot.slane %v1761_v9, 2  ;;  %v4426_v40 = vld [vmem:[#allocation87_spill] sm:$0xff] }
 0x34a   :  { %v1746_v62 = vrot.slane %v1745_v48, 1  ;;  %v1770_v2 = vmax.f32 %v1768_v15, %v1769_v38  ;;  %v1777_v7 = vmax.f32 %v4421_v54, %v1776_v0  ;;  %v2004_v8 = vsel %vm620_vm1, %v3852_v1, 0.0 }
 0x34b   :  { %v1215_v21 = vsel %vm1213_vm2, %v1214_v56, %v1212_v10  ;;  %v1755_v29 = vrot.slane %v1754_v58, 1  ;;  %v1763_v22 = vmax.f32 %v1761_v9, %v1762_v27  ;;  %v1795_v34 = vsel %vm4422_vm11, %v1738_v35, %v1794_v33 }
 0x34c   :  { %v1222_v52 = vmul.f32 %v1215_v21, %v4423_v42  ;;  %v1232_v46 = vmul.f32 %v1215_v21, %v4424_v44  ;;  %v1243_v17 = vmul.f32 %v1215_v21, %v4425_v12  ;;  %v1254_v47 = vmul.f32 %v1215_v21, %v4426_v40 }
 0x34d   :  { %v1747_v14 = vmax.f32 %v1745_v48, %v1746_v62  ;;  %v1764_v15 = vrot.slane %v1763_v22, 1  ;;  %v1771_v25 = vrot.slane %v1770_v2, 2  ;;  %v1973_v1 = vadd.f32 %v1972_v18, %v3854_v61  ;;  %v4428_v18 = vld [vmem:[#allocation21_spill] sm:$0xff] }
 0x34e   :  { %v1223_v13 = vadd.f32 %v1222_v52, %v3902_v31  ;;  %v1233_v10 = vadd.f32 %v1232_v46, %v3905_v53  ;;  %v1244_v35 = vadd.f32 %v1243_v17, %v3908_v37  ;;  %v1255_v30 = vadd.f32 %v1254_v47, %v3911_v43  ;;  %v4429_v31 = vld [vmem:[#allocation19_spill] sm:$0xff]  ;;  %v4430_v53 = vld [vmem:[#allocation61_spill] sm:$0xff] }
 0x34f   :  { %v1756_v9 = vmax.f32 %v1754_v58, %v1755_v29  ;;  %v1772_v38 = vmax.f32 %v1770_v2, %v1771_v25  ;;  %v1778_v0 = vrot.slane %v1777_v7, 4  ;;  %vm4427_vm9 = vcmask 1043459  }
 0x350   :  { %v1796_v33 = vsel %vm4427_vm9, %v1747_v14, %v1795_v34  ;;  %v1224_v48 = vadd.f32 %v1223_v13, %v4400_v49  ;;  %v1234_v56 = vadd.f32 %v1233_v10, %v4401_v4  ;;  %v1245_v27 = vadd.f32 %v1244_v35, %v4402_v16 }
 0x351   :  { %v1256_v61 = vadd.f32 %v1255_v30, %v4403_v57  ;;  %vm1612_vm3 = vcmp.lt.s32.totalorder %v4429_v31, %v4428_v18  ;;  %vm1613_vm4 = vcmp.lt.s32.totalorder %v4429_v31, %v4430_v53  ;;  %v1765_v37 = vmax.f32 %v1763_v22, %v1764_v15 }
 0x352   :  { %v1773_v43 = vrot.slane %v1772_v38, 1  ;;  %v1779_v58 = vmax.f32 %v1777_v7, %v1778_v0  ;;  %v1797_v62 = vsel %vm4431_vm12, %v1756_v9, %v1796_v33  ;;  %v1225_v2 = vmax.f32 %v1224_v48, 0.0  ;;  %v4434_v9 = vld [vmem:[#allocation38_spill] sm:$0xff] }
 0x353   :  { %v1235_v54 = vmax.f32 %v1234_v56, 0.0  ;;  %v1246_v21 = vmax.f32 %v1245_v27, 0.0  ;;  %v1257_v29 = vmax.f32 %v1256_v61, 0.0  ;;  %v1974_v46 = vrot.slane %v1973_v1, 1  ;;  %v4435_v0 = vld [vmem:[#allocation42_spill] sm:$0xff] }
 0x354   :  { %v1774_v34 = vmax.f32 %v1772_v38, %v1773_v43  ;;  %v1780_v52 = vrot.slane %v1779_v58, 2  ;;  %v2013_v17 = vsel %vm620_vm1, %v3862_v23, 0.0  ;;  %v1226_v47 = vmul.f32 %v1225_v2, %v4404_v26 }
 0x355   :  { %v1236_v14 = vmul.f32 %v1235_v54, %v4405_v59  ;;  %v1247_v22 = vmul.f32 %v1246_v21, %v4406_v60  ;;  %vm4432_vm14 = vcmask 1045509   ;;  %v1258_v15 = vmul.f32 %v1257_v29, %v3450_v39 }
 0x356   :  { %v1798_v7 = vsel %vm4432_vm14, %v1765_v37, %v1797_v62  ;;  %v1781_v25 = vmax.f32 %v1779_v58, %v1780_v52  ;;  %v1981_v13 = vrot.slane %v3866_v55, 2  ;;  %v4433_v10 = vrot.slane %v3845_v28, 4 }
 0x357   :  { %v1237_v30 = vadd.f32 %v1236_v14, %v1226_v47  ;;  %v1997_v23 = vrot.slane %v3873_v51, 4  ;;  %v2005_v38 = vadd.f32 %v2004_v8, %v4434_v9  ;;  %v2014_v33 = vadd.f32 %v2013_v17, %v4435_v0 }
 0x358   :  { %v1989_v35 = vadd.f32 %v4433_v10, %v3845_v28  ;;  %v1782_v48 = vrot.slane %v1781_v25, 1  ;;  %v1799_v56 = vsel %vm763_vm0, %v1774_v34, %v1798_v7  ;;  %v1982_v27 = vadd.f32 %v1981_v13, %v3866_v55 }
 0x359   :  { %v1248_v37 = vadd.f32 %v1247_v22, %v1237_v30  ;;  %v1998_v43 = vadd.f32 %v1997_v23, %v3873_v51  ;;  %v2006_v58 = vrot.slane %v2005_v38, 4  ;;  %v2015_v62 = vrot.slane %v2014_v33, 4 }
 0x35a   :  { %v1990_v61 = vrot.slane %v1989_v35, 2  ;;  %v1783_v2 = vmax.f32 %v1781_v25, %v1782_v48  ;;  %v1975_v28 = vadd.f32 %v1974_v46, %v1973_v1  ;;  %v1983_v54 = vrot.slane %v1982_v27, 1  ;;  %v4436_v25 = vld [vmem:[#allocation67_spill] sm:$0xff] }
 0x35b   :  { %v1259_v29 = vadd.f32 %v1258_v15, %v1248_v37  ;;  %v1999_v52 = vrot.slane %v1998_v43, 2  ;;  %v2007_v8 = vadd.f32 %v2006_v58, %v2005_v38  ;;  %v2021_v17 = vmax.f32 %v3864_v3, 1e-24 }
 0x35c   :  { %v1991_v21 = vadd.f32 %v1990_v61, %v1989_v35  ;;  %v1800_v47 = vsel %vm765_vm8, %v1783_v2, %v1799_v56  ;;  %v1984_v34 = vadd.f32 %v1983_v54, %v1982_v27  ;;  %v2016_v55 = vadd.f32 %v2015_v62, %v2014_v33 }
 0x35d   :  { %v1260_v22 = vadd.f32 %v1259_v29, %v4408_v41  ;;  %v1802_v51 = vsel %vm1613_vm4, %v1800_v47, 0.0  ;;  %v1815_v1 = vsel %vm1612_vm3, %v1800_v47, -inf  ;;  %v2000_v46 = vadd.f32 %v1999_v52, %v1998_v43 }
 0x35e   :  { %v1992_v14 = vrot.slane %v1991_v21, 1  ;;  %v1803_v7 = vsel %vm620_vm1, %v1802_v51, 0.0  ;;  %vm1817_vm0 = vcmp.lt.s32.totalorder %v1815_v1, 0  ;;  %v1818_v3 = vxor.u32 2147483647, %v1815_v1  ;;  %v4438_v51 = vld [vmem:[#allocation64_spill] sm:$0xff] }
 0x35f   :  { %v1261_v13 = vadd.f32 %v1260_v22, %v4436_v25  ;;  %v1804_v10 = vrot.slane %v1803_v7, 4  ;;  %v2001_v35 = vrot.slane %v2000_v46, 1  ;;  %v2008_v30 = vrot.slane %v2007_v8, 2 }
 0x360   :  { %v1993_v15 = vadd.f32 %v1992_v14, %v1991_v21  ;;  %v1819_v23 = vsel %vm1817_vm0, %v1818_v3, %v1815_v1  ;;  %v2017_v9 = vrot.slane %v2016_v55, 2  ;;  %v2022_v38 = vmax.f32 %v3868_v11, 1e-24  ;;  %v4439_v3 = vld [vmem:[#allocation23_spill] sm:$0xff] }
 0x361   :  { %v2023_v0 = vmax.f32 %v1975_v28, 1e-24  ;;  %2301 = vst.msk [vmem:[%s4175_s7 + $0x2] sm:$0x1] %vm1262_vm7, %v1261_v13  ;;  %v1805_v18 = vadd.f32 %v1804_v10, %v1803_v7  ;;  %v1820_v33 = vand.u32 4294967288, %v1819_v23  ;;  %v2002_v48 = vadd.f32 %v2001_v35, %v2000_v46  ;;  %v4440_v35 = vld [vmem:[#allocation63_spill] sm:$0xff] }
 0x362   :  { %v2009_v56 = vadd.f32 %v2008_v30, %v2007_v8  ;;  %v2018_v27 = vadd.f32 %v2017_v9, %v2016_v55  ;;  %v2024_v61 = vmax.f32 %v1984_v34, 1e-24  ;;  %2391 = vrsqrt.f32 %v2021_v17 }
 0x363   :  { %v1806_v37 = vrot.slane %v1805_v18, 2  ;;  %v4437_v43 = vsub.s32 7, %v4429_v31  ;;  %v2025_v2 = vmax.f32 %v1993_v15, 1e-24  ;;  %v2026_v28 = vmax.f32 %v2002_v48, 1e-24 }
 0x364   :  { %v2010_v62 = vrot.slane %v2009_v56, 1  ;;  %v2019_v11 = vrot.slane %v2018_v27, 1  ;;  %2393 = vrsqrt.f32 %v2022_v38  ;;  %vm1604_vm13 = vcmp.gt.s32.totalorder %v4430_v53, 0 }
 0x365   :  { %v1821_v58 = vor.u32 %v1820_v33, %v4437_v43  ;;  %v1807_v54 = vadd.f32 %v1806_v37, %v1805_v18  ;;  %2395 = vrsqrt.f32 %v2023_v0  ;;  %vm1605_vm6 = vcmp.gt.s32.totalorder %v4430_v53, 1  ;;  %v4441_v0 = vld [vmem:[#allocation24_spill] sm:$0xff]  ;;  %v4443_v43 = vld [vmem:[#allocation25_spill] sm:$0xff] }
 0x366   :  { %v2011_v29 = vadd.f32 %v2010_v62, %v2009_v56  ;;  %v2020_v47 = vadd.f32 %v2019_v11, %v2018_v27  ;;  %2397 = vrsqrt.f32 %v2024_v61  ;;  %vm1606_vm5 = vcmp.gt.s32.totalorder %v4430_v53, 2  ;;  %v4442_v56 = vld [vmem:[#allocation72_spill] sm:$0xff] }
 0x367   :  { %v1822_v21 = vsel %vm620_vm1, %v1821_v58, 2147483648  ;;  %v1808_v8 = vrot.slane %v1807_v54, 1  ;;  %2399 = vrsqrt.f32 %v2025_v2  ;;  %vm1607_vm10 = vcmp.gt.s32.totalorder %v4430_v53, 3  ;;  %v4444_v2 = vld [vmem:[#allocation75_spill] sm:$0xff] }
 0x368   :  { %v1823_v52 = vrot.slane %v1822_v21, 4  ;;  %v2027_v34 = vmax.f32 %v2011_v29, 1e-24  ;;  %v2028_v17 = vmax.f32 %v2020_v47, 1e-24  ;;  %2401 = vrsqrt.f32 %v2026_v28  ;;  %v4445_v29 = vld [vmem:[#allocation26_spill] sm:$0xff] }
 0x369   :  { %v1809_v14 = vadd.f32 %v1808_v8, %v1807_v54  ;;  %vm1608_vm2 = vcmp.gt.s32.totalorder %v4430_v53, 4  ;;  %vm1609_vm9 = vcmp.gt.s32.totalorder %v4430_v53, 5  ;;  %vm1610_vm3 = vcmp.gt.s32.totalorder %v4430_v53, 6  ;;  %v4446_v47 = vld [vmem:[#allocation62_spill] sm:$0xff] }
 0x36a   :  { %vm1824_vm8 = vcmp.gt.s32.totalorder %v1822_v21, %v1823_v52  ;;  %2403 = vrsqrt.f32 %v2027_v34  ;;  %vm1611_vm4 = vcmp.gt.s32.totalorder %v4430_v53, 7 }
 0x36b   :  { %v1825_v55 = vsel %vm1824_vm8, %v1822_v21, %v1823_v52  ;;  %2405 = vrsqrt.f32 %v2028_v17  ;;  %v3986_v1 = vmul.f32 %v4438_v51, %v1809_v14  ;;  %v4447_v14 = vld [vmem:[#allocation27_spill] sm:$0xff] }
 0x36c   :  { %v1826_v22 = vrot.slane %v1825_v55, 2  ;;  %v2392_v46 = vpop.eup %2391 }
 0x36d   :  { %v2037_v15 = vmul.f32 %v2392_v46, %v4439_v3  ;;  %2306 = vst.msk [vmem:[%s4175_s7 + $0x5] sm:$0x1] %vm1262_vm7, %v3986_v1  ;;  %v2038_v30 = vmul.f32 %v2392_v46, %v4440_v35  ;;  %v4449_v46 = vld [vmem:[#allocation28_spill] sm:$0xff]  ;;  %v4452_v35 = vld [vmem:[#allocation30_spill] sm:$0xff] }
 0x36e   :  { %vm1827_vm15 = vcmp.gt.s32.totalorder %v1825_v55, %v1826_v22  ;;  %v2394_v25 = vpop.eup %2393  ;;  %v4450_v3 = vld [vmem:[#allocation68_spill] sm:$0xff] }
 0x36f   :  { %v1828_v7 = vsel %vm1827_vm15, %v1825_v55, %v1826_v22  ;;  %v2396_v10 = vpop.eup %2395  ;;  %v2039_v18 = vmul.f32 %v2394_v25, %v4441_v0  ;;  %v2069_v33 = vsel %vm1604_vm13, %v2037_v15, -inf  ;;  %v2040_v27 = vmul.f32 %v2394_v25, %v4442_v56  ;;  %v4451_v25 = vld [vmem:[#allocation29_spill] sm:$0xff] }
 0x370   :  { %v1829_v13 = vrot.slane %v1828_v7, 1  ;;  %v2398_v23 = vpop.eup %2397  ;;  %v2041_v62 = vmul.f32 %v2396_v10, %v4443_v43  ;;  %v2042_v11 = vmul.f32 %v2396_v10, %v4444_v2  ;;  %v2070_v28 = vsel %vm1604_vm13, %v2038_v30, -inf }
 0x371   :  { %v2400_v9 = vpop.eup %2399  ;;  %v2043_v52 = vmul.f32 %v2398_v23, %v4445_v29  ;;  %v2044_v8 = vmul.f32 %v2398_v23, %v4446_v47  ;;  %v2085_v34 = vsel %vm620_vm1, %v2069_v33, -inf  ;;  %v2071_v51 = vsel %vm1605_vm6, %v2039_v18, -inf }
 0x372   :  { %vm1830_vm11 = vcmp.gt.s32.totalorder %v1828_v7, %v1829_v13  ;;  %v2402_v48 = vpop.eup %2401  ;;  %v2045_v55 = vmul.f32 %v2400_v9, %v4447_v14  ;;  %v2072_v0 = vsel %vm1605_vm6, %v2040_v27, -inf  ;;  %v2073_v18 = vsel %vm1606_vm5, %v2041_v62, -inf }
 0x373   :  { %v4001_v38 = vsel %vm1830_vm11, %v1828_v7, %v1829_v13  ;;  %v2047_v7 = vmul.f32 %v2402_v48, %v4449_v46  ;;  %v2048_v15 = vmul.f32 %v2402_v48, %v4450_v3  ;;  %v2074_v33 = vsel %vm1606_vm5, %v2042_v11, -inf }
 0x374   :  { %vm1837_vm12 = vcmp.eq.s32.totalorder %v1821_v58, %v4001_v38  ;;  %v2404_v61 = vpop.eup %2403  ;;  %v2075_v48 = vsel %vm1607_vm10, %v2043_v52, -inf  ;;  %v2086_v11 = vsel %vm620_vm1, %v2071_v51, -inf  ;;  %v2100_v51 = vsel %vm620_vm1, %v2070_v28, -inf }
 0x375   :  { %v1838_v37 = vsel %vm1837_vm12, 2147483648, %v1821_v58  ;;  %v2406_v54 = vpop.eup %2405  ;;  %v4448_v58 = vld [vmem:[#allocation20_spill] sm:$0xff]  ;;  %v2049_v13 = vmul.f32 %v2404_v61, %v4451_v25  ;;  %v2050_v10 = vmul.f32 %v2404_v61, %v3671_v32  ;;  %v2076_v32 = vsel %vm1607_vm10, %v2044_v8, -inf }
 0x376   :  { %v1839_v21 = vsel %vm620_vm1, %v1838_v37, 2147483648  ;;  %v2046_v22 = vmul.f32 %v2400_v9, %v4448_v58  ;;  %v2051_v30 = vmul.f32 %v2406_v54, %v4452_v35  ;;  %v2052_v23 = vmul.f32 %v2406_v54, %v3676_v24 }
 0x377   :  { %v1840_v17 = vrot.slane %v1839_v21, 4  ;;  %v2077_v24 = vsel %vm1608_vm2, %v2045_v55, -inf  ;;  %v2079_v61 = vsel %vm1609_vm9, %v2047_v7, -inf  ;;  %v2080_v43 = vsel %vm1609_vm9, %v2048_v15, -inf }
 0x378   :  { %v2078_v27 = vsel %vm1608_vm2, %v2046_v22, -inf  ;;  %v2081_v62 = vsel %vm1610_vm3, %v2049_v13, -inf  ;;  %v2082_v2 = vsel %vm1610_vm3, %v2050_v10, -inf  ;;  %v2087_v54 = vsel %vm620_vm1, %v2073_v18, -inf }
 0x379   :  { %vm1841_vm14 = vcmp.gt.s32.totalorder %v1839_v21, %v1840_v17  ;;  %v2083_v52 = vsel %vm1611_vm4, %v2051_v30, -inf  ;;  %v2088_v47 = vmax.f32 %v2085_v34, %v2087_v54  ;;  %v2091_v14 = vsel %vm620_vm1, %v2077_v24, -inf }
 0x37a   :  { %v1842_v9 = vsel %vm1841_vm14, %v1839_v21, %v1840_v17  ;;  %v2089_v21 = vsel %vm620_vm1, %v2075_v48, -inf  ;;  %v2093_v55 = vsel %vm620_vm1, %v2079_v61, -inf  ;;  %v2095_v58 = vsel %vm620_vm1, %v2081_v62, -inf }
 0x37b   :  { %v1843_v56 = vrot.slane %v1842_v9, 2  ;;  %v2090_v8 = vmax.f32 %v2086_v11, %v2089_v21  ;;  %v2092_v22 = vmax.f32 %v2088_v47, %v2091_v14  ;;  %v2101_v7 = vsel %vm620_vm1, %v2072_v0, -inf }
 0x37c   :  { %v2097_v3 = vsel %vm620_vm1, %v2083_v52, -inf  ;;  %v2102_v15 = vsel %vm620_vm1, %v2074_v33, -inf  ;;  %v2104_v34 = vsel %vm620_vm1, %v2076_v32, -inf  ;;  %v2084_v30 = vsel %vm1611_vm4, %v2052_v23, -inf }
 0x37d   :  { %vm1844_vm0 = vcmp.gt.s32.totalorder %v1842_v9, %v1843_v56  ;;  %v2094_v46 = vmax.f32 %v2090_v8, %v2093_v55  ;;  %v2096_v13 = vmax.f32 %v2092_v22, %v2095_v58  ;;  %v2103_v35 = vmax.f32 %v2100_v51, %v2102_v15 }
 0x37e   :  { %v1845_v29 = vsel %vm1844_vm0, %v1842_v9, %v1843_v56  ;;  %v2105_v9 = vmax.f32 %v2101_v7, %v2104_v34  ;;  %v2106_v28 = vsel %vm620_vm1, %v2078_v27, -inf  ;;  %v2108_v56 = vsel %vm620_vm1, %v2080_v43, -inf  ;;  %v4454_v7 = vld [vmem:[#allocation22_spill] sm:$0xff] }
 0x37f   :  { %v1846_v17 = vrot.slane %v1845_v29, 1  ;;  %v2098_v10 = vmax.f32 %v2094_v46, %v2097_v3  ;;  %v2107_v48 = vmax.f32 %v2103_v35, %v2106_v28  ;;  %v2110_v32 = vsel %vm620_vm1, %v2082_v2, -inf }
 0x380   :  { %v2109_v24 = vmax.f32 %v2105_v9, %v2108_v56  ;;  %v2112_v11 = vsel %vm620_vm1, %v2084_v30, -inf  ;;  %v4453_v22 = vsub.s32 15, %v4429_v31  ;;  %v4455_v3 = vsub.s32 15, %v4454_v7 }
 0x381   :  { %vm1847_vm8 = vcmp.gt.s32.totalorder %v1845_v29, %v1846_v17  ;;  %v2099_v0 = vmax.f32 %v2096_v13, %v2098_v10  ;;  %v2111_v62 = vmax.f32 %v2107_v48, %v2110_v32  ;;  %v1832_v13 = vand.u32 4294967288, %v4001_v38 }
 0x382   :  { %v1848_v25 = vsel %vm1847_vm8, %v1845_v29, %v1846_v17  ;;  %v2113_v54 = vmax.f32 %v2109_v24, %v2112_v11 }
 0x383   :  { %vm1854_vm15 = vcmp.eq.s32.totalorder %v1838_v37, %v1848_v25  ;;  %vm2127_vm13 = vcmp.lt.s32.totalorder %v2099_v0, 0  ;;  %v2129_v53 = vxor.u32 2147483647, %v2099_v0  ;;  %v1849_v31 = vand.u32 4294967288, %v1848_v25 }
 0x384   :  { %v1855_v18 = vsel %vm1854_vm15, 2147483648, %v1838_v37  ;;  %v2114_v27 = vmax.f32 %v2111_v62, %v2113_v54  ;;  %v2115_v37 = vsel %vm620_vm1, %v2099_v0, 0.0  ;;  %v1834_v48 = vxor.u32 2147483647, %v1832_v13 }
 0x385   :  { %v1856_v33 = vsel %vm620_vm1, %v1855_v18, 2147483648  ;;  %v2131_v21 = vsel %vm2127_vm13, %v2129_v53, %v2099_v0  ;;  %vm1833_vm3 = vcmp.lt.s32.totalorder %v1832_v13, 0  ;;  %v1851_v38 = vxor.u32 2147483647, %v1849_v31 }
 0x386   :  { %v1857_v61 = vrot.slane %v1856_v33, 4  ;;  %v2116_v43 = vsel %vm620_vm1, %v2114_v27, 0.0  ;;  %vm2128_vm5 = vcmp.lt.s32.totalorder %v2114_v27, 0  ;;  %v2130_v52 = vxor.u32 2147483647, %v2114_v27 }
 0x387   :  { %v2117_v2 = vadd.f32 %v2116_v43, %v2115_v37  ;;  %v2133_v47 = vand.u32 4294967280, %v2131_v21  ;;  %vm1850_vm12 = vcmp.lt.s32.totalorder %v1849_v31, 0  ;;  %v1835_v54 = vsel %vm1833_vm3, %v1834_v48, %v1832_v13 }
 0x388   :  { %vm1858_vm6 = vcmp.gt.s32.totalorder %v1856_v33, %v1857_v61  ;;  %v2132_v17 = vsel %vm2128_vm5, %v2130_v52, %v2114_v27  ;;  %v1852_v27 = vsel %vm1850_vm12, %v1851_v38, %v1849_v31 }
 0x389   :  { %v1859_v23 = vsel %vm1858_vm6, %v1856_v33, %v1857_v61  ;;  %v2118_v55 = vrot.slane %v2117_v2, 4  ;;  %v2134_v58 = vand.u32 4294967280, %v2132_v17  ;;  %v4074_v46 = vor.u32 %v2133_v47, %v4453_v22  ;;  %v4457_v47 = vld [vmem:[#allocation44_spill] sm:$0xff]  ;;  %v4458_v22 = vld [vmem:[#allocation45_spill] sm:$0xff] }
 0x38a   :  { %v1860_v29 = vrot.slane %v1859_v23, 2  ;;  %v1889_v17 = vmul.f32 %v1852_v27, %v4372_v6  ;;  %v1921_v7 = vmul.f32 %v1852_v27, %v4375_v20 }
 0x38b   :  { %v2119_v51 = vadd.f32 %v2118_v55, %v2117_v2  ;;  %v4078_v15 = vor.u32 %v2134_v58, %v4455_v3  ;;  %v2137_v34 = vsel %vm620_vm1, %v4074_v46, 2147483648  ;;  %v1910_v55 = vmul.f32 %v1852_v27, %v4374_v36 }
 0x38c   :  { %vm1861_vm10 = vcmp.gt.s32.totalorder %v1859_v23, %v1860_v29 }
 0x38d   :  { %v1862_v8 = vsel %vm1861_vm10, %v1859_v23, %v1860_v29  ;;  %v2120_v35 = vrot.slane %v2119_v51, 2  ;;  %v2138_v30 = vsel %vm620_vm1, %v4078_v15, 2147483648  ;;  %v4456_v29 = vld [vmem:[#allocation43_spill] sm:$0xff] }
 0x38e   :  { %v1863_v14 = vrot.slane %v1862_v8, 1  ;;  %vm2139_vm9 = vcmp.gt.s32.totalorder %v2137_v34, %v2138_v30  ;;  %v1888_v43 = vmul.f32 %v1835_v54, %v4456_v29 }
 0x38f   :  { %v2121_v0 = vadd.f32 %v2120_v35, %v2119_v51  ;;  %v2140_v24 = vsel %vm2139_vm9, %v2137_v34, %v2138_v30  ;;  %v1909_v51 = vmul.f32 %v1835_v54, %v4458_v22  ;;  %v4459_v35 = vld [vmem:[#allocation46_spill] sm:$0xff] }
 0x390   :  { %vm1864_vm2 = vcmp.gt.s32.totalorder %v1862_v8, %v1863_v14  ;;  %v2141_v61 = vrot.slane %v2140_v24, 4  ;;  %v1920_v30 = vmul.f32 %v1835_v54, %v4459_v35 }
 0x391   :  { %v1865_v10 = vsel %vm1864_vm2, %v1862_v8, %v1863_v14  ;;  %v2122_v32 = vrot.slane %v2121_v0, 1  ;;  %v1898_v8 = vmul.f32 %v1835_v54, %v4457_v47  ;;  %v1899_v14 = vmul.f32 %v1852_v27, %v4373_v19 }
 0x392   :  { %vm1871_vm11 = vcmp.eq.s32.totalorder %v1855_v18, %v1865_v10  ;;  %v1866_v56 = vand.u32 4294967288, %v1865_v10  ;;  %vm2142_vm14 = vcmp.gt.s32.totalorder %v2140_v24, %v2141_v61 }
 0x393   :  { %v1872_v9 = vsel %vm1871_vm11, 2147483648, %v1855_v18  ;;  %v2123_v11 = vadd.f32 %v2122_v32, %v2121_v0  ;;  %v2143_v23 = vsel %vm2142_vm14, %v2140_v24, %v2141_v61  ;;  %v1890_v0 = vadd.f32 %v1889_v17, %v1888_v43 }
 0x394   :  { %v1873_v28 = vsel %vm620_vm1, %v1872_v9, 2147483648  ;;  %v1868_v25 = vxor.u32 2147483647, %v1866_v56  ;;  %vm1867_vm0 = vcmp.lt.s32.totalorder %v1866_v56, 0  ;;  %v2144_v37 = vrot.slane %v2143_v23, 2 }
 0x395   :  { %v1874_v33 = vrot.slane %v1873_v28, 4  ;;  %v4086_v53 = vmul.f32 0.0625, %v2123_v11  ;;  %v1900_v48 = vadd.f32 %v1899_v14, %v1898_v8  ;;  %v1922_v32 = vadd.f32 %v1921_v7, %v1920_v30 }
 0x396   :  { %v1869_v52 = vsel %vm1867_vm0, %v1868_v25, %v1866_v56  ;;  %vm2145_vm15 = vcmp.gt.s32.totalorder %v2143_v23, %v2144_v37  ;;  %v1911_v56 = vadd.f32 %v1910_v55, %v1909_v51 }
 0x397   :  { %vm1875_vm4 = vcmp.gt.s32.totalorder %v1873_v28, %v1874_v33  ;;  %2307 = vst.msk [vmem:[%s4175_s7 + $0x7] sm:$0x1] %vm1262_vm7, %v4086_v53  ;;  %v2146_v58 = vsel %vm2145_vm15, %v2143_v23, %v2144_v37  ;;  %v1891_v13 = vmul.f32 %v1869_v52, %v4413_v63  ;;  %v1901_v10 = vmul.f32 %v1869_v52, %v4414_v45 }
 0x398   :  { %v1876_v62 = vsel %vm1875_vm4, %v1873_v28, %v1874_v33  ;;  %v2147_v3 = vrot.slane %v2146_v58, 1  ;;  %v1912_v9 = vmul.f32 %v1869_v52, %v4415_v5  ;;  %v1923_v28 = vmul.f32 %v1869_v52, %v4416_v50 }
 0x399   :  { %v1877_v18 = vrot.slane %v1876_v62, 2  ;;  %v1892_v61 = vadd.f32 %v1891_v13, %v1890_v0  ;;  %v1902_v38 = vadd.f32 %v1901_v10, %v1900_v48 }
 0x39a   :  { %vm2148_vm6 = vcmp.gt.s32.totalorder %v2146_v58, %v2147_v3  ;;  %v1913_v54 = vadd.f32 %v1912_v9, %v1911_v56  ;;  %v1924_v25 = vadd.f32 %v1923_v28, %v1922_v32 }
 0x39b   :  { %vm1878_vm8 = vcmp.gt.s32.totalorder %v1876_v62, %v1877_v18  ;;  %v4105_v33 = vsel %vm2148_vm6, %v2146_v58, %v2147_v3 }
 0x39c   :  { %v1879_v21 = vsel %vm1878_vm8, %v1876_v62, %v1877_v18  ;;  %vm2155_vm10 = vcmp.eq.s32.totalorder %v4074_v46, %v4105_v33  ;;  %vm2156_vm2 = vcmp.eq.s32.totalorder %v4078_v15, %v4105_v33 }
 0x39d   :  { %v1880_v2 = vrot.slane %v1879_v21, 1  ;;  %v2157_v62 = vsel %vm2155_vm10, 2147483648, %v4074_v46  ;;  %v2158_v18 = vsel %vm2156_vm2, 2147483648, %v4078_v15 }
 0x39e   :  { %v2159_v43 = vsel %vm620_vm1, %v2157_v62, 2147483648  ;;  %v2160_v52 = vsel %vm620_vm1, %v2158_v18, 2147483648 }
 0x39f   :  { %vm1881_vm13 = vcmp.gt.s32.totalorder %v1879_v21, %v1880_v2  ;;  %vm2161_vm11 = vcmp.gt.s32.totalorder %v2159_v43, %v2160_v52 }
 0x3a0   :  { %v1882_v34 = vsel %vm1881_vm13, %v1879_v21, %v1880_v2  ;;  %v2162_v51 = vsel %vm2161_vm11, %v2159_v43, %v2160_v52 }
 0x3a1   :  { %v1883_v31 = vand.u32 4294967288, %v1882_v34  ;;  %v2163_v13 = vrot.slane %v2162_v51, 4 }
 0x3a3   :  { %vm1884_vm5 = vcmp.lt.s32.totalorder %v1883_v31, 0  ;;  %v1885_v24 = vxor.u32 2147483647, %v1883_v31  ;;  %vm2164_vm9 = vcmp.gt.s32.totalorder %v2162_v51, %v2163_v13 }
 0x3a4   :  { %v2165_v0 = vsel %vm2164_vm9, %v2162_v51, %v2163_v13 }
 0x3a5   :  { %v1886_v11 = vsel %vm1884_vm5, %v1885_v24, %v1883_v31  ;;  %v2166_v48 = vrot.slane %v2165_v0, 2 }
 0x3a6   :  { %v1893_v23 = vmul.f32 %v1886_v11, %v4423_v42  ;;  %v1903_v27 = vmul.f32 %v1886_v11, %v4424_v44  ;;  %v1914_v37 = vmul.f32 %v1886_v11, %v4425_v12  ;;  %v1925_v21 = vmul.f32 %v1886_v11, %v4426_v40 }
 0x3a7   :  { %vm2167_vm3 = vcmp.gt.s32.totalorder %v2165_v0, %v2166_v48 }
 0x3a8   :  { %v1894_v2 = vadd.f32 %v1893_v23, %v1892_v61  ;;  %v1904_v8 = vadd.f32 %v1903_v27, %v1902_v38  ;;  %v1915_v46 = vadd.f32 %v1914_v37, %v1913_v54  ;;  %v1926_v17 = vadd.f32 %v1925_v21, %v1924_v25 }
 0x3a9   :  { %v2168_v61 = vsel %vm2167_vm3, %v2165_v0, %v2166_v48 }
 0x3aa   :  { %v1895_v14 = vadd.f32 %v1894_v2, %v4400_v49  ;;  %v1905_v15 = vadd.f32 %v1904_v8, %v4401_v4  ;;  %v1916_v55 = vadd.f32 %v1915_v46, %v4402_v16  ;;  %v1927_v58 = vadd.f32 %v1926_v17, %v4403_v57 }
 0x3ab   :  { %v2169_v38 = vrot.slane %v2168_v61, 1 }
 0x3ac   :  { %v1896_v7 = vmax.f32 %v1895_v14, 0.0  ;;  %v1906_v3 = vmax.f32 %v1905_v15, 0.0  ;;  %v1917_v34 = vmax.f32 %v1916_v55, 0.0  ;;  %v1928_v31 = vmax.f32 %v1927_v58, 0.0 }
 0x3ad   :  { %vm2170_vm4 = vcmp.gt.s32.totalorder %v2168_v61, %v2169_v38  ;;  %v2150_v55 = vand.u32 4294967280, %v4105_v33 }
 0x3ae   :  { %v1897_v10 = vmul.f32 %v1896_v7, %v4404_v26  ;;  %v1907_v30 = vmul.f32 %v1906_v3, %v4405_v59  ;;  %v1918_v28 = vmul.f32 %v1917_v34, %v4406_v60  ;;  %v1929_v24 = vmul.f32 %v1928_v31, %v3450_v39 }
 0x3af   :  { %v2171_v25 = vsel %vm2170_vm4, %v2168_v61, %v2169_v38  ;;  %v2152_v34 = vxor.u32 2147483647, %v2150_v55  ;;  %vm2151_vm11 = vcmp.lt.s32.totalorder %v2150_v55, 0 }
 0x3b0   :  { %v1908_v9 = vadd.f32 %v1907_v30, %v1897_v10  ;;  %vm2177_vm12 = vcmp.eq.s32.totalorder %v2157_v62, %v2171_v25  ;;  %vm2178_vm14 = vcmp.eq.s32.totalorder %v2158_v18, %v2171_v25  ;;  %v2172_v58 = vand.u32 4294967280, %v2171_v25 }
 0x3b1   :  { %v2179_v23 = vsel %vm2177_vm12, 2147483648, %v2157_v62  ;;  %v2180_v27 = vsel %vm2178_vm14, 2147483648, %v2158_v18 }
 0x3b2   :  { %v1919_v56 = vadd.f32 %v1918_v28, %v1908_v9  ;;  %v2181_v37 = vsel %vm620_vm1, %v2179_v23, 2147483648  ;;  %v2182_v21 = vsel %vm620_vm1, %v2180_v27, 2147483648  ;;  %v2174_v13 = vxor.u32 2147483647, %v2172_v58 }
 0x3b3   :  { %vm2183_vm0 = vcmp.gt.s32.totalorder %v2181_v37, %v2182_v21  ;;  %vm2173_vm9 = vcmp.lt.s32.totalorder %v2172_v58, 0  ;;  %v2153_v9 = vsel %vm2151_vm11, %v2152_v34, %v2150_v55 }
 0x3b4   :  { %v1930_v32 = vadd.f32 %v1929_v24, %v1919_v56  ;;  %v2184_v43 = vsel %vm2183_vm0, %v2181_v37, %v2182_v21  ;;  %v2175_v28 = vsel %vm2173_vm9, %v2174_v13, %v2172_v58  ;;  %v2221_v56 = vmul.f32 %v2153_v9, %v4456_v29 }
 0x3b5   :  { %v2185_v52 = vrot.slane %v2184_v43, 4  ;;  %v2222_v24 = vmul.f32 %v2175_v28, %v4372_v6  ;;  %v2231_v61 = vmul.f32 %v2153_v9, %v4457_v47  ;;  %v2243_v38 = vmul.f32 %v2175_v28, %v4374_v36 }
 0x3b6   :  { %v1931_v11 = vadd.f32 %v1930_v32, %v4408_v41  ;;  %v2232_v32 = vmul.f32 %v2175_v28, %v4373_v19 }
 0x3b7   :  { %vm2186_vm8 = vcmp.gt.s32.totalorder %v2184_v43, %v2185_v52  ;;  %v2223_v21 = vadd.f32 %v2222_v24, %v2221_v56 }
 0x3b8   :  { %v1932_v54 = vadd.f32 %v1931_v11, %v3986_v1  ;;  %v2187_v2 = vsel %vm2186_vm8, %v2184_v43, %v2185_v52  ;;  %v2254_v11 = vmul.f32 %v2175_v28, %v4375_v20  ;;  %v2233_v47 = vadd.f32 %v2232_v32, %v2231_v61 }
 0x3b9   :  { %v2188_v1 = vrot.slane %v2187_v2, 2 }
 0x3ba   :  { %2266 = vst.msk [vmem:[%s4175_s7 + $0x1] sm:$0x1] %vm1262_vm7, %v1932_v54 }
 0x3bb   :  { %vm2189_vm15 = vcmp.gt.s32.totalorder %v2187_v2, %v2188_v1 }
 0x3bc   :  { %v2190_v8 = vsel %vm2189_vm15, %v2187_v2, %v2188_v1 }
 0x3bd   :  { %v2191_v46 = vrot.slane %v2190_v8, 1 }
 0x3bf   :  { %vm2192_vm13 = vcmp.gt.s32.totalorder %v2190_v8, %v2191_v46 }
 0x3c0   :  { %v2193_v62 = vsel %vm2192_vm13, %v2190_v8, %v2191_v46 }
 0x3c1   :  { %vm2199_vm6 = vcmp.eq.s32.totalorder %v2179_v23, %v2193_v62  ;;  %vm2200_vm5 = vcmp.eq.s32.totalorder %v2180_v27, %v2193_v62  ;;  %v2194_v7 = vand.u32 4294967280, %v2193_v62 }
 0x3c2   :  { %v2201_v18 = vsel %vm2199_vm6, 2147483648, %v2179_v23  ;;  %v2202_v17 = vsel %vm2200_vm5, 2147483648, %v2180_v27  ;;  %v2242_v23 = vmul.f32 %v2153_v9, %v4458_v22  ;;  %v2253_v27 = vmul.f32 %v2153_v9, %v4459_v35 }
 0x3c3   :  { %v2203_v14 = vsel %vm620_vm1, %v2201_v18, 2147483648  ;;  %v2204_v15 = vsel %vm620_vm1, %v2202_v17, 2147483648  ;;  %v2196_v30 = vxor.u32 2147483647, %v2194_v7  ;;  %vm2195_vm3 = vcmp.lt.s32.totalorder %v2194_v7, 0 }
 0x3c4   :  { %vm2205_vm10 = vcmp.gt.s32.totalorder %v2203_v14, %v2204_v15  ;;  %v2244_v43 = vadd.f32 %v2243_v38, %v2242_v23  ;;  %v2255_v20 = vadd.f32 %v2254_v11, %v2253_v27 }
 0x3c5   :  { %v2206_v51 = vsel %vm2205_vm10, %v2203_v14, %v2204_v15  ;;  %v2197_v48 = vsel %vm2195_vm3, %v2196_v30, %v2194_v7 }
 0x3c6   :  { %v2207_v3 = vrot.slane %v2206_v51, 4  ;;  %v2224_v25 = vmul.f32 %v2197_v48, %v4413_v63  ;;  %v2234_v29 = vmul.f32 %v2197_v48, %v4414_v45  ;;  %v2245_v6 = vmul.f32 %v2197_v48, %v4415_v5 }
 0x3c7   :  { %v2256_v19 = vmul.f32 %v2197_v48, %v4416_v50 }
 0x3c8   :  { %vm2208_vm2 = vcmp.gt.s32.totalorder %v2206_v51, %v2207_v3  ;;  %v2225_v52 = vadd.f32 %v2224_v25, %v2223_v21  ;;  %v2235_v63 = vadd.f32 %v2234_v29, %v2233_v47  ;;  %v2246_v1 = vadd.f32 %v2245_v6, %v2244_v43 }
 0x3c9   :  { %v2209_v10 = vsel %vm2208_vm2, %v2206_v51, %v2207_v3  ;;  %v2257_v22 = vadd.f32 %v2256_v19, %v2255_v20 }
 0x3ca   :  { %v2210_v31 = vrot.slane %v2209_v10, 2 }
 0x3cc   :  { %vm2211_vm4 = vcmp.gt.s32.totalorder %v2209_v10, %v2210_v31 }
 0x3cd   :  { %v2212_v0 = vsel %vm2211_vm4, %v2209_v10, %v2210_v31 }
 0x3ce   :  { %v2213_v33 = vrot.slane %v2212_v0, 1 }
 0x3d0   :  { %vm2214_vm1 = vcmp.gt.s32.totalorder %v2212_v0, %v2213_v33 }
 0x3d1   :  { %v2215_v54 = vsel %vm2214_vm1, %v2212_v0, %v2213_v33 }
 0x3d2   :  { %v2216_v37 = vand.u32 4294967280, %v2215_v54 }
 0x3d4   :  { %vm2217_vm12 = vcmp.lt.s32.totalorder %v2216_v37, 0  ;;  %v2218_v36 = vxor.u32 2147483647, %v2216_v37 }
 0x3d6   :  { %v2219_v2 = vsel %vm2217_vm12, %v2218_v36, %v2216_v37 }
 0x3d7   :  { %v2226_v35 = vmul.f32 %v2219_v2, %v4423_v42  ;;  %v2236_v8 = vmul.f32 %v2219_v2, %v4424_v44  ;;  %v2247_v45 = vmul.f32 %v2219_v2, %v4425_v12  ;;  %v2258_v5 = vmul.f32 %v2219_v2, %v4426_v40 }
 0x3d9   :  { %v2227_v50 = vadd.f32 %v2226_v35, %v2225_v52  ;;  %v2237_v46 = vadd.f32 %v2236_v8, %v2235_v63  ;;  %v2248_v62 = vadd.f32 %v2247_v45, %v2246_v1  ;;  %v2259_v18 = vadd.f32 %v2258_v5, %v2257_v22 }
 0x3db   :  { %v2228_v17 = vadd.f32 %v2227_v50, %v4400_v49  ;;  %v2238_v14 = vadd.f32 %v2237_v46, %v4401_v4  ;;  %v2249_v15 = vadd.f32 %v2248_v62, %v4402_v16  ;;  %v2260_v55 = vadd.f32 %v2259_v18, %v4403_v57 }
 0x3dd   :  { %v2229_v58 = vmax.f32 %v2228_v17, 0.0  ;;  %v2239_v42 = vmax.f32 %v2238_v14, 0.0  ;;  %v2250_v51 = vmax.f32 %v2249_v15, 0.0  ;;  %v2261_v40 = vmax.f32 %v2260_v55, 0.0 }
 0x3df   :  { %v2230_v44 = vmul.f32 %v2229_v58, %v4404_v26  ;;  %v2240_v12 = vmul.f32 %v2239_v42, %v4405_v59  ;;  %v2251_v3 = vmul.f32 %v2250_v51, %v4406_v60  ;;  %v2262_v49 = vmul.f32 %v2261_v40, %v3450_v39 }
 0x3e1   :  { %v2241_v7 = vadd.f32 %v2240_v12, %v2230_v44 }
 0x3e3   :  { %v2252_v34 = vadd.f32 %v2251_v3, %v2241_v7 }
 0x3e5   :  { %v2263_v13 = vadd.f32 %v2262_v49, %v2252_v34 }
 0x3e7   :  { %v2264_v4 = vadd.f32 %v2263_v13, %v4408_v41 }
 0x3e9   :  { %v2265_v16 = vadd.f32 %v2264_v4, %v4086_v53 }
 0x3eb   :  { %2305 = vst.msk [vmem:[%s4175_s7 + $0x3] sm:$0x1] %vm1262_vm7, %v2265_v16 }
 0x3ec   :  { %2274 = vsyncpa [#allocation6], 1 }
 0x3ed   :  { %2275 = vsyncpa [#allocation9], 1 }
 0x3ee   :  { %2276 = vsyncpa [#allocation7], 1 }
 0x3ef   :  { %2277 = vsyncpa [#allocation12], 1 }

// kernel: tpu_custom_call.1
= control target key start
LH: loop header
LB: loop body
LE: loop exit
PB: predicated region body
PF: predicated region fallthrough
CT: control target
= control target key end

     0   :  { %s4168_s0 = inlined_call_operand.vmem [shape: s32[2], index: 0, kind: input, shape index: {}]   ;;  %s4169_s1 = inlined_call_operand.hbm [shape: f32[16,32], index: 1, kind: input, shape index: {}]   ;;  %s4170_s2 = inlined_call_operand.hbm [shape: f32[1,32,32], index: 2, kind: input, shape index: {}]   ;;  %s4171_s3 = inlined_call_operand.vmem [shape: f32[4,4], index: 3, kind: input, shape index: {}]   ;;  %s4172_s4 = inlined_call_operand.vmem [shape: f32[4], index: 4, kind: input, shape index: {}]   ;;  %s4173_s5 = inlined_call_operand.vmem [shape: f32[4], index: 5, kind: input, shape index: {}]   ;;  %s4174_s6 = inlined_call_operand.<no memory space> [shape: f32[1], index: 6, kind: input, shape index: {}]   ;;  %s4175_s7 = inlined_call_operand.vmem [shape: f32[4,2,2], index: 7, kind: output, shape index: {}]  }
   0x1   :  { %s12_s26 = sshll.u32 %s4168_s0, 4  ;;  %s13_s26 = int_to_ptr.vmem [resolvable:$true] %s12_s26 }
   0x2   :  { %s2407_s27 = scalar_lea.vmem %s13_s26, 16  ;;  %p2412_p1 = scmp.lt.s32.totalorder %s13_s26, %s13_s26 }
   0x3   :  { %p2408_p0 = scmp.ne.s32.totalorder %s13_s26, %s2407_s27  ;;  %p2413_p2 = scmp.lt.s32.totalorder %s2407_s27, %s2407_s27 }
   0x5   :  { %p2414_p3 = por %p2413_p2, %p2412_p1 }
   0x7   :  { %p2415_p4 = pnand %p2414_p3, %p2408_p0 }
   0x9   :  { %2418 = shalt.err (!%p2415_p4)  }
   0xa   :  { %s2509_s28 = smov [#allocation3]  }
   0xb   :  { %15 = dma.vmem_to_smem %s13_s26, 16, %s2509_s28, [#allocation2] }
   0xc   :  { %2499 = dma.done.wait [#allocation2], 16 }
   0xd   :  { %2500 = vsyncadd [#allocation2], 4294967280 }
   0xe   :  { %18 = sfence }
   0xf   :  { %19 = vsyncpa [#allocation6], 0 }
  0x10   :  { %20 = vsyncpa [#allocation9], 0 }
  0x11   :  { %21 = vsyncpa [#allocation7], 0 }
  0x12   :  { %22 = vsyncpa [#allocation12], 0  ;;  %s63_s0 = sshll.u32 %s4172_s4, 4  ;;  %s64_s0 = int_to_ptr.vmem [resolvable:$true] %s63_s0 }
  0x13   :  { %s2419_s8 = scalar_lea.vmem %s64_s0, 16  ;;  %p2424_p6 = scmp.lt.s32.totalorder %s64_s0, %s64_s0 }
  0x14   :  { %p2420_p5 = scmp.ne.s32.totalorder %s64_s0, %s2419_s8  ;;  %p2425_p7 = scmp.lt.s32.totalorder %s2419_s8, %s2419_s8 }
  0x16   :  { %p2426_p8 = por %p2425_p7, %p2424_p6 }
  0x18   :  { %p2427_p9 = pnand %p2426_p8, %p2420_p5 }
  0x1a   :  { %2430 = shalt.err (!%p2427_p9)
}
  0x1b   :  { %s2510_s9 = smov [#allocation11]   ;;  %s2511_s10 = smov [#allocation5]  }
  0x1c   :  { %66 = dma.vmem_to_smem %s64_s0, 16, %s2510_s9, [#allocation12]  }
  0x1d   :  { %s28_s11 = sshll.u32 %s2511_s10, 4  ;;  %s2431_s14 = scalar_lea.hbm %s4169_s1, 256  ;;  %s29_s11 = int_to_ptr.vmem [resolvable:$true] %s28_s11 }
  0x1e   :  { %p2432_p10 = scmp.ne.s32.totalorder %s4169_s1, %s2431_s14  ;;  %p2435_p11 = scmp.lt.u32.totalorder %s2431_s14, %s4169_s1 }
  0x20   :  { %p2437_p12 = pnand %p2435_p11, %p2432_p10 }
  0x22   :  { %2440 = shalt.err (!%p2437_p12)
}
  0x23   :  { %s2441_s18 = scalar_lea.vmem %s29_s11, 256  ;;  %p2446_p0 = scmp.lt.s32.totalorder %s29_s11, %s29_s11 }
  0x24   :  { %p2442_p13 = scmp.ne.s32.totalorder %s29_s11, %s2441_s18  ;;  %p2447_p1 = scmp.lt.s32.totalorder %s2441_s18, %s2441_s18 }
  0x26   :  { %p2448_p2 = por %p2447_p1, %p2446_p0 }
  0x28   :  { %p2449_p3 = pnand %p2448_p2, %p2442_p13 }
  0x2a   :  { %2452 = shalt.err (!%p2449_p3)
}
  0x2b   :  { %s2512_s19 = smov 128   ;;  %s2513_s20 = smov 8  }
  0x2c   :  { %34 = dma.hbm_to_vmem [thread:$0]  %s4169_s1, 256, %s29_s11, [#allocation6], %s2512_s19, %s2512_s19, %s2513_s20  }
  0x2d   :  { %s53_s25 = sshll.u32 %s4171_s3, 4  ;;  %s2514_s26 = smov [#allocation8]   ;;  %s54_s25 = int_to_ptr.vmem [resolvable:$true] %s53_s25 }
  0x2e   :  { %s40_s27 = sshll.u32 %s2514_s26, 4  ;;  %s2453_s30 = scalar_lea.hbm %s4170_s2, 512  ;;  %s41_s27 = int_to_ptr.vmem [resolvable:$true] %s40_s27 }
  0x2f   :  { %p2454_p4 = scmp.ne.s32.totalorder %s4170_s2, %s2453_s30  ;;  %p2457_p5 = scmp.lt.u32.totalorder %s2453_s30, %s4170_s2 }
  0x31   :  { %p2459_p6 = pnand %p2457_p5, %p2454_p4 }
  0x33   :  { %2462 = shalt.err (!%p2459_p6)
}
  0x34   :  { %s2463_s1 = scalar_lea.vmem %s41_s27, 512  ;;  %p2468_p8 = scmp.lt.s32.totalorder %s41_s27, %s41_s27 }
  0x35   :  { %p2464_p7 = scmp.ne.s32.totalorder %s41_s27, %s2463_s1  ;;  %p2469_p9 = scmp.lt.s32.totalorder %s2463_s1, %s2463_s1 }
  0x37   :  { %p2470_p10 = por %p2469_p9, %p2468_p8 }
  0x39   :  { %p2471_p11 = pnand %p2470_p10, %p2464_p7 }
  0x3b   :  { %2474 = shalt.err (!%p2471_p11)
}
  0x3c   :  { %46 = dma.hbm_to_vmem [thread:$0]  %s4170_s2, 512, %s41_s27, [#allocation9], %s2512_s19, %s2512_s19, %s2513_s20  }
  0x3d   :  { %s2475_s12 = scalar_lea.vmem %s54_s25, 64  ;;  %p2480_p13 = scmp.lt.s32.totalorder %s54_s25, %s54_s25 }
  0x3e   :  { %p2476_p12 = scmp.ne.s32.totalorder %s54_s25, %s2475_s12  ;;  %p2481_p0 = scmp.lt.s32.totalorder %s2475_s12, %s2475_s12 }
  0x40   :  { %p2482_p1 = por %p2481_p0, %p2480_p13 }
  0x42   :  { %p2483_p2 = pnand %p2482_p1, %p2476_p12 }
  0x44   :  { %2486 = shalt.err (!%p2483_p2)
}
  0x45   :  { %s2515_s13 = smov [#allocation10]   ;;  %s73_s16 = sshll.u32 %s4173_s5, 4  ;;  %s74_s16 = int_to_ptr.vmem [resolvable:$true] %s73_s16 }
  0x46   :  { %56 = dma.vmem_to_smem %s54_s25, 64, %s2515_s13, [#allocation7]  }
  0x47   :  { %s2487_s4 = scalar_lea.vmem %s74_s16, 16  ;;  %p2492_p4 = scmp.lt.s32.totalorder %s74_s16, %s74_s16 }
  0x48   :  { %p2488_p3 = scmp.ne.s32.totalorder %s74_s16, %s2487_s4  ;;  %p2493_p5 = scmp.lt.s32.totalorder %s2487_s4, %s2487_s4 }
  0x4a   :  { %p2494_p6 = por %p2493_p5, %p2492_p4 }
  0x4c   :  { %p2495_p7 = pnand %p2494_p6, %p2488_p3 }
  0x4e   :  { %2498 = shalt.err (!%p2495_p7)
}
  0x4f   :  { %s2516_s2 = smov [#allocation13]  }
  0x50   :  { %76 = dma.vmem_to_smem %s74_s16, 16, %s2516_s2, [#allocation12]  }
  0x51   :  { %2501 = dma.done.wait [#allocation6], 256  }
  0x52   :  { %2502 = vsyncadd [#allocation6], 4294967040 }
  0x53   :  { %2503 = dma.done.wait [#allocation9], 512  }
  0x54   :  { %2504 = vsyncadd [#allocation9], 4294966784 }
  0x55   :  { %2505 = dma.done.wait [#allocation7], 64  }
  0x56   :  { %2506 = vsyncadd [#allocation7], 4294967232 }
  0x57   :  { %2507 = dma.done.wait [#allocation12], 32  }
  0x58   :  { %2508 = vsyncadd [#allocation12], 4294967264 }
  0x59   :  { %94 = sfence }
  0x5a   :  { %v120_v0 = vld [vmem:[#allocation5] sm:$0xff]  ;;  %vm124_vm0 = vcmask 261120   ;;  %v121_v1 = vld [vmem:[#allocation5 + $0x8] sm:$0xff]  ;;  %v137_v6 = vld [vmem:[#allocation8] sm:$0xff]  ;;  %s2517_s5 = smov 124   ;;  %s2518_s17 = smov 126   ;;  %v226_v26 = vlaneseq }
  0x5b   :  { %v122_v2 = vmul.f32 %v120_v0, %v120_v0  ;;  %v123_v3 = vmul.f32 %v121_v1, %v121_v1  ;;  %v138_v7 = vld [vmem:[#allocation8 + $0x8] sm:$0xff]  ;;  %v139_v8 = vld [vmem:[#allocation8 + $0x10] sm:$0xff]  ;;  %v140_v10 = vld [vmem:[#allocation8 + $0x18] sm:$0xff]  ;;  %s2519_s18 = smov 120   ;;  %s2520_s19 = smov 122   ;;  %vm620_vm1 = vcmask 15360  }
  0x5c   :  { %v2325_v9 = vpack.c.bf16 %v138_v7, %v137_v6  ;;  %v2329_v11 = vpack.c.bf16 %v140_v10, %v139_v8  ;;  %s2521_s20 = smov 116   ;;  %s2522_s21 = smov 118   ;;  %v2532_v27 = vmov 1983009808   ;;  %v2651_v29 = vshrl.u32 %v226_v26, 7 }
  0x5d   :  { %v125_v4 = vsel %vm124_vm0, %v122_v2, 0.0  ;;  %v128_v5 = vsel %vm124_vm0, %v123_v3, 0.0  ;;  %s2523_s22 = smov 112   ;;  %s2524_s23 = smov 114   ;;  %v283_v28 = vunpack.c.l.s4 %v2532_v27  ;;  %v2533_v40 = vmov 1934713408  }
  0x5e   :  { %126 = vadd.xlane.f32.xlu0 %v125_v4  ;;  %2326 = vmatprep.subr.bf16.mxu0 %v2325_v9  ;;  %s2525_s24 = smov 108   ;;  %s2526_s25 = smov 110   ;;  %4262 = vst [vmem:[#allocation19_spill] sm:$0xff] %v2651_v29  ;;  %v347_v41 = vunpack.c.l.s4 %v2533_v40 }
  0x5f   :  { %2328 = vmatpush3.bf16.msra.mxu0 %v2325_v9  ;;  %s2527_s26 = smov 104   ;;  %s2528_s27 = smov 106   ;;  %v284_v30 = vunpack.c.0.s8 %v283_v28 }
  0x60   :  { %2330 = vmatprep.subr.bf16.mxu0 %v2329_v11  ;;  %s2529_s28 = smov 102   ;;  %s2530_s29 = smov 100   ;;  %v348_v52 = vunpack.c.0.s8 %v347_v41 }
  0x61   :  { %s2531_s30 = smov 98   ;;  %s2653_s0 = sld [smem:[#allocation3 + $0x1]]  ;;  %v2656_v33 = vsub.s32 %v284_v30, %v2651_v29 }
  0x62   :  { %129 = vadd.xlane.f32.xlu0 %v128_v5  ;;  %s2664_s8 = sld [smem:[#allocation3]]  ;;  %v2670_v59 = vsub.s32 %v348_v52, %v2651_v29  ;;  %s2534_s1 = smov 1.0  }
  0x63   :  { %2332 = vmatpush3.bf16.msra.mxu0 %v2329_v11  ;;  %s2744_s14 = sld [smem:[#allocation10]]  ;;  %s2850_s4 = sld [smem:[#allocation10 + $0x1]] }
  0x64   :  { %4263 = vst [vmem:[#allocation20_spill] sm:$0xff] %v2670_v59  ;;  %s2755_s15 = sld [smem:[#allocation10 + $0x100]]  ;;  %s2861_s2 = sld [smem:[#allocation10 + $0x81]] }
  0x65   :  { %s2767_s16 = sld [smem:[#allocation10 + $0x180]] }
  0x67   :  { %p1272_p8 = scmp.gt.s32.totalorder %s2653_s0, 4 }
  0x68   :  { %s232_s10 = scvt.s32.f32 %s2664_s8  ;;  %p230_p9 = scmp.gt.s32.totalorder %s2664_s8, 4 }
  0x69   :  { %s1273_s9 = scalar_select %p1272_p8, %s2653_s0, 4 }
  0x6a   :  { %s2682_s3 = smax.f32 %s2534_s1, %s232_s10  ;;  %s3406_s10 = sld [smem:[#allocation13 + $0x3]] }
  0x6b   :  { %v2679_v2 = vstv %s1273_s9  ;;  %s231_s11 = scalar_select %p230_p9, %s2664_s8, 4 }
  0x6c   :  { %4264 = vst [vmem:[#allocation21_spill] sm:$0xff] %v2679_v2  ;;  %vm1595_vm2 = vcmp.gt.s32.totalorder %v2679_v2, 0  ;;  %vm1596_vm3 = vcmp.gt.s32.totalorder %v2679_v2, 1  ;;  %vm1597_vm4 = vcmp.gt.s32.totalorder %v2679_v2, 2  ;;  %vm4243_vm5 = vcmp.gt.s32.totalorder %v2679_v2, 3  ;;  %s3201_s9 = sld [smem:[#allocation13 + $0x2]] }
  0x6d   :  { %vm4242_vm6 = vcmp.gt.s32.totalorder %v2679_v2, 4  ;;  %vm4241_vm7 = vcmp.gt.s32.totalorder %v2679_v2, 5  ;;  %vm4240_vm8 = vcmp.gt.s32.totalorder %v2679_v2, 6  ;;  %vm4182_vm9 = vcmp.gt.s32.totalorder %v2679_v2, 7 }
  0xeb   :  { %v127_v12 = vpop.xlane.xlu0 %126 }
  0xec   :  { %v131_v13 = vmax.f32 %v127_v12, 1e-24 }
  0xee   :  { %2359 = vrsqrt.f32 %v131_v13 }
  0xef   :  { %v130_v14 = vpop.xlane.xlu0 %129 }
  0xf0   :  { %v132_v15 = vmax.f32 %v130_v14, 1e-24 }
  0xf2   :  { %2361 = vrsqrt.f32 %v132_v15 }
  0xf8   :  { %v2360_v16 = vpop.eup %2359 }
  0xf9   :  { %v135_v17 = vmul.f32 %v2360_v16, %v120_v0 }
  0xfb   :  { %2322 = vmatprep.mubr.msk.f32.mxu0 %vm124_vm0, %v135_v17 }
  0xfc   :  { %v2362_v18 = vpop.eup %2361 }
  0xfd   :  { %v136_v19 = vmul.f32 %v2362_v18, %v121_v1 }
  0xff   :  { %2323 = vmatmul.mubr.msk.f32.vlgmr.msra.gmra.mrb[0].mxu0 %vm124_vm0, %v136_v19  ;;  %v776_v19 = vstv %s2682_s3  ;;  %s1274_s3 = scvt.s32.f32 %s2653_s0 }
 0x100   :  { %2363 = vrcp.f32 %v776_v19  ;;  %v2825_v19 = vstv %s2744_s14 }
 0x101   :  { %4286 = vst [vmem:[#allocation43_spill] sm:$0xff] %v2825_v19 }
 0x1d2   :  { %v2324_v20 = vpop.f32.mrb[0].mxu0 }
 0x1d3   :  { %v223_v21 = vmul.f32 0.1, %v2324_v20  ;;  %v213_v22 = vpop.f32.mrb[1].mxu0 }
 0x1d4   :  { %v222_v24 = vmul.f32 0.1, %v213_v22 }
 0x1d5   :  { %v2615_v23 = vmax.f32 %v2324_v20, %v223_v21  ;;  %v2699_v20 = vadd.s32 8, %v2651_v29 }
 0x1d6   :  { %v2630_v25 = vmax.f32 %v213_v22, %v222_v24 }
 0x1d7   :  { %1280 = vrot.lane.b32.xlu1 %v2615_v23, %s2517_s5  ;;  %1277 = vrot.lane.b32.xlu0 %v2615_v23, %s2518_s17  ;;  %4265 = vst [vmem:[#allocation22_spill] sm:$0xff] %v2699_v20 }
 0x1db   :  { %1286 = vrot.lane.b32.xlu1 %v2615_v23, %s2519_s18  ;;  %1283 = vrot.lane.b32.xlu0 %v2615_v23, %s2520_s19 }
 0x1df   :  { %1292 = vrot.lane.b32.xlu1 %v2615_v23, %s2521_s20  ;;  %1289 = vrot.lane.b32.xlu0 %v2615_v23, %s2522_s21 }
 0x1e3   :  { %1298 = vrot.lane.b32.xlu1 %v2615_v23, %s2523_s22  ;;  %1295 = vrot.lane.b32.xlu0 %v2615_v23, %s2524_s23 }
 0x1e7   :  { %1304 = vrot.lane.b32.xlu1 %v2615_v23, %s2525_s24  ;;  %1301 = vrot.lane.b32.xlu0 %v2615_v23, %s2526_s25 }
 0x1eb   :  { %1310 = vrot.lane.b32.xlu1 %v2615_v23, %s2527_s26  ;;  %1307 = vrot.lane.b32.xlu0 %v2615_v23, %s2528_s27 }
 0x1ef   :  { %1313 = vrot.lane.b32.xlu0 %v2615_v23, %s2529_s28  ;;  %235 = vrot.lane.b32.xlu1 %v2630_v25, %s2518_s17  ;;  %s2889_s17 = sld [smem:[#allocation10 + $0x181]] }
 0x1f3   :  { %241 = vrot.lane.b32.xlu0 %v2630_v25, %s2520_s19  ;;  %238 = vrot.lane.b32.xlu1 %v2630_v25, %s2517_s5  ;;  %s2863_s5 = sld [smem:[#allocation10 + $0x101]]  ;;  %s3083_s19 = sld [smem:[#allocation10 + $0x82]] }
 0x1f7   :  { %262 = vrot.lane.b32.xlu0 %v2630_v25, %s2525_s24  ;;  %244 = vrot.lane.b32.xlu1 %v2630_v25, %s2519_s18  ;;  %s3070_s18 = sld [smem:[#allocation10 + $0x2]]  ;;  %s3148_s24 = sld [smem:[#allocation10 + $0x103]] }
 0x1fb   :  { %268 = vrot.lane.b32.xlu0 %v2630_v25, %s2527_s26  ;;  %247 = vrot.lane.b32.xlu1 %v2630_v25, %s2522_s21  ;;  %s3138_s21 = sld [smem:[#allocation10 + $0x3]]  ;;  %s3156_s26 = sld [smem:[#allocation11]] }
 0x1ff   :  { %274 = vrot.lane.b32.xlu0 %v2630_v25, %s2530_s29  ;;  %250 = vrot.lane.b32.xlu1 %v2630_v25, %s2521_s20  ;;  %s3085_s20 = sld [smem:[#allocation10 + $0x102]] }
 0x203   :  { %1319 = vrot.lane.b32.xlu0 %v2615_v23, %s2531_s30  ;;  %253 = vrot.lane.b32.xlu1 %v2630_v25, %s2524_s23  ;;  %s3146_s23 = sld [smem:[#allocation10 + $0x83]] }
 0x207   :  { %256 = vrot.lane.b32.xlu1 %v2630_v25, %s2523_s22  ;;  %s3140_s22 = sld [smem:[#allocation10 + $0x182]] }
 0x20b   :  { %259 = vrot.lane.b32.xlu1 %v2630_v25, %s2526_s25  ;;  %s3154_s25 = sld [smem:[#allocation10 + $0x183]] }
 0x20f   :  { %265 = vrot.lane.b32.xlu1 %v2630_v25, %s2528_s27  ;;  %s3165_s27 = sld [smem:[#allocation11 + $0x1]] }
 0x213   :  { %271 = vrot.lane.b32.xlu1 %v2630_v25, %s2529_s28  ;;  %s3167_s28 = sld [smem:[#allocation13]] }
 0x217   :  { %277 = vrot.lane.b32.xlu1 %v2630_v25, %s2531_s30  ;;  %s3183_s30 = sld [smem:[#allocation13 + $0x1]] }
 0x21b   :  { %1316 = vrot.lane.b32.xlu1 %v2615_v23, %s2530_s29  ;;  %s3181_s29 = sld [smem:[#allocation11 + $0x2]] }
 0x249   :  { %v1281_v31 = vpop.permute.xlu1 %1280  ;;  %v1278_v32 = vpop.permute.xlu0 %1277 }
 0x24a   :  { %v1322_v34 = vcombine.low %v2615_v23, %v1281_v31  ;;  %v1323_v35 = vcombine.high %v2615_v23, %v1281_v31 }
 0x24c   :  { %v1330_v42 = vrot.slane %v1322_v34, %v2656_v33  ;;  %v1337_v43 = vrot.slane %v1323_v35, %v2656_v33  ;;  %v2719_v34 = vstv %s231_s11  ;;  %v2722_v35 = vstv %s2664_s8  ;;  %s3199_s8 = sld [smem:[#allocation11 + $0x3]] }
 0x24d   :  { %v1287_v36 = vpop.permute.xlu1 %1286  ;;  %v1284_v37 = vpop.permute.xlu0 %1283  ;;  %vm553_vm10 = vcmp.gt.s32.totalorder %v2719_v34, 0  ;;  %vm554_vm11 = vcmp.gt.s32.totalorder %v2719_v34, 1  ;;  %vm555_vm12 = vcmp.gt.s32.totalorder %v2719_v34, 2  ;;  %vm556_vm13 = vcmp.gt.s32.totalorder %v2719_v34, 3 }
 0x24e   :  { %v1338_v38 = vcombine.low %v1278_v32, %v1284_v37  ;;  %v1339_v39 = vcombine.high %v1278_v32, %v1284_v37  ;;  %v2730_v37 = vstv %s4174_s6  ;;  %s2753_s6 = sld [smem:[#allocation10 + $0x80]]  ;;  %vm557_vm14 = vcmp.gt.s32.totalorder %v2719_v34, 4 }
 0x24f   :  { %4274 = vst [vmem:[#allocation31_spill] sm:$0xff] %v2730_v37  ;;  %vm558_vm15 = vcmp.gt.s32.totalorder %v2719_v34, 5  ;;  %vm559_vm0 = vcmp.gt.s32.totalorder %v2719_v34, 6 }
 0x250   :  { %v1346_v44 = vrot.slane %v1338_v38, %v2656_v33  ;;  %v1353_v45 = vrot.slane %v1339_v39, %v2656_v33 }
 0x251   :  { %v1293_v46 = vpop.permute.xlu1 %1292  ;;  %v1290_v47 = vpop.permute.xlu0 %1289 }
 0x252   :  { %v1386_v48 = vcombine.low %v1330_v42, %v1346_v44  ;;  %v1387_v49 = vcombine.high %v1330_v42, %v1346_v44  ;;  %v1402_v50 = vcombine.low %v1337_v43, %v1353_v45  ;;  %v1403_v51 = vcombine.high %v1337_v43, %v1353_v45 }
 0x253   :  { %v1354_v53 = vcombine.low %v1287_v36, %v1293_v46  ;;  %v1355_v54 = vcombine.high %v1287_v36, %v1293_v46 }
 0x254   :  { %v1394_v7 = vrot.slane %v1386_v48, %v2670_v59  ;;  %v1401_v8 = vrot.slane %v1387_v49, %v2670_v59  ;;  %v1410_v15 = vrot.slane %v1402_v50, %v2670_v59  ;;  %v1417_v16 = vrot.slane %v1403_v51, %v2670_v59 }
 0x255   :  { %v1299_v55 = vpop.permute.xlu1 %1298  ;;  %v1296_v56 = vpop.permute.xlu0 %1295  ;;  %v1362_v60 = vrot.slane %v1354_v53, %v2656_v33  ;;  %v1369_v61 = vrot.slane %v1355_v54, %v2656_v33 }
 0x256   :  { %v1370_v57 = vcombine.low %v1290_v47, %v1296_v56  ;;  %v1371_v58 = vcombine.high %v1290_v47, %v1296_v56 }
 0x258   :  { %v1378_v62 = vrot.slane %v1370_v57, %v2656_v33  ;;  %v1385_v63 = vrot.slane %v1371_v58, %v2656_v33 }
 0x259   :  { %v1305_v0 = vpop.permute.xlu1 %1304  ;;  %v2676_v1 = vpop.permute.xlu0 %1301 }
 0x25a   :  { %v1418_v3 = vcombine.low %v1362_v60, %v1378_v62  ;;  %v1419_v4 = vcombine.high %v1362_v60, %v1378_v62  ;;  %v1434_v5 = vcombine.low %v1369_v61, %v1385_v63  ;;  %v1435_v6 = vcombine.high %v1369_v61, %v1385_v63 }
 0x25b   :  { %v1458_v9 = vcombine.low %v1299_v55, %v1305_v0  ;;  %v1459_v10 = vcombine.high %v1299_v55, %v1305_v0 }
 0x25c   :  { %v1426_v11 = vrot.slane %v1418_v3, %v2670_v59  ;;  %v1433_v12 = vrot.slane %v1419_v4, %v2670_v59  ;;  %v1442_v13 = vrot.slane %v1434_v5, %v2670_v59  ;;  %v1449_v14 = vrot.slane %v1435_v6, %v2670_v59 }
 0x25d   :  { %v2692_v17 = vpop.permute.xlu1 %1310  ;;  %v1308_v18 = vpop.permute.xlu0 %1307  ;;  %v2738_v40 = vrot.slane %v1458_v9, %v2656_v33  ;;  %v2741_v41 = vrot.slane %v1459_v10, %v2656_v33 }
 0x25e   :  { %v2701_v21 = vcombine.low %v1394_v7, %v1426_v11  ;;  %v2703_v22 = vcombine.high %v1394_v7, %v1426_v11  ;;  %v2705_v23 = vcombine.low %v1401_v8, %v1433_v12  ;;  %v2707_v24 = vcombine.high %v1401_v8, %v1433_v12 }
 0x25f   :  { %v2709_v26 = vcombine.low %v1410_v15, %v1442_v13  ;;  %v2711_v27 = vcombine.high %v1410_v15, %v1442_v13  ;;  %v2713_v28 = vcombine.low %v1417_v16, %v1449_v14  ;;  %v2715_v30 = vcombine.high %v1417_v16, %v1449_v14  ;;  %v2819_v16 = vpop.eup %2363 }
 0x260   :  { %4266 = vst [vmem:[#allocation23_spill] sm:$0xff] %v2701_v21  ;;  %4267 = vst [vmem:[#allocation24_spill] sm:$0xff] %v2703_v22  ;;  %v1933_v39 = vmul.f32 %v2701_v21, %v2701_v21  ;;  %v1935_v43 = vmul.f32 %v2703_v22, %v2703_v22  ;;  %v1937_v44 = vmul.f32 %v2705_v23, %v2705_v23  ;;  %v2812_v14 = vsel %vm1595_vm2, %v2701_v21, 0.0 }
 0x261   :  { %4268 = vst [vmem:[#allocation25_spill] sm:$0xff] %v2705_v23  ;;  %4269 = vst [vmem:[#allocation26_spill] sm:$0xff] %v2707_v24  ;;  %v2717_v31 = vpop.permute.xlu0 %1313  ;;  %v236_v32 = vpop.permute.xlu1 %235  ;;  %v1474_v45 = vcombine.low %v2676_v1, %v1308_v18  ;;  %v1475_v46 = vcombine.high %v2676_v1, %v1308_v18  ;;  %v1939_v47 = vmul.f32 %v2707_v24, %v2707_v24  ;;  %v2817_v15 = vsel %vm1596_vm3, %v2703_v22, 0.0 }
 0x262   :  { %4270 = vst [vmem:[#allocation27_spill] sm:$0xff] %v2709_v26  ;;  %4271 = vst [vmem:[#allocation28_spill] sm:$0xff] %v2711_v27  ;;  %v1941_v48 = vmul.f32 %v2709_v26, %v2709_v26  ;;  %v1943_v49 = vmul.f32 %v2711_v27, %v2711_v27  ;;  %v1945_v50 = vmul.f32 %v2713_v28, %v2713_v28  ;;  %v2775_v57 = vsel %vm620_vm1, %v1933_v39, 0.0 }
 0x263   :  { %4272 = vst [vmem:[#allocation29_spill] sm:$0xff] %v2713_v28  ;;  %4273 = vst [vmem:[#allocation30_spill] sm:$0xff] %v2715_v30  ;;  %v1947_v53 = vmul.f32 %v2715_v30, %v2715_v30  ;;  %v1482_v54 = vrot.slane %v1474_v45, %v2656_v33  ;;  %v1489_v55 = vrot.slane %v1475_v46, %v2656_v33  ;;  %v2784_v3 = vsel %vm620_vm1, %v1935_v43, 0.0 }
 0x264   :  { %4275 = vst [vmem:[#allocation32_spill] sm:$0xff] %v2775_v57  ;;  %4276 = vst [vmem:[#allocation33_spill] sm:$0xff] %v2784_v3  ;;  %v2787_v4 = vsel %vm620_vm1, %v1937_v44, 0.0  ;;  %v2796_v8 = vsel %vm620_vm1, %v1939_v47, 0.0  ;;  %v2799_v9 = vsel %vm620_vm1, %v1941_v48, 0.0  ;;  %v2802_v10 = vsel %vm620_vm1, %v1943_v49, 0.0 }
 0x265   :  { %v242_v51 = vpop.permute.xlu0 %241  ;;  %v239_v52 = vpop.permute.xlu1 %238  ;;  %v1522_v62 = vcombine.low %v2738_v40, %v1482_v54  ;;  %v1523_v63 = vcombine.high %v2738_v40, %v1482_v54  ;;  %v1538_v0 = vcombine.low %v2741_v41, %v1489_v55  ;;  %v1539_v1 = vcombine.high %v2741_v41, %v1489_v55  ;;  %4277 = vst [vmem:[#allocation34_spill] sm:$0xff] %v2787_v4 }
 0x266   :  { %v296_v56 = vcombine.low %v236_v32, %v242_v51  ;;  %v297_v58 = vcombine.high %v236_v32, %v242_v51  ;;  %v280_v60 = vcombine.low %v2630_v25, %v239_v52  ;;  %v281_v61 = vcombine.high %v2630_v25, %v239_v52  ;;  %4278 = vst [vmem:[#allocation35_spill] sm:$0xff] %v2796_v8 }
 0x267   :  { %4279 = vst [vmem:[#allocation36_spill] sm:$0xff] %v2799_v9  ;;  %4280 = vst [vmem:[#allocation37_spill] sm:$0xff] %v2802_v10  ;;  %v2805_v11 = vsel %vm620_vm1, %v1945_v50, 0.0  ;;  %v2822_v18 = vsel %vm620_vm1, %v1947_v53, 0.0  ;;  %v2828_v32 = vstv %s2753_s6  ;;  %v2831_v39 = vstv %s2755_s15 }
 0x268   :  { %v304_v5 = vrot.slane %v296_v56, %v2656_v33  ;;  %v288_v25 = vrot.slane %v280_v60, %v2656_v33  ;;  %4281 = vst [vmem:[#allocation38_spill] sm:$0xff] %v2805_v11  ;;  %v311_v12 = vrot.slane %v297_v58, %v2656_v33  ;;  %v295_v13 = vrot.slane %v281_v61, %v2656_v33 }
 0x269   :  { %v2791_v6 = vpop.permute.xlu0 %262  ;;  %v2793_v7 = vpop.permute.xlu1 %244  ;;  %4282 = vst [vmem:[#allocation39_spill] sm:$0xff] %v2812_v14  ;;  %4283 = vst [vmem:[#allocation40_spill] sm:$0xff] %v2817_v15  ;;  %v2838_v44 = vstv %s2767_s16  ;;  %v2843_v45 = vsel %vm1597_vm4, %v2705_v23, 0.0  ;;  %v2848_v46 = vsel %vm4243_vm5, %v2707_v24, 0.0  ;;  %v2855_v48 = vsel %vm4242_vm6, %v2709_v26, 0.0 }
 0x26a   :  { %4284 = vst [vmem:[#allocation41_spill] sm:$0xff] %v2819_v16  ;;  %4285 = vst [vmem:[#allocation42_spill] sm:$0xff] %v2822_v18  ;;  %v344_v40 = vcombine.low %v288_v25, %v304_v5  ;;  %v345_v47 = vcombine.high %v288_v25, %v304_v5  ;;  %v1646_v49 = vmul.f32 %v2812_v14, %v2812_v14  ;;  %v2868_v53 = vsel %vm4241_vm7, %v2711_v27, 0.0 }
 0x26b   :  { %4287 = vst [vmem:[#allocation44_spill] sm:$0xff] %v2828_v32  ;;  %4288 = vst [vmem:[#allocation45_spill] sm:$0xff] %v2831_v39  ;;  %v1648_v50 = vmul.f32 %v2817_v15, %v2817_v15  ;;  %v360_v51 = vcombine.low %v295_v13, %v311_v12  ;;  %v361_v52 = vcombine.high %v295_v13, %v311_v12  ;;  %v2873_v54 = vsel %vm4240_vm8, %v2713_v28, 0.0 }
 0x26c   :  { %4289 = vst [vmem:[#allocation46_spill] sm:$0xff] %v2838_v44  ;;  %4290 = vst [vmem:[#allocation47_spill] sm:$0xff] %v2843_v45  ;;  %v2876_v55 = vrot.slane %v1522_v62, %v2670_v59  ;;  %v2879_v56 = vrot.slane %v1523_v63, %v2670_v59  ;;  %v2882_v58 = vrot.slane %v1538_v0, %v2670_v59  ;;  %v2894_v62 = vsel %vm4182_vm9, %v2715_v30, 0.0 }
 0x26d   :  { %v2833_v41 = vpop.permute.xlu0 %268  ;;  %v2835_v43 = vpop.permute.xlu1 %247  ;;  %4291 = vst [vmem:[#allocation48_spill] sm:$0xff] %v2848_v46  ;;  %4292 = vst [vmem:[#allocation49_spill] sm:$0xff] %v2855_v48  ;;  %v1650_v60 = vmul.f32 %v2843_v45, %v2843_v45  ;;  %v2887_v61 = vrot.slane %v1539_v1, %v2670_v59  ;;  %v1652_v63 = vmul.f32 %v2848_v46, %v2848_v46  ;;  %v1662_v13 = vsel %vm620_vm1, %v1646_v49, 0.0 }
 0x26e   :  { %4293 = vst [vmem:[#allocation50_spill] sm:$0xff] %v2868_v53  ;;  %4294 = vst [vmem:[#allocation51_spill] sm:$0xff] %v2873_v54  ;;  %v1654_v0 = vmul.f32 %v2855_v48, %v2855_v48  ;;  %v1656_v12 = vmul.f32 %v2868_v53, %v2868_v53  ;;  %v1658_v1 = vmul.f32 %v2873_v54, %v2873_v54  ;;  %v1663_v42 = vsel %vm620_vm1, %v1648_v50, 0.0 }
 0x26f   :  { %4295 = vst [vmem:[#allocation52_spill] sm:$0xff] %v2876_v55  ;;  %4296 = vst [vmem:[#allocation53_spill] sm:$0xff] %v2879_v56  ;;  %v352_v38 = vrot.slane %v344_v40, %v2670_v59  ;;  %v359_v36 = vrot.slane %v345_v47, %v2670_v59  ;;  %v368_v30 = vrot.slane %v360_v51, %v2670_v59  ;;  %v1665_v23 = vsel %vm620_vm1, %v1650_v60, 0.0 }
 0x270   :  { %4297 = vst [vmem:[#allocation54_spill] sm:$0xff] %v2882_v58  ;;  %4298 = vst [vmem:[#allocation55_spill] sm:$0xff] %v2887_v61  ;;  %v375_v28 = vrot.slane %v361_v52, %v2670_v59  ;;  %v1660_v24 = vmul.f32 %v2894_v62, %v2894_v62  ;;  %v1667_v47 = vsel %vm620_vm1, %v1652_v63, 0.0  ;;  %v2922_v50 = vsel %vm620_vm1, %v1654_v0, 0.0 }
 0x271   :  { %v275_v5 = vpop.permute.xlu0 %274  ;;  %v251_v25 = vpop.permute.xlu1 %250  ;;  %4299 = vst [vmem:[#allocation56_spill] sm:$0xff] %v2894_v62  ;;  %vm560_vm9 = vcmp.gt.s32.totalorder %v2719_v34, 7  ;;  %v2938_v0 = vstv %s2850_s4  ;;  %v2944_v22 = vstv %s2863_s5  ;;  %vm765_vm8 = vcmask 1047559  }
 0x272   :  { %v312_v27 = vcombine.low %v2793_v7, %v251_v25  ;;  %v313_v26 = vcombine.high %v2793_v7, %v251_v25  ;;  %v448_v49 = vcombine.low %v2833_v41, %v275_v5  ;;  %v1664_v7 = vadd.f32 %v1663_v42, %v1662_v13  ;;  %4300 = vst [vmem:[#allocation57_spill] sm:$0xff] %v2938_v0 }
 0x273   :  { %v2931_v42 = vsel %vm620_vm1, %v1656_v12, 0.0  ;;  %v2934_v25 = vsel %vm620_vm1, %v1658_v1, 0.0  ;;  %v449_v63 = vcombine.high %v2833_v41, %v275_v5  ;;  %v2941_v13 = vstv %s2861_s2  ;;  %4302 = vst [vmem:[#allocation59_spill] sm:$0xff] %v2944_v22 }
 0x274   :  { %4301 = vst [vmem:[#allocation58_spill] sm:$0xff] %v2941_v13  ;;  %v320_v21 = vrot.slane %v312_v27, %v2656_v33  ;;  %v327_v18 = vrot.slane %v313_v26, %v2656_v33  ;;  %v2951_v1 = vrot.slane %v448_v49, %v2656_v33  ;;  %v1666_v11 = vadd.f32 %v1665_v23, %v1664_v7 }
 0x275   :  { %v254_v40 = vpop.permute.xlu1 %253  ;;  %v1320_v51 = vpop.permute.xlu0 %1319  ;;  %v2958_v27 = vrot.slane %v449_v63, %v2656_v33  ;;  %v2965_v49 = vsel %vm620_vm1, %v1660_v24, 0.0  ;;  %vm570_vm7 = vcmp.lt.s32.totalorder %v2651_v29, %v2719_v34  ;;  %vm571_vm6 = vcmp.lt.s32.totalorder %v2651_v29, %v2722_v35 }
 0x276   :  { %v328_v52 = vcombine.low %v2835_v43, %v254_v40  ;;  %v329_v60 = vcombine.high %v2835_v43, %v254_v40  ;;  %v1506_v41 = vcombine.low %v2717_v31, %v1320_v51  ;;  %v2955_v40 = vstv %s2889_s17 }
 0x277   :  { %4303 = vst [vmem:[#allocation60_spill] sm:$0xff] %v2955_v40  ;;  %v1507_v26 = vcombine.high %v2717_v31, %v1320_v51  ;;  %v1668_v63 = vadd.f32 %v1667_v47, %v1666_v11  ;;  %vm564_vm5 = vcmp.gt.s32.totalorder %v2722_v35, 2 }
 0x278   :  { %v336_v43 = vrot.slane %v328_v52, %v2656_v33  ;;  %v343_v12 = vrot.slane %v329_v60, %v2656_v33  ;;  %v2962_v52 = vstv %s2653_s0  ;;  %s3466_s0 = smax.f32 %s2534_s1, %s1274_s3 }
 0x279   :  { %v257_v5 = vpop.permute.xlu1 %256  ;;  %4304 = vst [vmem:[#allocation61_spill] sm:$0xff] %v2962_v52  ;;  %v3043_v3 = vrot.slane %v1507_v26, %v2656_v33  ;;  %v3061_v54 = vadd.f32 %v2922_v50, %v1668_v63 }
 0x27a   :  { %v376_v10 = vcombine.low %v320_v21, %v336_v43  ;;  %v377_v9 = vcombine.high %v320_v21, %v336_v43  ;;  %v392_v8 = vcombine.low %v327_v18, %v343_v12  ;;  %v393_v37 = vcombine.high %v327_v18, %v343_v12 }
 0x27b   :  { %v2972_v18 = vrot.slane %v1506_v41, %v2656_v33  ;;  %v416_v7 = vcombine.low %v257_v5, %v2791_v6  ;;  %v417_v31 = vcombine.high %v257_v5, %v2791_v6  ;;  %4311 = vst [vmem:[#allocation68_spill] sm:$0xff] %v3043_v3  ;;  %v3242_v3 = vstv %s3140_s22 }
 0x27c   :  { %v384_v60 = vrot.slane %v376_v10, %v2670_v59  ;;  %v391_v4 = vrot.slane %v377_v9, %v2670_v59  ;;  %v400_v23 = vrot.slane %v392_v8, %v2670_v59  ;;  %v407_v21 = vrot.slane %v393_v37, %v2670_v59  ;;  %4320 = vst [vmem:[#allocation77_spill] sm:$0xff] %v3242_v3 }
 0x27d   :  { %4305 = vst [vmem:[#allocation62_spill] sm:$0xff] %v2972_v18  ;;  %v2976_v51 = vpop.permute.xlu1 %259  ;;  %v424_v61 = vrot.slane %v416_v7, %v2656_v33  ;;  %v3055_v13 = vrot.slane %v417_v31, %v2656_v33  ;;  %v3246_v19 = vadd.f32 %v2931_v42, %v3061_v54  ;;  %v3258_v42 = vstv %s3156_s26 }
 0x27e   :  { %v2978_v24 = vcombine.low %v352_v38, %v384_v60  ;;  %v2980_v43 = vcombine.high %v352_v38, %v384_v60  ;;  %v2982_v10 = vcombine.low %v359_v36, %v391_v4  ;;  %v2984_v9 = vcombine.high %v359_v36, %v391_v4  ;;  %4322 = vst [vmem:[#allocation79_spill] sm:$0xff] %v3258_v42 }
 0x27f   :  { %v2986_v8 = vcombine.low %v368_v30, %v400_v23  ;;  %v2988_v37 = vcombine.high %v368_v30, %v400_v23  ;;  %v2990_v12 = vcombine.low %v375_v28, %v407_v21  ;;  %v2992_v41 = vcombine.high %v375_v28, %v407_v21 }
 0x280   :  { %4306 = vst [vmem:[#allocation63_spill] sm:$0xff] %v2984_v9  ;;  %v2997_v6 = vsel %vm553_vm10, %v2978_v24, 0.0  ;;  %v3002_v38 = vsel %vm554_vm11, %v2980_v43, 0.0  ;;  %v3007_v36 = vsel %vm555_vm12, %v2982_v10, 0.0  ;;  %v3012_v28 = vsel %vm556_vm13, %v2984_v9, 0.0 }
 0x281   :  { %4307 = vst [vmem:[#allocation64_spill] sm:$0xff] %v2986_v8  ;;  %4308 = vst [vmem:[#allocation65_spill] sm:$0xff] %v2988_v37  ;;  %v3017_v30 = vsel %vm557_vm14, %v2986_v8, 0.0  ;;  %v3022_v4 = vsel %vm558_vm15, %v2988_v37, 0.0  ;;  %v3027_v11 = vsel %vm559_vm0, %v2990_v12, 0.0  ;;  %v3032_v47 = vsel %vm560_vm9, %v2992_v41, 0.0  ;;  %v266_v5 = vpop.permute.xlu1 %265 }
 0x282   :  { %4309 = vst [vmem:[#allocation66_spill] sm:$0xff] %v2990_v12  ;;  %4310 = vst [vmem:[#allocation67_spill] sm:$0xff] %v2992_v41  ;;  %v604_v60 = vmul.f32 %v2997_v6, %v2997_v6  ;;  %v606_v23 = vmul.f32 %v3002_v38, %v3002_v38  ;;  %v608_v21 = vmul.f32 %v3007_v36, %v3007_v36 }
 0x283   :  { %v610_v52 = vmul.f32 %v3012_v28, %v3012_v28  ;;  %v612_v57 = vmul.f32 %v3017_v30, %v3017_v30  ;;  %v614_v2 = vmul.f32 %v3022_v4, %v3022_v4  ;;  %v616_v58 = vmul.f32 %v3027_v11, %v3027_v11 }
 0x284   :  { %v621_v40 = vsel %vm620_vm1, %v604_v60, 0.0  ;;  %v622_v22 = vsel %vm620_vm1, %v606_v23, 0.0  ;;  %v618_v26 = vmul.f32 %v3032_v47, %v3032_v47  ;;  %v624_v56 = vsel %vm620_vm1, %v608_v21, 0.0 }
 0x285   :  { %v623_v0 = vadd.f32 %v622_v22, %v621_v40  ;;  %v272_v62 = vpop.permute.xlu1 %271  ;;  %v626_v7 = vsel %vm620_vm1, %v610_v52, 0.0  ;;  %v925_v60 = vmul.f32 %v2978_v24, %v2978_v24  ;;  %v927_v23 = vmul.f32 %v2980_v43, %v2980_v43 }
 0x286   :  { %v929_v31 = vmul.f32 %v2982_v10, %v2982_v10  ;;  %v628_v40 = vsel %vm620_vm1, %v612_v57, 0.0  ;;  %v630_v21 = vsel %vm620_vm1, %v614_v2, 0.0  ;;  %v931_v50 = vmul.f32 %v2984_v9, %v2984_v9 }
 0x287   :  { %v625_v22 = vadd.f32 %v624_v56, %v623_v0  ;;  %v632_v52 = vsel %vm620_vm1, %v616_v58, 0.0  ;;  %v933_v63 = vmul.f32 %v2986_v8, %v2986_v8  ;;  %v935_v53 = vmul.f32 %v2988_v37, %v2988_v37 }
 0x288   :  { %v937_v48 = vmul.f32 %v2990_v12, %v2990_v12  ;;  %v634_v2 = vsel %vm620_vm1, %v618_v26, 0.0  ;;  %v939_v56 = vmul.f32 %v2992_v41, %v2992_v41  ;;  %v3091_v58 = vsel %vm620_vm1, %v925_v60, 0.0 }
 0x289   :  { %v627_v57 = vadd.f32 %v626_v7, %v625_v22  ;;  %v278_v0 = vpop.permute.xlu1 %277  ;;  %v3094_v46 = vsel %vm620_vm1, %v927_v23, 0.0  ;;  %v3097_v45 = vsel %vm620_vm1, %v929_v31, 0.0  ;;  %v3100_v20 = vsel %vm620_vm1, %v931_v50, 0.0 }
 0x28a   :  { %v432_v7 = vcombine.low %v2976_v51, %v266_v5  ;;  %v433_v22 = vcombine.high %v2976_v51, %v266_v5  ;;  %v464_v15 = vcombine.low %v272_v62, %v278_v0  ;;  %v465_v14 = vcombine.high %v272_v62, %v278_v0 }
 0x28b   :  { %v629_v26 = vadd.f32 %v628_v40, %v627_v57  ;;  %v3105_v60 = vsel %vm620_vm1, %v933_v63, 0.0  ;;  %v3108_v23 = vsel %vm620_vm1, %v935_v53, 0.0  ;;  %v3111_v31 = vsel %vm620_vm1, %v937_v48, 0.0 }
 0x28c   :  { %v440_v50 = vrot.slane %v432_v7, %v2656_v33  ;;  %v447_v40 = vrot.slane %v433_v22, %v2656_v33  ;;  %v472_v51 = vrot.slane %v464_v15, %v2656_v33  ;;  %v479_v62 = vrot.slane %v465_v14, %v2656_v33 }
 0x28d   :  { %v631_v55 = vadd.f32 %v630_v21, %v629_v26  ;;  %v3118_v5 = vsel %vm620_vm1, %v939_v56, 0.0  ;;  %v3121_v57 = vstv %s3070_s18  ;;  %v3129_v22 = vstv %s3083_s19 }
 0x28e   :  { %v480_v63 = vcombine.low %v424_v61, %v440_v50  ;;  %v481_v53 = vcombine.high %v424_v61, %v440_v50  ;;  %4312 = vst [vmem:[#allocation69_spill] sm:$0xff] %v3121_v57  ;;  %v496_v0 = vcombine.low %v3055_v13, %v447_v40  ;;  %v497_v7 = vcombine.high %v3055_v13, %v447_v40 }
 0x28f   :  { %v633_v48 = vadd.f32 %v632_v52, %v631_v55  ;;  %v512_v21 = vcombine.low %v2951_v1, %v472_v51  ;;  %v513_v26 = vcombine.high %v2951_v1, %v472_v51  ;;  %v528_v15 = vcombine.low %v2958_v27, %v479_v62  ;;  %4313 = vst [vmem:[#allocation70_spill] sm:$0xff] %v3129_v22 }
 0x290   :  { %v3132_v14 = vstv %s3085_s20  ;;  %v488_v61 = vrot.slane %v480_v63, %v2670_v59  ;;  %v495_v50 = vrot.slane %v481_v53, %v2670_v59  ;;  %v504_v52 = vrot.slane %v496_v0, %v2670_v59 }
 0x291   :  { %4314 = vst [vmem:[#allocation71_spill] sm:$0xff] %v3132_v14  ;;  %v635_v56 = vadd.f32 %v634_v2, %v633_v48  ;;  %v520_v55 = vrot.slane %v512_v21, %v2670_v59  ;;  %v527_v13 = vrot.slane %v513_v26, %v2670_v59  ;;  %v529_v1 = vcombine.high %v2958_v27, %v479_v62 }
 0x292   :  { %v536_v40 = vrot.slane %v528_v15, %v2670_v59  ;;  %v511_v2 = vrot.slane %v497_v7, %v2670_v59  ;;  %v3255_v12 = vstv %s3138_s21 }
 0x293   :  { %v651_v51 = vmax.f32 %v635_v56, 1e-24  ;;  %v3150_v63 = vcombine.low %v488_v61, %v520_v55  ;;  %v3152_v53 = vcombine.high %v488_v61, %v520_v55  ;;  %v543_v48 = vrot.slane %v529_v1, %v2670_v59  ;;  %4321 = vst [vmem:[#allocation78_spill] sm:$0xff] %v3255_v12 }
 0x294   :  { %v3159_v27 = vcombine.low %v495_v50, %v527_v13  ;;  %v3161_v62 = vcombine.high %v495_v50, %v527_v13  ;;  %v3163_v0 = vcombine.low %v504_v52, %v536_v40  ;;  %v3169_v7 = vcombine.high %v504_v52, %v536_v40 }
 0x295   :  { %2365 = vrsqrt.f32 %v651_v51  ;;  %v3174_v21 = vsel %vm553_vm10, %v3150_v63, 0.0  ;;  %v3179_v26 = vsel %vm554_vm11, %v3152_v53, 0.0  ;;  %v3185_v15 = vcombine.low %v511_v2, %v543_v48 }
 0x296   :  { %4315 = vst [vmem:[#allocation72_spill] sm:$0xff] %v3161_v62  ;;  %4316 = vst [vmem:[#allocation73_spill] sm:$0xff] %v3163_v0  ;;  %v3187_v56 = vcombine.high %v511_v2, %v543_v48  ;;  %v3192_v61 = vsel %vm555_vm12, %v3159_v27, 0.0  ;;  %v3197_v50 = vsel %vm556_vm13, %v3161_v62, 0.0  ;;  %v3206_v55 = vsel %vm557_vm14, %v3163_v0, 0.0 }
 0x297   :  { %4317 = vst [vmem:[#allocation74_spill] sm:$0xff] %v3169_v7  ;;  %4318 = vst [vmem:[#allocation75_spill] sm:$0xff] %v3185_v15  ;;  %v3211_v52 = vsel %vm558_vm15, %v3169_v7, 0.0  ;;  %v605_v13 = vmul.f32 %v3174_v21, %v3174_v21  ;;  %v607_v1 = vmul.f32 %v3179_v26, %v3179_v26  ;;  %v3220_v40 = vsel %vm559_vm0, %v3185_v15, 0.0 }
 0x298   :  { %4319 = vst [vmem:[#allocation76_spill] sm:$0xff] %v3187_v56  ;;  %v3225_v51 = vsel %vm560_vm9, %v3187_v56, 0.0  ;;  %v609_v2 = vmul.f32 %v3192_v61, %v3192_v61  ;;  %v611_v48 = vmul.f32 %v3197_v50, %v3197_v50  ;;  %v613_v14 = vmul.f32 %v3206_v55, %v3206_v55 }
 0x299   :  { %v615_v22 = vmul.f32 %v3211_v52, %v3211_v52  ;;  %v617_v57 = vmul.f32 %v3220_v40, %v3220_v40  ;;  %v619_v44 = vmul.f32 %v3225_v51, %v3225_v51  ;;  %v636_v39 = vsel %vm620_vm1, %v605_v13, 0.0 }
 0x29a   :  { %v637_v32 = vsel %vm620_vm1, %v607_v1, 0.0  ;;  %v639_v18 = vsel %vm620_vm1, %v609_v2, 0.0  ;;  %v641_v16 = vsel %vm620_vm1, %v611_v48, 0.0  ;;  %v643_v13 = vsel %vm620_vm1, %v613_v14, 0.0 }
 0x29b   :  { %v638_v59 = vadd.f32 %v637_v32, %v636_v39  ;;  %v645_v1 = vsel %vm620_vm1, %v615_v22, 0.0  ;;  %v647_v3 = vsel %vm620_vm1, %v617_v57, 0.0  ;;  %v649_v41 = vsel %vm620_vm1, %v619_v44, 0.0 }
 0x29c   :  { %v3261_v32 = vstv %s3167_s28  ;;  %v3264_v39 = vstv %s3146_s23  ;;  %v3267_v2 = vstv %s3165_s27  ;;  %v3270_v14 = vstv %s3183_s30 }
 0x29d   :  { %v640_v54 = vadd.f32 %v639_v18, %v638_v59  ;;  %4323 = vst [vmem:[#allocation80_spill] sm:$0xff] %v3261_v32  ;;  %4324 = vst [vmem:[#allocation81_spill] sm:$0xff] %v3264_v39  ;;  %v3273_v48 = vstv %s3148_s24  ;;  %v3276_v22 = vstv %s3181_s29  ;;  %v3279_v44 = vstv %s3201_s9 }
 0x29e   :  { %4325 = vst [vmem:[#allocation82_spill] sm:$0xff] %v3267_v2  ;;  %4326 = vst [vmem:[#allocation83_spill] sm:$0xff] %v3270_v14  ;;  %v3282_v12 = vstv %s3154_s25  ;;  %v3285_v59 = vstv %s3199_s8  ;;  %vm753_vm9 = vcmask 1041409   ;;  %vm4244_vm10 = vcmask 1042434  }
 0x29f   :  { %4327 = vst [vmem:[#allocation84_spill] sm:$0xff] %v3273_v48  ;;  %4328 = vst [vmem:[#allocation85_spill] sm:$0xff] %v3276_v22  ;;  %v2366_v57 = vpop.eup %2365  ;;  %v642_v37 = vadd.f32 %v641_v16, %v640_v54  ;;  %v926_v54 = vmul.f32 %v3150_v63, %v3150_v63  ;;  %vm4246_vm11 = vcmask 1043459   ;;  %vm4245_vm12 = vcmask 1044484  }
 0x2a0   :  { %4329 = vst [vmem:[#allocation86_spill] sm:$0xff] %v3279_v44  ;;  %4330 = vst [vmem:[#allocation87_spill] sm:$0xff] %v3282_v12  ;;  %v655_v18 = vmul.f32 %v2366_v57, %v2997_v6  ;;  %v657_v32 = vmul.f32 %v2366_v57, %v3002_v38  ;;  %v659_v2 = vmul.f32 %v2366_v57, %v3007_v36  ;;  %vm562_vm13 = vcmp.gt.s32.totalorder %v2722_v35, 0 }
 0x2a1   :  { %4331 = vst [vmem:[#allocation88_spill] sm:$0xff] %v3285_v59  ;;  %v661_v14 = vmul.f32 %v2366_v57, %v3012_v28  ;;  %v663_v42 = vmul.f32 %v2366_v57, %v3017_v30  ;;  %v665_v22 = vmul.f32 %v2366_v57, %v3022_v4  ;;  %v667_v16 = vmul.f32 %v2366_v57, %v3027_v11 }
 0x2a2   :  { %v3297_v44 = vmul.f32 %v2366_v57, %v3032_v47  ;;  %v3300_v6 = vsel %vm620_vm1, %v655_v18, -inf  ;;  %v3303_v38 = vsel %vm620_vm1, %v657_v32, -inf  ;;  %v3306_v36 = vsel %vm620_vm1, %v659_v2, -inf }
 0x2a3   :  { %v3309_v28 = vsel %vm620_vm1, %v661_v14, -inf  ;;  %v3312_v30 = vsel %vm620_vm1, %v663_v42, -inf  ;;  %v3315_v4 = vsel %vm620_vm1, %v665_v22, -inf  ;;  %v3318_v11 = vsel %vm620_vm1, %v667_v16, -inf }
 0x2a4   :  { %v644_v47 = vadd.f32 %v643_v13, %v642_v37  ;;  %v928_v32 = vmul.f32 %v3152_v53, %v3152_v53  ;;  %v930_v2 = vmul.f32 %v3159_v27, %v3159_v27  ;;  %v932_v14 = vmul.f32 %v3161_v62, %v3161_v62 }
 0x2a5   :  { %v934_v42 = vmul.f32 %v3163_v0, %v3163_v0  ;;  %v936_v22 = vmul.f32 %v3169_v7, %v3169_v7  ;;  %v938_v57 = vmul.f32 %v3185_v15, %v3185_v15  ;;  %v940_v37 = vmul.f32 %v3187_v56, %v3187_v56 }
 0x2a6   :  { %v646_v13 = vadd.f32 %v645_v1, %v644_v47  ;;  %v942_v18 = vsel %vm620_vm1, %v926_v54, 0.0  ;;  %v951_v16 = vsel %vm620_vm1, %v928_v32, 0.0  ;;  %v960_v59 = vsel %vm620_vm1, %v930_v2, 0.0 }
 0x2a7   :  { %v943_v12 = vadd.f32 %v942_v18, %v3091_v58  ;;  %v952_v48 = vadd.f32 %v951_v16, %v3094_v46  ;;  %v961_v39 = vadd.f32 %v960_v59, %v3097_v45  ;;  %v969_v7 = vsel %vm620_vm1, %v932_v14, 0.0 }
 0x2a8   :  { %v648_v0 = vadd.f32 %v647_v3, %v646_v13  ;;  %v970_v15 = vadd.f32 %v969_v7, %v3100_v20  ;;  %v978_v56 = vsel %vm620_vm1, %v934_v42, 0.0  ;;  %v987_v1 = vsel %vm620_vm1, %v936_v22, 0.0 }
 0x2a9   :  { %v944_v54 = vrot.slane %v943_v12, 4  ;;  %v953_v47 = vrot.slane %v952_v48, 4  ;;  %v962_v32 = vrot.slane %v961_v39, 4  ;;  %v979_v2 = vadd.f32 %v978_v56, %v3105_v60 }
 0x2aa   :  { %v650_v8 = vadd.f32 %v649_v41, %v648_v0  ;;  %v971_v58 = vrot.slane %v970_v15, 4  ;;  %v988_v46 = vadd.f32 %v987_v1, %v3108_v23  ;;  %v996_v45 = vsel %vm620_vm1, %v938_v57, 0.0 }
 0x2ab   :  { %v945_v59 = vadd.f32 %v944_v54, %v943_v12  ;;  %v954_v14 = vadd.f32 %v953_v47, %v952_v48  ;;  %v963_v3 = vadd.f32 %v962_v32, %v961_v39  ;;  %v980_v13 = vrot.slane %v979_v2, 4 }
 0x2ac   :  { %v652_v20 = vmax.f32 %v650_v8, 1e-24  ;;  %v972_v7 = vadd.f32 %v971_v58, %v970_v15  ;;  %v989_v42 = vrot.slane %v988_v46, 4  ;;  %v997_v22 = vadd.f32 %v996_v45, %v3111_v31 }
 0x2ad   :  { %v946_v18 = vrot.slane %v945_v59, 2  ;;  %v955_v16 = vrot.slane %v954_v14, 2  ;;  %v964_v62 = vrot.slane %v963_v3, 2  ;;  %v981_v9 = vadd.f32 %v980_v13, %v979_v2 }
 0x2ae   :  { %2367 = vrsqrt.f32 %v652_v20  ;;  %v973_v41 = vrot.slane %v972_v7, 2  ;;  %v990_v60 = vadd.f32 %v989_v42, %v988_v46  ;;  %v998_v0 = vrot.slane %v997_v22, 4 }
 0x2af   :  { %v947_v23 = vadd.f32 %v946_v18, %v945_v59  ;;  %v956_v56 = vadd.f32 %v955_v16, %v954_v14  ;;  %v965_v57 = vadd.f32 %v964_v62, %v963_v3  ;;  %v982_v12 = vrot.slane %v981_v9, 2 }
 0x2b0   :  { %v974_v48 = vadd.f32 %v973_v41, %v972_v7  ;;  %v991_v39 = vrot.slane %v990_v60, 2  ;;  %v999_v1 = vadd.f32 %v998_v0, %v997_v22  ;;  %v1005_v8 = vsel %vm620_vm1, %v940_v37, 0.0 }
 0x2b1   :  { %v948_v15 = vrot.slane %v947_v23, 1  ;;  %v957_v54 = vrot.slane %v956_v56, 1  ;;  %v966_v31 = vrot.slane %v965_v57, 1  ;;  %v983_v47 = vadd.f32 %v982_v12, %v981_v9 }
 0x2b2   :  { %v975_v32 = vrot.slane %v974_v48, 1  ;;  %v992_v58 = vadd.f32 %v991_v39, %v990_v60  ;;  %v1000_v2 = vrot.slane %v999_v1, 2  ;;  %v1006_v45 = vadd.f32 %v1005_v8, %v3118_v5 }
 0x2b3   :  { %v949_v46 = vadd.f32 %v948_v15, %v947_v23  ;;  %v958_v13 = vadd.f32 %v957_v54, %v956_v56  ;;  %v3350_v59 = vadd.f32 %v966_v31, %v965_v57  ;;  %v984_v62 = vrot.slane %v983_v47, 1 }
 0x2b4   :  { %v3352_v14 = vadd.f32 %v975_v32, %v974_v48  ;;  %v993_v3 = vrot.slane %v992_v58, 1  ;;  %v1001_v20 = vadd.f32 %v1000_v2, %v999_v1  ;;  %v1007_v7 = vrot.slane %v1006_v45, 4 }
 0x2b5   :  { %v734_v37 = vsel %vm620_vm1, %v3297_v44, -inf  ;;  %v3356_v42 = vadd.f32 %v984_v62, %v983_v47  ;;  %v1013_v9 = vmax.f32 %v949_v46, 1e-24  ;;  %v1014_v22 = vmax.f32 %v958_v13, 1e-24 }
 0x2b6   :  { %v3358_v18 = vadd.f32 %v993_v3, %v992_v58  ;;  %v1002_v5 = vrot.slane %v1001_v20, 1  ;;  %v3360_v16 = vadd.f32 %v1007_v7, %v1006_v45  ;;  %v1015_v41 = vmax.f32 %v3350_v59, 1e-24 }
 0x2b7   :  { %v1016_v60 = vmax.f32 %v3352_v14, 1e-24  ;;  %v1017_v0 = vmax.f32 %v3356_v42, 1e-24  ;;  %2369 = vrsqrt.f32 %v1013_v9  ;;  %v3367_v23 = vadd.f32 %v2934_v25, %v3246_v19  ;;  %v1317_v42 = vpop.permute.xlu1 %1316 }
 0x2b8   :  { %v2368_v44 = vpop.eup %2367  ;;  %v3369_v56 = vadd.f32 %v1002_v5, %v1001_v20  ;;  %v1009_v57 = vrot.slane %v3360_v16, 2  ;;  %v1018_v12 = vmax.f32 %v3358_v18, 1e-24  ;;  %2371 = vrsqrt.f32 %v1014_v22 }
 0x2b9   :  { %v656_v48 = vmul.f32 %v2368_v44, %v3174_v21  ;;  %v658_v39 = vmul.f32 %v2368_v44, %v3179_v26  ;;  %v660_v1 = vmul.f32 %v2368_v44, %v3192_v61  ;;  %v662_v8 = vmul.f32 %v2368_v44, %v3197_v50 }
 0x2ba   :  { %v664_v15 = vmul.f32 %v2368_v44, %v3206_v55  ;;  %v666_v19 = vmul.f32 %v2368_v44, %v3211_v52  ;;  %v668_v25 = vmul.f32 %v2368_v44, %v3220_v40  ;;  %v670_v54 = vmul.f32 %v2368_v44, %v3225_v51 }
 0x2bb   :  { %v672_v31 = vsel %vm620_vm1, %v656_v48, -inf  ;;  %v681_v47 = vsel %vm620_vm1, %v658_v39, -inf  ;;  %v690_v21 = vsel %vm620_vm1, %v660_v1, -inf  ;;  %v699_v26 = vsel %vm620_vm1, %v662_v8, -inf }
 0x2bc   :  { %v673_v61 = vmax.f32 %v3300_v6, %v672_v31  ;;  %v682_v50 = vmax.f32 %v3303_v38, %v681_v47  ;;  %v691_v55 = vmax.f32 %v3306_v36, %v690_v21  ;;  %v700_v52 = vmax.f32 %v3309_v28, %v699_v26 }
 0x2bd   :  { %v708_v40 = vsel %vm620_vm1, %v664_v15, -inf  ;;  %v717_v51 = vsel %vm620_vm1, %v666_v19, -inf  ;;  %v726_v32 = vsel %vm620_vm1, %v668_v25, -inf  ;;  %v735_v58 = vsel %vm620_vm1, %v670_v54, -inf }
 0x2be   :  { %v674_v2 = vrot.slane %v673_v61, 4  ;;  %v683_v45 = vrot.slane %v682_v50, 4  ;;  %v692_v46 = vrot.slane %v691_v55, 4  ;;  %v701_v13 = vrot.slane %v700_v52, 4 }
 0x2bf   :  { %v709_v6 = vmax.f32 %v3312_v30, %v708_v40  ;;  %v718_v38 = vmax.f32 %v3315_v4, %v717_v51  ;;  %v727_v36 = vmax.f32 %v3318_v11, %v726_v32  ;;  %v736_v28 = vmax.f32 %v734_v37, %v735_v58 }
 0x2c0   :  { %v675_v62 = vmax.f32 %v673_v61, %v674_v2  ;;  %v684_v3 = vmax.f32 %v682_v50, %v683_v45  ;;  %v693_v20 = vmax.f32 %v691_v55, %v692_v46  ;;  %v702_v7 = vmax.f32 %v700_v52, %v701_v13 }
 0x2c1   :  { %v3396_v9 = vpop.eup %2369  ;;  %v710_v22 = vrot.slane %v709_v6, 4  ;;  %v719_v5 = vrot.slane %v718_v38, 4  ;;  %v728_v44 = vrot.slane %v727_v36, 4  ;;  %v737_v48 = vrot.slane %v736_v28, 4 }
 0x2c2   :  { %v3398_v39 = vpop.eup %2371  ;;  %v676_v30 = vrot.slane %v675_v62, 2  ;;  %v685_v1 = vrot.slane %v684_v3, 2  ;;  %v694_v4 = vrot.slane %v693_v20, 2  ;;  %v703_v8 = vrot.slane %v702_v7, 2 }
 0x2c3   :  { %v711_v11 = vmax.f32 %v709_v6, %v710_v22  ;;  %v720_v37 = vmax.f32 %v718_v38, %v719_v5  ;;  %v729_v15 = vmax.f32 %v727_v36, %v728_v44  ;;  %v738_v19 = vmax.f32 %v736_v28, %v737_v48 }
 0x2c4   :  { %vm4247_vm14 = vcmask 1045509   ;;  %v677_v25 = vmax.f32 %v675_v62, %v676_v30  ;;  %v686_v54 = vmax.f32 %v684_v3, %v685_v1  ;;  %v695_v31 = vmax.f32 %v693_v20, %v694_v4 }
 0x2c5   :  { %v704_v47 = vmax.f32 %v702_v7, %v703_v8  ;;  %vm563_vm15 = vcmp.gt.s32.totalorder %v2722_v35, 1  ;;  %vm763_vm0 = vcmask 1046534   ;;  %v712_v21 = vrot.slane %v711_v11, 2 }
 0x2c6   :  { %v721_v26 = vrot.slane %v720_v37, 2  ;;  %v730_v61 = vrot.slane %v729_v15, 2  ;;  %v739_v50 = vrot.slane %v738_v19, 2  ;;  %v678_v55 = vrot.slane %v677_v25, 1 }
 0x2c7   :  { %v687_v52 = vrot.slane %v686_v54, 1  ;;  %v696_v40 = vrot.slane %v695_v31, 1  ;;  %v705_v51 = vrot.slane %v704_v47, 1  ;;  %v713_v32 = vmax.f32 %v711_v11, %v712_v21 }
 0x2c8   :  { %v722_v58 = vmax.f32 %v720_v37, %v721_v26  ;;  %v731_v2 = vmax.f32 %v729_v15, %v730_v61  ;;  %v740_v45 = vmax.f32 %v738_v19, %v739_v50  ;;  %v679_v46 = vmax.f32 %v677_v25, %v678_v55 }
 0x2c9   :  { %v688_v13 = vmax.f32 %v686_v54, %v687_v52  ;;  %v697_v6 = vmax.f32 %v695_v31, %v696_v40  ;;  %v706_v38 = vmax.f32 %v704_v47, %v705_v51  ;;  %v714_v36 = vrot.slane %v713_v32, 1 }
 0x2ca   :  { %v723_v28 = vrot.slane %v722_v58, 1  ;;  %v732_v62 = vrot.slane %v731_v2, 1  ;;  %v741_v3 = vrot.slane %v740_v45, 1  ;;  %v1010_v7 = vadd.f32 %v1009_v57, %v3360_v16 }
 0x2cb   :  { %v754_v20 = vsel %vm753_vm9, %v688_v13, %v679_v46  ;;  %v1019_v22 = vmax.f32 %v3369_v56, 1e-24  ;;  %2373 = vrsqrt.f32 %v1015_v41  ;;  %v715_v5 = vmax.f32 %v713_v32, %v714_v36  ;;  %v4333_v13 = vld [vmem:[#allocation72_spill] sm:$0xff] }
 0x2cc   :  { %v724_v44 = vmax.f32 %v722_v58, %v723_v28  ;;  %v733_v48 = vmax.f32 %v731_v2, %v732_v62  ;;  %v742_v30 = vmax.f32 %v740_v45, %v741_v3  ;;  %v756_v1 = vsel %vm4244_vm10, %v697_v6, %v754_v20  ;;  %v4332_v45 = vld [vmem:[#allocation63_spill] sm:$0xff]  ;;  %v4335_v62 = vld [vmem:[#allocation64_spill] sm:$0xff] }
 0x2cd   :  { %v1011_v4 = vrot.slane %v1010_v7, 1  ;;  %2375 = vrsqrt.f32 %v1016_v60  ;;  %v1029_v16 = vmul.f32 %v3396_v9, %v2978_v24  ;;  %v758_v56 = vsel %vm4246_vm11, %v706_v38, %v756_v1 }
 0x2ce   :  { %2377 = vrsqrt.f32 %v1017_v0  ;;  %v1030_v59 = vmul.f32 %v3396_v9, %v3150_v63  ;;  %v1031_v41 = vmul.f32 %v3398_v39, %v2980_v43  ;;  %vm565_vm10 = vcmp.gt.s32.totalorder %v2722_v35, 3 }
 0x2cf   :  { %v760_v57 = vsel %vm4245_vm12, %v715_v5, %v758_v56  ;;  %v1012_v14 = vadd.f32 %v1011_v4, %v1010_v7  ;;  %2379 = vrsqrt.f32 %v1018_v12  ;;  %v1032_v24 = vmul.f32 %v3398_v39, %v3152_v53  ;;  %v4339_v56 = vld [vmem:[#allocation66_spill] sm:$0xff] }
 0x2d0   :  { %v762_v60 = vsel %vm4247_vm14, %v724_v44, %v760_v57  ;;  %2381 = vrsqrt.f32 %v1019_v22  ;;  %v1061_v43 = vsel %vm562_vm13, %v1029_v16, -inf  ;;  %v1062_v63 = vsel %vm562_vm13, %v1030_v59, -inf  ;;  %v4336_v22 = vld [vmem:[#allocation73_spill] sm:$0xff] }
 0x2d1   :  { %vm566_vm12 = vcmp.gt.s32.totalorder %v2722_v35, 4  ;;  %vm567_vm11 = vcmp.gt.s32.totalorder %v2722_v35, 5  ;;  %v764_v18 = vsel %vm763_vm0, %v733_v48, %v762_v60  ;;  %v1020_v0 = vmax.f32 %v1012_v14, 1e-24  ;;  %v4337_v44 = vld [vmem:[#allocation65_spill] sm:$0xff] }
 0x2d2   :  { %v1063_v53 = vsel %vm563_vm15, %v1031_v41, -inf  ;;  %v1064_v12 = vsel %vm563_vm15, %v1032_v24, -inf  ;;  %vm568_vm14 = vcmp.gt.s32.totalorder %v2722_v35, 6  ;;  %v766_v9 = vsel %vm765_vm8, %v742_v30, %v764_v18  ;;  %v4338_v30 = vld [vmem:[#allocation74_spill] sm:$0xff]  ;;  %v4340_v41 = vld [vmem:[#allocation75_spill] sm:$0xff] }
 0x2d3   :  { %v3450_v39 = vstv %s3406_s10  ;;  %v3453_v8 = vsel %vm620_vm1, %v1061_v43, -inf  ;;  %v1490_v11 = vcombine.low %v2692_v17, %v1317_v42  ;;  %v768_v37 = vsel %vm571_vm6, %v766_v9, 0.0 }
 0x2d4   :  { %v781_v15 = vsel %vm570_vm7, %v766_v9, -inf  ;;  %2383 = vrsqrt.f32 %v1020_v0  ;;  %v3463_v19 = vsel %vm620_vm1, %v1063_v53, -inf  ;;  %v769_v25 = vsel %vm620_vm1, %v768_v37, 0.0 }
 0x2d5   :  { %vm783_vm13 = vcmp.lt.s32.totalorder %v781_v15, 0  ;;  %v784_v54 = vxor.u32 2147483647, %v781_v15  ;;  %v3471_v31 = vadd.f32 %v2965_v49, %v3367_v23  ;;  %v2374_v47 = vpop.eup %2373  ;;  %vm569_vm6 = vcmp.gt.s32.totalorder %v2722_v35, 7 }
 0x2d6   :  { %v770_v34 = vrot.slane %v769_v25, 4  ;;  %v3475_v21 = vsel %vm620_vm1, %v1062_v63, -inf  ;;  %v3478_v26 = vsel %vm620_vm1, %v1064_v12, -inf  ;;  %v1491_v61 = vcombine.high %v2692_v17, %v1317_v42  ;;  %v4341_v12 = vld [vmem:[#allocation67_spill] sm:$0xff] }
 0x2d7   :  { %v785_v50 = vsel %vm783_vm13, %v784_v54, %v781_v15  ;;  %v1033_v55 = vmul.f32 %v2374_v47, %v2982_v10  ;;  %v1034_v52 = vmul.f32 %v2374_v47, %v3159_v27  ;;  %v1810_v40 = vstv %s3466_s0  ;;  %v2376_v49 = vpop.eup %2375 }
 0x2d8   :  { %v771_v23 = vadd.f32 %v770_v34, %v769_v25  ;;  %v786_v51 = vand.u32 4294967288, %v785_v50  ;;  %v1692_v32 = vmax.f32 %v3471_v31, 1e-24  ;;  %v3486_v58 = vrot.slane %v1490_v11, %v2656_v33  ;;  %v2378_v2 = vpop.eup %2377  ;;  %v4342_v11 = vld [vmem:[#allocation76_spill] sm:$0xff] }
 0x2d9   :  { %v1035_v46 = vmul.f32 %v2376_v49, %v4332_v45  ;;  %v1036_v6 = vmul.f32 %v2376_v49, %v4333_v13  ;;  %v1066_v17 = vsel %vm564_vm5, %v1034_v52, -inf  ;;  %v3493_v10 = vrot.slane %v1491_v61, %v2656_v33  ;;  %v2380_v27 = vpop.eup %2379  ;;  %v4343_v49 = vld [vmem:[#allocation41_spill] sm:$0xff] }
 0x2da   :  { %v772_v38 = vrot.slane %v771_v23, 2  ;;  %v4334_v36 = vsub.s32 7, %v2651_v29  ;;  %v1037_v3 = vmul.f32 %v2378_v2, %v4335_v62  ;;  %v1065_v20 = vsel %vm564_vm5, %v1033_v55, -inf  ;;  %v2382_v7 = vpop.eup %2381 }
 0x2db   :  { %vm1262_vm7 = vcmask 8192   ;;  %v1038_v5 = vmul.f32 %v2378_v2, %v4336_v22  ;;  %v1039_v48 = vmul.f32 %v2380_v27, %v4337_v44  ;;  %v1040_v33 = vmul.f32 %v2380_v27, %v4338_v30 }
 0x2dc   :  { %v3497_v28 = vor.u32 %v4334_v36, %v786_v51  ;;  %v1067_v1 = vsel %vm565_vm10, %v1035_v46, -inf  ;;  %v773_v4 = vadd.f32 %v772_v38, %v771_v23  ;;  %v1041_v59 = vmul.f32 %v2382_v7, %v4339_v56 }
 0x2dd   :  { %v1042_v57 = vmul.f32 %v2382_v7, %v4340_v41  ;;  %v1068_v24 = vsel %vm565_vm10, %v1036_v6, -inf  ;;  %v1069_v42 = vsel %vm566_vm12, %v1037_v3, -inf  ;;  %v1071_v60 = vsel %vm567_vm11, %v1039_v48, -inf }
 0x2de   :  { %v789_v16 = vsel %vm620_vm1, %v3497_v28, 2147483648  ;;  %v2384_v43 = vpop.eup %2383  ;;  %v774_v63 = vrot.slane %v773_v4, 1  ;;  %v1072_v18 = vsel %vm567_vm11, %v1040_v33, -inf  ;;  %v1073_v0 = vsel %vm568_vm14, %v1041_v59, -inf }
 0x2df   :  { %v790_v14 = vrot.slane %v789_v16, 4  ;;  %v1074_v53 = vsel %vm568_vm14, %v1042_v57, -inf  ;;  %v1043_v9 = vmul.f32 %v2384_v43, %v4341_v12  ;;  %v1044_v37 = vmul.f32 %v2384_v43, %v4342_v11  ;;  %v4348_v11 = vld [vmem:[#allocation44_spill] sm:$0xff] }
 0x2e0   :  { %v1079_v15 = vsel %vm620_vm1, %v1065_v20, -inf  ;;  %v775_v25 = vadd.f32 %v774_v63, %v773_v4  ;;  %v1081_v34 = vsel %vm620_vm1, %v1067_v1, -inf  ;;  %v1070_v50 = vsel %vm566_vm12, %v1038_v5, -inf  ;;  %v4345_v63 = vld [vmem:[#allocation20_spill] sm:$0xff] }
 0x2e1   :  { %vm791_vm5 = vcmp.gt.s32.totalorder %v789_v16, %v790_v14  ;;  %v1080_v47 = vmax.f32 %v3453_v8, %v1079_v15  ;;  %v1075_v55 = vsel %vm569_vm6, %v1043_v9, -inf  ;;  %v1082_v52 = vmax.f32 %v3463_v19, %v1081_v34 }
 0x2e2   :  { %v792_v54 = vsel %vm791_vm5, %v789_v16, %v790_v14  ;;  %v3534_v23 = vmul.f32 %v4343_v49, %v775_v25  ;;  %v1076_v51 = vsel %vm569_vm6, %v1044_v37, -inf  ;;  %v1083_v2 = vsel %vm620_vm1, %v1069_v42, -inf  ;;  %v4351_v49 = vld [vmem:[#allocation46_spill] sm:$0xff] }
 0x2e3   :  { %v793_v61 = vrot.slane %v792_v54, 2  ;;  %v1085_v8 = vsel %vm620_vm1, %v1071_v60, -inf  ;;  %v1084_v45 = vmax.f32 %v1080_v47, %v1083_v2  ;;  %v1087_v13 = vsel %vm620_vm1, %v1073_v0, -inf }
 0x2e4   :  { %v1086_v46 = vmax.f32 %v1082_v52, %v1085_v8  ;;  %v1089_v27 = vsel %vm620_vm1, %v1075_v55, -inf  ;;  %v1094_v19 = vsel %vm620_vm1, %v1066_v17, -inf  ;;  %v1096_v38 = vsel %vm620_vm1, %v1068_v24, -inf  ;;  %2302 = vst.msk [vmem:[%s4175_s7 + $0x4] sm:$0x1] %vm1262_vm7, %v3534_v23  ;;  %v4350_v55 = vld [vmem:[#allocation45_spill] sm:$0xff] }
 0x2e5   :  { %vm794_vm10 = vcmp.gt.s32.totalorder %v792_v54, %v793_v61  ;;  %v1088_v36 = vmax.f32 %v1084_v45, %v1087_v13  ;;  %v1095_v3 = vmax.f32 %v3475_v21, %v1094_v19  ;;  %v1097_v20 = vmax.f32 %v3478_v26, %v1096_v38  ;;  %v4344_v21 = vld [vmem:[#allocation62_spill] sm:$0xff]  ;;  %v4355_v19 = vld [vmem:[#allocation39_spill] sm:$0xff] }
 0x2e6   :  { %v795_v6 = vsel %vm794_vm10, %v792_v54, %v793_v61  ;;  %v1090_v62 = vmax.f32 %v1086_v46, %v1089_v27  ;;  %v1098_v7 = vsel %vm620_vm1, %v1070_v50, -inf  ;;  %v1100_v22 = vsel %vm620_vm1, %v1072_v18, -inf  ;;  %v4346_v18 = vld [vmem:[#allocation43_spill] sm:$0xff] }
 0x2e7   :  { %v796_v35 = vrot.slane %v795_v6, 1  ;;  %v1102_v17 = vsel %vm620_vm1, %v1074_v53, -inf  ;;  %v1099_v44 = vmax.f32 %v1095_v3, %v1098_v7  ;;  %2385 = vrsqrt.f32 %v1692_v32  ;;  %v4347_v53 = vld [vmem:[#allocation68_spill] sm:$0xff] }
 0x2e8   :  { %v1091_v5 = vmax.f32 %v1088_v36, %v1090_v62  ;;  %v1101_v30 = vmax.f32 %v1097_v20, %v1100_v22  ;;  %v1104_v33 = vsel %vm620_vm1, %v1076_v51, -inf  ;;  %v1554_v26 = vcombine.low %v3486_v58, %v4344_v21  ;;  %v4352_v51 = vld [vmem:[#allocation52_spill] sm:$0xff] }
 0x2e9   :  { %vm797_vm11 = vcmp.gt.s32.totalorder %v795_v6, %v796_v35  ;;  %v1103_v4 = vmax.f32 %v1099_v44, %v1102_v17  ;;  %v1555_v16 = vcombine.high %v3486_v58, %v4344_v21  ;;  %2387 = vrcp.f32 %v1810_v40  ;;  %v4356_v20 = vld [vmem:[#allocation40_spill] sm:$0xff]  ;;  %v4358_v17 = vld [vmem:[#allocation22_spill] sm:$0xff] }
 0x2ea   :  { %v798_v48 = vsel %vm797_vm11, %v795_v6, %v796_v35  ;;  %v1105_v59 = vmax.f32 %v1101_v30, %v1104_v33  ;;  %vm1120_vm14 = vcmp.lt.s32.totalorder %v1091_v5, 0  ;;  %v1122_v31 = vxor.u32 2147483647, %v1091_v5  ;;  %v4361_v33 = vld [vmem:[#allocation48_spill] sm:$0xff] }
 0x2eb   :  { %v799_v1 = vand.u32 4294967288, %v798_v48  ;;  %vm804_vm12 = vcmp.eq.s32.totalorder %v3497_v28, %v798_v48  ;;  %v1107_v24 = vsel %vm620_vm1, %v1091_v5, 0.0  ;;  %v1562_v58 = vrot.slane %v1554_v26, %v4345_v63  ;;  %v4360_v48 = vld [vmem:[#allocation47_spill] sm:$0xff]  ;;  %v4362_v26 = vld [vmem:[#allocation49_spill] sm:$0xff] }
 0x2ec   :  { %v805_v56 = vsel %vm804_vm12, 2147483648, %v3497_v28  ;;  %v1106_v14 = vmax.f32 %v1103_v4, %v1105_v59  ;;  %v1124_v42 = vsel %vm1120_vm14, %v1122_v31, %v1091_v5  ;;  %v3569_v28 = vrot.slane %v1555_v16, %v4345_v63  ;;  %v4363_v16 = vld [vmem:[#allocation50_spill] sm:$0xff]  ;;  %v4364_v31 = vld [vmem:[#allocation51_spill] sm:$0xff] }
 0x2ed   :  { %vm800_vm15 = vcmp.lt.s32.totalorder %v799_v1, 0  ;;  %v801_v32 = vxor.u32 2147483647, %v799_v1  ;;  %v806_v41 = vsel %vm620_vm1, %v805_v56, 2147483648  ;;  %v1127_v43 = vand.u32 4294967280, %v1124_v42 }
 0x2ee   :  { %v807_v57 = vrot.slane %v806_v41, 4  ;;  %v1570_v12 = vcombine.low %v3493_v10, %v4347_v53  ;;  %v1571_v40 = vcombine.high %v3493_v10, %v4347_v53  ;;  %v1108_v15 = vsel %vm620_vm1, %v1106_v14, 0.0 }
 0x2ef   :  { %v802_v60 = vsel %vm800_vm15, %v801_v32, %v799_v1  ;;  %vm1121_vm6 = vcmp.lt.s32.totalorder %v1106_v14, 0  ;;  %v1109_v54 = vadd.f32 %v1108_v15, %v1107_v24  ;;  %v1123_v47 = vxor.u32 2147483647, %v1106_v14 }
 0x2f0   :  { %vm808_vm13 = vcmp.gt.s32.totalorder %v806_v41, %v807_v57  ;;  %v3572_v0 = vmul.f32 %v4346_v18, %v802_v60  ;;  %v3579_v37 = vmul.f32 %v4348_v11, %v802_v60  ;;  %v4349_v34 = vsub.s32 15, %v2651_v29  ;;  %v4393_v29 = vld [vmem:[#allocation77_spill] sm:$0xff] }
 0x2f1   :  { %v809_v9 = vsel %vm808_vm13, %v806_v41, %v807_v57  ;;  %v2386_v50 = vpop.eup %2385  ;;  %v3587_v52 = vmul.f32 %v4350_v55, %v802_v60  ;;  %v3590_v10 = vmul.f32 %v4351_v49, %v802_v60  ;;  %v3593_v2 = vcombine.low %v4352_v51, %v1562_v58 }
 0x2f2   :  { %v810_v25 = vrot.slane %v809_v9, 2  ;;  %v3584_v61 = vor.u32 %v4349_v34, %v1127_v43  ;;  %v3596_v8 = vcombine.high %v4352_v51, %v1562_v58  ;;  %v1110_v45 = vrot.slane %v1109_v54, 4 }
 0x2f3   :  { %4353 = vst [vmem:[#allocation63_spill] sm:$0xff] %v3593_v2  ;;  %v1125_v46 = vsel %vm1121_vm6, %v1123_v47, %v1106_v14  ;;  %v1578_v13 = vrot.slane %v1570_v12, %v4345_v63  ;;  %v1696_v38 = vmul.f32 %v2386_v50, %v4355_v19  ;;  %v1585_v35 = vrot.slane %v1571_v40, %v4345_v63  ;;  %v3604_v22 = vpop.eup %2387  ;;  %v4365_v14 = vld [vmem:[#allocation56_spill] sm:$0xff]  ;;  %v4373_v19 = vld [vmem:[#allocation58_spill] sm:$0xff] }
 0x2f4   :  { %4354 = vst [vmem:[#allocation72_spill] sm:$0xff] %v3596_v8  ;;  %vm811_vm5 = vcmp.gt.s32.totalorder %v809_v9, %v810_v25  ;;  %v1128_v27 = vand.u32 4294967280, %v1125_v46  ;;  %v1111_v62 = vadd.f32 %v1110_v45, %v1109_v54  ;;  %v1133_v3 = vsel %vm620_vm1, %v3584_v61, 2147483648  ;;  %4357 = vst [vmem:[#allocation64_spill] sm:$0xff] %v3604_v22  ;;  %v4370_v45 = vld [vmem:[#allocation53_spill] sm:$0xff] }
 0x2f5   :  { %v812_v6 = vsel %vm811_vm5, %v809_v9, %v810_v25  ;;  %v1698_v7 = vmul.f32 %v2386_v50, %v4356_v20  ;;  %v4359_v5 = vsub.s32 15, %v4358_v17  ;;  %v1700_v30 = vmul.f32 %v2386_v50, %v4360_v48  ;;  %v4375_v20 = vld [vmem:[#allocation60_spill] sm:$0xff]  ;;  %v4392_v17 = vld [vmem:[#allocation71_spill] sm:$0xff] }
 0x2f6   :  { %v813_v36 = vrot.slane %v812_v6, 1  ;;  %v1702_v21 = vmul.f32 %v2386_v50, %v4361_v33  ;;  %v1704_v1 = vmul.f32 %v2386_v50, %v4362_v26  ;;  %v1112_v4 = vrot.slane %v1111_v62, 2 }
 0x2f7   :  { %v3608_v44 = vor.u32 %v4359_v5, %v1128_v27  ;;  %v1706_v59 = vmul.f32 %v2386_v50, %v4363_v16  ;;  %v1708_v32 = vmul.f32 %v2386_v50, %v4364_v31  ;;  %v1710_v24 = vmul.f32 %v2386_v50, %v4365_v14 }
 0x2f8   :  { %vm814_vm10 = vcmp.gt.s32.totalorder %v812_v6, %v813_v36  ;;  %v3619_v42 = vsel %vm620_vm1, %v1696_v38, -inf  ;;  %v1113_v43 = vadd.f32 %v1112_v4, %v1111_v62  ;;  %v3622_v53 = vsel %vm620_vm1, %v1698_v7, -inf }
 0x2f9   :  { %v815_v41 = vsel %vm814_vm10, %v812_v6, %v813_v36  ;;  %v1134_v57 = vsel %vm620_vm1, %v3608_v44, 2147483648  ;;  %v3625_v12 = vsel %vm620_vm1, %v1700_v30, -inf  ;;  %v3629_v47 = vsel %vm620_vm1, %v1702_v21, -inf  ;;  %v4372_v6 = vld [vmem:[#allocation57_spill] sm:$0xff]  ;;  %v4374_v36 = vld [vmem:[#allocation59_spill] sm:$0xff] }
 0x2fa   :  { %v816_v60 = vand.u32 4294967288, %v815_v41  ;;  %vm821_vm11 = vcmp.eq.s32.totalorder %v805_v56, %v815_v41  ;;  %vm1135_vm12 = vcmp.gt.s32.totalorder %v1133_v3, %v1134_v57  ;;  %4366 = vst [vmem:[#allocation73_spill] sm:$0xff] %v3625_v12  ;;  %v1114_v15 = vrot.slane %v1113_v43, 1  ;;  %4367 = vst [vmem:[#allocation65_spill] sm:$0xff] %v3629_v47 }
 0x2fb   :  { %v822_v63 = vsel %vm821_vm11, 2147483648, %v805_v56  ;;  %v1136_v58 = vsel %vm1135_vm12, %v1133_v3, %v1134_v57  ;;  %v3632_v34 = vsel %vm620_vm1, %v1704_v1, -inf  ;;  %v3635_v51 = vsel %vm620_vm1, %v1706_v59, -inf }
 0x2fc   :  { %vm817_vm14 = vcmp.lt.s32.totalorder %v816_v60, 0  ;;  %v818_v40 = vxor.u32 2147483647, %v816_v60  ;;  %v823_v9 = vsel %vm620_vm1, %v822_v63, 2147483648  ;;  %v1137_v54 = vrot.slane %v1136_v58, 4  ;;  %4368 = vst [vmem:[#allocation74_spill] sm:$0xff] %v3632_v34 }
 0x2fd   :  { %v824_v25 = vrot.slane %v823_v9, 4  ;;  %v1115_v50 = vadd.f32 %v1114_v15, %v1113_v43  ;;  %4369 = vst [vmem:[#allocation66_spill] sm:$0xff] %v3635_v51  ;;  %v3639_v46 = vcombine.low %v4370_v45, %v3569_v28  ;;  %v3649_v33 = vsel %vm620_vm1, %v1708_v32, -inf }
 0x2fe   :  { %v819_v56 = vsel %vm817_vm14, %v818_v40, %v816_v60  ;;  %vm1138_vm13 = vcmp.gt.s32.totalorder %v1136_v58, %v1137_v54  ;;  %4377 = vst [vmem:[#allocation76_spill] sm:$0xff] %v3649_v33  ;;  %v3652_v21 = vsel %vm620_vm1, %v1710_v24, -inf  ;;  %v3662_v4 = vcombine.high %v4370_v45, %v3569_v28  ;;  %v4384_v60 = vld [vmem:[#allocation21_spill] sm:$0xff] }
 0x2ff   :  { %4371 = vst [vmem:[#allocation75_spill] sm:$0xff] %v3639_v46  ;;  %vm825_vm15 = vcmp.gt.s32.totalorder %v823_v9, %v824_v25  ;;  %v858_v27 = vmul.f32 %v4372_v6, %v819_v56  ;;  %v874_v38 = vmul.f32 %v4373_v19, %v819_v56  ;;  %v891_v62 = vmul.f32 %v4374_v36, %v819_v56 }
 0x300   :  { %v826_v3 = vsel %vm825_vm15, %v823_v9, %v824_v25  ;;  %v908_v7 = vmul.f32 %v4375_v20, %v819_v56  ;;  %v3645_v5 = vmul.f32 0.0625, %v1115_v50  ;;  %4378 = vst [vmem:[#allocation41_spill] sm:$0xff] %v3652_v21  ;;  %v1139_v1 = vsel %vm1138_vm13, %v1136_v58, %v1137_v54  ;;  %4379 = vst [vmem:[#allocation62_spill] sm:$0xff] %v3662_v4 }
 0x301   :  { %v827_v48 = vrot.slane %v826_v3, 2  ;;  %v859_v30 = vadd.f32 %v858_v27, %v3572_v0  ;;  %v875_v26 = vadd.f32 %v874_v38, %v3579_v37  ;;  %v4380_v0 = vld [vmem:[#allocation54_spill] sm:$0xff]  ;;  %v1140_v59 = vrot.slane %v1139_v1, 2  ;;  %v4383_v37 = vld [vmem:[#allocation55_spill] sm:$0xff] }
 0x302   :  { %4376 = vst [vmem:[#allocation67_spill] sm:$0xff] %v3645_v5  ;;  %2303 = vst.msk [vmem:[%s4175_s7 + $0x6] sm:$0x1] %vm1262_vm7, %v3645_v5  ;;  %v3665_v16 = vcombine.low %v4380_v0, %v1578_v13  ;;  %v3668_v31 = vcombine.high %v4380_v0, %v1578_v13  ;;  %v3671_v32 = vcombine.low %v4383_v37, %v1585_v35  ;;  %v3681_v43 = vsel %vm1595_vm2, %v3593_v2, 0.0 }
 0x303   :  { %vm828_vm6 = vcmp.gt.s32.totalorder %v826_v3, %v827_v48  ;;  %v892_v57 = vadd.f32 %v891_v62, %v3587_v52  ;;  %v909_v14 = vadd.f32 %v908_v7, %v3590_v10  ;;  %v3676_v24 = vcombine.high %v4383_v37, %v1585_v35 }
 0x304   :  { %4381 = vst [vmem:[#allocation20_spill] sm:$0xff] %v3665_v16  ;;  %4382 = vst [vmem:[#allocation68_spill] sm:$0xff] %v3668_v31  ;;  %v829_v41 = vsel %vm828_vm6, %v826_v3, %v827_v48  ;;  %vm1141_vm5 = vcmp.gt.s32.totalorder %v1139_v1, %v1140_v59  ;;  %v3686_v13 = vsel %vm1596_vm3, %v3596_v8, 0.0  ;;  %v3691_v52 = vsel %vm1597_vm4, %v3639_v46, 0.0 }
 0x305   :  { %v830_v28 = vrot.slane %v829_v41, 1  ;;  %v1142_v58 = vsel %vm1141_vm5, %v1139_v1, %v1140_v59  ;;  %vm4385_vm10 = vcmp.gt.s32.totalorder %v4384_v60, 3  ;;  %vm4386_vm2 = vcmp.gt.s32.totalorder %v4384_v60, 4 }
 0x306   :  { %v3696_v10 = vsel %vm4385_vm10, %v3662_v4, 0.0  ;;  %v3701_v35 = vsel %vm4386_vm2, %v3665_v16, 0.0  ;;  %v1143_v40 = vrot.slane %v1142_v58, 1  ;;  %vm4387_vm3 = vcmp.gt.s32.totalorder %v4384_v60, 5 }
 0x307   :  { %vm831_vm11 = vcmp.gt.s32.totalorder %v829_v41, %v830_v28  ;;  %v3706_v9 = vsel %vm4387_vm3, %v3668_v31, 0.0  ;;  %vm4388_vm4 = vcmp.gt.s32.totalorder %v4384_v60, 6  ;;  %vm4389_vm12 = vcmp.gt.s32.totalorder %v4384_v60, 7 }
 0x308   :  { %v3711_v15 = vsel %vm4388_vm4, %v3671_v32, 0.0  ;;  %v832_v25 = vsel %vm831_vm11, %v829_v41, %v830_v28  ;;  %v3716_v54 = vsel %vm4389_vm12, %v3676_v24, 0.0  ;;  %v1647_v56 = vmul.f32 %v3681_v43, %v3681_v43 }
 0x309   :  { %v1649_v50 = vmul.f32 %v3686_v13, %v3686_v13  ;;  %v833_v45 = vand.u32 4294967288, %v832_v25  ;;  %vm838_vm14 = vcmp.eq.s32.totalorder %v822_v63, %v832_v25  ;;  %vm1144_vm15 = vcmp.gt.s32.totalorder %v1142_v58, %v1143_v40  ;;  %v4391_v25 = vld [vmem:[#allocation70_spill] sm:$0xff] }
 0x30a   :  { %v1651_v27 = vmul.f32 %v3691_v52, %v3691_v52  ;;  %v839_v38 = vsel %vm838_vm14, 2147483648, %v822_v63  ;;  %v1145_v62 = vsel %vm1144_vm15, %v1142_v58, %v1143_v40  ;;  %v1653_v3 = vmul.f32 %v3696_v10, %v3696_v10  ;;  %v4390_v58 = vld [vmem:[#allocation69_spill] sm:$0xff] }
 0x30b   :  { %v1655_v7 = vmul.f32 %v3701_v35, %v3701_v35  ;;  %vm834_vm13 = vcmp.lt.s32.totalorder %v833_v45, 0  ;;  %v835_v48 = vxor.u32 2147483647, %v833_v45  ;;  %v840_v1 = vsel %vm620_vm1, %v839_v38, 2147483648 }
 0x30c   :  { %v1146_v0 = vand.u32 4294967280, %v1145_v62  ;;  %v841_v59 = vrot.slane %v840_v1, 4  ;;  %vm1151_vm6 = vcmp.eq.s32.totalorder %v3584_v61, %v1145_v62  ;;  %vm1152_vm5 = vcmp.eq.s32.totalorder %v3608_v44, %v1145_v62 }
 0x30d   :  { %v1657_v63 = vmul.f32 %v3706_v9, %v3706_v9  ;;  %v836_v37 = vsel %vm834_vm13, %v835_v48, %v833_v45  ;;  %v3734_v28 = vsel %vm1151_vm6, 2147483648, %v3584_v61  ;;  %v3741_v21 = vsel %vm1152_vm5, 2147483648, %v3608_v44 }
 0x30e   :  { %vm1147_vm10 = vcmp.lt.s32.totalorder %v1146_v0, 0  ;;  %v1148_v41 = vxor.u32 2147483647, %v1146_v0  ;;  %vm842_vm2 = vcmp.gt.s32.totalorder %v840_v1, %v841_v59  ;;  %v861_v40 = vmul.f32 %v4390_v58, %v836_v37 }
 0x30f   :  { %v877_v38 = vmul.f32 %v4391_v25, %v836_v37  ;;  %v894_v22 = vmul.f32 %v4392_v17, %v836_v37  ;;  %v843_v5 = vsel %vm842_vm2, %v840_v1, %v841_v59  ;;  %v911_v60 = vmul.f32 %v4393_v29, %v836_v37 }
 0x310   :  { %v1149_v62 = vsel %vm1147_vm10, %v1148_v41, %v1146_v0  ;;  %v844_v45 = vrot.slane %v843_v5, 2  ;;  %v862_v48 = vadd.f32 %v861_v40, %v859_v30  ;;  %v1659_v61 = vmul.f32 %v3711_v15, %v3711_v15 }
 0x311   :  { %v1661_v33 = vmul.f32 %v3716_v54, %v3716_v54  ;;  %v878_v51 = vadd.f32 %v877_v38, %v875_v26  ;;  %v895_v34 = vadd.f32 %v894_v22, %v892_v57  ;;  %v1155_v47 = vsel %vm620_vm1, %v3734_v28, 2147483648 }
 0x312   :  { %v1156_v1 = vsel %vm620_vm1, %v3741_v21, 2147483648  ;;  %vm845_vm11 = vcmp.gt.s32.totalorder %v843_v5, %v844_v45  ;;  %v912_v0 = vadd.f32 %v911_v60, %v909_v14  ;;  %v3752_v44 = vmul.f32 %v1149_v62, %v4346_v18 }
 0x313   :  { %vm1157_vm3 = vcmp.gt.s32.totalorder %v1155_v47, %v1156_v1  ;;  %v846_v30 = vsel %vm845_vm11, %v843_v5, %v844_v45  ;;  %v3755_v37 = vmul.f32 %v1149_v62, %v4348_v11  ;;  %v1677_v26 = vsel %vm620_vm1, %v1647_v56, 0.0 }
 0x314   :  { %v1158_v59 = vsel %vm1157_vm3, %v1155_v47, %v1156_v1  ;;  %v847_v22 = vrot.slane %v846_v30, 1  ;;  %v3759_v41 = vmul.f32 %v1149_v62, %v4350_v55  ;;  %v1678_v40 = vsel %vm620_vm1, %v1649_v50, 0.0 }
 0x315   :  { %v1159_v57 = vrot.slane %v1158_v59, 4  ;;  %v3763_v14 = vmul.f32 %v1149_v62, %v4351_v49  ;;  %v1679_v60 = vadd.f32 %v1678_v40, %v1677_v26  ;;  %v1680_v38 = vsel %vm620_vm1, %v1651_v27, 0.0  ;;  %v4395_v49 = vld [vmem:[#allocation78_spill] sm:$0xff] }
 0x316   :  { %v1682_v47 = vsel %vm620_vm1, %v1653_v3, 0.0  ;;  %vm848_vm4 = vcmp.gt.s32.totalorder %v846_v30, %v847_v22  ;;  %v1684_v5 = vsel %vm620_vm1, %v1655_v7, 0.0  ;;  %v1686_v56 = vsel %vm620_vm1, %v1657_v63, 0.0 }
 0x317   :  { %vm1160_vm12 = vcmp.gt.s32.totalorder %v1158_v59, %v1159_v57  ;;  %v849_v45 = vsel %vm848_vm4, %v846_v30, %v847_v22  ;;  %v1681_v55 = vadd.f32 %v1680_v38, %v1679_v60  ;;  %v1934_v50 = vmul.f32 %v3593_v2, %v3593_v2  ;;  %v4394_v38 = vld [vmem:[#allocation32_spill] sm:$0xff] }
 0x318   :  { %v1161_v1 = vsel %vm1160_vm12, %v1158_v59, %v1159_v57  ;;  %v850_v11 = vand.u32 4294967288, %v849_v45  ;;  %v1688_v26 = vsel %vm620_vm1, %v1659_v61, 0.0  ;;  %v1936_v27 = vmul.f32 %v3596_v8, %v3596_v8 }
 0x319   :  { %v1162_v62 = vrot.slane %v1161_v1, 2  ;;  %v1683_v3 = vadd.f32 %v1682_v47, %v1681_v55  ;;  %v1690_v40 = vsel %vm620_vm1, %v1661_v33, 0.0  ;;  %v3777_v7 = vmul.f32 %v3639_v46, %v3639_v46 }
 0x31a   :  { %v3781_v63 = vmul.f32 %v3662_v4, %v3662_v4  ;;  %vm851_vm14 = vcmp.lt.s32.totalorder %v850_v11, 0  ;;  %v852_v30 = vxor.u32 2147483647, %v850_v11  ;;  %v3785_v61 = vmul.f32 %v3665_v16, %v3665_v16  ;;  %v4396_v4 = vld [vmem:[#allocation81_spill] sm:$0xff]  ;;  %v4397_v16 = vld [vmem:[#allocation84_spill] sm:$0xff] }
 0x31b   :  { %vm1163_vm15 = vcmp.gt.s32.totalorder %v1161_v1, %v1162_v62  ;;  %v1685_v22 = vadd.f32 %v1684_v5, %v1683_v3  ;;  %v3789_v55 = vmul.f32 %v3668_v31, %v3668_v31  ;;  %v1950_v33 = vsel %vm620_vm1, %v1934_v50, 0.0  ;;  %v4399_v31 = vld [vmem:[#allocation33_spill] sm:$0xff] }
 0x31c   :  { %v1164_v59 = vsel %vm1163_vm15, %v1161_v1, %v1162_v62  ;;  %v853_v57 = vsel %vm851_vm14, %v852_v30, %v850_v11  ;;  %v1951_v47 = vadd.f32 %v1950_v33, %v4394_v38  ;;  %v1959_v45 = vsel %vm620_vm1, %v1936_v27, 0.0  ;;  %v4398_v1 = vld [vmem:[#allocation87_spill] sm:$0xff] }
 0x31d   :  { %v1165_v60 = vrot.slane %v1164_v59, 1  ;;  %v864_v18 = vmul.f32 %v4395_v49, %v853_v57  ;;  %v880_v46 = vmul.f32 %v4396_v4, %v853_v57  ;;  %v897_v8 = vmul.f32 %v4397_v16, %v853_v57  ;;  %v4400_v49 = vld [vmem:[#allocation79_spill] sm:$0xff]  ;;  %v4401_v4 = vld [vmem:[#allocation82_spill] sm:$0xff]  ;;  %v4402_v16 = vld [vmem:[#allocation85_spill] sm:$0xff] }
 0x31e   :  { %v914_v5 = vmul.f32 %v4398_v1, %v853_v57  ;;  %v1687_v62 = vadd.f32 %v1686_v56, %v1685_v22  ;;  %v1952_v3 = vrot.slane %v1951_v47, 4  ;;  %v1960_v2 = vadd.f32 %v1959_v45, %v4399_v31  ;;  %v4403_v57 = vld [vmem:[#allocation88_spill] sm:$0xff] }
 0x31f   :  { %vm1166_vm13 = vcmp.gt.s32.totalorder %v1164_v59, %v1165_v60  ;;  %v865_v50 = vadd.f32 %v864_v18, %v862_v48  ;;  %v881_v11 = vadd.f32 %v880_v46, %v878_v51  ;;  %v898_v30 = vadd.f32 %v897_v8, %v895_v34 }
 0x320   :  { %v915_v29 = vadd.f32 %v914_v5, %v912_v0  ;;  %v1167_v33 = vsel %vm1166_vm13, %v1164_v59, %v1165_v60  ;;  %v1689_v38 = vadd.f32 %v1688_v26, %v1687_v62  ;;  %v1953_v27 = vadd.f32 %v1952_v3, %v1951_v47  ;;  %v4404_v26 = vld [vmem:[#allocation80_spill] sm:$0xff]  ;;  %v4405_v59 = vld [vmem:[#allocation83_spill] sm:$0xff]  ;;  %v4406_v60 = vld [vmem:[#allocation86_spill] sm:$0xff] }
 0x321   :  { %v1961_v17 = vrot.slane %v1960_v2, 4  ;;  %v867_v25 = vadd.f32 %v4400_v49, %v865_v50  ;;  %v883_v58 = vadd.f32 %v4401_v4, %v881_v11  ;;  %v900_v12 = vadd.f32 %v4402_v16, %v898_v30 }
 0x322   :  { %v917_v1 = vadd.f32 %v4403_v57, %v915_v29  ;;  %v1168_v56 = vand.u32 4294967280, %v1167_v33  ;;  %vm1173_vm6 = vcmp.eq.s32.totalorder %v3734_v28, %v1167_v33  ;;  %vm1174_vm5 = vcmp.eq.s32.totalorder %v3741_v21, %v1167_v33 }
 0x323   :  { %v1691_v18 = vadd.f32 %v1690_v40, %v1689_v38  ;;  %v868_v8 = vmax.f32 %v867_v25, 0.0  ;;  %v884_v34 = vmax.f32 %v883_v58, 0.0  ;;  %v901_v51 = vmax.f32 %v900_v12, 0.0 }
 0x324   :  { %v918_v46 = vmax.f32 %v917_v1, 0.0  ;;  %vm1169_vm10 = vcmp.lt.s32.totalorder %v1168_v56, 0  ;;  %v1170_v31 = vxor.u32 2147483647, %v1168_v56  ;;  %v3806_v48 = vsel %vm1173_vm6, 2147483648, %v3734_v28 }
 0x325   :  { %v3809_v0 = vsel %vm1174_vm5, 2147483648, %v3741_v21  ;;  %v870_v29 = vmul.f32 %v4404_v26, %v868_v8  ;;  %v886_v22 = vmul.f32 %v4405_v59, %v884_v34  ;;  %v903_v47 = vmul.f32 %v4406_v60, %v901_v51 }
 0x326   :  { %v920_v40 = vmul.f32 %v3450_v39, %v918_v46  ;;  %v1171_v25 = vsel %vm1169_vm10, %v1170_v31, %v1168_v56  ;;  %v1177_v12 = vsel %vm620_vm1, %v3806_v48, 2147483648  ;;  %v1178_v58 = vsel %vm620_vm1, %v3809_v0, 2147483648 }
 0x327   :  { %v1693_v28 = vmax.f32 %v1691_v18, 1e-24  ;;  %v887_v45 = vadd.f32 %v886_v22, %v870_v29  ;;  %vm1179_vm2 = vcmp.gt.s32.totalorder %v1177_v12, %v1178_v58  ;;  %v1218_v21 = vmul.f32 %v1171_v25, %v4372_v6  ;;  %v4407_v29 = vld [vmem:[#allocation34_spill] sm:$0xff] }
 0x328   :  { %v1228_v1 = vmul.f32 %v1171_v25, %v4373_v19  ;;  %v1180_v5 = vsel %vm1179_vm2, %v1177_v12, %v1178_v58  ;;  %v1239_v62 = vmul.f32 %v1171_v25, %v4374_v36  ;;  %v1250_v3 = vmul.f32 %v1171_v25, %v4375_v20 }
 0x329   :  { %2389 = vrsqrt.f32 %v1693_v28  ;;  %v904_v50 = vadd.f32 %v903_v47, %v887_v45  ;;  %v1181_v11 = vrot.slane %v1180_v5, 4  ;;  %v3824_v30 = vadd.f32 %v1218_v21, %v3752_v44 }
 0x32a   :  { %v3827_v33 = vadd.f32 %v1228_v1, %v3755_v37  ;;  %v3830_v38 = vadd.f32 %v1239_v62, %v3759_v41  ;;  %v3833_v56 = vadd.f32 %v1250_v3, %v3763_v14  ;;  %v1954_v18 = vrot.slane %v1953_v27, 2  ;;  %v4408_v41 = vld [vmem:[#allocation31_spill] sm:$0xff] }
 0x32b   :  { %v1962_v8 = vadd.f32 %v1961_v17, %v1960_v2  ;;  %v921_v34 = vadd.f32 %v920_v40, %v904_v50  ;;  %vm1182_vm11 = vcmp.gt.s32.totalorder %v1180_v5, %v1181_v11  ;;  %v1968_v51 = vsel %vm620_vm1, %v3777_v7, 0.0  ;;  %v4409_v14 = vld [vmem:[#allocation35_spill] sm:$0xff]  ;;  %v4410_v7 = vld [vmem:[#allocation36_spill] sm:$0xff] }
 0x32c   :  { %v1977_v44 = vsel %vm620_vm1, %v3781_v63, 0.0  ;;  %v1183_v46 = vsel %vm1182_vm11, %v1180_v5, %v1181_v11  ;;  %v1955_v31 = vadd.f32 %v1954_v18, %v1953_v27  ;;  %v1969_v22 = vadd.f32 %v1968_v51, %v4407_v29 }
 0x32d   :  { %v1963_v37 = vrot.slane %v1962_v8, 2  ;;  %v923_v47 = vadd.f32 %v4408_v41, %v921_v34  ;;  %v1184_v25 = vrot.slane %v1183_v46, 2  ;;  %v1978_v12 = vadd.f32 %v1977_v44, %v4409_v14  ;;  %v4411_v34 = vld [vmem:[#allocation37_spill] sm:$0xff] }
 0x32e   :  { %v1986_v2 = vsel %vm620_vm1, %v3785_v61, 0.0  ;;  %v1956_v17 = vrot.slane %v1955_v31, 1  ;;  %v1970_v58 = vrot.slane %v1969_v22, 4  ;;  %v1995_v45 = vsel %vm620_vm1, %v3789_v55, 0.0 }
 0x32f   :  { %v1964_v40 = vadd.f32 %v1963_v37, %v1962_v8  ;;  %v3845_v28 = vadd.f32 %v1986_v2, %v4410_v7  ;;  %v924_v63 = vadd.f32 %v923_v47, %v3534_v23  ;;  %vm1185_vm3 = vcmp.gt.s32.totalorder %v1183_v46, %v1184_v25 }
 0x330   :  { %v1979_v27 = vrot.slane %v1978_v12, 4  ;;  %v1186_v21 = vsel %vm1185_vm3, %v1183_v46, %v1184_v25  ;;  %v3852_v1 = vmul.f32 %v3671_v32, %v3671_v32  ;;  %v3854_v61 = vadd.f32 %v1970_v58, %v1969_v22 }
 0x331   :  { %v1965_v5 = vrot.slane %v1964_v40, 1  ;;  %v1187_v62 = vrot.slane %v1186_v21, 1  ;;  %1263 = vst.msk [vmem:[%s4175_s7] sm:$0x1] %vm1262_vm7, %v924_v63  ;;  %v3862_v23 = vmul.f32 %v3676_v24, %v3676_v24  ;;  %v3864_v3 = vadd.f32 %v1956_v17, %v1955_v31  ;;  %v4413_v63 = vld [vmem:[#allocation69_spill] sm:$0xff] }
 0x332   :  { %v3866_v55 = vadd.f32 %v1979_v27, %v1978_v12  ;;  %v1972_v18 = vrot.slane %v3854_v61, 2  ;;  %v3873_v51 = vadd.f32 %v1995_v45, %v4411_v34  ;;  %v4414_v45 = vld [vmem:[#allocation70_spill] sm:$0xff]  ;;  %vm4422_vm11 = vcmask 1042434  }
 0x333   :  { %v2390_v50 = vpop.eup %2389  ;;  %v3868_v11 = vadd.f32 %v1965_v5, %v1964_v40  ;;  %vm1188_vm4 = vcmp.gt.s32.totalorder %v1186_v21, %v1187_v62  ;;  %v4412_v40 = vld [vmem:[#allocation73_spill] sm:$0xff]  ;;  %v4415_v5 = vld [vmem:[#allocation71_spill] sm:$0xff] }
 0x334   :  { %v1697_v44 = vmul.f32 %v2390_v50, %v3681_v43  ;;  %v1699_v46 = vmul.f32 %v2390_v50, %v3686_v13  ;;  %v1701_v31 = vmul.f32 %v2390_v50, %v3691_v52  ;;  %v1189_v37 = vsel %vm1188_vm4, %v1186_v21, %v1187_v62 }
 0x335   :  { %v1703_v29 = vmul.f32 %v2390_v50, %v3696_v10  ;;  %v1705_v22 = vmul.f32 %v2390_v50, %v3701_v35  ;;  %v1707_v47 = vmul.f32 %v2390_v50, %v3706_v9  ;;  %v1190_v25 = vand.u32 4294967280, %v1189_v37 }
 0x336   :  { %vm1195_vm12 = vcmp.eq.s32.totalorder %v3806_v48, %v1189_v37  ;;  %vm1196_vm14 = vcmp.eq.s32.totalorder %v3809_v0, %v1189_v37  ;;  %v1709_v14 = vmul.f32 %v2390_v50, %v3711_v15  ;;  %v3887_v52 = vmul.f32 %v2390_v50, %v3716_v54  ;;  %v4416_v50 = vld [vmem:[#allocation77_spill] sm:$0xff] }
 0x337   :  { %v1197_v43 = vsel %vm1195_vm12, 2147483648, %v3806_v48  ;;  %v1198_v13 = vsel %vm1196_vm14, 2147483648, %v3809_v0  ;;  %v1713_v10 = vsel %vm620_vm1, %v1697_v44, -inf  ;;  %vm1191_vm15 = vcmp.lt.s32.totalorder %v1190_v25, 0 }
 0x338   :  { %v1192_v35 = vxor.u32 2147483647, %v1190_v25  ;;  %v1199_v9 = vsel %vm620_vm1, %v1197_v43, 2147483648  ;;  %v1200_v12 = vsel %vm620_vm1, %v1198_v13, 2147483648  ;;  %v1714_v2 = vmax.f32 %v3619_v42, %v1713_v10 }
 0x339   :  { %vm1201_vm13 = vcmp.gt.s32.totalorder %v1199_v9, %v1200_v12  ;;  %v1722_v15 = vsel %vm620_vm1, %v1699_v46, -inf  ;;  %v1731_v48 = vsel %vm620_vm1, %v1701_v31, -inf  ;;  %vm4431_vm12 = vcmask 1044484  }
 0x33a   :  { %v1193_v17 = vsel %vm1191_vm15, %v1192_v35, %v1190_v25  ;;  %v1202_v0 = vsel %vm1201_vm13, %v1199_v9, %v1200_v12  ;;  %v1723_v54 = vmax.f32 %v3622_v53, %v1722_v15  ;;  %v1732_v58 = vmax.f32 %v4412_v40, %v1731_v48  ;;  %v4418_v40 = vld [vmem:[#allocation74_spill] sm:$0xff] }
 0x33b   :  { %v1203_v7 = vrot.slane %v1202_v0, 4  ;;  %v1220_v27 = vmul.f32 %v1193_v17, %v4413_v63  ;;  %v1230_v21 = vmul.f32 %v1193_v17, %v4414_v45  ;;  %v1241_v62 = vmul.f32 %v1193_v17, %v4415_v5 }
 0x33c   :  { %v1252_v34 = vmul.f32 %v1193_v17, %v4416_v50  ;;  %v1715_v42 = vrot.slane %v1714_v2, 4  ;;  %v1724_v44 = vrot.slane %v1723_v54, 4  ;;  %v1733_v46 = vrot.slane %v1732_v58, 4  ;;  %v4417_v17 = vld [vmem:[#allocation65_spill] sm:$0xff] }
 0x33d   :  { %vm1204_vm6 = vcmp.gt.s32.totalorder %v1202_v0, %v1203_v7  ;;  %v3902_v31 = vadd.f32 %v1220_v27, %v3824_v30  ;;  %v3905_v53 = vadd.f32 %v1230_v21, %v3827_v33  ;;  %v3908_v37 = vadd.f32 %v1241_v62, %v3830_v38 }
 0x33e   :  { %v1205_v25 = vsel %vm1204_vm6, %v1202_v0, %v1203_v7  ;;  %v3911_v43 = vadd.f32 %v1252_v34, %v3833_v56  ;;  %v1716_v13 = vmax.f32 %v1714_v2, %v1715_v42  ;;  %v1725_v10 = vmax.f32 %v1723_v54, %v1724_v44 }
 0x33f   :  { %v1206_v35 = vrot.slane %v1205_v25, 2  ;;  %v1734_v9 = vmax.f32 %v1732_v58, %v1733_v46  ;;  %v1740_v12 = vsel %vm620_vm1, %v1703_v29, -inf  ;;  %v1749_v15 = vsel %vm620_vm1, %v1705_v22, -inf  ;;  %v4419_v22 = vld [vmem:[#allocation66_spill] sm:$0xff] }
 0x340   :  { %v1717_v30 = vrot.slane %v1716_v13, 2  ;;  %v1726_v48 = vrot.slane %v1725_v10, 2  ;;  %v1741_v33 = vmax.f32 %v4417_v17, %v1740_v12  ;;  %v1750_v27 = vmax.f32 %v4418_v40, %v1749_v15  ;;  %v4420_v12 = vld [vmem:[#allocation76_spill] sm:$0xff] }
 0x341   :  { %vm1207_vm5 = vcmp.gt.s32.totalorder %v1205_v25, %v1206_v35  ;;  %v1735_v38 = vrot.slane %v1734_v9, 2  ;;  %v1758_v0 = vsel %vm620_vm1, %v1707_v47, -inf  ;;  %v1767_v56 = vsel %vm620_vm1, %v1709_v14, -inf }
 0x342   :  { %v1208_v2 = vsel %vm1207_vm5, %v1205_v25, %v1206_v35  ;;  %v1718_v54 = vmax.f32 %v1716_v13, %v1717_v30  ;;  %v1727_v7 = vmax.f32 %v1725_v10, %v1726_v48  ;;  %v1742_v58 = vrot.slane %v1741_v33, 4 }
 0x343   :  { %v1209_v21 = vrot.slane %v1208_v2, 1  ;;  %v1736_v29 = vmax.f32 %v1734_v9, %v1735_v38  ;;  %v1751_v62 = vrot.slane %v1750_v27, 4  ;;  %v1759_v34 = vmax.f32 %v4419_v22, %v1758_v0 }
 0x344   :  { %v1719_v42 = vrot.slane %v1718_v54, 1  ;;  %v1728_v44 = vrot.slane %v1727_v7, 1  ;;  %v1743_v46 = vmax.f32 %v1741_v33, %v1742_v58  ;;  %v1768_v15 = vmax.f32 %v4420_v12, %v1767_v56  ;;  %v4425_v12 = vld [vmem:[#allocation84_spill] sm:$0xff] }
 0x345   :  { %vm1210_vm10 = vcmp.gt.s32.totalorder %v1208_v2, %v1209_v21  ;;  %v1737_v17 = vrot.slane %v1736_v29, 1  ;;  %v1752_v40 = vmax.f32 %v1750_v27, %v1751_v62  ;;  %v1760_v47 = vrot.slane %v1759_v34, 4 }
 0x346   :  { %v1211_v8 = vsel %vm1210_vm10, %v1208_v2, %v1209_v21  ;;  %v1720_v14 = vmax.f32 %v1718_v54, %v1719_v42  ;;  %v1729_v25 = vmax.f32 %v1727_v7, %v1728_v44  ;;  %v1744_v13 = vrot.slane %v1743_v46, 2  ;;  %v4421_v54 = vld [vmem:[#allocation41_spill] sm:$0xff]  ;;  %v4423_v42 = vld [vmem:[#allocation78_spill] sm:$0xff] }
 0x347   :  { %v1212_v10 = vand.u32 4294967280, %v1211_v8  ;;  %v1738_v35 = vmax.f32 %v1736_v29, %v1737_v17  ;;  %v1753_v30 = vrot.slane %v1752_v40, 2  ;;  %v1761_v9 = vmax.f32 %v1759_v34, %v1760_v47  ;;  %v4424_v44 = vld [vmem:[#allocation81_spill] sm:$0xff] }
 0x348   :  { %v1745_v48 = vmax.f32 %v1743_v46, %v1744_v13  ;;  %v1769_v38 = vrot.slane %v1768_v15, 4  ;;  %v1776_v0 = vsel %vm620_vm1, %v3887_v52, -inf  ;;  %v1794_v33 = vsel %vm753_vm9, %v1729_v25, %v1720_v14 }
 0x349   :  { %vm1213_vm2 = vcmp.lt.s32.totalorder %v1212_v10, 0  ;;  %v1214_v56 = vxor.u32 2147483647, %v1212_v10  ;;  %v1754_v58 = vmax.f32 %v1752_v40, %v1753_v30  ;;  %v1762_v27 = vrot.slane %v1761_v9, 2  ;;  %v4426_v40 = vld [vmem:[#allocation87_spill] sm:$0xff] }
 0x34a   :  { %v1746_v62 = vrot.slane %v1745_v48, 1  ;;  %v1770_v2 = vmax.f32 %v1768_v15, %v1769_v38  ;;  %v1777_v7 = vmax.f32 %v4421_v54, %v1776_v0  ;;  %v2004_v8 = vsel %vm620_vm1, %v3852_v1, 0.0 }
 0x34b   :  { %v1215_v21 = vsel %vm1213_vm2, %v1214_v56, %v1212_v10  ;;  %v1755_v29 = vrot.slane %v1754_v58, 1  ;;  %v1763_v22 = vmax.f32 %v1761_v9, %v1762_v27  ;;  %v1795_v34 = vsel %vm4422_vm11, %v1738_v35, %v1794_v33 }
 0x34c   :  { %v1222_v52 = vmul.f32 %v1215_v21, %v4423_v42  ;;  %v1232_v46 = vmul.f32 %v1215_v21, %v4424_v44  ;;  %v1243_v17 = vmul.f32 %v1215_v21, %v4425_v12  ;;  %v1254_v47 = vmul.f32 %v1215_v21, %v4426_v40 }
 0x34d   :  { %v1747_v14 = vmax.f32 %v1745_v48, %v1746_v62  ;;  %v1764_v15 = vrot.slane %v1763_v22, 1  ;;  %v1771_v25 = vrot.slane %v1770_v2, 2  ;;  %v1973_v1 = vadd.f32 %v1972_v18, %v3854_v61  ;;  %v4428_v18 = vld [vmem:[#allocation21_spill] sm:$0xff] }
 0x34e   :  { %v1223_v13 = vadd.f32 %v1222_v52, %v3902_v31  ;;  %v1233_v10 = vadd.f32 %v1232_v46, %v3905_v53  ;;  %v1244_v35 = vadd.f32 %v1243_v17, %v3908_v37  ;;  %v1255_v30 = vadd.f32 %v1254_v47, %v3911_v43  ;;  %v4429_v31 = vld [vmem:[#allocation19_spill] sm:$0xff]  ;;  %v4430_v53 = vld [vmem:[#allocation61_spill] sm:$0xff] }
 0x34f   :  { %v1756_v9 = vmax.f32 %v1754_v58, %v1755_v29  ;;  %v1772_v38 = vmax.f32 %v1770_v2, %v1771_v25  ;;  %v1778_v0 = vrot.slane %v1777_v7, 4  ;;  %vm4427_vm9 = vcmask 1043459  }
 0x350   :  { %v1796_v33 = vsel %vm4427_vm9, %v1747_v14, %v1795_v34  ;;  %v1224_v48 = vadd.f32 %v1223_v13, %v4400_v49  ;;  %v1234_v56 = vadd.f32 %v1233_v10, %v4401_v4  ;;  %v1245_v27 = vadd.f32 %v1244_v35, %v4402_v16 }
 0x351   :  { %v1256_v61 = vadd.f32 %v1255_v30, %v4403_v57  ;;  %vm1612_vm3 = vcmp.lt.s32.totalorder %v4429_v31, %v4428_v18  ;;  %vm1613_vm4 = vcmp.lt.s32.totalorder %v4429_v31, %v4430_v53  ;;  %v1765_v37 = vmax.f32 %v1763_v22, %v1764_v15 }
 0x352   :  { %v1773_v43 = vrot.slane %v1772_v38, 1  ;;  %v1779_v58 = vmax.f32 %v1777_v7, %v1778_v0  ;;  %v1797_v62 = vsel %vm4431_vm12, %v1756_v9, %v1796_v33  ;;  %v1225_v2 = vmax.f32 %v1224_v48, 0.0  ;;  %v4434_v9 = vld [vmem:[#allocation38_spill] sm:$0xff] }
 0x353   :  { %v1235_v54 = vmax.f32 %v1234_v56, 0.0  ;;  %v1246_v21 = vmax.f32 %v1245_v27, 0.0  ;;  %v1257_v29 = vmax.f32 %v1256_v61, 0.0  ;;  %v1974_v46 = vrot.slane %v1973_v1, 1  ;;  %v4435_v0 = vld [vmem:[#allocation42_spill] sm:$0xff] }
 0x354   :  { %v1774_v34 = vmax.f32 %v1772_v38, %v1773_v43  ;;  %v1780_v52 = vrot.slane %v1779_v58, 2  ;;  %v2013_v17 = vsel %vm620_vm1, %v3862_v23, 0.0  ;;  %v1226_v47 = vmul.f32 %v1225_v2, %v4404_v26 }
 0x355   :  { %v1236_v14 = vmul.f32 %v1235_v54, %v4405_v59  ;;  %v1247_v22 = vmul.f32 %v1246_v21, %v4406_v60  ;;  %vm4432_vm14 = vcmask 1045509   ;;  %v1258_v15 = vmul.f32 %v1257_v29, %v3450_v39 }
 0x356   :  { %v1798_v7 = vsel %vm4432_vm14, %v1765_v37, %v1797_v62  ;;  %v1781_v25 = vmax.f32 %v1779_v58, %v1780_v52  ;;  %v1981_v13 = vrot.slane %v3866_v55, 2  ;;  %v4433_v10 = vrot.slane %v3845_v28, 4 }
 0x357   :  { %v1237_v30 = vadd.f32 %v1236_v14, %v1226_v47  ;;  %v1997_v23 = vrot.slane %v3873_v51, 4  ;;  %v2005_v38 = vadd.f32 %v2004_v8, %v4434_v9  ;;  %v2014_v33 = vadd.f32 %v2013_v17, %v4435_v0 }
 0x358   :  { %v1989_v35 = vadd.f32 %v4433_v10, %v3845_v28  ;;  %v1782_v48 = vrot.slane %v1781_v25, 1  ;;  %v1799_v56 = vsel %vm763_vm0, %v1774_v34, %v1798_v7  ;;  %v1982_v27 = vadd.f32 %v1981_v13, %v3866_v55 }
 0x359   :  { %v1248_v37 = vadd.f32 %v1247_v22, %v1237_v30  ;;  %v1998_v43 = vadd.f32 %v1997_v23, %v3873_v51  ;;  %v2006_v58 = vrot.slane %v2005_v38, 4  ;;  %v2015_v62 = vrot.slane %v2014_v33, 4 }
 0x35a   :  { %v1990_v61 = vrot.slane %v1989_v35, 2  ;;  %v1783_v2 = vmax.f32 %v1781_v25, %v1782_v48  ;;  %v1975_v28 = vadd.f32 %v1974_v46, %v1973_v1  ;;  %v1983_v54 = vrot.slane %v1982_v27, 1  ;;  %v4436_v25 = vld [vmem:[#allocation67_spill] sm:$0xff] }
 0x35b   :  { %v1259_v29 = vadd.f32 %v1258_v15, %v1248_v37  ;;  %v1999_v52 = vrot.slane %v1998_v43, 2  ;;  %v2007_v8 = vadd.f32 %v2006_v58, %v2005_v38  ;;  %v2021_v17 = vmax.f32 %v3864_v3, 1e-24 }
 0x35c   :  { %v1991_v21 = vadd.f32 %v1990_v61, %v1989_v35  ;;  %v1800_v47 = vsel %vm765_vm8, %v1783_v2, %v1799_v56  ;;  %v1984_v34 = vadd.f32 %v1983_v54, %v1982_v27  ;;  %v2016_v55 = vadd.f32 %v2015_v62, %v2014_v33 }
 0x35d   :  { %v1260_v22 = vadd.f32 %v1259_v29, %v4408_v41  ;;  %v1802_v51 = vsel %vm1613_vm4, %v1800_v47, 0.0  ;;  %v1815_v1 = vsel %vm1612_vm3, %v1800_v47, -inf  ;;  %v2000_v46 = vadd.f32 %v1999_v52, %v1998_v43 }
 0x35e   :  { %v1992_v14 = vrot.slane %v1991_v21, 1  ;;  %v1803_v7 = vsel %vm620_vm1, %v1802_v51, 0.0  ;;  %vm1817_vm0 = vcmp.lt.s32.totalorder %v1815_v1, 0  ;;  %v1818_v3 = vxor.u32 2147483647, %v1815_v1  ;;  %v4438_v51 = vld [vmem:[#allocation64_spill] sm:$0xff] }
 0x35f   :  { %v1261_v13 = vadd.f32 %v1260_v22, %v4436_v25  ;;  %v1804_v10 = vrot.slane %v1803_v7, 4  ;;  %v2001_v35 = vrot.slane %v2000_v46, 1  ;;  %v2008_v30 = vrot.slane %v2007_v8, 2 }
 0x360   :  { %v1993_v15 = vadd.f32 %v1992_v14, %v1991_v21  ;;  %v1819_v23 = vsel %vm1817_vm0, %v1818_v3, %v1815_v1  ;;  %v2017_v9 = vrot.slane %v2016_v55, 2  ;;  %v2022_v38 = vmax.f32 %v3868_v11, 1e-24  ;;  %v4439_v3 = vld [vmem:[#allocation23_spill] sm:$0xff] }
 0x361   :  { %v2023_v0 = vmax.f32 %v1975_v28, 1e-24  ;;  %2301 = vst.msk [vmem:[%s4175_s7 + $0x2] sm:$0x1] %vm1262_vm7, %v1261_v13  ;;  %v1805_v18 = vadd.f32 %v1804_v10, %v1803_v7  ;;  %v1820_v33 = vand.u32 4294967288, %v1819_v23  ;;  %v2002_v48 = vadd.f32 %v2001_v35, %v2000_v46  ;;  %v4440_v35 = vld [vmem:[#allocation63_spill] sm:$0xff] }
 0x362   :  { %v2009_v56 = vadd.f32 %v2008_v30, %v2007_v8  ;;  %v2018_v27 = vadd.f32 %v2017_v9, %v2016_v55  ;;  %v2024_v61 = vmax.f32 %v1984_v34, 1e-24  ;;  %2391 = vrsqrt.f32 %v2021_v17 }
 0x363   :  { %v1806_v37 = vrot.slane %v1805_v18, 2  ;;  %v4437_v43 = vsub.s32 7, %v4429_v31  ;;  %v2025_v2 = vmax.f32 %v1993_v15, 1e-24  ;;  %v2026_v28 = vmax.f32 %v2002_v48, 1e-24 }
 0x364   :  { %v2010_v62 = vrot.slane %v2009_v56, 1  ;;  %v2019_v11 = vrot.slane %v2018_v27, 1  ;;  %2393 = vrsqrt.f32 %v2022_v38  ;;  %vm1604_vm13 = vcmp.gt.s32.totalorder %v4430_v53, 0 }
 0x365   :  { %v1821_v58 = vor.u32 %v1820_v33, %v4437_v43  ;;  %v1807_v54 = vadd.f32 %v1806_v37, %v1805_v18  ;;  %2395 = vrsqrt.f32 %v2023_v0  ;;  %vm1605_vm6 = vcmp.gt.s32.totalorder %v4430_v53, 1  ;;  %v4441_v0 = vld [vmem:[#allocation24_spill] sm:$0xff]  ;;  %v4443_v43 = vld [vmem:[#allocation25_spill] sm:$0xff] }
 0x366   :  { %v2011_v29 = vadd.f32 %v2010_v62, %v2009_v56  ;;  %v2020_v47 = vadd.f32 %v2019_v11, %v2018_v27  ;;  %2397 = vrsqrt.f32 %v2024_v61  ;;  %vm1606_vm5 = vcmp.gt.s32.totalorder %v4430_v53, 2  ;;  %v4442_v56 = vld [vmem:[#allocation72_spill] sm:$0xff] }
 0x367   :  { %v1822_v21 = vsel %vm620_vm1, %v1821_v58, 2147483648  ;;  %v1808_v8 = vrot.slane %v1807_v54, 1  ;;  %2399 = vrsqrt.f32 %v2025_v2  ;;  %vm1607_vm10 = vcmp.gt.s32.totalorder %v4430_v53, 3  ;;  %v4444_v2 = vld [vmem:[#allocation75_spill] sm:$0xff] }
 0x368   :  { %v1823_v52 = vrot.slane %v1822_v21, 4  ;;  %v2027_v34 = vmax.f32 %v2011_v29, 1e-24  ;;  %v2028_v17 = vmax.f32 %v2020_v47, 1e-24  ;;  %2401 = vrsqrt.f32 %v2026_v28  ;;  %v4445_v29 = vld [vmem:[#allocation26_spill] sm:$0xff] }
 0x369   :  { %v1809_v14 = vadd.f32 %v1808_v8, %v1807_v54  ;;  %vm1608_vm2 = vcmp.gt.s32.totalorder %v4430_v53, 4  ;;  %vm1609_vm9 = vcmp.gt.s32.totalorder %v4430_v53, 5  ;;  %vm1610_vm3 = vcmp.gt.s32.totalorder %v4430_v53, 6  ;;  %v4446_v47 = vld [vmem:[#allocation62_spill] sm:$0xff] }
 0x36a   :  { %vm1824_vm8 = vcmp.gt.s32.totalorder %v1822_v21, %v1823_v52  ;;  %2403 = vrsqrt.f32 %v2027_v34  ;;  %vm1611_vm4 = vcmp.gt.s32.totalorder %v4430_v53, 7 }
 0x36b   :  { %v1825_v55 = vsel %vm1824_vm8, %v1822_v21, %v1823_v52  ;;  %2405 = vrsqrt.f32 %v2028_v17  ;;  %v3986_v1 = vmul.f32 %v4438_v51, %v1809_v14  ;;  %v4447_v14 = vld [vmem:[#allocation27_spill] sm:$0xff] }
 0x36c   :  { %v1826_v22 = vrot.slane %v1825_v55, 2  ;;  %v2392_v46 = vpop.eup %2391 }
 0x36d   :  { %v2037_v15 = vmul.f32 %v2392_v46, %v4439_v3  ;;  %2306 = vst.msk [vmem:[%s4175_s7 + $0x5] sm:$0x1] %vm1262_vm7, %v3986_v1  ;;  %v2038_v30 = vmul.f32 %v2392_v46, %v4440_v35  ;;  %v4449_v46 = vld [vmem:[#allocation28_spill] sm:$0xff]  ;;  %v4452_v35 = vld [vmem:[#allocation30_spill] sm:$0xff] }
 0x36e   :  { %vm1827_vm15 = vcmp.gt.s32.totalorder %v1825_v55, %v1826_v22  ;;  %v2394_v25 = vpop.eup %2393  ;;  %v4450_v3 = vld [vmem:[#allocation68_spill] sm:$0xff] }
 0x36f   :  { %v1828_v7 = vsel %vm1827_vm15, %v1825_v55, %v1826_v22  ;;  %v2396_v10 = vpop.eup %2395  ;;  %v2039_v18 = vmul.f32 %v2394_v25, %v4441_v0  ;;  %v2069_v33 = vsel %vm1604_vm13, %v2037_v15, -inf  ;;  %v2040_v27 = vmul.f32 %v2394_v25, %v4442_v56  ;;  %v4451_v25 = vld [vmem:[#allocation29_spill] sm:$0xff] }
 0x370   :  { %v1829_v13 = vrot.slane %v1828_v7, 1  ;;  %v2398_v23 = vpop.eup %2397  ;;  %v2041_v62 = vmul.f32 %v2396_v10, %v4443_v43  ;;  %v2042_v11 = vmul.f32 %v2396_v10, %v4444_v2  ;;  %v2070_v28 = vsel %vm1604_vm13, %v2038_v30, -inf }
 0x371   :  { %v2400_v9 = vpop.eup %2399  ;;  %v2043_v52 = vmul.f32 %v2398_v23, %v4445_v29  ;;  %v2044_v8 = vmul.f32 %v2398_v23, %v4446_v47  ;;  %v2085_v34 = vsel %vm620_vm1, %v2069_v33, -inf  ;;  %v2071_v51 = vsel %vm1605_vm6, %v2039_v18, -inf }
 0x372   :  { %vm1830_vm11 = vcmp.gt.s32.totalorder %v1828_v7, %v1829_v13  ;;  %v2402_v48 = vpop.eup %2401  ;;  %v2045_v55 = vmul.f32 %v2400_v9, %v4447_v14  ;;  %v2072_v0 = vsel %vm1605_vm6, %v2040_v27, -inf  ;;  %v2073_v18 = vsel %vm1606_vm5, %v2041_v62, -inf }
 0x373   :  { %v4001_v38 = vsel %vm1830_vm11, %v1828_v7, %v1829_v13  ;;  %v2047_v7 = vmul.f32 %v2402_v48, %v4449_v46  ;;  %v2048_v15 = vmul.f32 %v2402_v48, %v4450_v3  ;;  %v2074_v33 = vsel %vm1606_vm5, %v2042_v11, -inf }
 0x374   :  { %vm1837_vm12 = vcmp.eq.s32.totalorder %v1821_v58, %v4001_v38  ;;  %v2404_v61 = vpop.eup %2403  ;;  %v2075_v48 = vsel %vm1607_vm10, %v2043_v52, -inf  ;;  %v2086_v11 = vsel %vm620_vm1, %v2071_v51, -inf  ;;  %v2100_v51 = vsel %vm620_vm1, %v2070_v28, -inf }
 0x375   :  { %v1838_v37 = vsel %vm1837_vm12, 2147483648, %v1821_v58  ;;  %v2406_v54 = vpop.eup %2405  ;;  %v4448_v58 = vld [vmem:[#allocation20_spill] sm:$0xff]  ;;  %v2049_v13 = vmul.f32 %v2404_v61, %v4451_v25  ;;  %v2050_v10 = vmul.f32 %v2404_v61, %v3671_v32  ;;  %v2076_v32 = vsel %vm1607_vm10, %v2044_v8, -inf }
 0x376   :  { %v1839_v21 = vsel %vm620_vm1, %v1838_v37, 2147483648  ;;  %v2046_v22 = vmul.f32 %v2400_v9, %v4448_v58  ;;  %v2051_v30 = vmul.f32 %v2406_v54, %v4452_v35  ;;  %v2052_v23 = vmul.f32 %v2406_v54, %v3676_v24 }
 0x377   :  { %v1840_v17 = vrot.slane %v1839_v21, 4  ;;  %v2077_v24 = vsel %vm1608_vm2, %v2045_v55, -inf  ;;  %v2079_v61 = vsel %vm1609_vm9, %v2047_v7, -inf  ;;  %v2080_v43 = vsel %vm1609_vm9, %v2048_v15, -inf }
 0x378   :  { %v2078_v27 = vsel %vm1608_vm2, %v2046_v22, -inf  ;;  %v2081_v62 = vsel %vm1610_vm3, %v2049_v13, -inf  ;;  %v2082_v2 = vsel %vm1610_vm3, %v2050_v10, -inf  ;;  %v2087_v54 = vsel %vm620_vm1, %v2073_v18, -inf }
 0x379   :  { %vm1841_vm14 = vcmp.gt.s32.totalorder %v1839_v21, %v1840_v17  ;;  %v2083_v52 = vsel %vm1611_vm4, %v2051_v30, -inf  ;;  %v2088_v47 = vmax.f32 %v2085_v34, %v2087_v54  ;;  %v2091_v14 = vsel %vm620_vm1, %v2077_v24, -inf }
 0x37a   :  { %v1842_v9 = vsel %vm1841_vm14, %v1839_v21, %v1840_v17  ;;  %v2089_v21 = vsel %vm620_vm1, %v2075_v48, -inf  ;;  %v2093_v55 = vsel %vm620_vm1, %v2079_v61, -inf  ;;  %v2095_v58 = vsel %vm620_vm1, %v2081_v62, -inf }
 0x37b   :  { %v1843_v56 = vrot.slane %v1842_v9, 2  ;;  %v2090_v8 = vmax.f32 %v2086_v11, %v2089_v21  ;;  %v2092_v22 = vmax.f32 %v2088_v47, %v2091_v14  ;;  %v2101_v7 = vsel %vm620_vm1, %v2072_v0, -inf }
 0x37c   :  { %v2097_v3 = vsel %vm620_vm1, %v2083_v52, -inf  ;;  %v2102_v15 = vsel %vm620_vm1, %v2074_v33, -inf  ;;  %v2104_v34 = vsel %vm620_vm1, %v2076_v32, -inf  ;;  %v2084_v30 = vsel %vm1611_vm4, %v2052_v23, -inf }
 0x37d   :  { %vm1844_vm0 = vcmp.gt.s32.totalorder %v1842_v9, %v1843_v56  ;;  %v2094_v46 = vmax.f32 %v2090_v8, %v2093_v55  ;;  %v2096_v13 = vmax.f32 %v2092_v22, %v2095_v58  ;;  %v2103_v35 = vmax.f32 %v2100_v51, %v2102_v15 }
 0x37e   :  { %v1845_v29 = vsel %vm1844_vm0, %v1842_v9, %v1843_v56  ;;  %v2105_v9 = vmax.f32 %v2101_v7, %v2104_v34  ;;  %v2106_v28 = vsel %vm620_vm1, %v2078_v27, -inf  ;;  %v2108_v56 = vsel %vm620_vm1, %v2080_v43, -inf  ;;  %v4454_v7 = vld [vmem:[#allocation22_spill] sm:$0xff] }
 0x37f   :  { %v1846_v17 = vrot.slane %v1845_v29, 1  ;;  %v2098_v10 = vmax.f32 %v2094_v46, %v2097_v3  ;;  %v2107_v48 = vmax.f32 %v2103_v35, %v2106_v28  ;;  %v2110_v32 = vsel %vm620_vm1, %v2082_v2, -inf }
 0x380   :  { %v2109_v24 = vmax.f32 %v2105_v9, %v2108_v56  ;;  %v2112_v11 = vsel %vm620_vm1, %v2084_v30, -inf  ;;  %v4453_v22 = vsub.s32 15, %v4429_v31  ;;  %v4455_v3 = vsub.s32 15, %v4454_v7 }
 0x381   :  { %vm1847_vm8 = vcmp.gt.s32.totalorder %v1845_v29, %v1846_v17  ;;  %v2099_v0 = vmax.f32 %v2096_v13, %v2098_v10  ;;  %v2111_v62 = vmax.f32 %v2107_v48, %v2110_v32  ;;  %v1832_v13 = vand.u32 4294967288, %v4001_v38 }
 0x382   :  { %v1848_v25 = vsel %vm1847_vm8, %v1845_v29, %v1846_v17  ;;  %v2113_v54 = vmax.f32 %v2109_v24, %v2112_v11 }
 0x383   :  { %vm1854_vm15 = vcmp.eq.s32.totalorder %v1838_v37, %v1848_v25  ;;  %vm2127_vm13 = vcmp.lt.s32.totalorder %v2099_v0, 0  ;;  %v2129_v53 = vxor.u32 2147483647, %v2099_v0  ;;  %v1849_v31 = vand.u32 4294967288, %v1848_v25 }
 0x384   :  { %v1855_v18 = vsel %vm1854_vm15, 2147483648, %v1838_v37  ;;  %v2114_v27 = vmax.f32 %v2111_v62, %v2113_v54  ;;  %v2115_v37 = vsel %vm620_vm1, %v2099_v0, 0.0  ;;  %v1834_v48 = vxor.u32 2147483647, %v1832_v13 }
 0x385   :  { %v1856_v33 = vsel %vm620_vm1, %v1855_v18, 2147483648  ;;  %v2131_v21 = vsel %vm2127_vm13, %v2129_v53, %v2099_v0  ;;  %vm1833_vm3 = vcmp.lt.s32.totalorder %v1832_v13, 0  ;;  %v1851_v38 = vxor.u32 2147483647, %v1849_v31 }
 0x386   :  { %v1857_v61 = vrot.slane %v1856_v33, 4  ;;  %v2116_v43 = vsel %vm620_vm1, %v2114_v27, 0.0  ;;  %vm2128_vm5 = vcmp.lt.s32.totalorder %v2114_v27, 0  ;;  %v2130_v52 = vxor.u32 2147483647, %v2114_v27 }
 0x387   :  { %v2117_v2 = vadd.f32 %v2116_v43, %v2115_v37  ;;  %v2133_v47 = vand.u32 4294967280, %v2131_v21  ;;  %vm1850_vm12 = vcmp.lt.s32.totalorder %v1849_v31, 0  ;;  %v1835_v54 = vsel %vm1833_vm3, %v1834_v48, %v1832_v13 }
 0x388   :  { %vm1858_vm6 = vcmp.gt.s32.totalorder %v1856_v33, %v1857_v61  ;;  %v2132_v17 = vsel %vm2128_vm5, %v2130_v52, %v2114_v27  ;;  %v1852_v27 = vsel %vm1850_vm12, %v1851_v38, %v1849_v31 }
 0x389   :  { %v1859_v23 = vsel %vm1858_vm6, %v1856_v33, %v1857_v61  ;;  %v2118_v55 = vrot.slane %v2117_v2, 4  ;;  %v2134_v58 = vand.u32 4294967280, %v2132_v17  ;;  %v4074_v46 = vor.u32 %v2133_v47, %v4453_v22  ;;  %v4457_v47 = vld [vmem:[#allocation44_spill] sm:$0xff]  ;;  %v4458_v22 = vld [vmem:[#allocation45_spill] sm:$0xff] }
 0x38a   :  { %v1860_v29 = vrot.slane %v1859_v23, 2  ;;  %v1889_v17 = vmul.f32 %v1852_v27, %v4372_v6  ;;  %v1921_v7 = vmul.f32 %v1852_v27, %v4375_v20 }
 0x38b   :  { %v2119_v51 = vadd.f32 %v2118_v55, %v2117_v2  ;;  %v4078_v15 = vor.u32 %v2134_v58, %v4455_v3  ;;  %v2137_v34 = vsel %vm620_vm1, %v4074_v46, 2147483648  ;;  %v1910_v55 = vmul.f32 %v1852_v27, %v4374_v36 }
 0x38c   :  { %vm1861_vm10 = vcmp.gt.s32.totalorder %v1859_v23, %v1860_v29 }
 0x38d   :  { %v1862_v8 = vsel %vm1861_vm10, %v1859_v23, %v1860_v29  ;;  %v2120_v35 = vrot.slane %v2119_v51, 2  ;;  %v2138_v30 = vsel %vm620_vm1, %v4078_v15, 2147483648  ;;  %v4456_v29 = vld [vmem:[#allocation43_spill] sm:$0xff] }
 0x38e   :  { %v1863_v14 = vrot.slane %v1862_v8, 1  ;;  %vm2139_vm9 = vcmp.gt.s32.totalorder %v2137_v34, %v2138_v30  ;;  %v1888_v43 = vmul.f32 %v1835_v54, %v4456_v29 }
 0x38f   :  { %v2121_v0 = vadd.f32 %v2120_v35, %v2119_v51  ;;  %v2140_v24 = vsel %vm2139_vm9, %v2137_v34, %v2138_v30  ;;  %v1909_v51 = vmul.f32 %v1835_v54, %v4458_v22  ;;  %v4459_v35 = vld [vmem:[#allocation46_spill] sm:$0xff] }
 0x390   :  { %vm1864_vm2 = vcmp.gt.s32.totalorder %v1862_v8, %v1863_v14  ;;  %v2141_v61 = vrot.slane %v2140_v24, 4  ;;  %v1920_v30 = vmul.f32 %v1835_v54, %v4459_v35 }
 0x391   :  { %v1865_v10 = vsel %vm1864_vm2, %v1862_v8, %v1863_v14  ;;  %v2122_v32 = vrot.slane %v2121_v0, 1  ;;  %v1898_v8 = vmul.f32 %v1835_v54, %v4457_v47  ;;  %v1899_v14 = vmul.f32 %v1852_v27, %v4373_v19 }
 0x392   :  { %vm1871_vm11 = vcmp.eq.s32.totalorder %v1855_v18, %v1865_v10  ;;  %v1866_v56 = vand.u32 4294967288, %v1865_v10  ;;  %vm2142_vm14 = vcmp.gt.s32.totalorder %v2140_v24, %v2141_v61 }
 0x393   :  { %v1872_v9 = vsel %vm1871_vm11, 2147483648, %v1855_v18  ;;  %v2123_v11 = vadd.f32 %v2122_v32, %v2121_v0  ;;  %v2143_v23 = vsel %vm2142_vm14, %v2140_v24, %v2141_v61  ;;  %v1890_v0 = vadd.f32 %v1889_v17, %v1888_v43 }
 0x394   :  { %v1873_v28 = vsel %vm620_vm1, %v1872_v9, 2147483648  ;;  %v1868_v25 = vxor.u32 2147483647, %v1866_v56  ;;  %vm1867_vm0 = vcmp.lt.s32.totalorder %v1866_v56, 0  ;;  %v2144_v37 = vrot.slane %v2143_v23, 2 }
 0x395   :  { %v1874_v33 = vrot.slane %v1873_v28, 4  ;;  %v4086_v53 = vmul.f32 0.0625, %v2123_v11  ;;  %v1900_v48 = vadd.f32 %v1899_v14, %v1898_v8  ;;  %v1922_v32 = vadd.f32 %v1921_v7, %v1920_v30 }
 0x396   :  { %v1869_v52 = vsel %vm1867_vm0, %v1868_v25, %v1866_v56  ;;  %vm2145_vm15 = vcmp.gt.s32.totalorder %v2143_v23, %v2144_v37  ;;  %v1911_v56 = vadd.f32 %v1910_v55, %v1909_v51 }
 0x397   :  { %vm1875_vm4 = vcmp.gt.s32.totalorder %v1873_v28, %v1874_v33  ;;  %2307 = vst.msk [vmem:[%s4175_s7 + $0x7] sm:$0x1] %vm1262_vm7, %v4086_v53  ;;  %v2146_v58 = vsel %vm2145_vm15, %v2143_v23, %v2144_v37  ;;  %v1891_v13 = vmul.f32 %v1869_v52, %v4413_v63  ;;  %v1901_v10 = vmul.f32 %v1869_v52, %v4414_v45 }
 0x398   :  { %v1876_v62 = vsel %vm1875_vm4, %v1873_v28, %v1874_v33  ;;  %v2147_v3 = vrot.slane %v2146_v58, 1  ;;  %v1912_v9 = vmul.f32 %v1869_v52, %v4415_v5  ;;  %v1923_v28 = vmul.f32 %v1869_v52, %v4416_v50 }
 0x399   :  { %v1877_v18 = vrot.slane %v1876_v62, 2  ;;  %v1892_v61 = vadd.f32 %v1891_v13, %v1890_v0  ;;  %v1902_v38 = vadd.f32 %v1901_v10, %v1900_v48 }
 0x39a   :  { %vm2148_vm6 = vcmp.gt.s32.totalorder %v2146_v58, %v2147_v3  ;;  %v1913_v54 = vadd.f32 %v1912_v9, %v1911_v56  ;;  %v1924_v25 = vadd.f32 %v1923_v28, %v1922_v32 }
 0x39b   :  { %vm1878_vm8 = vcmp.gt.s32.totalorder %v1876_v62, %v1877_v18  ;;  %v4105_v33 = vsel %vm2148_vm6, %v2146_v58, %v2147_v3 }
 0x39c   :  { %v1879_v21 = vsel %vm1878_vm8, %v1876_v62, %v1877_v18  ;;  %vm2155_vm10 = vcmp.eq.s32.totalorder %v4074_v46, %v4105_v33  ;;  %vm2156_vm2 = vcmp.eq.s32.totalorder %v4078_v15, %v4105_v33 }
 0x39d   :  { %v1880_v2 = vrot.slane %v1879_v21, 1  ;;  %v2157_v62 = vsel %vm2155_vm10, 2147483648, %v4074_v46  ;;  %v2158_v18 = vsel %vm2156_vm2, 2147483648, %v4078_v15 }
 0x39e   :  { %v2159_v43 = vsel %vm620_vm1, %v2157_v62, 2147483648  ;;  %v2160_v52 = vsel %vm620_vm1, %v2158_v18, 2147483648 }
 0x39f   :  { %vm1881_vm13 = vcmp.gt.s32.totalorder %v1879_v21, %v1880_v2  ;;  %vm2161_vm11 = vcmp.gt.s32.totalorder %v2159_v43, %v2160_v52 }
 0x3a0   :  { %v1882_v34 = vsel %vm1881_vm13, %v1879_v21, %v1880_v2  ;;  %v2162_v51 = vsel %vm2161_vm11, %v2159_v43, %v2160_v52 }
 0x3a1   :  { %v1883_v31 = vand.u32 4294967288, %v1882_v34  ;;  %v2163_v13 = vrot.slane %v2162_v51, 4 }
 0x3a3   :  { %vm1884_vm5 = vcmp.lt.s32.totalorder %v1883_v31, 0  ;;  %v1885_v24 = vxor.u32 2147483647, %v1883_v31  ;;  %vm2164_vm9 = vcmp.gt.s32.totalorder %v2162_v51, %v2163_v13 }
 0x3a4   :  { %v2165_v0 = vsel %vm2164_vm9, %v2162_v51, %v2163_v13 }
 0x3a5   :  { %v1886_v11 = vsel %vm1884_vm5, %v1885_v24, %v1883_v31  ;;  %v2166_v48 = vrot.slane %v2165_v0, 2 }
 0x3a6   :  { %v1893_v23 = vmul.f32 %v1886_v11, %v4423_v42  ;;  %v1903_v27 = vmul.f32 %v1886_v11, %v4424_v44  ;;  %v1914_v37 = vmul.f32 %v1886_v11, %v4425_v12  ;;  %v1925_v21 = vmul.f32 %v1886_v11, %v4426_v40 }
 0x3a7   :  { %vm2167_vm3 = vcmp.gt.s32.totalorder %v2165_v0, %v2166_v48 }
 0x3a8   :  { %v1894_v2 = vadd.f32 %v1893_v23, %v1892_v61  ;;  %v1904_v8 = vadd.f32 %v1903_v27, %v1902_v38  ;;  %v1915_v46 = vadd.f32 %v1914_v37, %v1913_v54  ;;  %v1926_v17 = vadd.f32 %v1925_v21, %v1924_v25 }
 0x3a9   :  { %v2168_v61 = vsel %vm2167_vm3, %v2165_v0, %v2166_v48 }
 0x3aa   :  { %v1895_v14 = vadd.f32 %v1894_v2, %v4400_v49  ;;  %v1905_v15 = vadd.f32 %v1904_v8, %v4401_v4  ;;  %v1916_v55 = vadd.f32 %v1915_v46, %v4402_v16  ;;  %v1927_v58 = vadd.f32 %v1926_v17, %v4403_v57 }
 0x3ab   :  { %v2169_v38 = vrot.slane %v2168_v61, 1 }
 0x3ac   :  { %v1896_v7 = vmax.f32 %v1895_v14, 0.0  ;;  %v1906_v3 = vmax.f32 %v1905_v15, 0.0  ;;  %v1917_v34 = vmax.f32 %v1916_v55, 0.0  ;;  %v1928_v31 = vmax.f32 %v1927_v58, 0.0 }
 0x3ad   :  { %vm2170_vm4 = vcmp.gt.s32.totalorder %v2168_v61, %v2169_v38  ;;  %v2150_v55 = vand.u32 4294967280, %v4105_v33 }
 0x3ae   :  { %v1897_v10 = vmul.f32 %v1896_v7, %v4404_v26  ;;  %v1907_v30 = vmul.f32 %v1906_v3, %v4405_v59  ;;  %v1918_v28 = vmul.f32 %v1917_v34, %v4406_v60  ;;  %v1929_v24 = vmul.f32 %v1928_v31, %v3450_v39 }
 0x3af   :  { %v2171_v25 = vsel %vm2170_vm4, %v2168_v61, %v2169_v38  ;;  %v2152_v34 = vxor.u32 2147483647, %v2150_v55  ;;  %vm2151_vm11 = vcmp.lt.s32.totalorder %v2150_v55, 0 }
 0x3b0   :  { %v1908_v9 = vadd.f32 %v1907_v30, %v1897_v10  ;;  %vm2177_vm12 = vcmp.eq.s32.totalorder %v2157_v62, %v2171_v25  ;;  %vm2178_vm14 = vcmp.eq.s32.totalorder %v2158_v18, %v2171_v25  ;;  %v2172_v58 = vand.u32 4294967280, %v2171_v25 }
 0x3b1   :  { %v2179_v23 = vsel %vm2177_vm12, 2147483648, %v2157_v62  ;;  %v2180_v27 = vsel %vm2178_vm14, 2147483648, %v2158_v18 }
 0x3b2   :  { %v1919_v56 = vadd.f32 %v1918_v28, %v1908_v9  ;;  %v2181_v37 = vsel %vm620_vm1, %v2179_v23, 2147483648  ;;  %v2182_v21 = vsel %vm620_vm1, %v2180_v27, 2147483648  ;;  %v2174_v13 = vxor.u32 2147483647, %v2172_v58 }
 0x3b3   :  { %vm2183_vm0 = vcmp.gt.s32.totalorder %v2181_v37, %v2182_v21  ;;  %vm2173_vm9 = vcmp.lt.s32.totalorder %v2172_v58, 0  ;;  %v2153_v9 = vsel %vm2151_vm11, %v2152_v34, %v2150_v55 }
 0x3b4   :  { %v1930_v32 = vadd.f32 %v1929_v24, %v1919_v56  ;;  %v2184_v43 = vsel %vm2183_vm0, %v2181_v37, %v2182_v21  ;;  %v2175_v28 = vsel %vm2173_vm9, %v2174_v13, %v2172_v58  ;;  %v2221_v56 = vmul.f32 %v2153_v9, %v4456_v29 }
 0x3b5   :  { %v2185_v52 = vrot.slane %v2184_v43, 4  ;;  %v2222_v24 = vmul.f32 %v2175_v28, %v4372_v6  ;;  %v2231_v61 = vmul.f32 %v2153_v9, %v4457_v47  ;;  %v2243_v38 = vmul.f32 %v2175_v28, %v4374_v36 }
 0x3b6   :  { %v1931_v11 = vadd.f32 %v1930_v32, %v4408_v41  ;;  %v2232_v32 = vmul.f32 %v2175_v28, %v4373_v19 }
 0x3b7   :  { %vm2186_vm8 = vcmp.gt.s32.totalorder %v2184_v43, %v2185_v52  ;;  %v2223_v21 = vadd.f32 %v2222_v24, %v2221_v56 }
 0x3b8   :  { %v1932_v54 = vadd.f32 %v1931_v11, %v3986_v1  ;;  %v2187_v2 = vsel %vm2186_vm8, %v2184_v43, %v2185_v52  ;;  %v2254_v11 = vmul.f32 %v2175_v28, %v4375_v20  ;;  %v2233_v47 = vadd.f32 %v2232_v32, %v2231_v61 }
 0x3b9   :  { %v2188_v1 = vrot.slane %v2187_v2, 2 }
 0x3ba   :  { %2266 = vst.msk [vmem:[%s4175_s7 + $0x1] sm:$0x1] %vm1262_vm7, %v1932_v54 }
 0x3bb   :  { %vm2189_vm15 = vcmp.gt.s32.totalorder %v2187_v2, %v2188_v1 }
 0x3bc   :  { %v2190_v8 = vsel %vm2189_vm15, %v2187_v2, %v2188_v1 }
 0x3bd   :  { %v2191_v46 = vrot.slane %v2190_v8, 1 }
 0x3bf   :  { %vm2192_vm13 = vcmp.gt.s32.totalorder %v2190_v8, %v2191_v46 }
 0x3c0   :  { %v2193_v62 = vsel %vm2192_vm13, %v2190_v8, %v2191_v46 }
 0x3c1   :  { %vm2199_vm6 = vcmp.eq.s32.totalorder %v2179_v23, %v2193_v62  ;;  %vm2200_vm5 = vcmp.eq.s32.totalorder %v2180_v27, %v2193_v62  ;;  %v2194_v7 = vand.u32 4294967280, %v2193_v62 }
 0x3c2   :  { %v2201_v18 = vsel %vm2199_vm6, 2147483648, %v2179_v23  ;;  %v2202_v17 = vsel %vm2200_vm5, 2147483648, %v2180_v27  ;;  %v2242_v23 = vmul.f32 %v2153_v9, %v4458_v22  ;;  %v2253_v27 = vmul.f32 %v2153_v9, %v4459_v35 }
 0x3c3   :  { %v2203_v14 = vsel %vm620_vm1, %v2201_v18, 2147483648  ;;  %v2204_v15 = vsel %vm620_vm1, %v2202_v17, 2147483648  ;;  %v2196_v30 = vxor.u32 2147483647, %v2194_v7  ;;  %vm2195_vm3 = vcmp.lt.s32.totalorder %v2194_v7, 0 }
 0x3c4   :  { %vm2205_vm10 = vcmp.gt.s32.totalorder %v2203_v14, %v2204_v15  ;;  %v2244_v43 = vadd.f32 %v2243_v38, %v2242_v23  ;;  %v2255_v20 = vadd.f32 %v2254_v11, %v2253_v27 }
 0x3c5   :  { %v2206_v51 = vsel %vm2205_vm10, %v2203_v14, %v2204_v15  ;;  %v2197_v48 = vsel %vm2195_vm3, %v2196_v30, %v2194_v7 }
 0x3c6   :  { %v2207_v3 = vrot.slane %v2206_v51, 4  ;;  %v2224_v25 = vmul.f32 %v2197_v48, %v4413_v63  ;;  %v2234_v29 = vmul.f32 %v2197_v48, %v4414_v45  ;;  %v2245_v6 = vmul.f32 %v2197_v48, %v4415_v5 }
 0x3c7   :  { %v2256_v19 = vmul.f32 %v2197_v48, %v4416_v50 }
 0x3c8   :  { %vm2208_vm2 = vcmp.gt.s32.totalorder %v2206_v51, %v2207_v3  ;;  %v2225_v52 = vadd.f32 %v2224_v25, %v2223_v21  ;;  %v2235_v63 = vadd.f32 %v2234_v29, %v2233_v47  ;;  %v2246_v1 = vadd.f32 %v2245_v6, %v2244_v43 }
 0x3c9   :  { %v2209_v10 = vsel %vm2208_vm2, %v2206_v51, %v2207_v3  ;;  %v2257_v22 = vadd.f32 %v2256_v19, %v2255_v20 }
 0x3ca   :  { %v2210_v31 = vrot.slane %v2209_v10, 2 }
 0x3cc   :  { %vm2211_vm4 = vcmp.gt.s32.totalorder %v2209_v10, %v2210_v31 }
 0x3cd   :  { %v2212_v0 = vsel %vm2211_vm4, %v2209_v10, %v2210_v31 }
 0x3ce   :  { %v2213_v33 = vrot.slane %v2212_v0, 1 }
 0x3d0   :  { %vm2214_vm1 = vcmp.gt.s32.totalorder %v2212_v0, %v2213_v33 }
 0x3d1   :  { %v2215_v54 = vsel %vm2214_vm1, %v2212_v0, %v2213_v33 }
 0x3d2   :  { %v2216_v37 = vand.u32 4294967280, %v2215_v54 }
 0x3d4   :  { %vm2217_vm12 = vcmp.lt.s32.totalorder %v2216_v37, 0  ;;  %v2218_v36 = vxor.u32 2147483647, %v2216_v37 }
 0x3d6   :  { %v2219_v2 = vsel %vm2217_vm12, %v2218_v36, %v2216_v37 }
 0x3d7   :  { %v2226_v35 = vmul.f32 %v2219_v2, %v4423_v42  ;;  %v2236_v8 = vmul.f32 %v2219_v2, %v4424_v44  ;;  %v2247_v45 = vmul.f32 %v2219_v2, %v4425_v12  ;;  %v2258_v5 = vmul.f32 %v2219_v2, %v4426_v40 }
 0x3d9   :  { %v2227_v50 = vadd.f32 %v2226_v35, %v2225_v52  ;;  %v2237_v46 = vadd.f32 %v2236_v8, %v2235_v63  ;;  %v2248_v62 = vadd.f32 %v2247_v45, %v2246_v1  ;;  %v2259_v18 = vadd.f32 %v2258_v5, %v2257_v22 }
 0x3db   :  { %v2228_v17 = vadd.f32 %v2227_v50, %v4400_v49  ;;  %v2238_v14 = vadd.f32 %v2237_v46, %v4401_v4  ;;  %v2249_v15 = vadd.f32 %v2248_v62, %v4402_v16  ;;  %v2260_v55 = vadd.f32 %v2259_v18, %v4403_v57 }
 0x3dd   :  { %v2229_v58 = vmax.f32 %v2228_v17, 0.0  ;;  %v2239_v42 = vmax.f32 %v2238_v14, 0.0  ;;  %v2250_v51 = vmax.f32 %v2249_v15, 0.0  ;;  %v2261_v40 = vmax.f32 %v2260_v55, 0.0 }
 0x3df   :  { %v2230_v44 = vmul.f32 %v2229_v58, %v4404_v26  ;;  %v2240_v12 = vmul.f32 %v2239_v42, %v4405_v59  ;;  %v2251_v3 = vmul.f32 %v2250_v51, %v4406_v60  ;;  %v2262_v49 = vmul.f32 %v2261_v40, %v3450_v39 }
 0x3e1   :  { %v2241_v7 = vadd.f32 %v2240_v12, %v2230_v44 }
 0x3e3   :  { %v2252_v34 = vadd.f32 %v2251_v3, %v2241_v7 }
 0x3e5   :  { %v2263_v13 = vadd.f32 %v2262_v49, %v2252_v34 }
 0x3e7   :  { %v2264_v4 = vadd.f32 %v2263_v13, %v4408_v41 }
 0x3e9   :  { %v2265_v16 = vadd.f32 %v2264_v4, %v4086_v53 }
 0x3eb   :  { %2305 = vst.msk [vmem:[%s4175_s7 + $0x3] sm:$0x1] %vm1262_vm7, %v2265_v16 }
 0x3ec   :  { %2274 = vsyncpa [#allocation6], 1 }
 0x3ed   :  { %2275 = vsyncpa [#allocation9], 1 }
 0x3ee   :  { %2276 = vsyncpa [#allocation7], 1 }
 0x3ef   :  { %2277 = vsyncpa [#allocation12], 1 }

</bundles_post_ra>
